<compile_context>
chip_gen: v5e
topology: v5e:2x2
jax: 0.10.0
libtpu: 0.0.40
codegen_flags: <defaults>
</compile_context>

<pallas_src>
import functools
import math

import jax
import jax.numpy as jnp
from jax.experimental import pallas as pl
from jax.experimental.pallas import tpu as pltpu


def _round_up(x, m):
    return ((x + m - 1) // m) * m


def _row_block(m):
    # At least 2 grid steps when possible, capped at 1024 rows per step.
    half = -(-m // 2)
    return min(1024, _round_up(max(half, 8), 8))


def _full_spec(arr):
    """BlockSpec covering the whole (weight) array, resident across the grid."""
    zero = (0,) * arr.ndim
    return pl.BlockSpec(arr.shape, lambda *_: zero)


# ---------------------------------------------------------------------------
# Kernel 1: fused SectionEncoder (filterbank + 2-layer biLSTM + soft attention)
# ---------------------------------------------------------------------------
def _sec_enc_kernel(x_ref, wfb_ref, wih1_ref, whh1_ref, b1_ref,
                    wih2_ref, whh2_ref, b2_ref,
                    saw_ref, sab_ref, sau_ref, o_ref):
    f32 = jnp.float32
    bf16 = jnp.bfloat16
    RM = x_ref.shape[1]
    H = 32                                   # LSTM hidden, gate block = 4H = 128

    def mm(a, b):
        return jnp.dot(a.astype(bf16), b, preferred_element_type=f32)

    def sigm(z):                             # 1/(1+exp(-z)) via the EUP
        return pl.reciprocal(1.0 + jnp.exp(-z), approx=True)

    def cell(gates, c_prev):                 # torch gate order i, f, g, o
        i_g = sigm(gates[:, 0:H])
        f_g = sigm(gates[:, H:2 * H])
        g_g = jnp.tanh(gates[:, 2 * H:3 * H])
        o_g = sigm(gates[:, 3 * H:4 * H])
        c = i_g * g_g if c_prev is None else f_g * c_prev + i_g * g_g
        return o_g * jnp.tanh(c), c

    def bilstm(xs, wih_ref, whh_ref, b_ref):
        # xs: (2*RM, in); rows [0:RM] = timestep 0, [RM:2RM] = timestep 1.
        b_f = b_ref[0]                                   # (1, 128)
        b_b = b_ref[1]
        # ONE input-gate matmul for both timesteps and both directions.
        ig = mm(xs, wih_ref[...])                        # (2*RM, 256)
        ig_f_t0 = ig[:RM, 0:128]
        ig_b_t0 = ig[:RM, 128:256]
        ig_f_t1 = ig[RM:, 0:128]
        ig_b_t1 = ig[RM:, 128:256]
        # step 1: fwd consumes t0, bwd consumes t1 (h = c = 0)
        h_f0, c_f0 = cell(ig_f_t0 + b_f, None)
        h_b1, c_b1 = cell(ig_b_t1 + b_b, None)
        # step 2: fused hidden contribution via block-diagonal (64, 256) weight
        hg = mm(jnp.concatenate([h_f0, h_b1], axis=1), whh_ref[...])   # (RM, 256)
        h_f1, _ = cell(ig_f_t1 + hg[:, 0:128] + b_f, c_f0)
        h_b0, _ = cell(ig_b_t0 + hg[:, 128:256] + b_b, c_b1)
        out_t0 = jnp.concatenate([h_f0, h_b0], axis=1)   # (RM, 64)
        out_t1 = jnp.concatenate([h_f1, h_b1], axis=1)
        return out_t0, out_t1

    # Learnable filterbank: K = 129 -> K = 128 MXU matmul + rank-1 VPU update.
    xs = jnp.concatenate([x_ref[0], x_ref[1]], axis=0)   # (2*RM, 129) bf16
    wfb = wfb_ref[...]                                   # (129, 32) bf16
    xf = mm(xs[:, 0:128], wfb[0:128, :])
    xf = xf + xs[:, 128:129].astype(f32) * wfb[128:129, :].astype(f32)

    # 2-layer bidirectional LSTM, T = 2 unrolled, fused gemms.
    h1_t0, h1_t1 = bilstm(xf, wih1_ref, whh1_ref, b1_ref)
    h2_t0, h2_t1 = bilstm(jnp.concatenate([h1_t0, h1_t1], axis=0),
                          wih2_ref, whh2_ref, b2_ref)

    # Soft attention over the two timesteps (one fused (2*RM, 64)@(64,128) gemm).
    h2s = jnp.concatenate([h2_t0, h2_t1], axis=0)                  # (2*RM, 64)
    v = jnp.tanh(mm(h2s, saw_ref[...]) + sab_ref[...])             # (2*RM, 128)
    sc = jnp.sum(v * sau_ref[...], axis=-1, keepdims=True)         # (2*RM, 1)
    s0 = sc[:RM]
    s1 = sc[RM:]
    m = jnp.maximum(s0, s1)
    e0 = jnp.exp(s0 - m)
    e1 = jnp.exp(s1 - m)
    inv = pl.reciprocal(e0 + e1, approx=True)
    out = (e0 * inv) * h2_t0 + (e1 * inv) * h2_t1
    o_ref[...] = out.astype(o_ref.dtype)


def section_encoder(x, p):
    """x: (M, 2, 129) -> (M, 64)."""
    M, T, F = x.shape
    RM = _row_block(M)
    Mp = _round_up(M, RM)
    xt = jnp.transpose(x, (1, 0, 2))                      # time-major (2, M, F)
    xt = jnp.pad(xt, ((0, 0), (0, Mp - M), (0, 0))).astype(jnp.bfloat16)
    out = pl.pallas_call(
        _sec_enc_kernel,
        out_shape=jax.ShapeDtypeStruct((Mp, 64), jnp.float32),
        grid_spec=pltpu.PrefetchScalarGridSpec(
            num_scalar_prefetch=0,
            grid=(Mp // RM,),
            in_specs=[pl.BlockSpec((T, RM, F), lambda i: (0, i, 0)),
                      _full_spec(p['wfb']),
                      _full_spec(p['wih1']), _full_spec(p['whh1']), _full_spec(p['b1']),
                      _full_spec(p['wih2']), _full_spec(p['whh2']), _full_spec(p['b2']),
                      _full_spec(p['saW']), _full_spec(p['sab']), _full_spec(p['sau'])],
            out_specs=pl.BlockSpec((RM, 64), lambda i: (i, 0))),
        compiler_params=pltpu.CompilerParams(
            dimension_semantics=("parallel",),
            vmem_limit_bytes=32 * 1024 * 1024),
    )(xt, p['wfb'], p['wih1'], p['whh1'], p['b1'],
      p['wih2'], p['whh2'], p['b2'], p['saW'], p['sab'], p['sau'])
    return out[:M]


# ---------------------------------------------------------------------------
# Kernel 2: hard-attention logits, RB batch rows / step, (b, N, S) layout
#           (uses  sum_t Q_s.K_t = Q_s . sum_t K_t)
# ---------------------------------------------------------------------------
def _hard_attn_kernel(pos_ref, wq_ref, wk_ref, o_ref, *, n_sel, att_size, inv_scale):
    f32 = jnp.float32
    bf16 = jnp.bfloat16
    RB, Sp, H = pos_ref.shape

    def mm(a, b):
        return jnp.dot(a.astype(bf16), b, preferred_element_type=f32)

    pos = pos_ref[...]                                    # (RB, Sp, H) f32
    pos2 = pos.reshape(RB * Sp, H)                        # Sp % 8 == 0 -> clean merge
    q = mm(pos2, wq_ref[...])                             # (RB*Sp, N*att)
    psum = jnp.sum(pos, axis=1)                           # (RB, H) (padded rows are 0)
    ksum = mm(psum, wk_ref[...])                          # (RB, N*att)

    qr = q.reshape(RB, Sp, n_sel * att_size)
    prod = qr * ksum[:, None, :]                          # (RB, Sp, N*att)
    rows = [jnp.sum(prod[:, :, n * att_size:(n + 1) * att_size], axis=-1)
            for n in range(n_sel)]                        # each (RB, Sp)
    logits = jnp.stack(rows, axis=1) * inv_scale          # (RB, N, Sp)
    o_ref[...] = logits.astype(o_ref.dtype)


def hard_attention(feats, p, N, temperature, key):
    """feats: (BL, S, 64) -> selected (BL, N, 64), indexes (BL, N)."""
    BL, S, H = feats.shape
    pos = feats + p['pe100'][None, :S, :]
    Sp = _round_up(S, 8)
    att_size = p['ha_Qt'].shape[1] // N
    inv_scale = 1.0 / (math.sqrt(H) * S)
    RB = max(1, min(BL, 512 // Sp))
    BLp = _round_up(BL, RB)
    pos_p = jnp.pad(pos, ((0, BLp - BL), (0, Sp - S), (0, 0)))

    kernel = functools.partial(_hard_attn_kernel, n_sel=N, att_size=att_size,
                               inv_scale=inv_scale)
    logits = pl.pallas_call(
        kernel,
        out_shape=jax.ShapeDtypeStruct((BLp, N, Sp), jnp.float32),
        grid_spec=pltpu.PrefetchScalarGridSpec(
            num_scalar_prefetch=0,
            grid=(BLp // RB,),
            in_specs=[pl.BlockSpec((RB, Sp, H), lambda b: (b, 0, 0)),
                      _full_spec(p['ha_Qt']), _full_spec(p['ha_Kt'])],
            out_specs=pl.BlockSpec((RB, N, Sp), lambda b: (b, 0, 0))),
        compiler_params=pltpu.CompilerParams(dimension_semantics=("parallel",)),
    )(pos_p, p['ha_Qt'], p['ha_Kt'])

    logits = logits[:BL, :, :S].reshape(BL * N, S)
    # gumbel_softmax(hard=True): forward value is the one-hot argmax sample
    # (temperature does not change the argmax).
    g = jax.random.gumbel(key, logits.shape, jnp.float32)
    idx = jnp.argmax(logits + g, axis=-1)
    indexes = idx.reshape(BL, N)
    # one-hot @ x is just a row gather (on the raw features, no PE)
    sel = feats[jnp.arange(BL)[:, None], indexes]         # (BL, N, 64)
    return sel, indexes


# ---------------------------------------------------------------------------
# Kernel 3: fused SequenceEncoder (2 transformer layers) + classifier,
#           RB sequences per grid step, gemms flattened to (RB*Lp, D)
# ---------------------------------------------------------------------------
def _seq_enc_clf_kernel(x_ref, pe_ref, in_wT, in_b, out_wT, out_b,
                        ff1_wT, ff1_b, ff2_wT, ff2_b, ln,
                        clf_wT, clf_b, o_ref, *, nhead, l_valid):
    f32 = jnp.float32
    bf16 = jnp.bfloat16
    RB, Lp, D = x_ref.shape
    Hd = D // nhead
    n_layers = in_wT.shape[0]
    scale = 1.0 / math.sqrt(Hd)

    def mm(a, b):
        return jnp.dot(a.astype(bf16), b, preferred_element_type=f32)

    def layernorm(v, w, b):
        mu = jnp.mean(v, axis=-1, keepdims=True)
        var = jnp.mean((v - mu) ** 2, axis=-1, keepdims=True)
        return (v - mu) * jax.lax.rsqrt(var + 1e-5) * w + b

    x2 = (x_ref[...].astype(f32) + pe_ref[...]).reshape(RB * Lp, D)

    if l_valid < Lp:                                      # key mask for padded rows
        col = jax.lax.broadcasted_iota(jnp.int32, (Lp, Lp), 1)
        bias = jnp.where(col >= l_valid, jnp.float32(-1e30),
                         jnp.float32(0.0))[None, :, :]
    else:
        bias = None

    for l in range(n_layers):
        lnl = ln[l]                                       # (4, D)
        qkv = (mm(x2, in_wT[l]) + in_b[l]).reshape(RB, Lp, 3 * D)
        q = qkv[:, :, 0:D]
        k = qkv[:, :, D:2 * D]
        v = qkv[:, :, 2 * D:3 * D]
        heads = []
        for h in range(nhead):
            sl = slice(h * Hd, (h + 1) * Hd)
            qh = (q[:, :, sl] * scale).astype(bf16)
            kh = k[:, :, sl].astype(bf16)
            vh = v[:, :, sl].astype(bf16)
            s = jnp.einsum('bld,bmd->blm', qh, kh,
                           preferred_element_type=f32)    # (RB, Lp, Lp)
            if bias is not None:
                s = s + bias
            s = s - jnp.max(s, axis=-1, keepdims=True)
            e = jnp.exp(s)
            att = e * pl.reciprocal(jnp.sum(e, axis=-1, keepdims=True), approx=True)
            heads.append(jnp.einsum('blm,bmd->bld', att.astype(bf16), vh,
                                    preferred_element_type=f32))
        att_out = jnp.concatenate(heads, axis=-1).reshape(RB * Lp, D)
        att_out = mm(att_out, out_wT[l]) + out_b[l]
        x2 = layernorm(x2 + att_out, lnl[0:1, :], lnl[1:2, :])
        ffh = jnp.maximum(mm(x2, ff1_wT[l]) + ff1_b[l], 0.0)
        ffo = mm(ffh, ff2_wT[l]) + ff2_b[l]
        x2 = layernorm(x2 + ffo, lnl[2:3, :], lnl[3:4, :])

    out = mm(x2, clf_wT[...]) + clf_b[...]                # (RB*Lp, n_classes)
    o_ref[...] = out.reshape(RB, Lp, -1).astype(o_ref.dtype)


def sequence_encoder_clf(x, p, nhead=4):
    """x: (B, L, 64) -> clf logits (B, L, n_classes)."""
    B, L, D = x.shape
    n_classes = p['clf_b'].shape[-1]
    Lp = _round_up(L, 8)
    RB = max(1, min(B, 512 // Lp))
    Bp = _round_up(B, RB)
    xp = jnp.pad(x, ((0, Bp - B), (0, Lp - L), (0, 0)))
    pe = p['pe1024'][:Lp]

    kernel = functools.partial(_seq_enc_clf_kernel, nhead=nhead, l_valid=L)
    out = pl.pallas_call(
        kernel,
        out_shape=jax.ShapeDtypeStruct((Bp, Lp, n_classes), jnp.float32),
        grid_spec=pltpu.PrefetchScalarGridSpec(
            num_scalar_prefetch=0,
            grid=(Bp // RB,),
            in_specs=[pl.BlockSpec((RB, Lp, D), lambda b: (b, 0, 0)),
                      _full_spec(pe),
                      _full_spec(p['t_in_wT']), _full_spec(p['t_in_b']),
                      _full_spec(p['t_out_wT']), _full_spec(p['t_out_b']),
                      _full_spec(p['t_ff1_wT']), _full_spec(p['t_ff1_b']),
                      _full_spec(p['t_ff2_wT']), _full_spec(p['t_ff2_b']),
                      _full_spec(p['t_ln']),
                      _full_spec(p['clf_wT']), _full_spec(p['clf_b'])],
            out_specs=pl.BlockSpec((RB, Lp, n_classes), lambda b: (b, 0, 0))),
        compiler_params=pltpu.CompilerParams(dimension_semantics=("parallel",)),
    )(xp, pe, p['t_in_wT'], p['t_in_b'], p['t_out_wT'], p['t_out_b'],
      p['t_ff1_wT'], p['t_ff1_b'], p['t_ff2_wT'], p['t_ff2_b'],
      p['t_ln'], p['clf_wT'], p['clf_b'])
    return out[:B, :L]


# ---------------------------------------------------------------------------
# Remaining glue in JAX (gathers / argmin / sampling — not matmul hot paths)
# ---------------------------------------------------------------------------
def positional_encoding(max_len, hidden):
    pos = jnp.arange(max_len, dtype=jnp.float32)[:, None]
    div = jnp.exp(jnp.arange(0, hidden, 2, dtype=jnp.float32)
                  * (-math.log(10000.0) / hidden))
    pe = jnp.zeros((max_len, hidden), jnp.float32)
    pe = pe.at[:, 0::2].set(jnp.sin(pos * div))
    pe = pe.at[:, 1::2].set(jnp.cos(pos * div))
    return pe


def prototype_layer(x, protos, commitment_cost=0.25):
    # TODO(synk): 12x5 nearest-neighbour + gather intentionally left in XLA
    # (a gather, not an MXU matmul); straight-through/stop-gradient training
    # semantics are not reproduced (forward values only).
    shp = x.shape
    D = shp[-1]
    x2 = x.reshape(-1, D)
    dist = (jnp.sum(x2 ** 2, axis=1, keepdims=True)
            + jnp.sum(protos ** 2, axis=1)
            - 2.0 * x2 @ protos.T)
    idx = jnp.argmin(dist, axis=1)
    proto = protos[idx].reshape(shp)
    mse = jnp.mean((proto - x) ** 2)
    loss = mse + commitment_cost * mse          # q_latent + 0.25 * e_latent
    residuals = x - proto                       # forward value (straight-through)
    return proto, residuals, loss


def nn_forward(params, x, key, N, temperature=1.0):
    # x: (B, L, C, 29, 129)
    B, L, C, T, F = x.shape
    # torch.unfold(dim=3, size=2, step=2).transpose(4, 5) + last-frame section
    n_sec = (T - 2) // 2 + 1
    sections = x[..., :2 * n_sec, :].reshape(B, L, C, n_sec, 2, F)
    last = x[:, :, :, 28:29, :][:, :, :, :, None, :]
    last = jnp.broadcast_to(last, (B, L, C, 1, 2, F))
    sections = jnp.concatenate([sections, last], axis=3)      # (B,L,C,15,2,F)
    tot_sections = n_sec + 1

    # EpochEncoder
    sec2 = sections.reshape(-1, 2, F)
    feats = section_encoder(sec2, params)                     # (B*L*C*15, 64)
    out_size = feats.shape[-1]
    feats = feats.reshape(B * L, tot_sections * C, out_size)
    sel, indexes = hard_attention(feats, params, N, temperature, key)
    sel = sel.reshape(B, L, N, out_size)
    proto, residual, loss = prototype_layer(sel, params['protos'])

    # NN.encode tail
    p_clf = jnp.sum(proto, axis=2) / N                        # (B, L, 64)
    clf = sequence_encoder_clf(p_clf, params)                 # (B, L, n_classes)
    return clf, (proto, loss, residual, indexes)


# ---------------------------------------------------------------------------
# Parameters: torch-convention init + one-time packing / transposition / bf16
# ---------------------------------------------------------------------------
def init_params(key, N, n_prototypes, n_classes):
    keys = iter(jax.random.split(key, 64))

    def nrm(shape, s=0.1):
        return s * jax.random.normal(next(keys), shape, jnp.float32)

    p = {}
    p['fb_W'] = nrm((129, 32), 1.0)
    p['fb_S'] = jnp.abs(nrm((129, 32), 1.0))
    lstm = []
    in_sizes = [32, 64]
    for l in range(2):
        layer = {}
        for d in ('fwd', 'bwd'):
            layer[d] = dict(W_ih=nrm((4 * 32, in_sizes[l])),
                            W_hh=nrm((4 * 32, 32)),
                            b_ih=nrm((4 * 32,)),
                            b_hh=nrm((4 * 32,)))
        lstm.append(layer)
    p['lstm'] = lstm
    p['sa_W'] = nrm((64, 128))
    p['sa_b'] = nrm((128,))
    p['sa_u'] = nrm((128,))
    p['ha_Q'] = nrm((128 * N, 64))
    p['ha_K'] = nrm((128 * N, 64))
    p['protos'] = nrm((n_prototypes, 64), 1.0)
    tlayers = []
    for l in range(2):
        tlayers.append(dict(
            in_w=nrm((3 * 64, 64)), in_b=nrm((3 * 64,)),
            out_w=nrm((64, 64)), out_b=nrm((64,)),
            ff1_w=nrm((64, 64)), ff1_b=nrm((64,)),
            ff2_w=nrm((64, 64)), ff2_b=nrm((64,)),
            ln1_w=jnp.ones((64,), jnp.float32), ln1_b=jnp.zeros((64,), jnp.float32),
            ln2_w=jnp.ones((64,), jnp.float32), ln2_b=jnp.zeros((64,), jnp.float32)))
    p['transformer'] = tlayers
    p['clf_w'] = nrm((n_classes, 64))
    p['clf_b'] = nrm((n_classes,))
    return p


def prepare_params(p):
    """One-time pack: fuse LSTM gemm weights, transpose to (in,out), bf16 cast."""
    bf16 = jnp.bfloat16
    q = {}
    q['wfb'] = (jax.nn.sigmoid(p['fb_W']) * p['fb_S']).astype(bf16)    # (129, 32)

    def pack_lstm_layer(layer):
        # input weights for both directions stacked along the output dim
        wih = jnp.concatenate([layer['fwd']['W_ih'].T,
                               layer['bwd']['W_ih'].T], axis=1)        # (in, 256)
        # hidden weights as a block-diagonal (64, 256) matrix
        z = jnp.zeros((32, 128), jnp.float32)
        whh = jnp.concatenate([
            jnp.concatenate([layer['fwd']['W_hh'].T, z], axis=1),
            jnp.concatenate([z, layer['bwd']['W_hh'].T], axis=1)], axis=0)
        b = jnp.stack([(layer['fwd']['b_ih'] + layer['fwd']['b_hh'])[None, :],
                       (layer['bwd']['b_ih'] + layer['bwd']['b_hh'])[None, :]])
        return wih.astype(bf16), whh.astype(bf16), b                   # b: (2,1,128)

    q['wih1'], q['whh1'], q['b1'] = pack_lstm_layer(p['lstm'][0])
    q['wih2'], q['whh2'], q['b2'] = pack_lstm_layer(p['lstm'][1])
    q['saW'] = p['sa_W'].astype(bf16)                                  # (64,128)
    q['sab'] = p['sa_b'][None, :]
    q['sau'] = p['sa_u'][None, :]
    q['ha_Qt'] = p['ha_Q'].T.astype(bf16)                              # (64,128N)
    q['ha_Kt'] = p['ha_K'].T.astype(bf16)
    q['protos'] = p['protos']
    tl = p['transformer']
    q['t_in_wT'] = jnp.stack([t['in_w'].T for t in tl]).astype(bf16)   # (2,64,192)
    q['t_in_b'] = jnp.stack([t['in_b'][None, :] for t in tl])
    q['t_out_wT'] = jnp.stack([t['out_w'].T for t in tl]).astype(bf16)
    q['t_out_b'] = jnp.stack([t['out_b'][None, :] for t in tl])
    q['t_ff1_wT'] = jnp.stack([t['ff1_w'].T for t in tl]).astype(bf16)
    q['t_ff1_b'] = jnp.stack([t['ff1_b'][None, :] for t in tl])
    q['t_ff2_wT'] = jnp.stack([t['ff2_w'].T for t in tl]).astype(bf16)
    q['t_ff2_b'] = jnp.stack([t['ff2_b'][None, :] for t in tl])
    q['t_ln'] = jnp.stack([jnp.stack([t['ln1_w'], t['ln1_b'],
                                      t['ln2_w'], t['ln2_b']]) for t in tl])
    q['clf_wT'] = p['clf_w'].T.astype(bf16)                            # (64,n_cls)
    q['clf_b'] = p['clf_b'][None, :]
    q['pe100'] = positional_encoding(100, 64)
    q['pe1024'] = positional_encoding(1024, 64)
    return q


if __name__ == "__main__":
    key = jax.random.PRNGKey(0)
    k_x, k_p, k_g = jax.random.split(key, 3)

    # 29 time frames are required by the `28:29` slice; 129 freq bins are
    # fixed by the LearnableFilterbank (F=129).
    B, L, C = 2, 3, 1
    T, F = 29, 129
    N, n_prototypes, n_classes = 2, 5, 5

    x = jax.random.normal(k_x, (B, L, C, T, F), jnp.float32)
    raw_params = init_params(k_p, N, n_prototypes, n_classes)
    params = prepare_params(raw_params)

    fwd = jax.jit(lambda p, xx, kk: nn_forward(p, xx, kk, N))
    clf, (proto, loss, residual, indexes) = fwd(params, x, k_g)
    jax.block_until_ready(clf)
    jax.block_until_ready(loss)

    assert clf.shape == (B, L, n_classes)
    assert proto.shape == (B, L, N, 64)
    assert residual.shape == (B, L, N, 64)
    assert indexes.shape == (B * L, N)
    assert bool(jnp.isfinite(clf).all()) and bool(jnp.isfinite(loss))
    print("KERNEL_OK")
</pallas_src>

<mosaic_0001>
module attributes {stable_mosaic.version = 11 : i64} {
  func.func @_sec_enc_kernel(%arg0: i32, %arg1: memref<2x48x129xbf16, #tpu.memory_space<vmem>>, %arg2: memref<129x32xbf16, #tpu.memory_space<vmem>>, %arg3: memref<32x256xbf16, #tpu.memory_space<vmem>>, %arg4: memref<64x256xbf16, #tpu.memory_space<vmem>>, %arg5: memref<2x1x128xf32, #tpu.memory_space<vmem>>, %arg6: memref<64x256xbf16, #tpu.memory_space<vmem>>, %arg7: memref<64x256xbf16, #tpu.memory_space<vmem>>, %arg8: memref<2x1x128xf32, #tpu.memory_space<vmem>>, %arg9: memref<64x128xbf16, #tpu.memory_space<vmem>>, %arg10: memref<1x128xf32, #tpu.memory_space<vmem>>, %arg11: memref<1x128xf32, #tpu.memory_space<vmem>>, %arg12: memref<48x64xf32, #tpu.memory_space<vmem>>) attributes {dimension_semantics = [#tpu.dimension_semantics<parallel>], iteration_bounds = array<i64: 2>, scalar_prefetch = 0 : i64, scratch_operands = 0 : i64, tpu.core_type = #tpu.core_type<tc>, window_params = [{transform_indices = @transform_0, window_bounds = array<i64: 2, 48, 129>}, {pipeline_mode = #tpu.pipeline_mode<synchronous>, transform_indices = @transform_1, window_bounds = array<i64: 129, 32>}, {pipeline_mode = #tpu.pipeline_mode<synchronous>, transform_indices = @transform_2, window_bounds = array<i64: 32, 256>}, {pipeline_mode = #tpu.pipeline_mode<synchronous>, transform_indices = @transform_3, window_bounds = array<i64: 64, 256>}, {pipeline_mode = #tpu.pipeline_mode<synchronous>, transform_indices = @transform_4, window_bounds = array<i64: 2, 1, 128>}, {pipeline_mode = #tpu.pipeline_mode<synchronous>, transform_indices = @transform_5, window_bounds = array<i64: 64, 256>}, {pipeline_mode = #tpu.pipeline_mode<synchronous>, transform_indices = @transform_6, window_bounds = array<i64: 64, 256>}, {pipeline_mode = #tpu.pipeline_mode<synchronous>, transform_indices = @transform_7, window_bounds = array<i64: 2, 1, 128>}, {pipeline_mode = #tpu.pipeline_mode<synchronous>, transform_indices = @transform_8, window_bounds = array<i64: 64, 128>}, {pipeline_mode = #tpu.pipeline_mode<synchronous>, transform_indices = @transform_9, window_bounds = array<i64: 1, 128>}, {pipeline_mode = #tpu.pipeline_mode<synchronous>, transform_indices = @transform_10, window_bounds = array<i64: 1, 128>}, {transform_indices = @transform_11, window_bounds = array<i64: 48, 64>}]} {
    %c0 = arith.constant 0 : index
    %c0_0 = arith.constant 0 : index
    %c0_1 = arith.constant 0 : index
    %0 = vector.load %arg1[%c0, %c0_0, %c0_1] : memref<2x48x129xbf16, #tpu.memory_space<vmem>>, vector<1x48x129xbf16>
    %1 = vector.shape_cast %0 : vector<1x48x129xbf16> to vector<48x129xbf16>
    %c1 = arith.constant 1 : index
    %c0_2 = arith.constant 0 : index
    %c0_3 = arith.constant 0 : index
    %2 = vector.load %arg1[%c1, %c0_2, %c0_3] : memref<2x48x129xbf16, #tpu.memory_space<vmem>>, vector<1x48x129xbf16>
    %3 = vector.shape_cast %2 : vector<1x48x129xbf16> to vector<48x129xbf16>
    %4 = tpu.concatenate %1, %3 in 0 : vector<48x129xbf16>, vector<48x129xbf16> -> vector<96x129xbf16>
    %c0_4 = arith.constant 0 : index
    %c0_5 = arith.constant 0 : index
    %5 = vector.load %arg2[%c0_4, %c0_5] : memref<129x32xbf16, #tpu.memory_space<vmem>>, vector<129x32xbf16>
    %6 = vector.extract_strided_slice %4 {offsets = [0, 0], sizes = [96, 128], strides = [1, 1]} : vector<96x129xbf16> to vector<96x128xbf16>
    %7 = vector.extract_strided_slice %5 {offsets = [0, 0], sizes = [128, 32], strides = [1, 1]} : vector<129x32xbf16> to vector<128x32xbf16>
    %cst = arith.constant dense<0.000000e+00> : vector<96x32xf32>
    %8 = tpu.matmul %6, %7, %cst {dimension_numbers = #tpu.dot_dimension_numbers<[1], [0], [0], [1], [0, 0, 1, 1], [], []>} : vector<96x128xbf16>, vector<128x32xbf16>, vector<96x32xf32> -> vector<96x32xf32>
    %9 = vector.extract_strided_slice %4 {offsets = [0, 128], sizes = [96, 1], strides = [1, 1]} : vector<96x129xbf16> to vector<96x1xbf16>
    %10 = arith.extf %9 : vector<96x1xbf16> to vector<96x1xf32>
    %11 = vector.extract_strided_slice %5 {offsets = [128, 0], sizes = [1, 32], strides = [1, 1]} : vector<129x32xbf16> to vector<1x32xbf16>
    %12 = arith.extf %11 : vector<1x32xbf16> to vector<1x32xf32>
    %13 = vector.broadcast %10 : vector<96x1xf32> to vector<96x32xf32>
    %14 = vector.broadcast %12 : vector<1x32xf32> to vector<96x32xf32>
    %15 = arith.mulf %13, %14 : vector<96x32xf32>
    %16 = arith.addf %8, %15 : vector<96x32xf32>
    %c0_6 = arith.constant 0 : index
    %c0_7 = arith.constant 0 : index
    %c0_8 = arith.constant 0 : index
    %17 = vector.load %arg5[%c0_6, %c0_7, %c0_8] : memref<2x1x128xf32, #tpu.memory_space<vmem>>, vector<1x1x128xf32>
    %18 = vector.shape_cast %17 : vector<1x1x128xf32> to vector<1x128xf32>
    %c1_9 = arith.constant 1 : index
    %c0_10 = arith.constant 0 : index
    %c0_11 = arith.constant 0 : index
    %19 = vector.load %arg5[%c1_9, %c0_10, %c0_11] : memref<2x1x128xf32, #tpu.memory_space<vmem>>, vector<1x1x128xf32>
    %20 = vector.shape_cast %19 : vector<1x1x128xf32> to vector<1x128xf32>
    %c0_12 = arith.constant 0 : index
    %c0_13 = arith.constant 0 : index
    %21 = vector.load %arg3[%c0_12, %c0_13] : memref<32x256xbf16, #tpu.memory_space<vmem>>, vector<32x256xbf16>
    %22 = arith.truncf %16 : vector<96x32xf32> to vector<96x32xbf16>
    %cst_14 = arith.constant dense<0.000000e+00> : vector<96x256xf32>
    %23 = tpu.matmul %22, %21, %cst_14 {dimension_numbers = #tpu.dot_dimension_numbers<[1], [0], [0], [1], [0, 0, 1, 1], [], []>} : vector<96x32xbf16>, vector<32x256xbf16>, vector<96x256xf32> -> vector<96x256xf32>
    %24 = vector.extract_strided_slice %23 {offsets = [0, 0], sizes = [48, 128], strides = [1, 1]} : vector<96x256xf32> to vector<48x128xf32>
    %25 = vector.extract_strided_slice %23 {offsets = [0, 128], sizes = [48, 128], strides = [1, 1]} : vector<96x256xf32> to vector<48x128xf32>
    %26 = vector.extract_strided_slice %23 {offsets = [48, 0], sizes = [48, 128], strides = [1, 1]} : vector<96x256xf32> to vector<48x128xf32>
    %27 = vector.extract_strided_slice %23 {offsets = [48, 128], sizes = [48, 128], strides = [1, 1]} : vector<96x256xf32> to vector<48x128xf32>
    %28 = vector.broadcast %18 : vector<1x128xf32> to vector<48x128xf32>
    %29 = arith.addf %24, %28 : vector<48x128xf32>
    %30 = vector.extract_strided_slice %29 {offsets = [0, 0], sizes = [48, 32], strides = [1, 1]} : vector<48x128xf32> to vector<48x32xf32>
    %cst_15 = arith.constant 0.000000e+00 : f32
    %31 = vector.broadcast %cst_15 : f32 to vector<48x32xf32>
    %32 = arith.subf %31, %30 : vector<48x32xf32>
    %33 = math.exp %32 : vector<48x32xf32>
    %cst_16 = arith.constant 1.000000e+00 : f32
    %34 = vector.broadcast %cst_16 : f32 to vector<48x32xf32>
    %35 = arith.addf %34, %33 : vector<48x32xf32>
    %36 = tpu.reciprocal %35 {approx = true} : vector<48x32xf32> -> vector<48x32xf32>
    %37 = vector.extract_strided_slice %29 {offsets = [0, 64], sizes = [48, 32], strides = [1, 1]} : vector<48x128xf32> to vector<48x32xf32>
    %38 = math.tanh %37 : vector<48x32xf32>
    %39 = vector.extract_strided_slice %29 {offsets = [0, 96], sizes = [48, 32], strides = [1, 1]} : vector<48x128xf32> to vector<48x32xf32>
    %cst_17 = arith.constant 0.000000e+00 : f32
    %40 = vector.broadcast %cst_17 : f32 to vector<48x32xf32>
    %41 = arith.subf %40, %39 : vector<48x32xf32>
    %42 = math.exp %41 : vector<48x32xf32>
    %cst_18 = arith.constant 1.000000e+00 : f32
    %43 = vector.broadcast %cst_18 : f32 to vector<48x32xf32>
    %44 = arith.addf %43, %42 : vector<48x32xf32>
    %45 = tpu.reciprocal %44 {approx = true} : vector<48x32xf32> -> vector<48x32xf32>
    %46 = arith.mulf %36, %38 : vector<48x32xf32>
    %47 = math.tanh %46 : vector<48x32xf32>
    %48 = arith.mulf %45, %47 : vector<48x32xf32>
    %49 = vector.broadcast %20 : vector<1x128xf32> to vector<48x128xf32>
    %50 = arith.addf %27, %49 : vector<48x128xf32>
    %51 = vector.extract_strided_slice %50 {offsets = [0, 0], sizes = [48, 32], strides = [1, 1]} : vector<48x128xf32> to vector<48x32xf32>
    %cst_19 = arith.constant 0.000000e+00 : f32
    %52 = vector.broadcast %cst_19 : f32 to vector<48x32xf32>
    %53 = arith.subf %52, %51 : vector<48x32xf32>
    %54 = math.exp %53 : vector<48x32xf32>
    %cst_20 = arith.constant 1.000000e+00 : f32
    %55 = vector.broadcast %cst_20 : f32 to vector<48x32xf32>
    %56 = arith.addf %55, %54 : vector<48x32xf32>
    %57 = tpu.reciprocal %56 {approx = true} : vector<48x32xf32> -> vector<48x32xf32>
    %58 = vector.extract_strided_slice %50 {offsets = [0, 64], sizes = [48, 32], strides = [1, 1]} : vector<48x128xf32> to vector<48x32xf32>
    %59 = math.tanh %58 : vector<48x32xf32>
    %60 = vector.extract_strided_slice %50 {offsets = [0, 96], sizes = [48, 32], strides = [1, 1]} : vector<48x128xf32> to vector<48x32xf32>
    %cst_21 = arith.constant 0.000000e+00 : f32
    %61 = vector.broadcast %cst_21 : f32 to vector<48x32xf32>
    %62 = arith.subf %61, %60 : vector<48x32xf32>
    %63 = math.exp %62 : vector<48x32xf32>
    %cst_22 = arith.constant 1.000000e+00 : f32
    %64 = vector.broadcast %cst_22 : f32 to vector<48x32xf32>
    %65 = arith.addf %64, %63 : vector<48x32xf32>
    %66 = tpu.reciprocal %65 {approx = true} : vector<48x32xf32> -> vector<48x32xf32>
    %67 = arith.mulf %57, %59 : vector<48x32xf32>
    %68 = math.tanh %67 : vector<48x32xf32>
    %69 = arith.mulf %66, %68 : vector<48x32xf32>
    %70 = tpu.concatenate %48, %69 in 1 : vector<48x32xf32>, vector<48x32xf32> -> vector<48x64xf32>
    %c0_23 = arith.constant 0 : index
    %c0_24 = arith.constant 0 : index
    %71 = vector.load %arg4[%c0_23, %c0_24] : memref<64x256xbf16, #tpu.memory_space<vmem>>, vector<64x256xbf16>
    %72 = arith.truncf %70 : vector<48x64xf32> to vector<48x64xbf16>
    %cst_25 = arith.constant dense<0.000000e+00> : vector<48x256xf32>
    %73 = tpu.matmul %72, %71, %cst_25 {dimension_numbers = #tpu.dot_dimension_numbers<[1], [0], [0], [1], [0, 0, 1, 1], [], []>} : vector<48x64xbf16>, vector<64x256xbf16>, vector<48x256xf32> -> vector<48x256xf32>
    %74 = vector.extract_strided_slice %73 {offsets = [0, 0], sizes = [48, 128], strides = [1, 1]} : vector<48x256xf32> to vector<48x128xf32>
    %75 = arith.addf %26, %74 : vector<48x128xf32>
    %76 = vector.broadcast %18 : vector<1x128xf32> to vector<48x128xf32>
    %77 = arith.addf %75, %76 : vector<48x128xf32>
    %78 = vector.extract_strided_slice %77 {offsets = [0, 0], sizes = [48, 32], strides = [1, 1]} : vector<48x128xf32> to vector<48x32xf32>
    %cst_26 = arith.constant 0.000000e+00 : f32
    %79 = vector.broadcast %cst_26 : f32 to vector<48x32xf32>
    %80 = arith.subf %79, %78 : vector<48x32xf32>
    %81 = math.exp %80 : vector<48x32xf32>
    %cst_27 = arith.constant 1.000000e+00 : f32
    %82 = vector.broadcast %cst_27 : f32 to vector<48x32xf32>
    %83 = arith.addf %82, %81 : vector<48x32xf32>
    %84 = tpu.reciprocal %83 {approx = true} : vector<48x32xf32> -> vector<48x32xf32>
    %85 = vector.extract_strided_slice %77 {offsets = [0, 32], sizes = [48, 32], strides = [1, 1]} : vector<48x128xf32> to vector<48x32xf32>
    %cst_28 = arith.constant 0.000000e+00 : f32
    %86 = vector.broadcast %cst_28 : f32 to vector<48x32xf32>
    %87 = arith.subf %86, %85 : vector<48x32xf32>
    %88 = math.exp %87 : vector<48x32xf32>
    %cst_29 = arith.constant 1.000000e+00 : f32
    %89 = vector.broadcast %cst_29 : f32 to vector<48x32xf32>
    %90 = arith.addf %89, %88 : vector<48x32xf32>
    %91 = tpu.reciprocal %90 {approx = true} : vector<48x32xf32> -> vector<48x32xf32>
    %92 = vector.extract_strided_slice %77 {offsets = [0, 64], sizes = [48, 32], strides = [1, 1]} : vector<48x128xf32> to vector<48x32xf32>
    %93 = math.tanh %92 : vector<48x32xf32>
    %94 = vector.extract_strided_slice %77 {offsets = [0, 96], sizes = [48, 32], strides = [1, 1]} : vector<48x128xf32> to vector<48x32xf32>
    %cst_30 = arith.constant 0.000000e+00 : f32
    %95 = vector.broadcast %cst_30 : f32 to vector<48x32xf32>
    %96 = arith.subf %95, %94 : vector<48x32xf32>
    %97 = math.exp %96 : vector<48x32xf32>
    %cst_31 = arith.constant 1.000000e+00 : f32
    %98 = vector.broadcast %cst_31 : f32 to vector<48x32xf32>
    %99 = arith.addf %98, %97 : vector<48x32xf32>
    %100 = tpu.reciprocal %99 {approx = true} : vector<48x32xf32> -> vector<48x32xf32>
    %101 = arith.mulf %91, %46 : vector<48x32xf32>
    %102 = arith.mulf %84, %93 : vector<48x32xf32>
    %103 = arith.addf %101, %102 : vector<48x32xf32>
    %104 = math.tanh %103 : vector<48x32xf32>
    %105 = arith.mulf %100, %104 : vector<48x32xf32>
    %106 = vector.extract_strided_slice %73 {offsets = [0, 128], sizes = [48, 128], strides = [1, 1]} : vector<48x256xf32> to vector<48x128xf32>
    %107 = arith.addf %25, %106 : vector<48x128xf32>
    %108 = vector.broadcast %20 : vector<1x128xf32> to vector<48x128xf32>
    %109 = arith.addf %107, %108 : vector<48x128xf32>
    %110 = vector.extract_strided_slice %109 {offsets = [0, 0], sizes = [48, 32], strides = [1, 1]} : vector<48x128xf32> to vector<48x32xf32>
    %cst_32 = arith.constant 0.000000e+00 : f32
    %111 = vector.broadcast %cst_32 : f32 to vector<48x32xf32>
    %112 = arith.subf %111, %110 : vector<48x32xf32>
    %113 = math.exp %112 : vector<48x32xf32>
    %cst_33 = arith.constant 1.000000e+00 : f32
    %114 = vector.broadcast %cst_33 : f32 to vector<48x32xf32>
    %115 = arith.addf %114, %113 : vector<48x32xf32>
    %116 = tpu.reciprocal %115 {approx = true} : vector<48x32xf32> -> vector<48x32xf32>
    %117 = vector.extract_strided_slice %109 {offsets = [0, 32], sizes = [48, 32], strides = [1, 1]} : vector<48x128xf32> to vector<48x32xf32>
    %cst_34 = arith.constant 0.000000e+00 : f32
    %118 = vector.broadcast %cst_34 : f32 to vector<48x32xf32>
    %119 = arith.subf %118, %117 : vector<48x32xf32>
    %120 = math.exp %119 : vector<48x32xf32>
    %cst_35 = arith.constant 1.000000e+00 : f32
    %121 = vector.broadcast %cst_35 : f32 to vector<48x32xf32>
    %122 = arith.addf %121, %120 : vector<48x32xf32>
    %123 = tpu.reciprocal %122 {approx = true} : vector<48x32xf32> -> vector<48x32xf32>
    %124 = vector.extract_strided_slice %109 {offsets = [0, 64], sizes = [48, 32], strides = [1, 1]} : vector<48x128xf32> to vector<48x32xf32>
    %125 = math.tanh %124 : vector<48x32xf32>
    %126 = vector.extract_strided_slice %109 {offsets = [0, 96], sizes = [48, 32], strides = [1, 1]} : vector<48x128xf32> to vector<48x32xf32>
    %cst_36 = arith.constant 0.000000e+00 : f32
    %127 = vector.broadcast %cst_36 : f32 to vector<48x32xf32>
    %128 = arith.subf %127, %126 : vector<48x32xf32>
    %129 = math.exp %128 : vector<48x32xf32>
    %cst_37 = arith.constant 1.000000e+00 : f32
    %130 = vector.broadcast %cst_37 : f32 to vector<48x32xf32>
    %131 = arith.addf %130, %129 : vector<48x32xf32>
    %132 = tpu.reciprocal %131 {approx = true} : vector<48x32xf32> -> vector<48x32xf32>
    %133 = arith.mulf %123, %67 : vector<48x32xf32>
    %134 = arith.mulf %116, %125 : vector<48x32xf32>
    %135 = arith.addf %133, %134 : vector<48x32xf32>
    %136 = math.tanh %135 : vector<48x32xf32>
    %137 = arith.mulf %132, %136 : vector<48x32xf32>
    %138 = tpu.concatenate %48, %137 in 1 : vector<48x32xf32>, vector<48x32xf32> -> vector<48x64xf32>
    %139 = tpu.concatenate %105, %69 in 1 : vector<48x32xf32>, vector<48x32xf32> -> vector<48x64xf32>
    %140 = tpu.concatenate %138, %139 in 0 : vector<48x64xf32>, vector<48x64xf32> -> vector<96x64xf32>
    %c0_38 = arith.constant 0 : index
    %c0_39 = arith.constant 0 : index
    %c0_40 = arith.constant 0 : index
    %141 = vector.load %arg8[%c0_38, %c0_39, %c0_40] : memref<2x1x128xf32, #tpu.memory_space<vmem>>, vector<1x1x128xf32>
    %142 = vector.shape_cast %141 : vector<1x1x128xf32> to vector<1x128xf32>
    %c1_41 = arith.constant 1 : index
    %c0_42 = arith.constant 0 : index
    %c0_43 = arith.constant 0 : index
    %143 = vector.load %arg8[%c1_41, %c0_42, %c0_43] : memref<2x1x128xf32, #tpu.memory_space<vmem>>, vector<1x1x128xf32>
    %144 = vector.shape_cast %143 : vector<1x1x128xf32> to vector<1x128xf32>
    %c0_44 = arith.constant 0 : index
    %c0_45 = arith.constant 0 : index
    %145 = vector.load %arg6[%c0_44, %c0_45] : memref<64x256xbf16, #tpu.memory_space<vmem>>, vector<64x256xbf16>
    %146 = arith.truncf %140 : vector<96x64xf32> to vector<96x64xbf16>
    %cst_46 = arith.constant dense<0.000000e+00> : vector<96x256xf32>
    %147 = tpu.matmul %146, %145, %cst_46 {dimension_numbers = #tpu.dot_dimension_numbers<[1], [0], [0], [1], [0, 0, 1, 1], [], []>} : vector<96x64xbf16>, vector<64x256xbf16>, vector<96x256xf32> -> vector<96x256xf32>
    %148 = vector.extract_strided_slice %147 {offsets = [0, 0], sizes = [48, 128], strides = [1, 1]} : vector<96x256xf32> to vector<48x128xf32>
    %149 = vector.extract_strided_slice %147 {offsets = [0, 128], sizes = [48, 128], strides = [1, 1]} : vector<96x256xf32> to vector<48x128xf32>
    %150 = vector.extract_strided_slice %147 {offsets = [48, 0], sizes = [48, 128], strides = [1, 1]} : vector<96x256xf32> to vector<48x128xf32>
    %151 = vector.extract_strided_slice %147 {offsets = [48, 128], sizes = [48, 128], strides = [1, 1]} : vector<96x256xf32> to vector<48x128xf32>
    %152 = vector.broadcast %142 : vector<1x128xf32> to vector<48x128xf32>
    %153 = arith.addf %148, %152 : vector<48x128xf32>
    %154 = vector.extract_strided_slice %153 {offsets = [0, 0], sizes = [48, 32], strides = [1, 1]} : vector<48x128xf32> to vector<48x32xf32>
    %cst_47 = arith.constant 0.000000e+00 : f32
    %155 = vector.broadcast %cst_47 : f32 to vector<48x32xf32>
    %156 = arith.subf %155, %154 : vector<48x32xf32>
    %157 = math.exp %156 : vector<48x32xf32>
    %cst_48 = arith.constant 1.000000e+00 : f32
    %158 = vector.broadcast %cst_48 : f32 to vector<48x32xf32>
    %159 = arith.addf %158, %157 : vector<48x32xf32>
    %160 = tpu.reciprocal %159 {approx = true} : vector<48x32xf32> -> vector<48x32xf32>
    %161 = vector.extract_strided_slice %153 {offsets = [0, 64], sizes = [48, 32], strides = [1, 1]} : vector<48x128xf32> to vector<48x32xf32>
    %162 = math.tanh %161 : vector<48x32xf32>
    %163 = vector.extract_strided_slice %153 {offsets = [0, 96], sizes = [48, 32], strides = [1, 1]} : vector<48x128xf32> to vector<48x32xf32>
    %cst_49 = arith.constant 0.000000e+00 : f32
    %164 = vector.broadcast %cst_49 : f32 to vector<48x32xf32>
    %165 = arith.subf %164, %163 : vector<48x32xf32>
    %166 = math.exp %165 : vector<48x32xf32>
    %cst_50 = arith.constant 1.000000e+00 : f32
    %167 = vector.broadcast %cst_50 : f32 to vector<48x32xf32>
    %168 = arith.addf %167, %166 : vector<48x32xf32>
    %169 = tpu.reciprocal %168 {approx = true} : vector<48x32xf32> -> vector<48x32xf32>
    %170 = arith.mulf %160, %162 : vector<48x32xf32>
    %171 = math.tanh %170 : vector<48x32xf32>
    %172 = arith.mulf %169, %171 : vector<48x32xf32>
    %173 = vector.broadcast %144 : vector<1x128xf32> to vector<48x128xf32>
    %174 = arith.addf %151, %173 : vector<48x128xf32>
    %175 = vector.extract_strided_slice %174 {offsets = [0, 0], sizes = [48, 32], strides = [1, 1]} : vector<48x128xf32> to vector<48x32xf32>
    %cst_51 = arith.constant 0.000000e+00 : f32
    %176 = vector.broadcast %cst_51 : f32 to vector<48x32xf32>
    %177 = arith.subf %176, %175 : vector<48x32xf32>
    %178 = math.exp %177 : vector<48x32xf32>
    %cst_52 = arith.constant 1.000000e+00 : f32
    %179 = vector.broadcast %cst_52 : f32 to vector<48x32xf32>
    %180 = arith.addf %179, %178 : vector<48x32xf32>
    %181 = tpu.reciprocal %180 {approx = true} : vector<48x32xf32> -> vector<48x32xf32>
    %182 = vector.extract_strided_slice %174 {offsets = [0, 64], sizes = [48, 32], strides = [1, 1]} : vector<48x128xf32> to vector<48x32xf32>
    %183 = math.tanh %182 : vector<48x32xf32>
    %184 = vector.extract_strided_slice %174 {offsets = [0, 96], sizes = [48, 32], strides = [1, 1]} : vector<48x128xf32> to vector<48x32xf32>
    %cst_53 = arith.constant 0.000000e+00 : f32
    %185 = vector.broadcast %cst_53 : f32 to vector<48x32xf32>
    %186 = arith.subf %185, %184 : vector<48x32xf32>
    %187 = math.exp %186 : vector<48x32xf32>
    %cst_54 = arith.constant 1.000000e+00 : f32
    %188 = vector.broadcast %cst_54 : f32 to vector<48x32xf32>
    %189 = arith.addf %188, %187 : vector<48x32xf32>
    %190 = tpu.reciprocal %189 {approx = true} : vector<48x32xf32> -> vector<48x32xf32>
    %191 = arith.mulf %181, %183 : vector<48x32xf32>
    %192 = math.tanh %191 : vector<48x32xf32>
    %193 = arith.mulf %190, %192 : vector<48x32xf32>
    %194 = tpu.concatenate %172, %193 in 1 : vector<48x32xf32>, vector<48x32xf32> -> vector<48x64xf32>
    %c0_55 = arith.constant 0 : index
    %c0_56 = arith.constant 0 : index
    %195 = vector.load %arg7[%c0_55, %c0_56] : memref<64x256xbf16, #tpu.memory_space<vmem>>, vector<64x256xbf16>
    %196 = arith.truncf %194 : vector<48x64xf32> to vector<48x64xbf16>
    %cst_57 = arith.constant dense<0.000000e+00> : vector<48x256xf32>
    %197 = tpu.matmul %196, %195, %cst_57 {dimension_numbers = #tpu.dot_dimension_numbers<[1], [0], [0], [1], [0, 0, 1, 1], [], []>} : vector<48x64xbf16>, vector<64x256xbf16>, vector<48x256xf32> -> vector<48x256xf32>
    %198 = vector.extract_strided_slice %197 {offsets = [0, 0], sizes = [48, 128], strides = [1, 1]} : vector<48x256xf32> to vector<48x128xf32>
    %199 = arith.addf %150, %198 : vector<48x128xf32>
    %200 = vector.broadcast %142 : vector<1x128xf32> to vector<48x128xf32>
    %201 = arith.addf %199, %200 : vector<48x128xf32>
    %202 = vector.extract_strided_slice %201 {offsets = [0, 0], sizes = [48, 32], strides = [1, 1]} : vector<48x128xf32> to vector<48x32xf32>
    %cst_58 = arith.constant 0.000000e+00 : f32
    %203 = vector.broadcast %cst_58 : f32 to vector<48x32xf32>
    %204 = arith.subf %203, %202 : vector<48x32xf32>
    %205 = math.exp %204 : vector<48x32xf32>
    %cst_59 = arith.constant 1.000000e+00 : f32
    %206 = vector.broadcast %cst_59 : f32 to vector<48x32xf32>
    %207 = arith.addf %206, %205 : vector<48x32xf32>
    %208 = tpu.reciprocal %207 {approx = true} : vector<48x32xf32> -> vector<48x32xf32>
    %209 = vector.extract_strided_slice %201 {offsets = [0, 32], sizes = [48, 32], strides = [1, 1]} : vector<48x128xf32> to vector<48x32xf32>
    %cst_60 = arith.constant 0.000000e+00 : f32
    %210 = vector.broadcast %cst_60 : f32 to vector<48x32xf32>
    %211 = arith.subf %210, %209 : vector<48x32xf32>
    %212 = math.exp %211 : vector<48x32xf32>
    %cst_61 = arith.constant 1.000000e+00 : f32
    %213 = vector.broadcast %cst_61 : f32 to vector<48x32xf32>
    %214 = arith.addf %213, %212 : vector<48x32xf32>
    %215 = tpu.reciprocal %214 {approx = true} : vector<48x32xf32> -> vector<48x32xf32>
    %216 = vector.extract_strided_slice %201 {offsets = [0, 64], sizes = [48, 32], strides = [1, 1]} : vector<48x128xf32> to vector<48x32xf32>
    %217 = math.tanh %216 : vector<48x32xf32>
    %218 = vector.extract_strided_slice %201 {offsets = [0, 96], sizes = [48, 32], strides = [1, 1]} : vector<48x128xf32> to vector<48x32xf32>
    %cst_62 = arith.constant 0.000000e+00 : f32
    %219 = vector.broadcast %cst_62 : f32 to vector<48x32xf32>
    %220 = arith.subf %219, %218 : vector<48x32xf32>
    %221 = math.exp %220 : vector<48x32xf32>
    %cst_63 = arith.constant 1.000000e+00 : f32
    %222 = vector.broadcast %cst_63 : f32 to vector<48x32xf32>
    %223 = arith.addf %222, %221 : vector<48x32xf32>
    %224 = tpu.reciprocal %223 {approx = true} : vector<48x32xf32> -> vector<48x32xf32>
    %225 = arith.mulf %215, %170 : vector<48x32xf32>
    %226 = arith.mulf %208, %217 : vector<48x32xf32>
    %227 = arith.addf %225, %226 : vector<48x32xf32>
    %228 = math.tanh %227 : vector<48x32xf32>
    %229 = arith.mulf %224, %228 : vector<48x32xf32>
    %230 = vector.extract_strided_slice %197 {offsets = [0, 128], sizes = [48, 128], strides = [1, 1]} : vector<48x256xf32> to vector<48x128xf32>
    %231 = arith.addf %149, %230 : vector<48x128xf32>
    %232 = vector.broadcast %144 : vector<1x128xf32> to vector<48x128xf32>
    %233 = arith.addf %231, %232 : vector<48x128xf32>
    %234 = vector.extract_strided_slice %233 {offsets = [0, 0], sizes = [48, 32], strides = [1, 1]} : vector<48x128xf32> to vector<48x32xf32>
    %cst_64 = arith.constant 0.000000e+00 : f32
    %235 = vector.broadcast %cst_64 : f32 to vector<48x32xf32>
    %236 = arith.subf %235, %234 : vector<48x32xf32>
    %237 = math.exp %236 : vector<48x32xf32>
    %cst_65 = arith.constant 1.000000e+00 : f32
    %238 = vector.broadcast %cst_65 : f32 to vector<48x32xf32>
    %239 = arith.addf %238, %237 : vector<48x32xf32>
    %240 = tpu.reciprocal %239 {approx = true} : vector<48x32xf32> -> vector<48x32xf32>
    %241 = vector.extract_strided_slice %233 {offsets = [0, 32], sizes = [48, 32], strides = [1, 1]} : vector<48x128xf32> to vector<48x32xf32>
    %cst_66 = arith.constant 0.000000e+00 : f32
    %242 = vector.broadcast %cst_66 : f32 to vector<48x32xf32>
    %243 = arith.subf %242, %241 : vector<48x32xf32>
    %244 = math.exp %243 : vector<48x32xf32>
    %cst_67 = arith.constant 1.000000e+00 : f32
    %245 = vector.broadcast %cst_67 : f32 to vector<48x32xf32>
    %246 = arith.addf %245, %244 : vector<48x32xf32>
    %247 = tpu.reciprocal %246 {approx = true} : vector<48x32xf32> -> vector<48x32xf32>
    %248 = vector.extract_strided_slice %233 {offsets = [0, 64], sizes = [48, 32], strides = [1, 1]} : vector<48x128xf32> to vector<48x32xf32>
    %249 = math.tanh %248 : vector<48x32xf32>
    %250 = vector.extract_strided_slice %233 {offsets = [0, 96], sizes = [48, 32], strides = [1, 1]} : vector<48x128xf32> to vector<48x32xf32>
    %cst_68 = arith.constant 0.000000e+00 : f32
    %251 = vector.broadcast %cst_68 : f32 to vector<48x32xf32>
    %252 = arith.subf %251, %250 : vector<48x32xf32>
    %253 = math.exp %252 : vector<48x32xf32>
    %cst_69 = arith.constant 1.000000e+00 : f32
    %254 = vector.broadcast %cst_69 : f32 to vector<48x32xf32>
    %255 = arith.addf %254, %253 : vector<48x32xf32>
    %256 = tpu.reciprocal %255 {approx = true} : vector<48x32xf32> -> vector<48x32xf32>
    %257 = arith.mulf %247, %191 : vector<48x32xf32>
    %258 = arith.mulf %240, %249 : vector<48x32xf32>
    %259 = arith.addf %257, %258 : vector<48x32xf32>
    %260 = math.tanh %259 : vector<48x32xf32>
    %261 = arith.mulf %256, %260 : vector<48x32xf32>
    %262 = tpu.concatenate %172, %261 in 1 : vector<48x32xf32>, vector<48x32xf32> -> vector<48x64xf32>
    %263 = tpu.concatenate %229, %193 in 1 : vector<48x32xf32>, vector<48x32xf32> -> vector<48x64xf32>
    %264 = tpu.concatenate %262, %263 in 0 : vector<48x64xf32>, vector<48x64xf32> -> vector<96x64xf32>
    %c0_70 = arith.constant 0 : index
    %c0_71 = arith.constant 0 : index
    %265 = vector.load %arg9[%c0_70, %c0_71] : memref<64x128xbf16, #tpu.memory_space<vmem>>, vector<64x128xbf16>
    %266 = arith.truncf %264 : vector<96x64xf32> to vector<96x64xbf16>
    %cst_72 = arith.constant dense<0.000000e+00> : vector<96x128xf32>
    %267 = tpu.matmul %266, %265, %cst_72 {dimension_numbers = #tpu.dot_dimension_numbers<[1], [0], [0], [1], [0, 0, 1, 1], [], []>} : vector<96x64xbf16>, vector<64x128xbf16>, vector<96x128xf32> -> vector<96x128xf32>
    %c0_73 = arith.constant 0 : index
    %c0_74 = arith.constant 0 : index
    %268 = vector.load %arg10[%c0_73, %c0_74] : memref<1x128xf32, #tpu.memory_space<vmem>>, vector<1x128xf32>
    %269 = vector.broadcast %268 : vector<1x128xf32> to vector<96x128xf32>
    %270 = arith.addf %267, %269 : vector<96x128xf32>
    %271 = math.tanh %270 : vector<96x128xf32>
    %c0_75 = arith.constant 0 : index
    %c0_76 = arith.constant 0 : index
    %272 = vector.load %arg11[%c0_75, %c0_76] : memref<1x128xf32, #tpu.memory_space<vmem>>, vector<1x128xf32>
    %273 = vector.broadcast %272 : vector<1x128xf32> to vector<96x128xf32>
    %274 = arith.mulf %271, %273 : vector<96x128xf32>
    %cst_77 = arith.constant dense<0.000000e+00> : vector<96xf32>
    %275 = vector.multi_reduction <add>, %274, %cst_77 [1] : vector<96x128xf32> to vector<96xf32>
    %276 = vector.shape_cast %275 : vector<96xf32> to vector<96x1xf32>
    %277 = vector.extract_strided_slice %276 {offsets = [0, 0], sizes = [48, 1], strides = [1, 1]} : vector<96x1xf32> to vector<48x1xf32>
    %278 = vector.extract_strided_slice %276 {offsets = [48, 0], sizes = [48, 1], strides = [1, 1]} : vector<96x1xf32> to vector<48x1xf32>
    %279 = arith.maximumf %277, %278 : vector<48x1xf32>
    %280 = arith.subf %277, %279 : vector<48x1xf32>
    %281 = math.exp %280 : vector<48x1xf32>
    %282 = arith.subf %278, %279 : vector<48x1xf32>
    %283 = math.exp %282 : vector<48x1xf32>
    %284 = arith.addf %281, %283 : vector<48x1xf32>
    %285 = tpu.reciprocal %284 {approx = true} : vector<48x1xf32> -> vector<48x1xf32>
    %286 = arith.mulf %281, %285 : vector<48x1xf32>
    %287 = vector.broadcast %286 : vector<48x1xf32> to vector<48x64xf32>
    %288 = arith.mulf %287, %262 : vector<48x64xf32>
    %289 = arith.mulf %283, %285 : vector<48x1xf32>
    %290 = vector.broadcast %289 : vector<48x1xf32> to vector<48x64xf32>
    %291 = arith.mulf %290, %263 : vector<48x64xf32>
    %292 = arith.addf %288, %291 : vector<48x64xf32>
    %c0_78 = arith.constant 0 : index
    %c0_79 = arith.constant 0 : index
    %293 = vector.load %arg12[%c0_78, %c0_79] : memref<48x64xf32, #tpu.memory_space<vmem>>, vector<48x64xf32>
    tpu.vector_store %arg12[%c0_78, %c0_79], %292 {strides = array<i32>} : memref<48x64xf32, #tpu.memory_space<vmem>>, vector<48x64xf32>,
    return
  }
  func.func @transform_0(%arg0: i32) -> (i32, i32, i32) {
    %c0_i32 = arith.constant 0 : i32
    %c0_i32_0 = arith.constant 0 : i32
    %c0_i32_1 = arith.constant 0 : i32
    return %c0_i32, %arg0, %c0_i32_0 : i32, i32, i32
  }
  func.func @transform_1(%arg0: i32) -> (i32, i32) {
    %c0_i32 = arith.constant 0 : i32
    %c0_i32_0 = arith.constant 0 : i32
    %c0_i32_1 = arith.constant 0 : i32
    return %c0_i32, %c0_i32_0 : i32, i32
  }
  func.func @transform_2(%arg0: i32) -> (i32, i32) {
    %c0_i32 = arith.constant 0 : i32
    %c0_i32_0 = arith.constant 0 : i32
    %c0_i32_1 = arith.constant 0 : i32
    return %c0_i32, %c0_i32_0 : i32, i32
  }
  func.func @transform_3(%arg0: i32) -> (i32, i32) {
    %c0_i32 = arith.constant 0 : i32
    %c0_i32_0 = arith.constant 0 : i32
    %c0_i32_1 = arith.constant 0 : i32
    return %c0_i32, %c0_i32_0 : i32, i32
  }
  func.func @transform_4(%arg0: i32) -> (i32, i32, i32) {
    %c0_i32 = arith.constant 0 : i32
    %c0_i32_0 = arith.constant 0 : i32
    %c0_i32_1 = arith.constant 0 : i32
    %c0_i32_2 = arith.constant 0 : i32
    return %c0_i32, %c0_i32_0, %c0_i32_1 : i32, i32, i32
  }
  func.func @transform_5(%arg0: i32) -> (i32, i32) {
    %c0_i32 = arith.constant 0 : i32
    %c0_i32_0 = arith.constant 0 : i32
    %c0_i32_1 = arith.constant 0 : i32
    return %c0_i32, %c0_i32_0 : i32, i32
  }
  func.func @transform_6(%arg0: i32) -> (i32, i32) {
    %c0_i32 = arith.constant 0 : i32
    %c0_i32_0 = arith.constant 0 : i32
    %c0_i32_1 = arith.constant 0 : i32
    return %c0_i32, %c0_i32_0 : i32, i32
  }
  func.func @transform_7(%arg0: i32) -> (i32, i32, i32) {
    %c0_i32 = arith.constant 0 : i32
    %c0_i32_0 = arith.constant 0 : i32
    %c0_i32_1 = arith.constant 0 : i32
    %c0_i32_2 = arith.constant 0 : i32
    return %c0_i32, %c0_i32_0, %c0_i32_1 : i32, i32, i32
  }
  func.func @transform_8(%arg0: i32) -> (i32, i32) {
    %c0_i32 = arith.constant 0 : i32
    %c0_i32_0 = arith.constant 0 : i32
    %c0_i32_1 = arith.constant 0 : i32
    return %c0_i32, %c0_i32_0 : i32, i32
  }
  func.func @transform_9(%arg0: i32) -> (i32, i32) {
    %c0_i32 = arith.constant 0 : i32
    %c0_i32_0 = arith.constant 0 : i32
    %c0_i32_1 = arith.constant 0 : i32
    return %c0_i32, %c0_i32_0 : i32, i32
  }
  func.func @transform_10(%arg0: i32) -> (i32, i32) {
    %c0_i32 = arith.constant 0 : i32
    %c0_i32_0 = arith.constant 0 : i32
    %c0_i32_1 = arith.constant 0 : i32
    return %c0_i32, %c0_i32_0 : i32, i32
  }
  func.func @transform_11(%arg0: i32) -> (i32, i32) {
    %c0_i32 = arith.constant 0 : i32
    %c0_i32_0 = arith.constant 0 : i32
    return %arg0, %c0_i32 : i32, i32
  }
}

module attributes {stable_mosaic.version = 11 : i64} {
  func.func @_hard_attn_kernel(%arg0: i32, %arg1: memref<6x16x64xf32, #tpu.memory_space<vmem>>, %arg2: memref<64x256xbf16, #tpu.memory_space<vmem>>, %arg3: memref<64x256xbf16, #tpu.memory_space<vmem>>, %arg4: memref<6x2x16xf32, #tpu.memory_space<vmem>>) attributes {dimension_semantics = [#tpu.dimension_semantics<parallel>], iteration_bounds = array<i64: 1>, scalar_prefetch = 0 : i64, scratch_operands = 0 : i64, tpu.core_type = #tpu.core_type<tc>, window_params = [{transform_indices = @transform_0, window_bounds = array<i64: 6, 16, 64>}, {pipeline_mode = #tpu.pipeline_mode<synchronous>, transform_indices = @transform_1, window_bounds = array<i64: 64, 256>}, {pipeline_mode = #tpu.pipeline_mode<synchronous>, transform_indices = @transform_2, window_bounds = array<i64: 64, 256>}, {transform_indices = @transform_3, window_bounds = array<i64: 6, 2, 16>}]} {
    %c0 = arith.constant 0 : index
    %c0_0 = arith.constant 0 : index
    %c0_1 = arith.constant 0 : index
    %0 = vector.load %arg1[%c0, %c0_0, %c0_1] : memref<6x16x64xf32, #tpu.memory_space<vmem>>, vector<6x16x64xf32>
    %1 = vector.shape_cast %0 : vector<6x16x64xf32> to vector<96x64xf32>
    %c0_2 = arith.constant 0 : index
    %c0_3 = arith.constant 0 : index
    %2 = vector.load %arg2[%c0_2, %c0_3] : memref<64x256xbf16, #tpu.memory_space<vmem>>, vector<64x256xbf16>
    %3 = arith.truncf %1 : vector<96x64xf32> to vector<96x64xbf16>
    %cst = arith.constant dense<0.000000e+00> : vector<96x256xf32>
    %4 = tpu.matmul %3, %2, %cst {dimension_numbers = #tpu.dot_dimension_numbers<[1], [0], [0], [1], [0, 0, 1, 1], [], []>} : vector<96x64xbf16>, vector<64x256xbf16>, vector<96x256xf32> -> vector<96x256xf32>
    %cst_4 = arith.constant dense<0.000000e+00> : vector<6x64xf32>
    %5 = vector.multi_reduction <add>, %0, %cst_4 [1] : vector<6x16x64xf32> to vector<6x64xf32>
    %c0_5 = arith.constant 0 : index
    %c0_6 = arith.constant 0 : index
    %6 = vector.load %arg3[%c0_5, %c0_6] : memref<64x256xbf16, #tpu.memory_space<vmem>>, vector<64x256xbf16>
    %7 = arith.truncf %5 : vector<6x64xf32> to vector<6x64xbf16>
    %cst_7 = arith.constant dense<0.000000e+00> : vector<6x256xf32>
    %8 = tpu.matmul %7, %6, %cst_7 {dimension_numbers = #tpu.dot_dimension_numbers<[1], [0], [0], [1], [0, 0, 1, 1], [], []>} : vector<6x64xbf16>, vector<64x256xbf16>, vector<6x256xf32> -> vector<6x256xf32>
    %9 = vector.shape_cast %4 : vector<96x256xf32> to vector<6x16x256xf32>
    %10 = vector.shape_cast %8 : vector<6x256xf32> to vector<6x1x256xf32>
    %11 = vector.broadcast %10 : vector<6x1x256xf32> to vector<6x16x256xf32>
    %12 = arith.mulf %9, %11 : vector<6x16x256xf32>
    %13 = vector.extract_strided_slice %12 {offsets = [0, 0, 0], sizes = [6, 16, 128], strides = [1, 1, 1]} : vector<6x16x256xf32> to vector<6x16x128xf32>
    %cst_8 = arith.constant dense<0.000000e+00> : vector<6x16xf32>
    %14 = vector.multi_reduction <add>, %13, %cst_8 [2] : vector<6x16x128xf32> to vector<6x16xf32>
    %15 = vector.extract_strided_slice %12 {offsets = [0, 0, 128], sizes = [6, 16, 128], strides = [1, 1, 1]} : vector<6x16x256xf32> to vector<6x16x128xf32>
    %cst_9 = arith.constant dense<0.000000e+00> : vector<6x16xf32>
    %16 = vector.multi_reduction <add>, %15, %cst_9 [2] : vector<6x16x128xf32> to vector<6x16xf32>
    %17 = vector.shape_cast %14 : vector<6x16xf32> to vector<6x1x16xf32>
    %18 = vector.shape_cast %16 : vector<6x16xf32> to vector<6x1x16xf32>
    %19 = tpu.concatenate %17, %18 in 1 : vector<6x1x16xf32>, vector<6x1x16xf32> -> vector<6x2x16xf32>
    %cst_10 = arith.constant 0.00833333377 : f32
    %20 = vector.broadcast %cst_10 : f32 to vector<6x2x16xf32>
    %21 = arith.mulf %19, %20 : vector<6x2x16xf32>
    %c0_11 = arith.constant 0 : index
    %c0_12 = arith.constant 0 : index
    %c0_13 = arith.constant 0 : index
    %22 = vector.load %arg4[%c0_11, %c0_12, %c0_13] : memref<6x2x16xf32, #tpu.memory_space<vmem>>, vector<6x2x16xf32>
    tpu.vector_store %arg4[%c0_11, %c0_12, %c0_13], %21 {strides = array<i32>} : memref<6x2x16xf32, #tpu.memory_space<vmem>>, vector<6x2x16xf32>,
    return
  }
  func.func @transform_0(%arg0: i32) -> (i32, i32, i32) {
    %c0_i32 = arith.constant 0 : i32
    %c0_i32_0 = arith.constant 0 : i32
    %c0_i32_1 = arith.constant 0 : i32
    return %arg0, %c0_i32, %c0_i32_0 : i32, i32, i32
  }
  func.func @transform_1(%arg0: i32) -> (i32, i32) {
    %c0_i32 = arith.constant 0 : i32
    %c0_i32_0 = arith.constant 0 : i32
    %c0_i32_1 = arith.constant 0 : i32
    return %c0_i32, %c0_i32_0 : i32, i32
  }
  func.func @transform_2(%arg0: i32) -> (i32, i32) {
    %c0_i32 = arith.constant 0 : i32
    %c0_i32_0 = arith.constant 0 : i32
    %c0_i32_1 = arith.constant 0 : i32
    return %c0_i32, %c0_i32_0 : i32, i32
  }
  func.func @transform_3(%arg0: i32) -> (i32, i32, i32) {
    %c0_i32 = arith.constant 0 : i32
    %c0_i32_0 = arith.constant 0 : i32
    %c0_i32_1 = arith.constant 0 : i32
    return %arg0, %c0_i32, %c0_i32_0 : i32, i32, i32
  }
}

module attributes {stable_mosaic.version = 11 : i64} {
  func.func @_seq_enc_clf_kernel(%arg0: i32, %arg1: memref<2x8x64xf32, #tpu.memory_space<vmem>>, %arg2: memref<8x64xf32, #tpu.memory_space<vmem>>, %arg3: memref<2x64x192xbf16, #tpu.memory_space<vmem>>, %arg4: memref<2x1x192xf32, #tpu.memory_space<vmem>>, %arg5: memref<2x64x64xbf16, #tpu.memory_space<vmem>>, %arg6: memref<2x1x64xf32, #tpu.memory_space<vmem>>, %arg7: memref<2x64x64xbf16, #tpu.memory_space<vmem>>, %arg8: memref<2x1x64xf32, #tpu.memory_space<vmem>>, %arg9: memref<2x64x64xbf16, #tpu.memory_space<vmem>>, %arg10: memref<2x1x64xf32, #tpu.memory_space<vmem>>, %arg11: memref<2x4x64xf32, #tpu.memory_space<vmem>>, %arg12: memref<64x5xbf16, #tpu.memory_space<vmem>>, %arg13: memref<1x5xf32, #tpu.memory_space<vmem>>, %arg14: memref<2x8x5xf32, #tpu.memory_space<vmem>>) attributes {dimension_semantics = [#tpu.dimension_semantics<parallel>], iteration_bounds = array<i64: 1>, scalar_prefetch = 0 : i64, scratch_operands = 0 : i64, tpu.core_type = #tpu.core_type<tc>, window_params = [{transform_indices = @transform_0, window_bounds = array<i64: 2, 8, 64>}, {pipeline_mode = #tpu.pipeline_mode<synchronous>, transform_indices = @transform_1, window_bounds = array<i64: 8, 64>}, {pipeline_mode = #tpu.pipeline_mode<synchronous>, transform_indices = @transform_2, window_bounds = array<i64: 2, 64, 192>}, {pipeline_mode = #tpu.pipeline_mode<synchronous>, transform_indices = @transform_3, window_bounds = array<i64: 2, 1, 192>}, {pipeline_mode = #tpu.pipeline_mode<synchronous>, transform_indices = @transform_4, window_bounds = array<i64: 2, 64, 64>}, {pipeline_mode = #tpu.pipeline_mode<synchronous>, transform_indices = @transform_5, window_bounds = array<i64: 2, 1, 64>}, {pipeline_mode = #tpu.pipeline_mode<synchronous>, transform_indices = @transform_6, window_bounds = array<i64: 2, 64, 64>}, {pipeline_mode = #tpu.pipeline_mode<synchronous>, transform_indices = @transform_7, window_bounds = array<i64: 2, 1, 64>}, {pipeline_mode = #tpu.pipeline_mode<synchronous>, transform_indices = @transform_8, window_bounds = array<i64: 2, 64, 64>}, {pipeline_mode = #tpu.pipeline_mode<synchronous>, transform_indices = @transform_9, window_bounds = array<i64: 2, 1, 64>}, {pipeline_mode = #tpu.pipeline_mode<synchronous>, transform_indices = @transform_10, window_bounds = array<i64: 2, 4, 64>}, {pipeline_mode = #tpu.pipeline_mode<synchronous>, transform_indices = @transform_11, window_bounds = array<i64: 64, 5>}, {pipeline_mode = #tpu.pipeline_mode<synchronous>, transform_indices = @transform_12, window_bounds = array<i64: 1, 5>}, {transform_indices = @transform_13, window_bounds = array<i64: 2, 8, 5>}]} {
    %c0 = arith.constant 0 : index
    %c0_0 = arith.constant 0 : index
    %c0_1 = arith.constant 0 : index
    %0 = vector.load %arg1[%c0, %c0_0, %c0_1] : memref<2x8x64xf32, #tpu.memory_space<vmem>>, vector<2x8x64xf32>
    %c0_2 = arith.constant 0 : index
    %c0_3 = arith.constant 0 : index
    %1 = vector.load %arg2[%c0_2, %c0_3] : memref<8x64xf32, #tpu.memory_space<vmem>>, vector<8x64xf32>
    %2 = vector.shape_cast %1 : vector<8x64xf32> to vector<1x8x64xf32>
    %3 = vector.broadcast %2 : vector<1x8x64xf32> to vector<2x8x64xf32>
    %4 = arith.addf %0, %3 : vector<2x8x64xf32>
    %5 = vector.shape_cast %4 : vector<2x8x64xf32> to vector<16x64xf32>
    %6 = tpu.iota {dimensions = array<i32: 1>} : vector<8x8xi32>
    %c3_i32 = arith.constant 3 : i32
    %7 = vector.broadcast %c3_i32 : i32 to vector<8x8xi32>
    %8 = arith.cmpi sge, %6, %7 : vector<8x8xi32>
    %cst = arith.constant -1.000000e+30 : f32
    %cst_4 = arith.constant 0.000000e+00 : f32
    %9 = vector.broadcast %cst : f32 to vector<8x8xf32>
    %10 = vector.broadcast %cst_4 : f32 to vector<8x8xf32>
    %11 = arith.select %8, %9, %10 : vector<8x8xi1>, vector<8x8xf32>
    %12 = vector.shape_cast %11 : vector<8x8xf32> to vector<1x8x8xf32>
    %c0_5 = arith.constant 0 : index
    %c0_6 = arith.constant 0 : index
    %c0_7 = arith.constant 0 : index
    %13 = vector.load %arg11[%c0_5, %c0_6, %c0_7] : memref<2x4x64xf32, #tpu.memory_space<vmem>>, vector<1x4x64xf32>
    %14 = vector.shape_cast %13 : vector<1x4x64xf32> to vector<4x64xf32>
    %c0_8 = arith.constant 0 : index
    %c0_9 = arith.constant 0 : index
    %c0_10 = arith.constant 0 : index
    %15 = vector.load %arg3[%c0_8, %c0_9, %c0_10] : memref<2x64x192xbf16, #tpu.memory_space<vmem>>, vector<1x64x192xbf16>
    %16 = vector.shape_cast %15 : vector<1x64x192xbf16> to vector<64x192xbf16>
    %17 = arith.truncf %5 : vector<16x64xf32> to vector<16x64xbf16>
    %cst_11 = arith.constant dense<0.000000e+00> : vector<16x192xf32>
    %18 = tpu.matmul %17, %16, %cst_11 {dimension_numbers = #tpu.dot_dimension_numbers<[1], [0], [0], [1], [0, 0, 1, 1], [], []>} : vector<16x64xbf16>, vector<64x192xbf16>, vector<16x192xf32> -> vector<16x192xf32>
    %c0_12 = arith.constant 0 : index
    %c0_13 = arith.constant 0 : index
    %c0_14 = arith.constant 0 : index
    %19 = vector.load %arg4[%c0_12, %c0_13, %c0_14] : memref<2x1x192xf32, #tpu.memory_space<vmem>>, vector<1x1x192xf32>
    %20 = vector.shape_cast %19 : vector<1x1x192xf32> to vector<1x192xf32>
    %21 = vector.broadcast %20 : vector<1x192xf32> to vector<16x192xf32>
    %22 = arith.addf %18, %21 : vector<16x192xf32>
    %23 = vector.shape_cast %22 : vector<16x192xf32> to vector<2x8x192xf32>
    %24 = vector.extract_strided_slice %23 {offsets = [0, 0, 0], sizes = [2, 8, 64], strides = [1, 1, 1]} : vector<2x8x192xf32> to vector<2x8x64xf32>
    %25 = vector.extract_strided_slice %23 {offsets = [0, 0, 64], sizes = [2, 8, 64], strides = [1, 1, 1]} : vector<2x8x192xf32> to vector<2x8x64xf32>
    %26 = vector.extract_strided_slice %23 {offsets = [0, 0, 128], sizes = [2, 8, 64], strides = [1, 1, 1]} : vector<2x8x192xf32> to vector<2x8x64xf32>
    %27 = vector.extract_strided_slice %24 {offsets = [0, 0, 0], sizes = [2, 8, 16], strides = [1, 1, 1]} : vector<2x8x64xf32> to vector<2x8x16xf32>
    %cst_15 = arith.constant 2.500000e-01 : f32
    %28 = vector.broadcast %cst_15 : f32 to vector<2x8x16xf32>
    %29 = arith.mulf %27, %28 : vector<2x8x16xf32>
    %30 = arith.truncf %29 : vector<2x8x16xf32> to vector<2x8x16xbf16>
    %31 = vector.extract_strided_slice %25 {offsets = [0, 0, 0], sizes = [2, 8, 16], strides = [1, 1, 1]} : vector<2x8x64xf32> to vector<2x8x16xf32>
    %32 = arith.truncf %31 : vector<2x8x16xf32> to vector<2x8x16xbf16>
    %33 = vector.extract_strided_slice %26 {offsets = [0, 0, 0], sizes = [2, 8, 16], strides = [1, 1, 1]} : vector<2x8x64xf32> to vector<2x8x16xf32>
    %34 = arith.truncf %33 : vector<2x8x16xf32> to vector<2x8x16xbf16>
    "tpu.trace_start"() <{level = 10 : i32, message = "bld,bmd->blm"}> : () -> ()
    %cst_16 = arith.constant dense<0.000000e+00> : vector<2x8x8xf32>
    %35 = tpu.matmul %30, %32, %cst_16 {dimension_numbers = #tpu.dot_dimension_numbers<[2], [2], [1], [1], [0, 0, 0, 1, 1, 1], [0], [0]>} : vector<2x8x16xbf16>, vector<2x8x16xbf16>, vector<2x8x8xf32> -> vector<2x8x8xf32>
    "tpu.trace_stop"() : () -> ()
    %36 = vector.broadcast %12 : vector<1x8x8xf32> to vector<2x8x8xf32>
    %37 = arith.addf %35, %36 : vector<2x8x8xf32>
    %cst_17 = arith.constant dense<0xFF800000> : vector<2x8xf32>
    %38 = vector.multi_reduction <maximumf>, %37, %cst_17 [2] : vector<2x8x8xf32> to vector<2x8xf32>
    %39 = vector.shape_cast %38 : vector<2x8xf32> to vector<2x8x1xf32>
    %40 = vector.broadcast %39 : vector<2x8x1xf32> to vector<2x8x8xf32>
    %41 = arith.subf %37, %40 : vector<2x8x8xf32>
    %42 = math.exp %41 : vector<2x8x8xf32>
    %cst_18 = arith.constant dense<0.000000e+00> : vector<2x8xf32>
    %43 = vector.multi_reduction <add>, %42, %cst_18 [2] : vector<2x8x8xf32> to vector<2x8xf32>
    %44 = vector.shape_cast %43 : vector<2x8xf32> to vector<2x8x1xf32>
    %45 = tpu.reciprocal %44 {approx = true} : vector<2x8x1xf32> -> vector<2x8x1xf32>
    %46 = vector.broadcast %45 : vector<2x8x1xf32> to vector<2x8x8xf32>
    %47 = arith.mulf %42, %46 : vector<2x8x8xf32>
    %48 = arith.truncf %47 : vector<2x8x8xf32> to vector<2x8x8xbf16>
    "tpu.trace_start"() <{level = 10 : i32, message = "blm,bmd->bld"}> : () -> ()
    %cst_19 = arith.constant dense<0.000000e+00> : vector<2x8x16xf32>
    %49 = tpu.matmul %48, %34, %cst_19 {dimension_numbers = #tpu.dot_dimension_numbers<[2], [1], [1], [2], [0, 0, 0, 1, 1, 2], [0], [0]>} : vector<2x8x8xbf16>, vector<2x8x16xbf16>, vector<2x8x16xf32> -> vector<2x8x16xf32>
    "tpu.trace_stop"() : () -> ()
    %50 = vector.extract_strided_slice %24 {offsets = [0, 0, 16], sizes = [2, 8, 16], strides = [1, 1, 1]} : vector<2x8x64xf32> to vector<2x8x16xf32>
    %cst_20 = arith.constant 2.500000e-01 : f32
    %51 = vector.broadcast %cst_20 : f32 to vector<2x8x16xf32>
    %52 = arith.mulf %50, %51 : vector<2x8x16xf32>
    %53 = arith.truncf %52 : vector<2x8x16xf32> to vector<2x8x16xbf16>
    %54 = vector.extract_strided_slice %25 {offsets = [0, 0, 16], sizes = [2, 8, 16], strides = [1, 1, 1]} : vector<2x8x64xf32> to vector<2x8x16xf32>
    %55 = arith.truncf %54 : vector<2x8x16xf32> to vector<2x8x16xbf16>
    %56 = vector.extract_strided_slice %26 {offsets = [0, 0, 16], sizes = [2, 8, 16], strides = [1, 1, 1]} : vector<2x8x64xf32> to vector<2x8x16xf32>
    %57 = arith.truncf %56 : vector<2x8x16xf32> to vector<2x8x16xbf16>
    "tpu.trace_start"() <{level = 10 : i32, message = "bld,bmd->blm"}> : () -> ()
    %cst_21 = arith.constant dense<0.000000e+00> : vector<2x8x8xf32>
    %58 = tpu.matmul %53, %55, %cst_21 {dimension_numbers = #tpu.dot_dimension_numbers<[2], [2], [1], [1], [0, 0, 0, 1, 1, 1], [0], [0]>} : vector<2x8x16xbf16>, vector<2x8x16xbf16>, vector<2x8x8xf32> -> vector<2x8x8xf32>
    "tpu.trace_stop"() : () -> ()
    %59 = vector.broadcast %12 : vector<1x8x8xf32> to vector<2x8x8xf32>
    %60 = arith.addf %58, %59 : vector<2x8x8xf32>
    %cst_22 = arith.constant dense<0xFF800000> : vector<2x8xf32>
    %61 = vector.multi_reduction <maximumf>, %60, %cst_22 [2] : vector<2x8x8xf32> to vector<2x8xf32>
    %62 = vector.shape_cast %61 : vector<2x8xf32> to vector<2x8x1xf32>
    %63 = vector.broadcast %62 : vector<2x8x1xf32> to vector<2x8x8xf32>
    %64 = arith.subf %60, %63 : vector<2x8x8xf32>
    %65 = math.exp %64 : vector<2x8x8xf32>
    %cst_23 = arith.constant dense<0.000000e+00> : vector<2x8xf32>
    %66 = vector.multi_reduction <add>, %65, %cst_23 [2] : vector<2x8x8xf32> to vector<2x8xf32>
    %67 = vector.shape_cast %66 : vector<2x8xf32> to vector<2x8x1xf32>
    %68 = tpu.reciprocal %67 {approx = true} : vector<2x8x1xf32> -> vector<2x8x1xf32>
    %69 = vector.broadcast %68 : vector<2x8x1xf32> to vector<2x8x8xf32>
    %70 = arith.mulf %65, %69 : vector<2x8x8xf32>
    %71 = arith.truncf %70 : vector<2x8x8xf32> to vector<2x8x8xbf16>
    "tpu.trace_start"() <{level = 10 : i32, message = "blm,bmd->bld"}> : () -> ()
    %cst_24 = arith.constant dense<0.000000e+00> : vector<2x8x16xf32>
    %72 = tpu.matmul %71, %57, %cst_24 {dimension_numbers = #tpu.dot_dimension_numbers<[2], [1], [1], [2], [0, 0, 0, 1, 1, 2], [0], [0]>} : vector<2x8x8xbf16>, vector<2x8x16xbf16>, vector<2x8x16xf32> -> vector<2x8x16xf32>
    "tpu.trace_stop"() : () -> ()
    %73 = vector.extract_strided_slice %24 {offsets = [0, 0, 32], sizes = [2, 8, 16], strides = [1, 1, 1]} : vector<2x8x64xf32> to vector<2x8x16xf32>
    %cst_25 = arith.constant 2.500000e-01 : f32
    %74 = vector.broadcast %cst_25 : f32 to vector<2x8x16xf32>
    %75 = arith.mulf %73, %74 : vector<2x8x16xf32>
    %76 = arith.truncf %75 : vector<2x8x16xf32> to vector<2x8x16xbf16>
    %77 = vector.extract_strided_slice %25 {offsets = [0, 0, 32], sizes = [2, 8, 16], strides = [1, 1, 1]} : vector<2x8x64xf32> to vector<2x8x16xf32>
    %78 = arith.truncf %77 : vector<2x8x16xf32> to vector<2x8x16xbf16>
    %79 = vector.extract_strided_slice %26 {offsets = [0, 0, 32], sizes = [2, 8, 16], strides = [1, 1, 1]} : vector<2x8x64xf32> to vector<2x8x16xf32>
    %80 = arith.truncf %79 : vector<2x8x16xf32> to vector<2x8x16xbf16>
    "tpu.trace_start"() <{level = 10 : i32, message = "bld,bmd->blm"}> : () -> ()
    %cst_26 = arith.constant dense<0.000000e+00> : vector<2x8x8xf32>
    %81 = tpu.matmul %76, %78, %cst_26 {dimension_numbers = #tpu.dot_dimension_numbers<[2], [2], [1], [1], [0, 0, 0, 1, 1, 1], [0], [0]>} : vector<2x8x16xbf16>, vector<2x8x16xbf16>, vector<2x8x8xf32> -> vector<2x8x8xf32>
    "tpu.trace_stop"() : () -> ()
    %82 = vector.broadcast %12 : vector<1x8x8xf32> to vector<2x8x8xf32>
    %83 = arith.addf %81, %82 : vector<2x8x8xf32>
    %cst_27 = arith.constant dense<0xFF800000> : vector<2x8xf32>
    %84 = vector.multi_reduction <maximumf>, %83, %cst_27 [2] : vector<2x8x8xf32> to vector<2x8xf32>
    %85 = vector.shape_cast %84 : vector<2x8xf32> to vector<2x8x1xf32>
    %86 = vector.broadcast %85 : vector<2x8x1xf32> to vector<2x8x8xf32>
    %87 = arith.subf %83, %86 : vector<2x8x8xf32>
    %88 = math.exp %87 : vector<2x8x8xf32>
    %cst_28 = arith.constant dense<0.000000e+00> : vector<2x8xf32>
    %89 = vector.multi_reduction <add>, %88, %cst_28 [2] : vector<2x8x8xf32> to vector<2x8xf32>
    %90 = vector.shape_cast %89 : vector<2x8xf32> to vector<2x8x1xf32>
    %91 = tpu.reciprocal %90 {approx = true} : vector<2x8x1xf32> -> vector<2x8x1xf32>
    %92 = vector.broadcast %91 : vector<2x8x1xf32> to vector<2x8x8xf32>
    %93 = arith.mulf %88, %92 : vector<2x8x8xf32>
    %94 = arith.truncf %93 : vector<2x8x8xf32> to vector<2x8x8xbf16>
    "tpu.trace_start"() <{level = 10 : i32, message = "blm,bmd->bld"}> : () -> ()
    %cst_29 = arith.constant dense<0.000000e+00> : vector<2x8x16xf32>
    %95 = tpu.matmul %94, %80, %cst_29 {dimension_numbers = #tpu.dot_dimension_numbers<[2], [1], [1], [2], [0, 0, 0, 1, 1, 2], [0], [0]>} : vector<2x8x8xbf16>, vector<2x8x16xbf16>, vector<2x8x16xf32> -> vector<2x8x16xf32>
    "tpu.trace_stop"() : () -> ()
    %96 = vector.extract_strided_slice %24 {offsets = [0, 0, 48], sizes = [2, 8, 16], strides = [1, 1, 1]} : vector<2x8x64xf32> to vector<2x8x16xf32>
    %cst_30 = arith.constant 2.500000e-01 : f32
    %97 = vector.broadcast %cst_30 : f32 to vector<2x8x16xf32>
    %98 = arith.mulf %96, %97 : vector<2x8x16xf32>
    %99 = arith.truncf %98 : vector<2x8x16xf32> to vector<2x8x16xbf16>
    %100 = vector.extract_strided_slice %25 {offsets = [0, 0, 48], sizes = [2, 8, 16], strides = [1, 1, 1]} : vector<2x8x64xf32> to vector<2x8x16xf32>
    %101 = arith.truncf %100 : vector<2x8x16xf32> to vector<2x8x16xbf16>
    %102 = vector.extract_strided_slice %26 {offsets = [0, 0, 48], sizes = [2, 8, 16], strides = [1, 1, 1]} : vector<2x8x64xf32> to vector<2x8x16xf32>
    %103 = arith.truncf %102 : vector<2x8x16xf32> to vector<2x8x16xbf16>
    "tpu.trace_start"() <{level = 10 : i32, message = "bld,bmd->blm"}> : () -> ()
    %cst_31 = arith.constant dense<0.000000e+00> : vector<2x8x8xf32>
    %104 = tpu.matmul %99, %101, %cst_31 {dimension_numbers = #tpu.dot_dimension_numbers<[2], [2], [1], [1], [0, 0, 0, 1, 1, 1], [0], [0]>} : vector<2x8x16xbf16>, vector<2x8x16xbf16>, vector<2x8x8xf32> -> vector<2x8x8xf32>
    "tpu.trace_stop"() : () -> ()
    %105 = vector.broadcast %12 : vector<1x8x8xf32> to vector<2x8x8xf32>
    %106 = arith.addf %104, %105 : vector<2x8x8xf32>
    %cst_32 = arith.constant dense<0xFF800000> : vector<2x8xf32>
    %107 = vector.multi_reduction <maximumf>, %106, %cst_32 [2] : vector<2x8x8xf32> to vector<2x8xf32>
    %108 = vector.shape_cast %107 : vector<2x8xf32> to vector<2x8x1xf32>
    %109 = vector.broadcast %108 : vector<2x8x1xf32> to vector<2x8x8xf32>
    %110 = arith.subf %106, %109 : vector<2x8x8xf32>
    %111 = math.exp %110 : vector<2x8x8xf32>
    %cst_33 = arith.constant dense<0.000000e+00> : vector<2x8xf32>
    %112 = vector.multi_reduction <add>, %111, %cst_33 [2] : vector<2x8x8xf32> to vector<2x8xf32>
    %113 = vector.shape_cast %112 : vector<2x8xf32> to vector<2x8x1xf32>
    %114 = tpu.reciprocal %113 {approx = true} : vector<2x8x1xf32> -> vector<2x8x1xf32>
    %115 = vector.broadcast %114 : vector<2x8x1xf32> to vector<2x8x8xf32>
    %116 = arith.mulf %111, %115 : vector<2x8x8xf32>
    %117 = arith.truncf %116 : vector<2x8x8xf32> to vector<2x8x8xbf16>
    "tpu.trace_start"() <{level = 10 : i32, message = "blm,bmd->bld"}> : () -> ()
    %cst_34 = arith.constant dense<0.000000e+00> : vector<2x8x16xf32>
    %118 = tpu.matmul %117, %103, %cst_34 {dimension_numbers = #tpu.dot_dimension_numbers<[2], [1], [1], [2], [0, 0, 0, 1, 1, 2], [0], [0]>} : vector<2x8x8xbf16>, vector<2x8x16xbf16>, vector<2x8x16xf32> -> vector<2x8x16xf32>
    "tpu.trace_stop"() : () -> ()
    %119 = tpu.concatenate %49, %72, %95, %118 in 2 : vector<2x8x16xf32>, vector<2x8x16xf32>, vector<2x8x16xf32>, vector<2x8x16xf32> -> vector<2x8x64xf32>
    %120 = vector.shape_cast %119 : vector<2x8x64xf32> to vector<16x64xf32>
    %c0_35 = arith.constant 0 : index
    %c0_36 = arith.constant 0 : index
    %c0_37 = arith.constant 0 : index
    %121 = vector.load %arg5[%c0_35, %c0_36, %c0_37] : memref<2x64x64xbf16, #tpu.memory_space<vmem>>, vector<1x64x64xbf16>
    %122 = vector.shape_cast %121 : vector<1x64x64xbf16> to vector<64x64xbf16>
    %123 = arith.truncf %120 : vector<16x64xf32> to vector<16x64xbf16>
    %cst_38 = arith.constant dense<0.000000e+00> : vector<16x64xf32>
    %124 = tpu.matmul %123, %122, %cst_38 {dimension_numbers = #tpu.dot_dimension_numbers<[1], [0], [0], [1], [0, 0, 1, 1], [], []>} : vector<16x64xbf16>, vector<64x64xbf16>, vector<16x64xf32> -> vector<16x64xf32>
    %c0_39 = arith.constant 0 : index
    %c0_40 = arith.constant 0 : index
    %c0_41 = arith.constant 0 : index
    %125 = vector.load %arg6[%c0_39, %c0_40, %c0_41] : memref<2x1x64xf32, #tpu.memory_space<vmem>>, vector<1x1x64xf32>
    %126 = vector.shape_cast %125 : vector<1x1x64xf32> to vector<1x64xf32>
    %127 = vector.broadcast %126 : vector<1x64xf32> to vector<16x64xf32>
    %128 = arith.addf %124, %127 : vector<16x64xf32>
    %129 = arith.addf %5, %128 : vector<16x64xf32>
    %130 = vector.extract_strided_slice %14 {offsets = [0, 0], sizes = [1, 64], strides = [1, 1]} : vector<4x64xf32> to vector<1x64xf32>
    %131 = vector.extract_strided_slice %14 {offsets = [1, 0], sizes = [1, 64], strides = [1, 1]} : vector<4x64xf32> to vector<1x64xf32>
    %cst_42 = arith.constant dense<0.000000e+00> : vector<16xf32>
    %132 = vector.multi_reduction <add>, %129, %cst_42 [1] : vector<16x64xf32> to vector<16xf32>
    %133 = vector.shape_cast %132 : vector<16xf32> to vector<16x1xf32>
    %cst_43 = arith.constant 6.400000e+01 : f32
    %134 = vector.broadcast %cst_43 : f32 to vector<16x1xf32>
    %135 = arith.divf %133, %134 : vector<16x1xf32>
    %136 = vector.broadcast %135 : vector<16x1xf32> to vector<16x64xf32>
    %137 = arith.subf %129, %136 : vector<16x64xf32>
    %138 = arith.mulf %137, %137 : vector<16x64xf32>
    %cst_44 = arith.constant dense<0.000000e+00> : vector<16xf32>
    %139 = vector.multi_reduction <add>, %138, %cst_44 [1] : vector<16x64xf32> to vector<16xf32>
    %140 = vector.shape_cast %139 : vector<16xf32> to vector<16x1xf32>
    %cst_45 = arith.constant 6.400000e+01 : f32
    %141 = vector.broadcast %cst_45 : f32 to vector<16x1xf32>
    %142 = arith.divf %140, %141 : vector<16x1xf32>
    %143 = vector.broadcast %135 : vector<16x1xf32> to vector<16x64xf32>
    %144 = arith.subf %129, %143 : vector<16x64xf32>
    %cst_46 = arith.constant 9.99999974E-6 : f32
    %145 = vector.broadcast %cst_46 : f32 to vector<16x1xf32>
    %146 = arith.addf %142, %145 : vector<16x1xf32>
    %147 = math.rsqrt %146 : vector<16x1xf32>
    %148 = vector.broadcast %147 : vector<16x1xf32> to vector<16x64xf32>
    %149 = arith.mulf %144, %148 : vector<16x64xf32>
    %150 = vector.broadcast %130 : vector<1x64xf32> to vector<16x64xf32>
    %151 = arith.mulf %149, %150 : vector<16x64xf32>
    %152 = vector.broadcast %131 : vector<1x64xf32> to vector<16x64xf32>
    %153 = arith.addf %151, %152 : vector<16x64xf32>
    %c0_47 = arith.constant 0 : index
    %c0_48 = arith.constant 0 : index
    %c0_49 = arith.constant 0 : index
    %154 = vector.load %arg7[%c0_47, %c0_48, %c0_49] : memref<2x64x64xbf16, #tpu.memory_space<vmem>>, vector<1x64x64xbf16>
    %155 = vector.shape_cast %154 : vector<1x64x64xbf16> to vector<64x64xbf16>
    %156 = arith.truncf %153 : vector<16x64xf32> to vector<16x64xbf16>
    %cst_50 = arith.constant dense<0.000000e+00> : vector<16x64xf32>
    %157 = tpu.matmul %156, %155, %cst_50 {dimension_numbers = #tpu.dot_dimension_numbers<[1], [0], [0], [1], [0, 0, 1, 1], [], []>} : vector<16x64xbf16>, vector<64x64xbf16>, vector<16x64xf32> -> vector<16x64xf32>
    %c0_51 = arith.constant 0 : index
    %c0_52 = arith.constant 0 : index
    %c0_53 = arith.constant 0 : index
    %158 = vector.load %arg8[%c0_51, %c0_52, %c0_53] : memref<2x1x64xf32, #tpu.memory_space<vmem>>, vector<1x1x64xf32>
    %159 = vector.shape_cast %158 : vector<1x1x64xf32> to vector<1x64xf32>
    %160 = vector.broadcast %159 : vector<1x64xf32> to vector<16x64xf32>
    %161 = arith.addf %157, %160 : vector<16x64xf32>
    %cst_54 = arith.constant 0.000000e+00 : f32
    %162 = vector.broadcast %cst_54 : f32 to vector<16x64xf32>
    %163 = arith.maximumf %161, %162 : vector<16x64xf32>
    %c0_55 = arith.constant 0 : index
    %c0_56 = arith.constant 0 : index
    %c0_57 = arith.constant 0 : index
    %164 = vector.load %arg9[%c0_55, %c0_56, %c0_57] : memref<2x64x64xbf16, #tpu.memory_space<vmem>>, vector<1x64x64xbf16>
    %165 = vector.shape_cast %164 : vector<1x64x64xbf16> to vector<64x64xbf16>
    %166 = arith.truncf %163 : vector<16x64xf32> to vector<16x64xbf16>
    %cst_58 = arith.constant dense<0.000000e+00> : vector<16x64xf32>
    %167 = tpu.matmul %166, %165, %cst_58 {dimension_numbers = #tpu.dot_dimension_numbers<[1], [0], [0], [1], [0, 0, 1, 1], [], []>} : vector<16x64xbf16>, vector<64x64xbf16>, vector<16x64xf32> -> vector<16x64xf32>
    %c0_59 = arith.constant 0 : index
    %c0_60 = arith.constant 0 : index
    %c0_61 = arith.constant 0 : index
    %168 = vector.load %arg10[%c0_59, %c0_60, %c0_61] : memref<2x1x64xf32, #tpu.memory_space<vmem>>, vector<1x1x64xf32>
    %169 = vector.shape_cast %168 : vector<1x1x64xf32> to vector<1x64xf32>
    %170 = vector.broadcast %169 : vector<1x64xf32> to vector<16x64xf32>
    %171 = arith.addf %167, %170 : vector<16x64xf32>
    %172 = arith.addf %153, %171 : vector<16x64xf32>
    %173 = vector.extract_strided_slice %14 {offsets = [2, 0], sizes = [1, 64], strides = [1, 1]} : vector<4x64xf32> to vector<1x64xf32>
    %174 = vector.extract_strided_slice %14 {offsets = [3, 0], sizes = [1, 64], strides = [1, 1]} : vector<4x64xf32> to vector<1x64xf32>
    %cst_62 = arith.constant dense<0.000000e+00> : vector<16xf32>
    %175 = vector.multi_reduction <add>, %172, %cst_62 [1] : vector<16x64xf32> to vector<16xf32>
    %176 = vector.shape_cast %175 : vector<16xf32> to vector<16x1xf32>
    %cst_63 = arith.constant 6.400000e+01 : f32
    %177 = vector.broadcast %cst_63 : f32 to vector<16x1xf32>
    %178 = arith.divf %176, %177 : vector<16x1xf32>
    %179 = vector.broadcast %178 : vector<16x1xf32> to vector<16x64xf32>
    %180 = arith.subf %172, %179 : vector<16x64xf32>
    %181 = arith.mulf %180, %180 : vector<16x64xf32>
    %cst_64 = arith.constant dense<0.000000e+00> : vector<16xf32>
    %182 = vector.multi_reduction <add>, %181, %cst_64 [1] : vector<16x64xf32> to vector<16xf32>
    %183 = vector.shape_cast %182 : vector<16xf32> to vector<16x1xf32>
    %cst_65 = arith.constant 6.400000e+01 : f32
    %184 = vector.broadcast %cst_65 : f32 to vector<16x1xf32>
    %185 = arith.divf %183, %184 : vector<16x1xf32>
    %186 = vector.broadcast %178 : vector<16x1xf32> to vector<16x64xf32>
    %187 = arith.subf %172, %186 : vector<16x64xf32>
    %cst_66 = arith.constant 9.99999974E-6 : f32
    %188 = vector.broadcast %cst_66 : f32 to vector<16x1xf32>
    %189 = arith.addf %185, %188 : vector<16x1xf32>
    %190 = math.rsqrt %189 : vector<16x1xf32>
    %191 = vector.broadcast %190 : vector<16x1xf32> to vector<16x64xf32>
    %192 = arith.mulf %187, %191 : vector<16x64xf32>
    %193 = vector.broadcast %173 : vector<1x64xf32> to vector<16x64xf32>
    %194 = arith.mulf %192, %193 : vector<16x64xf32>
    %195 = vector.broadcast %174 : vector<1x64xf32> to vector<16x64xf32>
    %196 = arith.addf %194, %195 : vector<16x64xf32>
    %c1 = arith.constant 1 : index
    %c0_67 = arith.constant 0 : index
    %c0_68 = arith.constant 0 : index
    %197 = vector.load %arg11[%c1, %c0_67, %c0_68] : memref<2x4x64xf32, #tpu.memory_space<vmem>>, vector<1x4x64xf32>
    %198 = vector.shape_cast %197 : vector<1x4x64xf32> to vector<4x64xf32>
    %c1_69 = arith.constant 1 : index
    %c0_70 = arith.constant 0 : index
    %c0_71 = arith.constant 0 : index
    %199 = vector.load %arg3[%c1_69, %c0_70, %c0_71] : memref<2x64x192xbf16, #tpu.memory_space<vmem>>, vector<1x64x192xbf16>
    %200 = vector.shape_cast %199 : vector<1x64x192xbf16> to vector<64x192xbf16>
    %201 = arith.truncf %196 : vector<16x64xf32> to vector<16x64xbf16>
    %cst_72 = arith.constant dense<0.000000e+00> : vector<16x192xf32>
    %202 = tpu.matmul %201, %200, %cst_72 {dimension_numbers = #tpu.dot_dimension_numbers<[1], [0], [0], [1], [0, 0, 1, 1], [], []>} : vector<16x64xbf16>, vector<64x192xbf16>, vector<16x192xf32> -> vector<16x192xf32>
    %c1_73 = arith.constant 1 : index
    %c0_74 = arith.constant 0 : index
    %c0_75 = arith.constant 0 : index
    %203 = vector.load %arg4[%c1_73, %c0_74, %c0_75] : memref<2x1x192xf32, #tpu.memory_space<vmem>>, vector<1x1x192xf32>
    %204 = vector.shape_cast %203 : vector<1x1x192xf32> to vector<1x192xf32>
    %205 = vector.broadcast %204 : vector<1x192xf32> to vector<16x192xf32>
    %206 = arith.addf %202, %205 : vector<16x192xf32>
    %207 = vector.shape_cast %206 : vector<16x192xf32> to vector<2x8x192xf32>
    %208 = vector.extract_strided_slice %207 {offsets = [0, 0, 0], sizes = [2, 8, 64], strides = [1, 1, 1]} : vector<2x8x192xf32> to vector<2x8x64xf32>
    %209 = vector.extract_strided_slice %207 {offsets = [0, 0, 64], sizes = [2, 8, 64], strides = [1, 1, 1]} : vector<2x8x192xf32> to vector<2x8x64xf32>
    %210 = vector.extract_strided_slice %207 {offsets = [0, 0, 128], sizes = [2, 8, 64], strides = [1, 1, 1]} : vector<2x8x192xf32> to vector<2x8x64xf32>
    %211 = vector.extract_strided_slice %208 {offsets = [0, 0, 0], sizes = [2, 8, 16], strides = [1, 1, 1]} : vector<2x8x64xf32> to vector<2x8x16xf32>
    %cst_76 = arith.constant 2.500000e-01 : f32
    %212 = vector.broadcast %cst_76 : f32 to vector<2x8x16xf32>
    %213 = arith.mulf %211, %212 : vector<2x8x16xf32>
    %214 = arith.truncf %213 : vector<2x8x16xf32> to vector<2x8x16xbf16>
    %215 = vector.extract_strided_slice %209 {offsets = [0, 0, 0], sizes = [2, 8, 16], strides = [1, 1, 1]} : vector<2x8x64xf32> to vector<2x8x16xf32>
    %216 = arith.truncf %215 : vector<2x8x16xf32> to vector<2x8x16xbf16>
    %217 = vector.extract_strided_slice %210 {offsets = [0, 0, 0], sizes = [2, 8, 16], strides = [1, 1, 1]} : vector<2x8x64xf32> to vector<2x8x16xf32>
    %218 = arith.truncf %217 : vector<2x8x16xf32> to vector<2x8x16xbf16>
    "tpu.trace_start"() <{level = 10 : i32, message = "bld,bmd->blm"}> : () -> ()
    %cst_77 = arith.constant dense<0.000000e+00> : vector<2x8x8xf32>
    %219 = tpu.matmul %214, %216, %cst_77 {dimension_numbers = #tpu.dot_dimension_numbers<[2], [2], [1], [1], [0, 0, 0, 1, 1, 1], [0], [0]>} : vector<2x8x16xbf16>, vector<2x8x16xbf16>, vector<2x8x8xf32> -> vector<2x8x8xf32>
    "tpu.trace_stop"() : () -> ()
    %220 = vector.broadcast %12 : vector<1x8x8xf32> to vector<2x8x8xf32>
    %221 = arith.addf %219, %220 : vector<2x8x8xf32>
    %cst_78 = arith.constant dense<0xFF800000> : vector<2x8xf32>
    %222 = vector.multi_reduction <maximumf>, %221, %cst_78 [2] : vector<2x8x8xf32> to vector<2x8xf32>
    %223 = vector.shape_cast %222 : vector<2x8xf32> to vector<2x8x1xf32>
    %224 = vector.broadcast %223 : vector<2x8x1xf32> to vector<2x8x8xf32>
    %225 = arith.subf %221, %224 : vector<2x8x8xf32>
    %226 = math.exp %225 : vector<2x8x8xf32>
    %cst_79 = arith.constant dense<0.000000e+00> : vector<2x8xf32>
    %227 = vector.multi_reduction <add>, %226, %cst_79 [2] : vector<2x8x8xf32> to vector<2x8xf32>
    %228 = vector.shape_cast %227 : vector<2x8xf32> to vector<2x8x1xf32>
    %229 = tpu.reciprocal %228 {approx = true} : vector<2x8x1xf32> -> vector<2x8x1xf32>
    %230 = vector.broadcast %229 : vector<2x8x1xf32> to vector<2x8x8xf32>
    %231 = arith.mulf %226, %230 : vector<2x8x8xf32>
    %232 = arith.truncf %231 : vector<2x8x8xf32> to vector<2x8x8xbf16>
    "tpu.trace_start"() <{level = 10 : i32, message = "blm,bmd->bld"}> : () -> ()
    %cst_80 = arith.constant dense<0.000000e+00> : vector<2x8x16xf32>
    %233 = tpu.matmul %232, %218, %cst_80 {dimension_numbers = #tpu.dot_dimension_numbers<[2], [1], [1], [2], [0, 0, 0, 1, 1, 2], [0], [0]>} : vector<2x8x8xbf16>, vector<2x8x16xbf16>, vector<2x8x16xf32> -> vector<2x8x16xf32>
    "tpu.trace_stop"() : () -> ()
    %234 = vector.extract_strided_slice %208 {offsets = [0, 0, 16], sizes = [2, 8, 16], strides = [1, 1, 1]} : vector<2x8x64xf32> to vector<2x8x16xf32>
    %cst_81 = arith.constant 2.500000e-01 : f32
    %235 = vector.broadcast %cst_81 : f32 to vector<2x8x16xf32>
    %236 = arith.mulf %234, %235 : vector<2x8x16xf32>
    %237 = arith.truncf %236 : vector<2x8x16xf32> to vector<2x8x16xbf16>
    %238 = vector.extract_strided_slice %209 {offsets = [0, 0, 16], sizes = [2, 8, 16], strides = [1, 1, 1]} : vector<2x8x64xf32> to vector<2x8x16xf32>
    %239 = arith.truncf %238 : vector<2x8x16xf32> to vector<2x8x16xbf16>
    %240 = vector.extract_strided_slice %210 {offsets = [0, 0, 16], sizes = [2, 8, 16], strides = [1, 1, 1]} : vector<2x8x64xf32> to vector<2x8x16xf32>
    %241 = arith.truncf %240 : vector<2x8x16xf32> to vector<2x8x16xbf16>
    "tpu.trace_start"() <{level = 10 : i32, message = "bld,bmd->blm"}> : () -> ()
    %cst_82 = arith.constant dense<0.000000e+00> : vector<2x8x8xf32>
    %242 = tpu.matmul %237, %239, %cst_82 {dimension_numbers = #tpu.dot_dimension_numbers<[2], [2], [1], [1], [0, 0, 0, 1, 1, 1], [0], [0]>} : vector<2x8x16xbf16>, vector<2x8x16xbf16>, vector<2x8x8xf32> -> vector<2x8x8xf32>
    "tpu.trace_stop"() : () -> ()
    %243 = vector.broadcast %12 : vector<1x8x8xf32> to vector<2x8x8xf32>
    %244 = arith.addf %242, %243 : vector<2x8x8xf32>
    %cst_83 = arith.constant dense<0xFF800000> : vector<2x8xf32>
    %245 = vector.multi_reduction <maximumf>, %244, %cst_83 [2] : vector<2x8x8xf32> to vector<2x8xf32>
    %246 = vector.shape_cast %245 : vector<2x8xf32> to vector<2x8x1xf32>
    %247 = vector.broadcast %246 : vector<2x8x1xf32> to vector<2x8x8xf32>
    %248 = arith.subf %244, %247 : vector<2x8x8xf32>
    %249 = math.exp %248 : vector<2x8x8xf32>
    %cst_84 = arith.constant dense<0.000000e+00> : vector<2x8xf32>
    %250 = vector.multi_reduction <add>, %249, %cst_84 [2] : vector<2x8x8xf32> to vector<2x8xf32>
    %251 = vector.shape_cast %250 : vector<2x8xf32> to vector<2x8x1xf32>
    %252 = tpu.reciprocal %251 {approx = true} : vector<2x8x1xf32> -> vector<2x8x1xf32>
    %253 = vector.broadcast %252 : vector<2x8x1xf32> to vector<2x8x8xf32>
    %254 = arith.mulf %249, %253 : vector<2x8x8xf32>
    %255 = arith.truncf %254 : vector<2x8x8xf32> to vector<2x8x8xbf16>
    "tpu.trace_start"() <{level = 10 : i32, message = "blm,bmd->bld"}> : () -> ()
    %cst_85 = arith.constant dense<0.000000e+00> : vector<2x8x16xf32>
    %256 = tpu.matmul %255, %241, %cst_85 {dimension_numbers = #tpu.dot_dimension_numbers<[2], [1], [1], [2], [0, 0, 0, 1, 1, 2], [0], [0]>} : vector<2x8x8xbf16>, vector<2x8x16xbf16>, vector<2x8x16xf32> -> vector<2x8x16xf32>
    "tpu.trace_stop"() : () -> ()
    %257 = vector.extract_strided_slice %208 {offsets = [0, 0, 32], sizes = [2, 8, 16], strides = [1, 1, 1]} : vector<2x8x64xf32> to vector<2x8x16xf32>
    %cst_86 = arith.constant 2.500000e-01 : f32
    %258 = vector.broadcast %cst_86 : f32 to vector<2x8x16xf32>
    %259 = arith.mulf %257, %258 : vector<2x8x16xf32>
    %260 = arith.truncf %259 : vector<2x8x16xf32> to vector<2x8x16xbf16>
    %261 = vector.extract_strided_slice %209 {offsets = [0, 0, 32], sizes = [2, 8, 16], strides = [1, 1, 1]} : vector<2x8x64xf32> to vector<2x8x16xf32>
    %262 = arith.truncf %261 : vector<2x8x16xf32> to vector<2x8x16xbf16>
    %263 = vector.extract_strided_slice %210 {offsets = [0, 0, 32], sizes = [2, 8, 16], strides = [1, 1, 1]} : vector<2x8x64xf32> to vector<2x8x16xf32>
    %264 = arith.truncf %263 : vector<2x8x16xf32> to vector<2x8x16xbf16>
    "tpu.trace_start"() <{level = 10 : i32, message = "bld,bmd->blm"}> : () -> ()
    %cst_87 = arith.constant dense<0.000000e+00> : vector<2x8x8xf32>
    %265 = tpu.matmul %260, %262, %cst_87 {dimension_numbers = #tpu.dot_dimension_numbers<[2], [2], [1], [1], [0, 0, 0, 1, 1, 1], [0], [0]>} : vector<2x8x16xbf16>, vector<2x8x16xbf16>, vector<2x8x8xf32> -> vector<2x8x8xf32>
    "tpu.trace_stop"() : () -> ()
    %266 = vector.broadcast %12 : vector<1x8x8xf32> to vector<2x8x8xf32>
    %267 = arith.addf %265, %266 : vector<2x8x8xf32>
    %cst_88 = arith.constant dense<0xFF800000> : vector<2x8xf32>
    %268 = vector.multi_reduction <maximumf>, %267, %cst_88 [2] : vector<2x8x8xf32> to vector<2x8xf32>
    %269 = vector.shape_cast %268 : vector<2x8xf32> to vector<2x8x1xf32>
    %270 = vector.broadcast %269 : vector<2x8x1xf32> to vector<2x8x8xf32>
    %271 = arith.subf %267, %270 : vector<2x8x8xf32>
    %272 = math.exp %271 : vector<2x8x8xf32>
    %cst_89 = arith.constant dense<0.000000e+00> : vector<2x8xf32>
    %273 = vector.multi_reduction <add>, %272, %cst_89 [2] : vector<2x8x8xf32> to vector<2x8xf32>
    %274 = vector.shape_cast %273 : vector<2x8xf32> to vector<2x8x1xf32>
    %275 = tpu.reciprocal %274 {approx = true} : vector<2x8x1xf32> -> vector<2x8x1xf32>
    %276 = vector.broadcast %275 : vector<2x8x1xf32> to vector<2x8x8xf32>
    %277 = arith.mulf %272, %276 : vector<2x8x8xf32>
    %278 = arith.truncf %277 : vector<2x8x8xf32> to vector<2x8x8xbf16>
    "tpu.trace_start"() <{level = 10 : i32, message = "blm,bmd->bld"}> : () -> ()
    %cst_90 = arith.constant dense<0.000000e+00> : vector<2x8x16xf32>
    %279 = tpu.matmul %278, %264, %cst_90 {dimension_numbers = #tpu.dot_dimension_numbers<[2], [1], [1], [2], [0, 0, 0, 1, 1, 2], [0], [0]>} : vector<2x8x8xbf16>, vector<2x8x16xbf16>, vector<2x8x16xf32> -> vector<2x8x16xf32>
    "tpu.trace_stop"() : () -> ()
    %280 = vector.extract_strided_slice %208 {offsets = [0, 0, 48], sizes = [2, 8, 16], strides = [1, 1, 1]} : vector<2x8x64xf32> to vector<2x8x16xf32>
    %cst_91 = arith.constant 2.500000e-01 : f32
    %281 = vector.broadcast %cst_91 : f32 to vector<2x8x16xf32>
    %282 = arith.mulf %280, %281 : vector<2x8x16xf32>
    %283 = arith.truncf %282 : vector<2x8x16xf32> to vector<2x8x16xbf16>
    %284 = vector.extract_strided_slice %209 {offsets = [0, 0, 48], sizes = [2, 8, 16], strides = [1, 1, 1]} : vector<2x8x64xf32> to vector<2x8x16xf32>
    %285 = arith.truncf %284 : vector<2x8x16xf32> to vector<2x8x16xbf16>
    %286 = vector.extract_strided_slice %210 {offsets = [0, 0, 48], sizes = [2, 8, 16], strides = [1, 1, 1]} : vector<2x8x64xf32> to vector<2x8x16xf32>
    %287 = arith.truncf %286 : vector<2x8x16xf32> to vector<2x8x16xbf16>
    "tpu.trace_start"() <{level = 10 : i32, message = "bld,bmd->blm"}> : () -> ()
    %cst_92 = arith.constant dense<0.000000e+00> : vector<2x8x8xf32>
    %288 = tpu.matmul %283, %285, %cst_92 {dimension_numbers = #tpu.dot_dimension_numbers<[2], [2], [1], [1], [0, 0, 0, 1, 1, 1], [0], [0]>} : vector<2x8x16xbf16>, vector<2x8x16xbf16>, vector<2x8x8xf32> -> vector<2x8x8xf32>
    "tpu.trace_stop"() : () -> ()
    %289 = vector.broadcast %12 : vector<1x8x8xf32> to vector<2x8x8xf32>
    %290 = arith.addf %288, %289 : vector<2x8x8xf32>
    %cst_93 = arith.constant dense<0xFF800000> : vector<2x8xf32>
    %291 = vector.multi_reduction <maximumf>, %290, %cst_93 [2] : vector<2x8x8xf32> to vector<2x8xf32>
    %292 = vector.shape_cast %291 : vector<2x8xf32> to vector<2x8x1xf32>
    %293 = vector.broadcast %292 : vector<2x8x1xf32> to vector<2x8x8xf32>
    %294 = arith.subf %290, %293 : vector<2x8x8xf32>
    %295 = math.exp %294 : vector<2x8x8xf32>
    %cst_94 = arith.constant dense<0.000000e+00> : vector<2x8xf32>
    %296 = vector.multi_reduction <add>, %295, %cst_94 [2] : vector<2x8x8xf32> to vector<2x8xf32>
    %297 = vector.shape_cast %296 : vector<2x8xf32> to vector<2x8x1xf32>
    %298 = tpu.reciprocal %297 {approx = true} : vector<2x8x1xf32> -> vector<2x8x1xf32>
    %299 = vector.broadcast %298 : vector<2x8x1xf32> to vector<2x8x8xf32>
    %300 = arith.mulf %295, %299 : vector<2x8x8xf32>
    %301 = arith.truncf %300 : vector<2x8x8xf32> to vector<2x8x8xbf16>
    "tpu.trace_start"() <{level = 10 : i32, message = "blm,bmd->bld"}> : () -> ()
    %cst_95 = arith.constant dense<0.000000e+00> : vector<2x8x16xf32>
    %302 = tpu.matmul %301, %287, %cst_95 {dimension_numbers = #tpu.dot_dimension_numbers<[2], [1], [1], [2], [0, 0, 0, 1, 1, 2], [0], [0]>} : vector<2x8x8xbf16>, vector<2x8x16xbf16>, vector<2x8x16xf32> -> vector<2x8x16xf32>
    "tpu.trace_stop"() : () -> ()
    %303 = tpu.concatenate %233, %256, %279, %302 in 2 : vector<2x8x16xf32>, vector<2x8x16xf32>, vector<2x8x16xf32>, vector<2x8x16xf32> -> vector<2x8x64xf32>
    %304 = vector.shape_cast %303 : vector<2x8x64xf32> to vector<16x64xf32>
    %c1_96 = arith.constant 1 : index
    %c0_97 = arith.constant 0 : index
    %c0_98 = arith.constant 0 : index
    %305 = vector.load %arg5[%c1_96, %c0_97, %c0_98] : memref<2x64x64xbf16, #tpu.memory_space<vmem>>, vector<1x64x64xbf16>
    %306 = vector.shape_cast %305 : vector<1x64x64xbf16> to vector<64x64xbf16>
    %307 = arith.truncf %304 : vector<16x64xf32> to vector<16x64xbf16>
    %cst_99 = arith.constant dense<0.000000e+00> : vector<16x64xf32>
    %308 = tpu.matmul %307, %306, %cst_99 {dimension_numbers = #tpu.dot_dimension_numbers<[1], [0], [0], [1], [0, 0, 1, 1], [], []>} : vector<16x64xbf16>, vector<64x64xbf16>, vector<16x64xf32> -> vector<16x64xf32>
    %c1_100 = arith.constant 1 : index
    %c0_101 = arith.constant 0 : index
    %c0_102 = arith.constant 0 : index
    %309 = vector.load %arg6[%c1_100, %c0_101, %c0_102] : memref<2x1x64xf32, #tpu.memory_space<vmem>>, vector<1x1x64xf32>
    %310 = vector.shape_cast %309 : vector<1x1x64xf32> to vector<1x64xf32>
    %311 = vector.broadcast %310 : vector<1x64xf32> to vector<16x64xf32>
    %312 = arith.addf %308, %311 : vector<16x64xf32>
    %313 = arith.addf %196, %312 : vector<16x64xf32>
    %314 = vector.extract_strided_slice %198 {offsets = [0, 0], sizes = [1, 64], strides = [1, 1]} : vector<4x64xf32> to vector<1x64xf32>
    %315 = vector.extract_strided_slice %198 {offsets = [1, 0], sizes = [1, 64], strides = [1, 1]} : vector<4x64xf32> to vector<1x64xf32>
    %cst_103 = arith.constant dense<0.000000e+00> : vector<16xf32>
    %316 = vector.multi_reduction <add>, %313, %cst_103 [1] : vector<16x64xf32> to vector<16xf32>
    %317 = vector.shape_cast %316 : vector<16xf32> to vector<16x1xf32>
    %cst_104 = arith.constant 6.400000e+01 : f32
    %318 = vector.broadcast %cst_104 : f32 to vector<16x1xf32>
    %319 = arith.divf %317, %318 : vector<16x1xf32>
    %320 = vector.broadcast %319 : vector<16x1xf32> to vector<16x64xf32>
    %321 = arith.subf %313, %320 : vector<16x64xf32>
    %322 = arith.mulf %321, %321 : vector<16x64xf32>
    %cst_105 = arith.constant dense<0.000000e+00> : vector<16xf32>
    %323 = vector.multi_reduction <add>, %322, %cst_105 [1] : vector<16x64xf32> to vector<16xf32>
    %324 = vector.shape_cast %323 : vector<16xf32> to vector<16x1xf32>
    %cst_106 = arith.constant 6.400000e+01 : f32
    %325 = vector.broadcast %cst_106 : f32 to vector<16x1xf32>
    %326 = arith.divf %324, %325 : vector<16x1xf32>
    %327 = vector.broadcast %319 : vector<16x1xf32> to vector<16x64xf32>
    %328 = arith.subf %313, %327 : vector<16x64xf32>
    %cst_107 = arith.constant 9.99999974E-6 : f32
    %329 = vector.broadcast %cst_107 : f32 to vector<16x1xf32>
    %330 = arith.addf %326, %329 : vector<16x1xf32>
    %331 = math.rsqrt %330 : vector<16x1xf32>
    %332 = vector.broadcast %331 : vector<16x1xf32> to vector<16x64xf32>
    %333 = arith.mulf %328, %332 : vector<16x64xf32>
    %334 = vector.broadcast %314 : vector<1x64xf32> to vector<16x64xf32>
    %335 = arith.mulf %333, %334 : vector<16x64xf32>
    %336 = vector.broadcast %315 : vector<1x64xf32> to vector<16x64xf32>
    %337 = arith.addf %335, %336 : vector<16x64xf32>
    %c1_108 = arith.constant 1 : index
    %c0_109 = arith.constant 0 : index
    %c0_110 = arith.constant 0 : index
    %338 = vector.load %arg7[%c1_108, %c0_109, %c0_110] : memref<2x64x64xbf16, #tpu.memory_space<vmem>>, vector<1x64x64xbf16>
    %339 = vector.shape_cast %338 : vector<1x64x64xbf16> to vector<64x64xbf16>
    %340 = arith.truncf %337 : vector<16x64xf32> to vector<16x64xbf16>
    %cst_111 = arith.constant dense<0.000000e+00> : vector<16x64xf32>
    %341 = tpu.matmul %340, %339, %cst_111 {dimension_numbers = #tpu.dot_dimension_numbers<[1], [0], [0], [1], [0, 0, 1, 1], [], []>} : vector<16x64xbf16>, vector<64x64xbf16>, vector<16x64xf32> -> vector<16x64xf32>
    %c1_112 = arith.constant 1 : index
    %c0_113 = arith.constant 0 : index
    %c0_114 = arith.constant 0 : index
    %342 = vector.load %arg8[%c1_112, %c0_113, %c0_114] : memref<2x1x64xf32, #tpu.memory_space<vmem>>, vector<1x1x64xf32>
    %343 = vector.shape_cast %342 : vector<1x1x64xf32> to vector<1x64xf32>
    %344 = vector.broadcast %343 : vector<1x64xf32> to vector<16x64xf32>
    %345 = arith.addf %341, %344 : vector<16x64xf32>
    %cst_115 = arith.constant 0.000000e+00 : f32
    %346 = vector.broadcast %cst_115 : f32 to vector<16x64xf32>
    %347 = arith.maximumf %345, %346 : vector<16x64xf32>
    %c1_116 = arith.constant 1 : index
    %c0_117 = arith.constant 0 : index
    %c0_118 = arith.constant 0 : index
    %348 = vector.load %arg9[%c1_116, %c0_117, %c0_118] : memref<2x64x64xbf16, #tpu.memory_space<vmem>>, vector<1x64x64xbf16>
    %349 = vector.shape_cast %348 : vector<1x64x64xbf16> to vector<64x64xbf16>
    %350 = arith.truncf %347 : vector<16x64xf32> to vector<16x64xbf16>
    %cst_119 = arith.constant dense<0.000000e+00> : vector<16x64xf32>
    %351 = tpu.matmul %350, %349, %cst_119 {dimension_numbers = #tpu.dot_dimension_numbers<[1], [0], [0], [1], [0, 0, 1, 1], [], []>} : vector<16x64xbf16>, vector<64x64xbf16>, vector<16x64xf32> -> vector<16x64xf32>
    %c1_120 = arith.constant 1 : index
    %c0_121 = arith.constant 0 : index
    %c0_122 = arith.constant 0 : index
    %352 = vector.load %arg10[%c1_120, %c0_121, %c0_122] : memref<2x1x64xf32, #tpu.memory_space<vmem>>, vector<1x1x64xf32>
    %353 = vector.shape_cast %352 : vector<1x1x64xf32> to vector<1x64xf32>
    %354 = vector.broadcast %353 : vector<1x64xf32> to vector<16x64xf32>
    %355 = arith.addf %351, %354 : vector<16x64xf32>
    %356 = arith.addf %337, %355 : vector<16x64xf32>
    %357 = vector.extract_strided_slice %198 {offsets = [2, 0], sizes = [1, 64], strides = [1, 1]} : vector<4x64xf32> to vector<1x64xf32>
    %358 = vector.extract_strided_slice %198 {offsets = [3, 0], sizes = [1, 64], strides = [1, 1]} : vector<4x64xf32> to vector<1x64xf32>
    %cst_123 = arith.constant dense<0.000000e+00> : vector<16xf32>
    %359 = vector.multi_reduction <add>, %356, %cst_123 [1] : vector<16x64xf32> to vector<16xf32>
    %360 = vector.shape_cast %359 : vector<16xf32> to vector<16x1xf32>
    %cst_124 = arith.constant 6.400000e+01 : f32
    %361 = vector.broadcast %cst_124 : f32 to vector<16x1xf32>
    %362 = arith.divf %360, %361 : vector<16x1xf32>
    %363 = vector.broadcast %362 : vector<16x1xf32> to vector<16x64xf32>
    %364 = arith.subf %356, %363 : vector<16x64xf32>
    %365 = arith.mulf %364, %364 : vector<16x64xf32>
    %cst_125 = arith.constant dense<0.000000e+00> : vector<16xf32>
    %366 = vector.multi_reduction <add>, %365, %cst_125 [1] : vector<16x64xf32> to vector<16xf32>
    %367 = vector.shape_cast %366 : vector<16xf32> to vector<16x1xf32>
    %cst_126 = arith.constant 6.400000e+01 : f32
    %368 = vector.broadcast %cst_126 : f32 to vector<16x1xf32>
    %369 = arith.divf %367, %368 : vector<16x1xf32>
    %370 = vector.broadcast %362 : vector<16x1xf32> to vector<16x64xf32>
    %371 = arith.subf %356, %370 : vector<16x64xf32>
    %cst_127 = arith.constant 9.99999974E-6 : f32
    %372 = vector.broadcast %cst_127 : f32 to vector<16x1xf32>
    %373 = arith.addf %369, %372 : vector<16x1xf32>
    %374 = math.rsqrt %373 : vector<16x1xf32>
    %375 = vector.broadcast %374 : vector<16x1xf32> to vector<16x64xf32>
    %376 = arith.mulf %371, %375 : vector<16x64xf32>
    %377 = vector.broadcast %357 : vector<1x64xf32> to vector<16x64xf32>
    %378 = arith.mulf %376, %377 : vector<16x64xf32>
    %379 = vector.broadcast %358 : vector<1x64xf32> to vector<16x64xf32>
    %380 = arith.addf %378, %379 : vector<16x64xf32>
    %c0_128 = arith.constant 0 : index
    %c0_129 = arith.constant 0 : index
    %381 = vector.load %arg12[%c0_128, %c0_129] : memref<64x5xbf16, #tpu.memory_space<vmem>>, vector<64x5xbf16>
    %382 = arith.truncf %380 : vector<16x64xf32> to vector<16x64xbf16>
    %cst_130 = arith.constant dense<0.000000e+00> : vector<16x5xf32>
    %383 = tpu.matmul %382, %381, %cst_130 {dimension_numbers = #tpu.dot_dimension_numbers<[1], [0], [0], [1], [0, 0, 1, 1], [], []>} : vector<16x64xbf16>, vector<64x5xbf16>, vector<16x5xf32> -> vector<16x5xf32>
    %c0_131 = arith.constant 0 : index
    %c0_132 = arith.constant 0 : index
    %384 = vector.load %arg13[%c0_131, %c0_132] : memref<1x5xf32, #tpu.memory_space<vmem>>, vector<1x5xf32>
    %385 = vector.broadcast %384 : vector<1x5xf32> to vector<16x5xf32>
    %386 = arith.addf %383, %385 : vector<16x5xf32>
    %387 = vector.shape_cast %386 : vector<16x5xf32> to vector<2x8x5xf32>
    %c0_133 = arith.constant 0 : index
    %c0_134 = arith.constant 0 : index
    %c0_135 = arith.constant 0 : index
    %388 = vector.load %arg14[%c0_133, %c0_134, %c0_135] : memref<2x8x5xf32, #tpu.memory_space<vmem>>, vector<2x8x5xf32>
    tpu.vector_store %arg14[%c0_133, %c0_134, %c0_135], %387 {strides = array<i32>} : memref<2x8x5xf32, #tpu.memory_space<vmem>>, vector<2x8x5xf32>,
    return
  }
  func.func @transform_0(%arg0: i32) -> (i32, i32, i32) {
    %c0_i32 = arith.constant 0 : i32
    %c0_i32_0 = arith.constant 0 : i32
    %c0_i32_1 = arith.constant 0 : i32
    return %arg0, %c0_i32, %c0_i32_0 : i32, i32, i32
  }
  func.func @transform_1(%arg0: i32) -> (i32, i32) {
    %c0_i32 = arith.constant 0 : i32
    %c0_i32_0 = arith.constant 0 : i32
    %c0_i32_1 = arith.constant 0 : i32
    return %c0_i32, %c0_i32_0 : i32, i32
  }
  func.func @transform_2(%arg0: i32) -> (i32, i32, i32) {
    %c0_i32 = arith.constant 0 : i32
    %c0_i32_0 = arith.constant 0 : i32
    %c0_i32_1 = arith.constant 0 : i32
    %c0_i32_2 = arith.constant 0 : i32
    return %c0_i32, %c0_i32_0, %c0_i32_1 : i32, i32, i32
  }
  func.func @transform_3(%arg0: i32) -> (i32, i32, i32) {
    %c0_i32 = arith.constant 0 : i32
    %c0_i32_0 = arith.constant 0 : i32
    %c0_i32_1 = arith.constant 0 : i32
    %c0_i32_2 = arith.constant 0 : i32
    return %c0_i32, %c0_i32_0, %c0_i32_1 : i32, i32, i32
  }
  func.func @transform_4(%arg0: i32) -> (i32, i32, i32) {
    %c0_i32 = arith.constant 0 : i32
    %c0_i32_0 = arith.constant 0 : i32
    %c0_i32_1 = arith.constant 0 : i32
    %c0_i32_2 = arith.constant 0 : i32
    return %c0_i32, %c0_i32_0, %c0_i32_1 : i32, i32, i32
  }
  func.func @transform_5(%arg0: i32) -> (i32, i32, i32) {
    %c0_i32 = arith.constant 0 : i32
    %c0_i32_0 = arith.constant 0 : i32
    %c0_i32_1 = arith.constant 0 : i32
    %c0_i32_2 = arith.constant 0 : i32
    return %c0_i32, %c0_i32_0, %c0_i32_1 : i32, i32, i32
  }
  func.func @transform_6(%arg0: i32) -> (i32, i32, i32) {
    %c0_i32 = arith.constant 0 : i32
    %c0_i32_0 = arith.constant 0 : i32
    %c0_i32_1 = arith.constant 0 : i32
    %c0_i32_2 = arith.constant 0 : i32
    return %c0_i32, %c0_i32_0, %c0_i32_1 : i32, i32, i32
  }
  func.func @transform_7(%arg0: i32) -> (i32, i32, i32) {
    %c0_i32 = arith.constant 0 : i32
    %c0_i32_0 = arith.constant 0 : i32
    %c0_i32_1 = arith.constant 0 : i32
    %c0_i32_2 = arith.constant 0 : i32
    return %c0_i32, %c0_i32_0, %c0_i32_1 : i32, i32, i32
  }
  func.func @transform_8(%arg0: i32) -> (i32, i32, i32) {
    %c0_i32 = arith.constant 0 : i32
    %c0_i32_0 = arith.constant 0 : i32
    %c0_i32_1 = arith.constant 0 : i32
    %c0_i32_2 = arith.constant 0 : i32
    return %c0_i32, %c0_i32_0, %c0_i32_1 : i32, i32, i32
  }
  func.func @transform_9(%arg0: i32) -> (i32, i32, i32) {
    %c0_i32 = arith.constant 0 : i32
    %c0_i32_0 = arith.constant 0 : i32
    %c0_i32_1 = arith.constant 0 : i32
    %c0_i32_2 = arith.constant 0 : i32
    return %c0_i32, %c0_i32_0, %c0_i32_1 : i32, i32, i32
  }
  func.func @transform_10(%arg0: i32) -> (i32, i32, i32) {
    %c0_i32 = arith.constant 0 : i32
    %c0_i32_0 = arith.constant 0 : i32
    %c0_i32_1 = arith.constant 0 : i32
    %c0_i32_2 = arith.constant 0 : i32
    return %c0_i32, %c0_i32_0, %c0_i32_1 : i32, i32, i32
  }
  func.func @transform_11(%arg0: i32) -> (i32, i32) {
    %c0_i32 = arith.constant 0 : i32
    %c0_i32_0 = arith.constant 0 : i32
    %c0_i32_1 = arith.constant 0 : i32
    return %c0_i32, %c0_i32_0 : i32, i32
  }
  func.func @transform_12(%arg0: i32) -> (i32, i32) {
    %c0_i32 = arith.constant 0 : i32
    %c0_i32_0 = arith.constant 0 : i32
    %c0_i32_1 = arith.constant 0 : i32
    return %c0_i32, %c0_i32_0 : i32, i32
  }
  func.func @transform_13(%arg0: i32) -> (i32, i32, i32) {
    %c0_i32 = arith.constant 0 : i32
    %c0_i32_0 = arith.constant 0 : i32
    %c0_i32_1 = arith.constant 0 : i32
    return %arg0, %c0_i32, %c0_i32_0 : i32, i32, i32
  }
}

</mosaic_0001>

<bundles_post_ra>
// kernel: _lambda_.4
= control target key start
LH: loop header
LB: loop body
LE: loop exit
PB: predicated region body
PF: predicated region fallthrough
CT: control target
= control target key end

     0   :  { %vm81_vm0 = vcmask 523264   ;;  %vm258_vm1 = vcmask 1041409   ;;  %vm260_vm2 = vcmask 1042434   ;;  %vm262_vm3 = vcmask 1043459   ;;  %s957_s1 = inlined_call_operand.vmem [shape: bf16[64,256], index: 1, kind: input, shape index: {}]   ;;  %s958_s0 = inlined_call_operand.vmem [shape: f32[6,16,64], index: 0, kind: input, shape index: {}]   ;;  %s959_s2 = inlined_call_operand.vmem [shape: bf16[64,256], index: 2, kind: input, shape index: {}]   ;;  %s960_s3 = inlined_call_operand.vmem [shape: f32[6,2,16], index: 3, kind: output, shape index: {}]  }
   0x1   :  { %v574_v0 = vld [vmem:[%s957_s1 + $0x30] sm:$0xf]  ;;  %v633_v1 = vld [vmem:[%s957_s1 + $0x34] sm:$0xf0]  ;;  %v632_v2 = vld [vmem:[%s957_s1 + $0x34] sm:$0xf] }
   0x2   :  { %v575_v3 = vor.u32 %v633_v1, %v574_v0  ;;  %v576_v4 = vld [vmem:[%s957_s1 + $0x38] sm:$0xf0]  ;;  %v566_v5 = vld [vmem:[%s957_s1 + $0x20] sm:$0xf]  ;;  %v631_v6 = vld [vmem:[%s957_s1 + $0x24] sm:$0xf0] }
   0x3   :  { %v579_v7 = vor.u32 %v632_v2, %v576_v4  ;;  %v630_v8 = vld [vmem:[%s957_s1 + $0x24] sm:$0xf]  ;;  %v568_v9 = vld [vmem:[%s957_s1 + $0x28] sm:$0xf0]  ;;  %v567_v10 = vor.u32 %v631_v6, %v566_v5  ;;  %v558_v12 = vld [vmem:[%s957_s1 + $0x10] sm:$0xf] }
   0x4   :  { %104 = vmatpush.bf16.msra.mxu0 %v575_v3  ;;  %642 = vmatpush.bf16.msra.mxu2 %v575_v3  ;;  %v571_v11 = vor.u32 %v630_v8, %v568_v9  ;;  %v629_v13 = vld [vmem:[%s957_s1 + $0x14] sm:$0xf0]  ;;  %v628_v14 = vld [vmem:[%s957_s1 + $0x14] sm:$0xf]  ;;  %v560_v15 = vld [vmem:[%s957_s1 + $0x18] sm:$0xf0] }
   0x5   :  { %143 = vmatpush.bf16.msra.mxu1 %v579_v7  ;;  %646 = vmatpush.bf16.msra.mxu3 %v579_v7  ;;  %v15_v16 = vld [vmem:[%s958_s0] sm:$0xff]  ;;  %v16_v17 = vld [vmem:[%s958_s0 + $0x8] sm:$0xff]  ;;  %v559_v24 = vor.u32 %v629_v13, %v558_v12  ;;  %v563_v30 = vor.u32 %v628_v14, %v560_v15  ;;  %v640_v32 = vld [vmem:[%s959_s2 + $0x34] sm:$0xf]  ;;  %vm264_vm4 = vcmask 1044484   ;;  %vm266_vm5 = vcmask 1045509  }
   0x6   :  { %v550_v18 = vld [vmem:[%s957_s1] sm:$0xf]  ;;  %v627_v19 = vld [vmem:[%s957_s1 + $0x4] sm:$0xf0]  ;;  %v178_v20 = vsel %vm81_vm0, %v15_v16, 0.0  ;;  %v179_v21 = vsel %vm81_vm0, %v16_v17, 0.0  ;;  %v35_v61 = vpack.c.bf16 %v16_v17, %v15_v16 }
   0x7   :  { %v23_v22 = vld [vmem:[%s958_s0 + $0x40] sm:$0xff]  ;;  %v24_v23 = vld [vmem:[%s958_s0 + $0x48] sm:$0xff]  ;;  %v180_v27 = vadd.f32 %v179_v21, %v178_v20  ;;  %v620_v33 = vld [vmem:[%s959_s2 + $0x38] sm:$0xf0]  ;;  %v551_v44 = vor.u32 %v627_v19, %v550_v18  ;;  %vm341_vm6 = vcmask 1040384   ;;  %vm466_vm7 = vcmask 130112  }
   0x8   :  { %105 = vmatpush.bf16.msra.mxu0 %v567_v10  ;;  %643 = vmatpush.bf16.msra.mxu2 %v567_v10  ;;  %v626_v25 = vld [vmem:[%s957_s1 + $0x4] sm:$0xf]  ;;  %v552_v26 = vld [vmem:[%s957_s1 + $0x8] sm:$0xf0]  ;;  %v214_v28 = vsel %vm81_vm0, %v23_v22, 0.0  ;;  %v215_v29 = vsel %vm81_vm0, %v24_v23, 0.0  ;;  %v623_v57 = vor.u32 %v640_v32, %v620_v33  ;;  %v39_v62 = vpack.c.bf16 %v24_v23, %v23_v22 }
   0x9   :  { %144 = vmatpush.bf16.msra.mxu1 %v571_v11  ;;  %647 = vmatpush.bf16.msra.mxu3 %v571_v11  ;;  %v216_v31 = vadd.f32 %v215_v29, %v214_v28  ;;  %v618_v34 = vld [vmem:[%s959_s2 + $0x30] sm:$0xf]  ;;  %v181_v35 = vrot.slane %v180_v27, 4  ;;  %v641_v36 = vld [vmem:[%s959_s2 + $0x34] sm:$0xf0]  ;;  %v555_v45 = vor.u32 %v626_v25, %v552_v26  ;;  %v791_v55 = vld [vmem:[%s958_s0 + $0x20] sm:$0xff] }
   0xa   :  { %v749_v37 = vld [vmem:[%s959_s2 + $0x24] sm:$0xf]  ;;  %v754_v38 = vld [vmem:[%s958_s0 + $0x10] sm:$0xff]  ;;  %v759_v40 = vld [vmem:[%s958_s0 + $0x18] sm:$0xff]  ;;  %v619_v58 = vor.u32 %v641_v36, %v618_v34  ;;  %v196_v4 = vsel %vm81_vm0, %v791_v55, 0.0  ;;  %vm537_vm8 = vcmask 123904  }
   0xb   :  { %v217_v39 = vrot.slane %v216_v31, 4  ;;  %v187_v41 = vsel %vm81_vm0, %v754_v38, 0.0  ;;  %v766_v42 = vld [vmem:[%s958_s0 + $0x50] sm:$0xff]  ;;  %v771_v43 = vld [vmem:[%s958_s0 + $0x58] sm:$0xff]  ;;  %v182_v46 = vadd.f32 %v181_v35, %v180_v27  ;;  %v612_v47 = vld [vmem:[%s959_s2 + $0x28] sm:$0xf0] }
   0xc   :  { %106 = vmatpush.bf16.msra.mxu0 %v559_v24  ;;  %644 = vmatpush.bf16.msra.mxu2 %v559_v24  ;;  %v610_v48 = vld [vmem:[%s959_s2 + $0x20] sm:$0xf]  ;;  %v188_v49 = vsel %vm81_vm0, %v759_v40, 0.0  ;;  %v639_v51 = vld [vmem:[%s959_s2 + $0x24] sm:$0xf0]  ;;  %v223_v53 = vsel %vm81_vm0, %v766_v42, 0.0  ;;  %v615_v63 = vor.u32 %v749_v37, %v612_v47 }
   0xd   :  { %145 = vmatpush.bf16.msra.mxu1 %v563_v30  ;;  %648 = vmatpush.bf16.msra.mxu3 %v563_v30  ;;  %v218_v50 = vadd.f32 %v217_v39, %v216_v31  ;;  %v189_v52 = vadd.f32 %v188_v49, %v187_v41  ;;  %v224_v54 = vsel %vm81_vm0, %v771_v43, 0.0  ;;  %v183_v56 = vrot.slane %v182_v46, 2  ;;  %v796_v60 = vld [vmem:[%s958_s0 + $0x28] sm:$0xff]  ;;  %v804_v5 = vld [vmem:[%s958_s0 + $0x30] sm:$0xff]  ;;  %v809_v6 = vld [vmem:[%s958_s0 + $0x38] sm:$0xff] }
   0xe   :  { %v225_v59 = vadd.f32 %v224_v54, %v223_v53  ;;  %v611_v2 = vor.u32 %v639_v51, %v610_v48  ;;  %v197_v9 = vsel %vm81_vm0, %v796_v60, 0.0  ;;  %v205_v10 = vsel %vm81_vm0, %v804_v5, 0.0  ;;  %v636_v13 = vld [vmem:[%s959_s2 + $0x14] sm:$0xf]  ;;  %v604_v14 = vld [vmem:[%s959_s2 + $0x18] sm:$0xf0] }
   0xf   :  { %v190_v0 = vrot.slane %v189_v52, 4  ;;  %v184_v1 = vadd.f32 %v183_v56, %v182_v46  ;;  %v219_v7 = vrot.slane %v218_v50, 2  ;;  %v198_v15 = vadd.f32 %v197_v9, %v196_v4  ;;  %v602_v18 = vld [vmem:[%s959_s2 + $0x10] sm:$0xf]  ;;  %v637_v19 = vld [vmem:[%s959_s2 + $0x14] sm:$0xf0] }
  0x10   :  { %107 = vmatpush.bf16.msra.mxu0 %v551_v44  ;;  %645 = vmatpush.bf16.msra.mxu2 %v551_v44  ;;  %v226_v3 = vrot.slane %v225_v59, 4  ;;  %v206_v16 = vsel %vm81_vm0, %v809_v6, 0.0  ;;  %v607_v27 = vor.u32 %v636_v13, %v604_v14  ;;  %v603_v28 = vor.u32 %v637_v19, %v602_v18  ;;  %v634_v29 = vld [vmem:[%s959_s2 + $0x4] sm:$0xf]  ;;  %v596_v30 = vld [vmem:[%s959_s2 + $0x8] sm:$0xf0] }
  0x11   :  { %146 = vmatpush.bf16.msra.mxu1 %v555_v45  ;;  %649 = vmatpush.bf16.msra.mxu3 %v555_v45  ;;  %v191_v8 = vadd.f32 %v190_v0, %v189_v52  ;;  %v185_v11 = vrot.slane %v184_v1, 1  ;;  %v207_v20 = vadd.f32 %v206_v16, %v205_v10  ;;  %v199_v22 = vrot.slane %v198_v15, 4  ;;  %v594_v33 = vld [vmem:[%s959_s2] sm:$0xf]  ;;  %v635_v34 = vld [vmem:[%s959_s2 + $0x4] sm:$0xf0] }
  0x12   :  { %v227_v12 = vadd.f32 %v226_v3, %v225_v59  ;;  %v220_v24 = vadd.f32 %v219_v7, %v218_v50  ;;  %v599_v46 = vor.u32 %v634_v29, %v596_v30  ;;  %v595_v47 = vor.u32 %v635_v34, %v594_v33 }
  0x13   :  { %580 = vmatmul.msk.bf16.vlgmr.msra.gmra.mxu0 %vm81_vm0, %v35_v61  ;;  %584 = vmatmul.msk.bf16.vlgmr.msra.gmra.mxu2 %vm81_vm0, %v39_v62  ;;  %v192_v17 = vrot.slane %v191_v8, 2  ;;  %v186_v23 = vadd.f32 %v185_v11, %v184_v1  ;;  %v208_v26 = vrot.slane %v207_v20, 4  ;;  %v200_v31 = vadd.f32 %v199_v22, %v198_v15 }
  0x14   :  { %316 = vmatpush.bf16.msrb.mxu2 %v619_v58  ;;  %586 = vmatmul.msk.bf16.vlgmr.msra.gmra.mxu1 %vm81_vm0, %v35_v61  ;;  %v228_v21 = vrot.slane %v227_v12, 2  ;;  %v221_v41 = vrot.slane %v220_v24, 1  ;;  %v36_v59 = vpack.c.bf16 %v759_v40, %v754_v38  ;;  %v40_v61 = vpack.c.bf16 %v771_v43, %v766_v42 }
  0x15   :  { %329 = vmatpush.bf16.msrb.mxu3 %v623_v57  ;;  %v193_v25 = vadd.f32 %v192_v17, %v191_v8  ;;  %v209_v35 = vadd.f32 %v208_v26, %v207_v20  ;;  %v201_v37 = vrot.slane %v200_v31, 2  ;;  %v240_v39 = vpack.c.bf16 %v186_v23, %v186_v23 }
  0x16   :  { %590 = vmatmul.msk.bf16.vlgmr.msra.gmra.mxu3 %vm81_vm0, %v39_v62  ;;  %v229_v36 = vadd.f32 %v228_v21, %v227_v12  ;;  %v222_v54 = vadd.f32 %v221_v41, %v220_v24  ;;  %v37_v11 = vpack.c.bf16 %v796_v60, %v791_v55  ;;  %v38_v13 = vpack.c.bf16 %v809_v6, %v804_v5 }
  0x17   :  { %v194_v32 = vrot.slane %v193_v25, 1  ;;  %v210_v45 = vrot.slane %v209_v35, 2  ;;  %v202_v48 = vadd.f32 %v201_v37, %v200_v31  ;;  %v252_v53 = vunpack.c.l.b16 %v240_v39 }
  0x18   :  { %317 = vmatpush.bf16.msrb.mxu2 %v611_v2  ;;  %v230_v51 = vrot.slane %v229_v36, 1  ;;  %v244_v1 = vpack.c.bf16 %v222_v54, %v222_v54 }
  0x19   :  { %330 = vmatpush.bf16.msrb.mxu3 %v615_v63  ;;  %v195_v44 = vadd.f32 %v194_v32, %v193_v25  ;;  %v211_v50 = vadd.f32 %v210_v45, %v209_v35  ;;  %v203_v52 = vrot.slane %v202_v48, 1 }
  0x1a   :  { %v231_v63 = vadd.f32 %v230_v51, %v229_v36  ;;  %v256_v42 = vunpack.c.l.b16 %v244_v1 }
  0x1b   :  { %v241_v49 = vpack.c.bf16 %v195_v44, %v195_v44  ;;  %v212_v57 = vrot.slane %v211_v50, 1  ;;  %v204_v58 = vadd.f32 %v203_v52, %v202_v48 }
  0x1c   :  { %318 = vmatpush.bf16.msrb.mxu2 %v603_v28  ;;  %v245_v38 = vpack.c.bf16 %v231_v63, %v231_v63 }
  0x1d   :  { %331 = vmatpush.bf16.msrb.mxu3 %v607_v27  ;;  %v253_v56 = vunpack.c.l.b16 %v241_v49  ;;  %v213_v62 = vadd.f32 %v212_v57, %v211_v50  ;;  %v242_v0 = vpack.c.bf16 %v204_v58, %v204_v58 }
  0x1e   :  { %v257_v8 = vunpack.c.l.b16 %v245_v38 }
  0x1f   :  { %v243_v2 = vpack.c.bf16 %v213_v62, %v213_v62  ;;  %v259_v3 = vsel %vm258_vm1, %v253_v56, %v252_v53  ;;  %v254_v4 = vunpack.c.l.b16 %v242_v0 }
  0x20   :  { %319 = vmatpush.bf16.msrb.mxu2 %v595_v47 }
  0x21   :  { %332 = vmatpush.bf16.msrb.mxu3 %v599_v46  ;;  %v255_v7 = vunpack.c.l.b16 %v243_v2  ;;  %v261_v40 = vsel %vm260_vm2, %v254_v4, %v259_v3 }
  0x23   :  { %581 = vmatmul.msk.bf16.gmra.mxu0 %vm81_vm0, %v36_v59  ;;  %585 = vmatmul.msk.bf16.gmra.mxu2 %vm81_vm0, %v40_v61  ;;  %v263_v43 = vsel %vm262_vm3, %v255_v7, %v261_v40 }
  0x24   :  { %587 = vmatmul.msk.bf16.gmra.mxu1 %vm81_vm0, %v36_v59  ;;  %v265_v9 = vsel %vm264_vm4, %v256_v42, %v263_v43 }
  0x25   :  { %v267_v10 = vsel %vm266_vm5, %v257_v8, %v265_v9 }
  0x26   :  { %591 = vmatmul.msk.bf16.gmra.mxu3 %vm81_vm0, %v40_v61  ;;  %v268_v12 = vpack.c.b16 %v267_v10, %v267_v10 }
  0x33   :  { %582 = vmatmul.msk.bf16.gmra.mxu0 %vm81_vm0, %v37_v11  ;;  %624 = vmatmul.msk.bf16.vlgmr.msrb.gmra.mxu2 %vm81_vm0, %v268_v12 }
  0x34   :  { %588 = vmatmul.msk.bf16.gmra.mxu1 %vm81_vm0, %v37_v11 }
  0x36   :  { %625 = vmatmul.msk.bf16.vlgmr.msrb.gmra.mxu3 %vm81_vm0, %v268_v12 }
  0x43   :  { %583 = vmatmul.msk.bf16.gmra.mxu0 %vm81_vm0, %v38_v13 }
  0x44   :  { %589 = vmatmul.msk.bf16.gmra.mxu1 %vm81_vm0, %v38_v13 }
  0x90   :  { %v109_v14 = vpop.f32.mrf.mxu0 }
  0x91   :  { %v148_v18 = vpop.f32.mrf.mxu1 }
  0x96   :  { %v129_v15 = vpop.f32.mrf.mxu2 }
  0x98   :  { %v111_v55 = vpop.f32.mrf.mxu0 }
  0x99   :  { %v868_v16 = vpop.f32.mrf.mxu3  ;;  %v150_v22 = vpop.f32.mrf.mxu1 }
  0x9e   :  { %v131_v60 = vpop.f32.mrf.mxu2 }
  0xa0   :  { %v114_v21 = vpop.f32.mrf.mxu0 }
  0xa1   :  { %v870_v17 = vpop.f32.mrf.mxu3  ;;  %v153_v26 = vpop.f32.mrf.mxu1 }
  0xa6   :  { %v134_v19 = vpop.f32.mrf.mxu2 }
  0xa8   :  { %v116_v6 = vpop.f32.mrf.mxu0 }
  0xa9   :  { %v872_v20 = vpop.f32.mrf.mxu3  ;;  %v155_v47 = vpop.f32.mrf.mxu1 }
  0xae   :  { %v136_v23 = vpop.f32.mrf.mxu2 }
  0xb0   :  { %v119_v34 = vpop.f32.mrf.mxu0 }
  0xb1   :  { %v874_v5 = vpop.f32.mrf.mxu3  ;;  %v158_v57 = vpop.f32.mrf.mxu1 }
  0xb6   :  { %v321_v24 = vpop.f32.mrf.mxu2 }
  0xb8   :  { %v121_v51 = vpop.f32.mrf.mxu0 }
  0xb9   :  { %v334_v25 = vpop.f32.mrf.mxu3  ;;  %v160_v2 = vpop.f32.mrf.mxu1 }
  0xba   :  { %v340_v27 = vrot.slane %v334_v25, 7 }
  0xbc   :  { %v345_v28 = vsel %vm260_vm2, %v321_v24, %v340_v27  ;;  %v342_v29 = vsel %vm341_vm6, %v321_v24, %v340_v27  ;;  %v343_v30 = vsel %vm258_vm1, %v321_v24, %v340_v27  ;;  %v349_v48 = vsel %vm264_vm4, %v321_v24, %v340_v27 }
  0xbd   :  { %v346_v31 = vrot.slane %v345_v28, 2  ;;  %v354_v32 = vperm.slane %v342_v29, 1  ;;  %v353_v33 = vperm.slane %v342_v29, 0  ;;  %v344_v39 = vrot.slane %v343_v30, 1 }
  0xbe   :  { %v323_v41 = vpop.f32.mrf.mxu2  ;;  %v350_v53 = vrot.slane %v349_v48, 4  ;;  %v351_v54 = vsel %vm266_vm5, %v321_v24, %v340_v27  ;;  %v347_v40 = vsel %vm262_vm3, %v321_v24, %v340_v27  ;;  %v461_v29 = vlaneseq }
  0xbf   :  { %v357_v35 = vperm.slane %v346_v31, 0  ;;  %v380_v36 = vmul.f32 %v354_v32, %v150_v22  ;;  %v377_v37 = vmul.f32 %v353_v33, %v109_v14  ;;  %v355_v46 = vperm.slane %v344_v39, 0 }
  0xc0   :  { %v379_v49 = vmul.f32 %v353_v33, %v111_v55  ;;  %v361_v56 = vperm.slane %v350_v53, 0  ;;  %v378_v58 = vmul.f32 %v354_v32, %v148_v18  ;;  %v352_v61 = vrot.slane %v351_v54, 5  ;;  %v124_v4 = vpop.f32.mrf.mxu0 }
  0xc1   :  { %v336_v44 = vpop.f32.mrf.mxu3  ;;  %427 = vadd.xlane.f32.xlu1 %v380_v36  ;;  %401 = vadd.xlane.f32.xlu0 %v377_v37  ;;  %v385_v45 = vmul.f32 %v357_v35, %v119_v34  ;;  %v381_v50 = vmul.f32 %v355_v46, %v114_v21  ;;  %v387_v52 = vmul.f32 %v357_v35, %v121_v51  ;;  %v358_v7 = vperm.slane %v346_v31, 1  ;;  %v163_v10 = vpop.f32.mrf.mxu1 }
  0xc2   :  { %v383_v59 = vmul.f32 %v355_v46, %v116_v6  ;;  %v393_v62 = vmul.f32 %v361_v56, %v129_v15  ;;  %v363_v63 = vperm.slane %v352_v61, 0  ;;  %v395_v0 = vmul.f32 %v361_v56, %v131_v60 }
  0xc3   :  { %409 = vadd.xlane.f32.xlu2 %v385_v45  ;;  %v356_v38 = vperm.slane %v344_v39, 1  ;;  %v386_v43 = vmul.f32 %v358_v7, %v158_v57  ;;  %v348_v8 = vrot.slane %v347_v40, 3  ;;  %v388_v15 = vmul.f32 %v358_v7, %v160_v2 }
  0xc4   :  { %v397_v1 = vmul.f32 %v363_v63, %v134_v19  ;;  %v399_v3 = vmul.f32 %v363_v63, %v136_v23  ;;  %v362_v18 = vperm.slane %v350_v53, 1  ;;  %v364_v23 = vperm.slane %v352_v61, 1 }
  0xc5   :  { %v384_v42 = vmul.f32 %v356_v38, %v155_v47  ;;  %v382_v9 = vmul.f32 %v356_v38, %v153_v26  ;;  %v359_v12 = vperm.slane %v348_v8, 0  ;;  %v360_v60 = vperm.slane %v348_v8, 1 }
  0xc6   :  { %v394_v22 = vmul.f32 %v362_v18, %v868_v16  ;;  %v396_v6 = vmul.f32 %v362_v18, %v870_v17  ;;  %v398_v24 = vmul.f32 %v364_v23, %v872_v20  ;;  %v400_v25 = vmul.f32 %v364_v23, %v874_v5 }
  0xc7   :  { %v389_v13 = vmul.f32 %v359_v12, %v124_v4  ;;  %v390_v19 = vmul.f32 %v360_v60, %v163_v10  ;;  %v886_v32 = vand.u32 127, %v461_v29 }
  0xc8   :  { %v126_v11 = vpop.f32.mrf.mxu0 }
  0xc9   :  { %403 = vadd.xlane.f32.xlu0 %v379_v49  ;;  %405 = vadd.xlane.f32.xlu1 %v381_v50  ;;  %v391_v14 = vmul.f32 %v359_v12, %v126_v11  ;;  %v165_v55 = vpop.f32.mrf.mxu1  ;;  %v889_v33 = vadd.s32 4294967288, %v886_v32 }
  0xca   :  { %v392_v21 = vmul.f32 %v360_v60, %v165_v55 }
  0xcb   :  { %411 = vadd.xlane.f32.xlu2 %v387_v52 }
  0xd1   :  { %425 = vadd.xlane.f32.xlu0 %v378_v58  ;;  %407 = vadd.xlane.f32.xlu1 %v383_v59 }
  0xd3   :  { %417 = vadd.xlane.f32.xlu2 %v393_v62 }
  0xd9   :  { %419 = vadd.xlane.f32.xlu0 %v395_v0  ;;  %421 = vadd.xlane.f32.xlu1 %v397_v1 }
  0xdb   :  { %423 = vadd.xlane.f32.xlu2 %v399_v3 }
  0xe1   :  { %431 = vadd.xlane.f32.xlu0 %v384_v42  ;;  %433 = vadd.xlane.f32.xlu1 %v386_v43 }
  0xe3   :  { %429 = vadd.xlane.f32.xlu2 %v382_v9 }
  0xe9   :  { %413 = vadd.xlane.f32.xlu0 %v389_v13  ;;  %415 = vadd.xlane.f32.xlu1 %v391_v14 }
  0xeb   :  { %435 = vadd.xlane.f32.xlu2 %v388_v15 }
  0xf1   :  { %437 = vadd.xlane.f32.xlu0 %v390_v19  ;;  %439 = vadd.xlane.f32.xlu1 %v392_v21 }
  0xf3   :  { %441 = vadd.xlane.f32.xlu2 %v394_v22 }
  0xf9   :  { %443 = vadd.xlane.f32.xlu0 %v396_v6  ;;  %445 = vadd.xlane.f32.xlu1 %v398_v24 }
  0xfb   :  { %447 = vadd.xlane.f32.xlu2 %v400_v25 }
 0x134   :  { %v428_v26 = vpop.xlane.xlu1 %427  ;;  %v402_v27 = vpop.xlane.xlu0 %401 }
 0x135   :  { %v502_v5 = vperm.slane %v428_v26, %v889_v33  ;;  %v463_v35 = vperm.slane %v402_v27, %v886_v32 }
 0x136   :  { %v410_v28 = vpop.xlane.xlu2 %409 }
 0x137   :  { %v471_v2 = vperm.slane %v410_v28, %v886_v32 }
 0x13c   :  { %v404_v30 = vpop.xlane.xlu0 %403  ;;  %v406_v31 = vpop.xlane.xlu1 %405 }
 0x13d   :  { %v465_v17 = vperm.slane %v404_v30, %v889_v33  ;;  %v468_v53 = vperm.slane %v406_v31, %v886_v32 }
 0x13e   :  { %v412_v16 = vpop.xlane.xlu2 %411 }
 0x13f   :  { %v467_v39 = vsel %vm466_vm7, %v465_v17, %v463_v35  ;;  %v472_v0 = vperm.slane %v412_v16, %v889_v33 }
 0x141   :  { %v473_v7 = vsel %vm466_vm7, %v472_v0, %v471_v2 }
 0x144   :  { %v426_v20 = vpop.xlane.xlu0 %425  ;;  %v408_v34 = vpop.xlane.xlu1 %407 }
 0x145   :  { %v501_v36 = vperm.slane %v426_v20, %v886_v32  ;;  %v469_v51 = vperm.slane %v408_v34, %v889_v33 }
 0x146   :  { %v418_v37 = vpop.xlane.xlu2 %417 }
 0x147   :  { %v503_v41 = vsel %vm466_vm7, %v502_v5, %v501_v36  ;;  %v470_v57 = vsel %vm466_vm7, %v469_v51, %v468_v53  ;;  %v477_v22 = vperm.slane %v418_v37, %v886_v32 }
 0x148   :  { %v525_v44 = vsel %vm341_vm6, %v467_v39, %v503_v41 }
 0x149   :  { %v531_v45 = vmul.f32 0.008333334, %v525_v44 }
 0x14b   :  { %538 = vst.msk [vmem:[%s960_s3] sm:$0x3] %vm537_vm8, %v531_v45 }
 0x14c   :  { %v420_v46 = vpop.xlane.xlu0 %419  ;;  %v422_v47 = vpop.xlane.xlu1 %421 }
 0x14d   :  { %v478_v18 = vperm.slane %v420_v46, %v889_v33  ;;  %v480_v25 = vperm.slane %v422_v47, %v886_v32 }
 0x14e   :  { %v424_v48 = vpop.xlane.xlu2 %423 }
 0x14f   :  { %v481_v23 = vperm.slane %v424_v48, %v889_v33  ;;  %v479_v27 = vsel %vm466_vm7, %v478_v18, %v477_v22 }
 0x151   :  { %v482_v16 = vsel %vm466_vm7, %v481_v23, %v480_v25 }
 0x154   :  { %v432_v49 = vpop.xlane.xlu0 %431  ;;  %v434_v50 = vpop.xlane.xlu1 %433 }
 0x155   :  { %v505_v54 = vperm.slane %v432_v49, %v889_v33  ;;  %v507_v3 = vperm.slane %v434_v50, %v886_v32 }
 0x156   :  { %v430_v52 = vpop.xlane.xlu2 %429 }
 0x157   :  { %v504_v56 = vperm.slane %v430_v52, %v886_v32 }
 0x159   :  { %v506_v58 = vsel %vm466_vm7, %v505_v54, %v504_v56 }
 0x15a   :  { %v526_v59 = vsel %vm341_vm6, %v470_v57, %v506_v58 }
 0x15b   :  { %v532_v61 = vmul.f32 0.008333334, %v526_v59 }
 0x15c   :  { %v414_v62 = vpop.xlane.xlu0 %413  ;;  %v416_v63 = vpop.xlane.xlu1 %415 }
 0x15d   :  { %539 = vst.msk [vmem:[%s960_s3 + $0x2] sm:$0x3] %vm537_vm8, %v532_v61  ;;  %v474_v42 = vperm.slane %v414_v62, %v886_v32  ;;  %v475_v43 = vperm.slane %v416_v63, %v889_v33 }
 0x15e   :  { %v436_v1 = vpop.xlane.xlu2 %435 }
 0x15f   :  { %v508_v4 = vperm.slane %v436_v1, %v889_v33  ;;  %v476_v14 = vsel %vm466_vm7, %v475_v43, %v474_v42 }
 0x161   :  { %v509_v38 = vsel %vm466_vm7, %v508_v4, %v507_v3 }
 0x162   :  { %v527_v40 = vsel %vm341_vm6, %v473_v7, %v509_v38 }
 0x163   :  { %v533_v8 = vmul.f32 0.008333334, %v527_v40 }
 0x164   :  { %v438_v9 = vpop.xlane.xlu0 %437  ;;  %v440_v10 = vpop.xlane.xlu1 %439 }
 0x165   :  { %540 = vst.msk [vmem:[%s960_s3 + $0x4] sm:$0x3] %vm537_vm8, %v533_v8  ;;  %v510_v11 = vperm.slane %v438_v9, %v886_v32  ;;  %v511_v12 = vperm.slane %v440_v10, %v889_v33 }
 0x166   :  { %v442_v13 = vpop.xlane.xlu2 %441 }
 0x167   :  { %v512_v15 = vsel %vm466_vm7, %v511_v12, %v510_v11  ;;  %v513_v6 = vperm.slane %v442_v13, %v886_v32 }
 0x168   :  { %v528_v55 = vsel %vm341_vm6, %v476_v14, %v512_v15 }
 0x169   :  { %v534_v60 = vmul.f32 0.008333334, %v528_v55 }
 0x16b   :  { %541 = vst.msk [vmem:[%s960_s3 + $0x6] sm:$0x3] %vm537_vm8, %v534_v60 }
 0x16c   :  { %v444_v19 = vpop.xlane.xlu0 %443  ;;  %v446_v21 = vpop.xlane.xlu1 %445 }
 0x16d   :  { %v514_v24 = vperm.slane %v444_v19, %v889_v33  ;;  %v516_v29 = vperm.slane %v446_v21, %v886_v32 }
 0x16e   :  { %v448_v26 = vpop.xlane.xlu2 %447 }
 0x16f   :  { %v515_v28 = vsel %vm466_vm7, %v514_v24, %v513_v6  ;;  %v517_v30 = vperm.slane %v448_v26, %v889_v33 }
 0x170   :  { %v529_v31 = vsel %vm341_vm6, %v479_v27, %v515_v28 }
 0x171   :  { %v535_v17 = vmul.f32 0.008333334, %v529_v31  ;;  %v518_v20 = vsel %vm466_vm7, %v517_v30, %v516_v29 }
 0x172   :  { %v530_v34 = vsel %vm341_vm6, %v482_v16, %v518_v20 }
 0x173   :  { %542 = vst.msk [vmem:[%s960_s3 + $0x8] sm:$0x3] %vm537_vm8, %v535_v17  ;;  %v536_v5 = vmul.f32 0.008333334, %v530_v34 }
 0x175   :  { %543 = vst.msk [vmem:[%s960_s3 + $0xa] sm:$0x3] %vm537_vm8, %v536_v5 }

// kernel: _lambda_.3
= control target key start
LH: loop header
LB: loop body
LE: loop exit
PB: predicated region body
PF: predicated region fallthrough
CT: control target
= control target key end

     0   :  { %s3893_s17 = smov 0   ;;  %s3895_s18 = smov 0   ;;  %s5226_s0 = inlined_call_operand.vmem [shape: bf16[2,96,129], index: 0, kind: input, shape index: {}]   ;;  %s5227_s1 = inlined_call_operand.vmem [shape: bf16[129,32], index: 1, kind: input, shape index: {}]   ;;  %s5228_s2 = inlined_call_operand.vmem [shape: bf16[32,256], index: 2, kind: input, shape index: {}]   ;;  %s5229_s3 = inlined_call_operand.vmem [shape: bf16[64,256], index: 3, kind: input, shape index: {}]   ;;  %s5230_s4 = inlined_call_operand.vmem [shape: f32[2,1,128], index: 4, kind: input, shape index: {}]   ;;  %s5231_s5 = inlined_call_operand.vmem [shape: bf16[64,256], index: 5, kind: input, shape index: {}]   ;;  %s5232_s6 = inlined_call_operand.vmem [shape: bf16[64,256], index: 6, kind: input, shape index: {}]   ;;  %s5233_s7 = inlined_call_operand.vmem [shape: f32[2,1,128], index: 7, kind: input, shape index: {}]   ;;  %s5234_s8 = inlined_call_operand.vmem [shape: bf16[64,128], index: 8, kind: input, shape index: {}]   ;;  %s5235_s9 = inlined_call_operand.vmem [shape: f32[1,128], index: 9, kind: input, shape index: {}]   ;;  %s5236_s10 = inlined_call_operand.vmem [shape: f32[1,128], index: 10, kind: input, shape index: {}]   ;;  %s5237_s11 = inlined_call_operand.vmem [shape: f32[96,64], index: 11, kind: output, shape index: {}]  }
   0x1   :  { %s3897_s19 = smov 0  }
   0x2 LB: > { %s2905_s20 = sadd.s32 4294967295, %s3827_s19   ;;  %s3910_s21 = sadd.s32 1, %s3827_s19   ;;  %s3827_s19 = sphi %s3897_s19, %s5240_s19   ;;  %s3823_s18 = sphi %s3895_s18, %s5239_s18   ;;  %s3819_s17 = sphi %s3893_s17, %s5238_s17  }
   0x3   : > { %s25_s22 = ssub.s32 %s3827_s19, %s3910_s21  ;;  %s28_s23 = sadd.s32 1, %s3823_s18 }
   0x4   : > { %p26_p0 = scmp.eq.s32.totalorder %s25_s22, 0  ;;  %p35_p1 = scmp.ne.s32.totalorder %s3823_s18, %s3819_s17 }
   0x5   : > { %p36_p2 = scmp.eq.s32.totalorder %s3827_s19, 0  ;;  %p2908_p4 = scmp.ge.s32.totalorder %s3827_s19, 2 }
   0x6   : > { %s3919_s24 = scalar_select %p26_p0, %s3823_s18, %s28_s23  }
   0x7   : > { %p37_p3 = por %p36_p2, %p35_p1  ;;  %327 = sbr.rel (%p2908_p4) target bundleno = 29 (0x1d), region = 56 }
   0xc   : > { %330 = sbr.rel (!%p37_p3) target bundleno = 29 (0x1d), region = 60  ;;  %s332_s25 = sand.u32 (%p37_p3), 1, %s3823_s18  }
   0xd   : > { %s3227_s26 = smul.u32 (%p37_p3), 48, %s3827_s19 }
   0xe   : > { %s3232_s27 = smul.u32 (%p37_p3), 96, %s332_s25 }
   0xf   : > { %s338_s30 = scalar_lea.vmem (%p37_p3), %s5226_s0, %s3227_s26 }
  0x10   : > { %v389_v0 = vld [vmem:[%s338_s30] sm:$0xff] (%p37_p3)  ;;  %v391_v1 = vld [vmem:[%s338_s30 + $0x8] sm:$0xff] (%p37_p3)  ;;  %v393_v2 = vld [vmem:[%s338_s30 + $0x10] sm:$0xff] (%p37_p3)  ;;  %s334_s12 = scalar_lea.vmem (%p37_p3), [#allocation2], %s3232_s27 }
  0x11   : > { %390 = vst [vmem:[%s334_s12] sm:$0xff] %v389_v0  ;;  %v395_v3 = vld [vmem:[%s338_s30 + $0x18] sm:$0xff]  ;;  %v397_v4 = vld [vmem:[%s338_s30 + $0x20] sm:$0xff]  ;;  %v399_v5 = vld [vmem:[%s338_s30 + $0x28] sm:$0xff] }
  0x12   : > { %392 = vst [vmem:[%s334_s12 + $0x8] sm:$0xff] %v391_v1  ;;  %v401_v6 = vld [vmem:[%s338_s30 + $0x60] sm:$0xff]  ;;  %v403_v7 = vld [vmem:[%s338_s30 + $0x68] sm:$0xff]  ;;  %v405_v8 = vld [vmem:[%s338_s30 + $0x70] sm:$0xff] }
  0x13   : > { %394 = vst [vmem:[%s334_s12 + $0x10] sm:$0xff] %v393_v2  ;;  %v407_v9 = vld [vmem:[%s338_s30 + $0x78] sm:$0xff]  ;;  %v409_v10 = vld [vmem:[%s338_s30 + $0x80] sm:$0xff]  ;;  %v411_v11 = vld [vmem:[%s338_s30 + $0x88] sm:$0xff] }
  0x14   : > { %396 = vst [vmem:[%s334_s12 + $0x18] sm:$0xff] %v395_v3 }
  0x15   : > { %398 = vst [vmem:[%s334_s12 + $0x20] sm:$0xff] %v397_v4 }
  0x16   : > { %400 = vst [vmem:[%s334_s12 + $0x28] sm:$0xff] %v399_v5 }
  0x17   : > { %402 = vst [vmem:[%s334_s12 + $0x30] sm:$0xff] %v401_v6 }
  0x18   : > { %404 = vst [vmem:[%s334_s12 + $0x38] sm:$0xff] %v403_v7 }
  0x19   : > { %406 = vst [vmem:[%s334_s12 + $0x40] sm:$0xff] %v405_v8 }
  0x1a   : > { %408 = vst [vmem:[%s334_s12 + $0x48] sm:$0xff] %v407_v9 }
  0x1b   : > { %410 = vst [vmem:[%s334_s12 + $0x50] sm:$0xff] %v409_v10 }
  0x1c   : > { %412 = vst [vmem:[%s334_s12 + $0x58] sm:$0xff] %v411_v11 }
  0x1d PF: > { %p2911_p5 = scmp.ge.s32.totalorder %s3827_s19, 1  ;;  %p417_p6 = scmp.lt.s32.totalorder %s3827_s19, 3 }
  0x1f   : > { %p418_p7 = pnand %p2911_p5, %p417_p6 }
  0x20   : > { %s424_s15 = sand.u32 (!%p418_p7), 1, %s3819_s17   ;;  %s3830_s30 = smov (!%p418_p7), 64  }
  0x21   : > { %421 = sbr.rel (%p418_p7) target bundleno = 3041 (0xbe1), region = 98  ;;  %s3831_s13 = smov (!%p418_p7), 96  }
  0x22   : > { %s3233_s16 = smul.u32 (!%p418_p7), 96, %s424_s15  ;;  %s3832_s14 = smov (!%p418_p7), 32  }
  0x23   : > { %s464_s28 = smul.u32 (!%p418_p7), 6, %s2905_s20 }
  0x24   : > { %s3936_s25 = scalar_lea.vmem (!%p418_p7), [#allocation2], %s3233_s16 }
  0x25   : > { %p465_p8 = scmp.lt.s32.totalorder (!%p418_p7), %s464_s28, 11 }
  0x26   : > { %v3194_v12 = vld [vmem:[%s5227_s1 + $0x38] sm:$0xff]  ;;  %v3193_v13 = vld [vmem:[%s5227_s1 + $0x30] sm:$0xff]  ;;  %v3829_v14 = vmov 0   ;;  %v3175_v15 = vld [vmem:[%s3936_s25 + $0x4] sm:$0xf]  ;;  %vm767_vm0 = vcmask 261120  }
  0x27   : > { %695 = vmatpush.bf16.msra.mxu0 %v3194_v12  ;;  %3262 = vset.pattern.permute.xlu0 %v3829_v14  ;;  %v2923_v16 = vld [vmem:[%s3936_s25 + $0x8] sm:$0xf0]  ;;  %v3177_v17 = vld [vmem:[%s3936_s25 + $0x14] sm:$0xf]  ;;  %v2931_v18 = vld [vmem:[%s3936_s25 + $0x18] sm:$0xf0] }
  0x28   : > { %3273 = vset.pattern.permute.xlu1 %v3829_v14  ;;  %3284 = vset.pattern.permute.xlu2 %v3829_v14  ;;  %v3192_v19 = vld [vmem:[%s5227_s1 + $0x28] sm:$0xff]  ;;  %v2926_v20 = vor.u32 %v3175_v15, %v2923_v16  ;;  %v2934_v23 = vor.u32 %v3177_v17, %v2931_v18  ;;  %v3191_v24 = vld [vmem:[%s5227_s1 + $0x20] sm:$0xff]  ;;  %v3190_v28 = vld [vmem:[%s5227_s1 + $0x18] sm:$0xff]  ;;  %vm1191_vm1 = vcmask 523264   ;;  %s5242_s28 = smov (!%p465_p8, %s464_s28), 11 }
  0x29   : > { %v3189_v30 = vld [vmem:[%s5227_s1 + $0x10] sm:$0xff]  ;;  %v3188_v31 = vld [vmem:[%s5227_s1 + $0x8] sm:$0xff]  ;;  %v3187_v32 = vld [vmem:[%s5227_s1] sm:$0xff]  ;;  %s2912_s29 = sshll.u32 %s5242_s28, 3 }
  0x2a   : > { %v561_v21 = vunpack.c.l.bf16 %v2926_v20  ;;  %v562_v22 = vunpack.c.h.bf16 %v2926_v20  ;;  %v563_v26 = vunpack.c.l.bf16 %v2934_v23  ;;  %v564_v27 = vunpack.c.h.bf16 %v2934_v23  ;;  %v2921_v33 = vld [vmem:[%s3936_s25] sm:$0xf]  ;;  %v3176_v34 = vld [vmem:[%s3936_s25 + $0x4] sm:$0xf0]  ;;  %v3179_v36 = vld [vmem:[%s3936_s25 + $0x24] sm:$0xf]  ;;  %s5190_s12 = scalar_lea.vmem %s5237_s11, %s2912_s29 }
  0x2b   : > { %696 = vmatpush.bf16.msra.mxu0 %v3193_v13  ;;  %v2922_v35 = vor.u32 %v3176_v34, %v2921_v33  ;;  %v2939_v37 = vld [vmem:[%s3936_s25 + $0x28] sm:$0xf0]  ;;  %v3181_v38 = vld [vmem:[%s3936_s25 + $0x34] sm:$0xf]  ;;  %v2947_v40 = vld [vmem:[%s3936_s25 + $0x38] sm:$0xf0] }
  0x2c   : > { %v3263_v25 = vpack.i.bf16 %v562_v22, %v561_v21  ;;  %v3268_v29 = vpack.i.bf16 %v564_v27, %v563_v26  ;;  %v2942_v39 = vor.u32 %v3179_v36, %v2939_v37  ;;  %v2950_v43 = vor.u32 %v3181_v38, %v2947_v40  ;;  %v2929_v47 = vld [vmem:[%s3936_s25 + $0x10] sm:$0xf]  ;;  %v3178_v48 = vld [vmem:[%s3936_s25 + $0x14] sm:$0xf0]  ;;  %v2937_v51 = vld [vmem:[%s3936_s25 + $0x20] sm:$0xf] }
  0x2d   : > { %v2930_v50 = vor.u32 %v3178_v48, %v2929_v47  ;;  %v3180_v52 = vld [vmem:[%s3936_s25 + $0x24] sm:$0xf0]  ;;  %v2945_v54 = vld [vmem:[%s3936_s25 + $0x30] sm:$0xf]  ;;  %v3182_v55 = vld [vmem:[%s3936_s25 + $0x34] sm:$0xf0] }
  0x2e   : > { %3264 = vperm.xlu0 %3262, %v3263_v25   ;;  %v565_v41 = vunpack.c.l.bf16 %v2942_v39  ;;  %v566_v42 = vunpack.c.h.bf16 %v2942_v39  ;;  %v567_v45 = vunpack.c.l.bf16 %v2950_v43  ;;  %v568_v46 = vunpack.c.h.bf16 %v2950_v43  ;;  %v3183_v57 = vld [vmem:[%s3936_s25 + $0x44] sm:$0xf]  ;;  %v2955_v58 = vld [vmem:[%s3936_s25 + $0x48] sm:$0xf0]  ;;  %v3185_v59 = vld [vmem:[%s3936_s25 + $0x54] sm:$0xf] }
  0x2f   : > { %697 = vmatpush.bf16.msra.mxu0 %v3192_v19  ;;  %v2938_v53 = vor.u32 %v3180_v52, %v2937_v51  ;;  %v2946_v56 = vor.u32 %v3182_v55, %v2945_v54  ;;  %v2958_v60 = vor.u32 %v3183_v57, %v2955_v58  ;;  %v2963_v61 = vld [vmem:[%s3936_s25 + $0x58] sm:$0xf0]  ;;  %v2953_v4 = vld [vmem:[%s3936_s25 + $0x40] sm:$0xf]  ;;  %v3184_v5 = vld [vmem:[%s3936_s25 + $0x44] sm:$0xf0] }
  0x30   : > { %v3274_v44 = vpack.i.bf16 %v566_v42, %v565_v41  ;;  %v3279_v49 = vpack.i.bf16 %v568_v46, %v567_v45  ;;  %v2966_v0 = vor.u32 %v3185_v59, %v2963_v61  ;;  %v2954_v7 = vor.u32 %v3184_v5, %v2953_v4  ;;  %v2961_v8 = vld [vmem:[%s3936_s25 + $0x50] sm:$0xf]  ;;  %v3186_v9 = vld [vmem:[%s3936_s25 + $0x54] sm:$0xf0]  ;;  %v3197_v13 = vld [vmem:[%s5228_s2 + $0x14] sm:$0xf] }
  0x31   : > { %v569_v62 = vunpack.c.l.bf16 %v2958_v60  ;;  %v570_v63 = vunpack.c.h.bf16 %v2958_v60  ;;  %v2962_v10 = vor.u32 %v3186_v9, %v2961_v8  ;;  %v3010_v11 = vld [vmem:[%s5228_s2 + $0x10] sm:$0xf]  ;;  %v3198_v12 = vld [vmem:[%s5228_s2 + $0x14] sm:$0xf0]  ;;  %v3012_v15 = vld [vmem:[%s5228_s2 + $0x18] sm:$0xf0] }
  0x32   : > { %3275 = vperm.xlu1 %3273, %v3274_v44   ;;  %v571_v2 = vunpack.c.l.bf16 %v2966_v0  ;;  %v572_v3 = vunpack.c.h.bf16 %v2966_v0  ;;  %v3011_v14 = vor.u32 %v3198_v12, %v3010_v11  ;;  %v3015_v16 = vor.u32 %v3197_v13, %v3012_v15  ;;  %v3002_v17 = vld [vmem:[%s5228_s2] sm:$0xf]  ;;  %v3196_v18 = vld [vmem:[%s5228_s2 + $0x4] sm:$0xf0]  ;;  %v3195_v19 = vld [vmem:[%s5228_s2 + $0x4] sm:$0xf] }
  0x33   : > { %698 = vmatpush.bf16.msra.mxu0 %v3191_v24  ;;  %v3285_v1 = vpack.i.bf16 %v570_v63, %v569_v62  ;;  %v3003_v20 = vor.u32 %v3196_v18, %v3002_v17  ;;  %v3004_v21 = vld [vmem:[%s5228_s2 + $0x8] sm:$0xf0]  ;;  %v560_v23 = vld [vmem:[%s5227_s1 + $0x40] sm:$0x1] }
  0x34   : > { %v3290_v6 = vpack.i.bf16 %v572_v3, %v571_v2  ;;  %792 = vmatpush.bf16.msra.mxu1 %v3011_v14  ;;  %831 = vmatpush.bf16.msra.mxu2 %v3015_v16  ;;  %v3007_v22 = vor.u32 %v3195_v19, %v3004_v21  ;;  %v573_v24 = vunpack.c.l.bf16 %v560_v23 }
  0x35   : > { %3286 = vperm.xlu2 %3284, %v3285_v1  }
  0x36   : > { %3269 = vperm.xlu0 %3262, %v3268_v29   ;;  %v4007_v29 = vperm.slane %v573_v24, 0 }
  0x37   : > { %699 = vmatpush.bf16.msra.mxu0 %v3190_v28 }
  0x38   : > { %793 = vmatpush.bf16.msra.mxu1 %v3003_v20  ;;  %832 = vmatpush.bf16.msra.mxu2 %v3007_v22  ;;  %v4036_v22 = vld [vmem:[%s5230_s4] ss:$0 sm:$0xff] }
  0x3a   : > { %3280 = vperm.xlu1 %3273, %v3279_v49  }
  0x3b   : > { %700 = vmatpush.bf16.msra.mxu0 %v3189_v30 }
  0x3d   : > { %3291 = vperm.xlu2 %3284, %v3290_v6  }
  0x3f   : > { %701 = vmatpush.bf16.msra.mxu0 %v3188_v31 }
  0x43   : > { %702 = vmatpush.bf16.msra.mxu0 %v3187_v32 }
  0x46   : > { %703 = vmatmul.bf16.vlgmr.msra.gmra.mxu0 %v2922_v35 }
  0x56   : > { %708 = vmatmul.bf16.gmra.mxu0 %v2930_v50 }
  0x66   : > { %713 = vmatmul.bf16.gmra.mxu0 %v2938_v53 }
  0x76   : > { %718 = vmatmul.bf16.gmra.mxu0 %v2946_v56 }
  0x86   : > { %723 = vmatmul.bf16.gmra.mxu0 %v2954_v7 }
  0x8f   : > { %v3287_v2 = vpop.permute.xlu2 %3286 }
  0x90   : > { %v3288_v3 = vunpack.i.l.bf16 %v3287_v2  ;;  %v3289_v5 = vunpack.i.h.bf16 %v3287_v2 }
  0x92   : > { %v643_v6 = vmul.f32 %v3288_v3, %v4007_v29  ;;  %v644_v7 = vmul.f32 %v3289_v5, %v4007_v29 }
  0x96   : > { %728 = vmatmul.bf16.gmra.mxu0 %v2962_v10 }
  0x97   : > { %v3292_v12 = vpop.permute.xlu2 %3291 }
  0x98   : > { %v3293_v13 = vunpack.i.l.bf16 %v3292_v12  ;;  %v3294_v15 = vunpack.i.h.bf16 %v3292_v12 }
  0x9a   : > { %v645_v16 = vmul.f32 %v3293_v13, %v4007_v29  ;;  %v646_v17 = vmul.f32 %v3294_v15, %v4007_v29 }
  0xa0   : > { %v3265_v25 = vpop.permute.xlu0 %3264 }
  0xa1   : > { %v3267_v27 = vunpack.i.h.bf16 %v3265_v25  ;;  %v3266_v28 = vunpack.i.l.bf16 %v3265_v25 }
  0xa3   : > { %v635_v30 = vmul.f32 %v3266_v28, %v4007_v29  ;;  %v636_v31 = vmul.f32 %v3267_v27, %v4007_v29 }
  0xa4   : > { %v3276_v46 = vpop.permute.xlu1 %3275 }
  0xa5   : > { %v3278_v48 = vunpack.i.h.bf16 %v3276_v46  ;;  %v3277_v49 = vunpack.i.l.bf16 %v3276_v46 }
  0xa7   : > { %v639_v50 = vmul.f32 %v3277_v49, %v4007_v29  ;;  %v640_v51 = vmul.f32 %v3278_v48, %v4007_v29 }
  0xa8   : > { %v3270_v36 = vpop.permute.xlu0 %3269 }
  0xa9   : > { %v3272_v38 = vunpack.i.h.bf16 %v3270_v36  ;;  %v3271_v39 = vunpack.i.l.bf16 %v3270_v36 }
  0xab   : > { %v637_v40 = vmul.f32 %v3271_v39, %v4007_v29  ;;  %v638_v41 = vmul.f32 %v3272_v38, %v4007_v29  ;;  %v4068_v38 = vld [vmem:[%s5230_s4 + $0x1] ss:$0 sm:$0xff] }
  0xac   : > { %v3281_v56 = vpop.permute.xlu1 %3280 }
  0xad   : > { %v3283_v58 = vunpack.i.h.bf16 %v3281_v56  ;;  %v3282_v59 = vunpack.i.l.bf16 %v3281_v56 }
  0xaf   : > { %v641_v60 = vmul.f32 %v3282_v59, %v4007_v29  ;;  %v642_v61 = vmul.f32 %v3283_v58, %v4007_v29 }
  0xc3   : > { %v704_v26 = vpop.f32.mrf.mxu0 }
  0xc4   : > { %v705_v33 = vadd.f32 %v704_v26, %v635_v30 }
  0xcb   : > { %v706_v32 = vpop.f32.mrf.mxu0 }
  0xcc   : > { %v707_v34 = vadd.f32 %v706_v32, %v636_v31 }
  0xce   : > { %v741_v35 = vpack.c.bf16 %v707_v34, %v705_v33 }
  0xd0   : > { %3016 = vmatmul.msk.bf16.vlgmr.msra.gmra.mxu1 %vm767_vm0, %v741_v35  ;;  %3022 = vmatmul.msk.bf16.vlgmr.msra.gmra.mxu2 %vm767_vm0, %v741_v35 }
  0xd3   : > { %v709_v37 = vpop.f32.mrf.mxu0 }
  0xd4   : > { %v710_v43 = vadd.f32 %v709_v37, %v637_v40 }
  0xdb   : > { %v711_v42 = vpop.f32.mrf.mxu0 }
  0xdc   : > { %v712_v44 = vadd.f32 %v711_v42, %v638_v41 }
  0xde   : > { %v742_v45 = vpack.c.bf16 %v712_v44, %v710_v43 }
  0xe0   : > { %3017 = vmatmul.msk.bf16.gmra.mxu1 %vm767_vm0, %v742_v45  ;;  %3023 = vmatmul.msk.bf16.gmra.mxu2 %vm767_vm0, %v742_v45 }
  0xe3   : > { %v714_v47 = vpop.f32.mrf.mxu0 }
  0xe4   : > { %v715_v53 = vadd.f32 %v714_v47, %v639_v50 }
  0xeb   : > { %v716_v52 = vpop.f32.mrf.mxu0 }
  0xec   : > { %v717_v54 = vadd.f32 %v716_v52, %v640_v51 }
  0xee   : > { %v743_v55 = vpack.c.bf16 %v717_v54, %v715_v53 }
  0xf0   : > { %3018 = vmatmul.msk.bf16.gmra.mxu1 %vm767_vm0, %v743_v55  ;;  %3024 = vmatmul.msk.bf16.gmra.mxu2 %vm767_vm0, %v743_v55 }
  0xf3   : > { %v719_v57 = vpop.f32.mrf.mxu0 }
  0xf4   : > { %v720_v63 = vadd.f32 %v719_v57, %v641_v60 }
  0xfb   : > { %v721_v62 = vpop.f32.mrf.mxu0 }
  0xfc   : > { %v722_v0 = vadd.f32 %v721_v62, %v642_v61 }
  0xfe   : > { %v744_v1 = vpack.c.bf16 %v722_v0, %v720_v63 }
 0x100   : > { %3019 = vmatmul.msk.bf16.gmra.mxu1 %vm767_vm0, %v744_v1  ;;  %3025 = vmatmul.msk.bf16.gmra.mxu2 %vm767_vm0, %v744_v1 }
 0x103   : > { %v724_v4 = vpop.f32.mrf.mxu0 }
 0x104   : > { %v725_v8 = vadd.f32 %v724_v4, %v643_v6 }
 0x10b   : > { %v726_v9 = vpop.f32.mrf.mxu0 }
 0x10c   : > { %v727_v10 = vadd.f32 %v726_v9, %v644_v7 }
 0x10e   : > { %v745_v11 = vpack.c.bf16 %v727_v10, %v725_v8 }
 0x110   : > { %3020 = vmatmul.msk.bf16.gmra.mxu1 %vm767_vm0, %v745_v11  ;;  %3026 = vmatmul.msk.bf16.gmra.mxu2 %vm767_vm0, %v745_v11 }
 0x113   : > { %v729_v14 = vpop.f32.mrf.mxu0 }
 0x114   : > { %v730_v18 = vadd.f32 %v729_v14, %v645_v16 }
 0x11b   : > { %v731_v19 = vpop.f32.mrf.mxu0 }
 0x11c   : > { %v732_v20 = vadd.f32 %v731_v19, %v646_v17 }
 0x11e   : > { %v746_v21 = vpack.c.bf16 %v732_v20, %v730_v18 }
 0x120   : > { %3021 = vmatmul.msk.bf16.gmra.mxu1 %vm767_vm0, %v746_v21  ;;  %3027 = vmatmul.msk.bf16.gmra.mxu2 %vm767_vm0, %v746_v21 }
 0x14d   : > { %v795_v23 = vpop.f32.mrf.mxu1 }
 0x14e   : > { %v4039_v24 = vadd.f32 %v4036_v22, %v795_v23 }
 0x150   : > { %3361 = vtanh.f32 %v4039_v24  ;;  %v873_v1 = vsub.f32 0.0, %v4039_v24 }
 0x152   : > { %v879_v2 = vmul.f32 1.442695, %v873_v1 }
 0x153   : > { %v4042_v25 = vpop.f32.mrf.mxu2 }
 0x155   : > { %v797_v26 = vpop.f32.mrf.mxu1 }
 0x156   : > { %v3362_v27 = vpop.eup %3361  ;;  %v4045_v28 = vadd.f32 %v4036_v22, %v797_v26 }
 0x157   : > { %915 = vrot.lane.b32.xlu0 %v3362_v27, %s3830_s30 }
 0x158   : > { %3363 = vtanh.f32 %v4045_v28  ;;  %v874_v4 = vsub.f32 0.0, %v4045_v28 }
 0x15a   : > { %v881_v5 = vmul.f32 1.442695, %v874_v4 }
 0x15b   : > { %v4049_v29 = vpop.f32.mrf.mxu2 }
 0x15d   : > { %v800_v30 = vpop.f32.mrf.mxu1 }
 0x15e   : > { %v3364_v31 = vpop.eup %3363  ;;  %v4052_v32 = vadd.f32 %v4036_v22, %v800_v30 }
 0x15f   : > { %917 = vrot.lane.b32.xlu1 %v3364_v31, %s3830_s30 }
 0x160   : > { %3365 = vtanh.f32 %v4052_v32  ;;  %v875_v7 = vsub.f32 0.0, %v4052_v32 }
 0x162   : > { %v883_v9 = vmul.f32 1.442695, %v875_v7 }
 0x163   : > { %v4056_v33 = vpop.f32.mrf.mxu2 }
 0x165   : > { %v802_v39 = vpop.f32.mrf.mxu1 }
 0x166   : > { %v3366_v34 = vpop.eup %3365  ;;  %v4075_v42 = vadd.f32 %v4036_v22, %v802_v39 }
 0x167   : > { %919 = vrot.lane.b32.xlu1 %v3366_v34, %s3830_s30 }
 0x168   : > { %v876_v24 = vsub.f32 0.0, %v4075_v42 }
 0x16a   : > { %v885_v26 = vmul.f32 1.442695, %v876_v24 }
 0x16b   : > { %v4059_v35 = vpop.f32.mrf.mxu2 }
 0x16d   : > { %v805_v45 = vpop.f32.mrf.mxu1 }
 0x16e   : > { %v4084_v47 = vadd.f32 %v4036_v22, %v805_v45 }
 0x170   : > { %v877_v34 = vsub.f32 0.0, %v4084_v47 }
 0x173   : > { %v4061_v36 = vpop.f32.mrf.mxu2 }
 0x175   : > { %v807_v52 = vpop.f32.mrf.mxu1 }
 0x176   : > { %v4094_v53 = vadd.f32 %v4036_v22, %v807_v52 }
 0x17b   : > { %v4063_v37 = vpop.f32.mrf.mxu2 }
 0x183   : > { %v849_v40 = vpop.f32.mrf.mxu2 }
 0x184   : > { %v4071_v41 = vadd.f32 %v4068_v38, %v849_v40  ;;  %v887_v40 = vmul.f32 1.442695, %v877_v34 }
 0x186   : > { %3367 = vtanh.f32 %v4071_v41  ;;  %v984_v16 = vsub.f32 0.0, %v4071_v41 }
 0x187   : > { %3369 = vtanh.f32 %v4075_v42 }
 0x188   : > { %v990_v18 = vmul.f32 1.442695, %v984_v16 }
 0x18b   : > { %v851_v43 = vpop.f32.mrf.mxu2 }
 0x18c   : > { %v3368_v44 = vpop.eup %3367  ;;  %v4078_v46 = vadd.f32 %v4068_v38, %v851_v43 }
 0x18d   : > { %1026 = vrot.lane.b32.xlu2 %v3368_v44, %s3830_s30  ;;  %v3370_v48 = vpop.eup %3369 }
 0x18e   : > { %3371 = vtanh.f32 %v4078_v46 }
 0x18f   : > { %3373 = vtanh.f32 %v4084_v47  ;;  %v985_v47 = vsub.f32 0.0, %v4078_v46 }
 0x193   : > { %v854_v49 = vpop.f32.mrf.mxu2 }
 0x194   : > { %v3372_v50 = vpop.eup %3371  ;;  %v4087_v51 = vadd.f32 %v4068_v38, %v854_v49 }
 0x195   : > { %1028 = vrot.lane.b32.xlu0 %v3372_v50, %s3830_s30  ;;  %921 = vrot.lane.b32.xlu2 %v3370_v48, %s3830_s30  ;;  %v3374_v54 = vpop.eup %3373 }
 0x196   : > { %3375 = vtanh.f32 %v4087_v51 }
 0x197   : > { %3377 = vtanh.f32 %v4094_v53 }
 0x19b   : > { %v856_v55 = vpop.f32.mrf.mxu2 }
 0x19c   : > { %v3376_v56 = vpop.eup %3375  ;;  %v4097_v57 = vadd.f32 %v4068_v38, %v856_v55 }
 0x19d   : > { %1030 = vrot.lane.b32.xlu0 %v3376_v56, %s3830_s30  ;;  %923 = vrot.lane.b32.xlu2 %v3374_v54, %s3830_s30  ;;  %v3378_v58 = vpop.eup %3377  ;;  %v992_v56 = vmul.f32 1.442695, %v985_v47 }
 0x19e   : > { %3379 = vtanh.f32 %v4097_v57 }
 0x1a3   : > { %v859_v59 = vpop.f32.mrf.mxu2 }
 0x1a4   : > { %v3380_v60 = vpop.eup %3379  ;;  %v4104_v61 = vadd.f32 %v4068_v38, %v859_v59  ;;  %v986_v59 = vsub.f32 0.0, %v4087_v51  ;;  %v987_v51 = vsub.f32 0.0, %v4097_v57 }
 0x1a5   : > { %1032 = vrot.lane.b32.xlu1 %v3380_v60, %s3830_s30  ;;  %925 = vrot.lane.b32.xlu0 %v3378_v58, %s3830_s30 }
 0x1a6   : > { %3381 = vtanh.f32 %v4104_v61 }
 0x1ab   : > { %v861_v62 = vpop.f32.mrf.mxu2 }
 0x1ac   : > { %v3382_v63 = vpop.eup %3381  ;;  %v4110_v0 = vadd.f32 %v4068_v38, %v861_v62  ;;  %v994_v62 = vmul.f32 1.442695, %v986_v59 }
 0x1ad   : > { %1034 = vrot.lane.b32.xlu1 %v3382_v63, %s3830_s30 }
 0x1ae   : > { %3383 = vtanh.f32 %v4110_v0  ;;  %v989_v60 = vsub.f32 0.0, %v4110_v0 }
 0x1af   : > { %3385 = vpow2.f32 %v879_v2 }
 0x1b0   : > { %3387 = vpow2.f32 %v881_v5  ;;  %v1000_v2 = vmul.f32 1.442695, %v989_v60  ;;  %v878_v5 = vsub.f32 0.0, %v4094_v53 }
 0x1b4   : > { %v3384_v3 = vpop.eup %3383 }
 0x1b5   : > { %1036 = vrot.lane.b32.xlu2 %v3384_v3, %s3830_s30  ;;  %v3386_v6 = vpop.eup %3385 }
 0x1b6   : > { %v891_v8 = vadd.f32 1.0, %v3386_v6  ;;  %v3388_v10 = vpop.eup %3387  ;;  %v889_v6 = vmul.f32 1.442695, %v878_v5 }
 0x1b7   : > { %v892_v11 = vadd.f32 1.0, %v3388_v10 }
 0x1b8   : > { %3389 = vrcp.f32 %v891_v8  ;;  %v996_v8 = vmul.f32 1.442695, %v987_v51 }
 0x1b9   : > { %3391 = vpow2.f32 %v883_v9 }
 0x1ba   : > { %3393 = vrcp.f32 %v892_v11 }
 0x1be   : > { %v4118_v12 = vpop.eup %3389 }
 0x1bf   : > { %v3392_v15 = vpop.eup %3391 }
 0x1c0   : > { %v893_v17 = vadd.f32 1.0, %v3392_v15  ;;  %v4125_v19 = vpop.eup %3393 }
 0x1c9   : > { %v916_v13 = vpop.permute.xlu0 %915 }
 0x1ca   : > { %v4121_v14 = vmul.f32 %v4118_v12, %v916_v13  ;;  %v988_v13 = vsub.f32 0.0, %v4104_v61 }
 0x1cc   : > { %3395 = vtanh.f32 %v4121_v14  ;;  %v998_v57 = vmul.f32 1.442695, %v988_v13 }
 0x1cd   : > { %3397 = vrcp.f32 %v893_v17 }
 0x1ce   : > { %3399 = vpow2.f32 %v990_v18 }
 0x1d1   : > { %v918_v20 = vpop.permute.xlu1 %917 }
 0x1d2   : > { %v3396_v21 = vpop.eup %3395  ;;  %v4128_v23 = vmul.f32 %v4125_v19, %v918_v20 }
 0x1d3   : > { %951 = vrot.lane.b32.xlu0 %v3396_v21, %s3831_s13  ;;  %v4133_v27 = vpop.eup %3397 }
 0x1d4   : > { %3401 = vtanh.f32 %v4128_v23  ;;  %v3400_v28 = vpop.eup %3399 }
 0x1d5   : > { %3403 = vpow2.f32 %v885_v26  ;;  %v1002_v39 = vadd.f32 1.0, %v3400_v28 }
 0x1d9   : > { %v920_v30 = vpop.permute.xlu1 %919 }
 0x1da   : > { %v3402_v31 = vpop.eup %3401  ;;  %v4136_v32 = vmul.f32 %v4133_v27, %v920_v30 }
 0x1db   : > { %953 = vrot.lane.b32.xlu1 %v3402_v31, %s3831_s13  ;;  %v3404_v41 = vpop.eup %3403 }
 0x1dc   : > { %3405 = vtanh.f32 %v4136_v32  ;;  %v894_v43 = vadd.f32 1.0, %v3404_v41 }
 0x1dd   : > { %3407 = vrcp.f32 %v1002_v39 }
 0x1de   : > { %3409 = vpow2.f32 %v887_v40 }
 0x1df   : > { %3411 = vrcp.f32 %v894_v43 }
 0x1e2   : > { %v3406_v42 = vpop.eup %3405 }
 0x1e3   : > { %955 = vrot.lane.b32.xlu1 %v3406_v42, %s3831_s13  ;;  %v4142_v44 = vpop.eup %3407 }
 0x1e4   : > { %v3410_v49 = vpop.eup %3409 }
 0x1e5   : > { %v895_v50 = vadd.f32 1.0, %v3410_v49  ;;  %v4149_v52 = vpop.eup %3411 }
 0x1e7   : > { %v1027_v45 = vpop.permute.xlu2 %1026 }
 0x1e8   : > { %v4145_v48 = vmul.f32 %v4142_v44, %v1027_v45 }
 0x1ea   : > { %3413 = vtanh.f32 %v4145_v48 }
 0x1eb   : > { %3415 = vrcp.f32 %v895_v50 }
 0x1ef   : > { %v922_v54 = vpop.permute.xlu2 %921 }
 0x1f0   : > { %v3414_v55 = vpop.eup %3413  ;;  %v4152_v58 = vmul.f32 %v4149_v52, %v922_v54 }
 0x1f1   : > { %1062 = vrot.lane.b32.xlu2 %v3414_v55, %s3831_s13  ;;  %v4158_v46 = vpop.eup %3415 }
 0x1f2   : > { %3417 = vtanh.f32 %v4152_v58 }
 0x1f3   : > { %3419 = vpow2.f32 %v992_v56 }
 0x1f7   : > { %v924_v63 = vpop.permute.xlu2 %923 }
 0x1f8   : > { %v3418_v1 = vpop.eup %3417  ;;  %v4161_v3 = vmul.f32 %v4158_v46, %v924_v63 }
 0x1f9   : > { %957 = vrot.lane.b32.xlu2 %v3418_v1, %s3831_s13  ;;  %v3420_v4 = vpop.eup %3419 }
 0x1fa   : > { %3421 = vtanh.f32 %v4161_v3  ;;  %v1003_v0 = vadd.f32 1.0, %v3420_v4 }
 0x1fb   : > { %3423 = vpow2.f32 %v994_v62 }
 0x1fc   : > { %3425 = vpow2.f32 %v1000_v2 }
 0x1fd   : > { %3427 = vrcp.f32 %v1003_v0 }
 0x1fe   : > { %3429 = vpow2.f32 %v889_v6 }
 0x1ff   : > { %3431 = vpow2.f32 %v996_v8 }
 0x200   : > { %v3422_v7 = vpop.eup %3421 }
 0x201   : > { %v3424_v9 = vpop.eup %3423  ;;  %959 = vrot.lane.b32.xlu2 %v3422_v7, %s3831_s13 }
 0x202   : > { %v3426_v10 = vpop.eup %3425  ;;  %v1004_v11 = vadd.f32 1.0, %v3424_v9 }
 0x203   : > { %v1007_v15 = vadd.f32 1.0, %v3426_v10  ;;  %v4169_v53 = vpop.eup %3427 }
 0x204   : > { %3433 = vrcp.f32 %v1004_v11  ;;  %v3430_v18 = vpop.eup %3429 }
 0x205   : > { %3435 = vrcp.f32 %v1007_v15  ;;  %v3432_v20 = vpop.eup %3431  ;;  %v896_v21 = vadd.f32 1.0, %v3430_v18 }
 0x206   : > { %v1005_v24 = vadd.f32 1.0, %v3432_v20 }
 0x207   : > { %v1029_v16 = vpop.permute.xlu0 %1028 }
 0x208   : > { %v4172_v17 = vmul.f32 %v4169_v53, %v1029_v16 }
 0x20a   : > { %3437 = vtanh.f32 %v4172_v17  ;;  %v3434_v26 = vpop.eup %3433 }
 0x20b   : > { %3439 = vpow2.f32 %v998_v57  ;;  %v4175_v28 = vpop.eup %3435 }
 0x20c   : > { %3441 = vrcp.f32 %v896_v21 }
 0x20d   : > { %3443 = vrcp.f32 %v1005_v24 }
 0x20f   : > { %v1031_v61 = vpop.permute.xlu0 %1030  ;;  %v1037_v30 = vpop.permute.xlu2 %1036 }
 0x210   : > { %v3438_v31 = vpop.eup %3437  ;;  %v4177_v34 = vmul.f32 %v3434_v26, %v1031_v61  ;;  %v4180_v39 = vmul.f32 %v4175_v28, %v1037_v30 }
 0x211   : > { %1064 = vrot.lane.b32.xlu0 %v3438_v31, %s3831_s13  ;;  %v3440_v40 = vpop.eup %3439 }
 0x212   : > { %3445 = vtanh.f32 %v4177_v34  ;;  %v1006_v41 = vadd.f32 1.0, %v3440_v40  ;;  %v3442_v42 = vpop.eup %3441 }
 0x213   : > { %3447 = vtanh.f32 %v4180_v39  ;;  %v3444_v43 = vpop.eup %3443 }
 0x214   : > { %3449 = vrcp.f32 %v1006_v41 }
 0x217   : > { %v1033_v45 = vpop.permute.xlu1 %1032  ;;  %v926_v49 = vpop.permute.xlu0 %925 }
 0x218   : > { %v3446_v47 = vpop.eup %3445  ;;  %v4185_v50 = vmul.f32 %v3444_v43, %v1033_v45  ;;  %v4187_v54 = vmul.f32 %v3442_v42, %v926_v49  ;;  %v3046_v45 = vld [vmem:[%s5229_s3 + $0x20] sm:$0xf]  ;;  %v3204_v49 = vld [vmem:[%s5229_s3 + $0x24] sm:$0xf0] }
 0x219   : > { %v3448_v55 = vpop.eup %3447  ;;  %1066 = vrot.lane.b32.xlu0 %v3446_v47, %s3831_s13 }
 0x21a   : > { %3451 = vtanh.f32 %v4185_v50  ;;  %1072 = vrot.lane.b32.xlu2 %v3448_v55, %s3831_s13  ;;  %v3450_v56 = vpop.eup %3449  ;;  %v3203_v55 = vld [vmem:[%s5229_s3 + $0x24] sm:$0xf] }
 0x21b   : > { %3453 = vtanh.f32 %v4187_v54 }
 0x21f   : > { %v1035_v59 = vpop.permute.xlu1 %1034 }
 0x220   : > { %v3452_v60 = vpop.eup %3451  ;;  %v4193_v62 = vmul.f32 %v3450_v56, %v1035_v59  ;;  %v3047_v59 = vor.u32 %v3204_v49, %v3046_v45 }
 0x221   : > { %v3454_v63 = vpop.eup %3453  ;;  %1068 = vrot.lane.b32.xlu1 %v3452_v60, %s3831_s13 }
 0x222   : > { %3455 = vtanh.f32 %v4193_v62  ;;  %961 = vrot.lane.b32.xlu0 %v3454_v63, %s3831_s13  ;;  %v3038_v63 = vld [vmem:[%s5229_s3 + $0x10] sm:$0xf] }
 0x228   : > { %v3456_v1 = vpop.eup %3455 }
 0x229   : > { %1070 = vrot.lane.b32.xlu1 %v3456_v1, %s3831_s13  ;;  %v3202_v1 = vld [vmem:[%s5229_s3 + $0x14] sm:$0xf0] }
 0x245   : > { %v952_v2 = vpop.permute.xlu0 %951 }
 0x246   : > { %v969_v51 = vmul.f32 %v4118_v12, %v952_v2  ;;  %v3201_v2 = vld [vmem:[%s5229_s3 + $0x14] sm:$0xf] }
 0x24b   : > { %v1063_v4 = vpop.permute.xlu2 %1062 }
 0x24c   : > { %v1080_v15 = vmul.f32 %v4142_v44, %v1063_v4  ;;  %v3040_v4 = vld [vmem:[%s5229_s3 + $0x18] sm:$0xf0] }
 0x24d   : > { %v954_v5 = vpop.permute.xlu1 %953 }
 0x24e   : > { %v970_v0 = vmul.f32 %v4125_v19, %v954_v5  ;;  %v3039_v5 = vor.u32 %v3202_v1, %v3038_v63 }
 0x250   : > { %v3295_v6 = vpack.i.bf16 %v970_v0, %v969_v51  ;;  %v3043_v51 = vor.u32 %v3201_v2, %v3040_v4  ;;  %v3030_v0 = vld [vmem:[%s5229_s3] sm:$0xf]  ;;  %v810_v2 = vpop.f32.mrf.mxu1 }
 0x252   : > { %3296 = vrot.lane.b32.xlu0 %v3295_v6, %s3832_s14  ;;  %v3200_v6 = vld [vmem:[%s5229_s3 + $0x4] sm:$0xf0] }
 0x253   : > { %v958_v7 = vpop.permute.xlu2 %957 }
 0x254   : > { %v972_v9 = vmul.f32 %v4149_v52, %v958_v7  ;;  %v3199_v7 = vld [vmem:[%s5229_s3 + $0x4] sm:$0xf] }
 0x255   : > { %v956_v8 = vpop.permute.xlu1 %955 }
 0x256   : > { %v971_v10 = vmul.f32 %v4133_v27, %v956_v8  ;;  %v3031_v8 = vor.u32 %v3200_v6, %v3030_v0 }
 0x258   : > { %v3305_v11 = vpack.i.bf16 %v972_v9, %v971_v10  ;;  %v3032_v9 = vld [vmem:[%s5229_s3 + $0x8] sm:$0xf0]  ;;  %v812_v6 = vpop.f32.mrf.mxu1 }
 0x259   : > { %v3035_v10 = vor.u32 %v3199_v7, %v3032_v9 }
 0x25a   : > { %3306 = vrot.lane.b32.xlu2 %v3305_v11, %s3832_s14 }
 0x25b   : > { %v960_v57 = vpop.permute.xlu2 %959 }
 0x25c   : > { %v973_v52 = vmul.f32 %v4158_v46, %v960_v57  ;;  %v3206_v46 = vld [vmem:[%s5229_s3 + $0x34] sm:$0xf0] }
 0x274   : > { %v1073_v31 = vpop.permute.xlu2 %1072 }
 0x283   : > { %v1065_v13 = vpop.permute.xlu0 %1064 }
 0x284   : > { %v1081_v12 = vmul.f32 %v4169_v53, %v1065_v13  ;;  %v1085_v53 = vmul.f32 %v4175_v28, %v1073_v31  ;;  %v3056_v28 = vld [vmem:[%s5229_s3 + $0x38] sm:$0xf0] }
 0x286   : > { %v3300_v16 = vpack.i.bf16 %v1081_v12, %v1080_v15 }
 0x288   : > { %3301 = vrot.lane.b32.xlu1 %v3300_v16, %s3830_s30 }
 0x28b   : > { %v1067_v19 = vpop.permute.xlu0 %1066 }
 0x28c   : > { %v1082_v20 = vmul.f32 %v3434_v26, %v1067_v19  ;;  %v3054_v26 = vld [vmem:[%s5229_s3 + $0x30] sm:$0xf] }
 0x293   : > { %v1069_v18 = vpop.permute.xlu1 %1068 }
 0x294   : > { %v1083_v21 = vmul.f32 %v3444_v43, %v1069_v18  ;;  %v962_v24 = vpop.permute.xlu0 %961  ;;  %v3055_v43 = vor.u32 %v3206_v46, %v3054_v26 }
 0x295   : > { %v974_v27 = vmul.f32 %v3442_v42, %v962_v24  ;;  %v3205_v42 = vld [vmem:[%s5229_s3 + $0x34] sm:$0xf] }
 0x296   : > { %v3310_v61 = vpack.i.bf16 %v1083_v21, %v1082_v20  ;;  %v3059_v47 = vor.u32 %v3205_v42, %v3056_v28  ;;  %1205 = vmatpush.bf16.msrb.mxu0 %v3055_v43  ;;  %3228 = vmatpush.bf16.msrb.mxu1 %v3055_v43 }
 0x297   : > { %v3315_v30 = vpack.i.bf16 %v974_v27, %v973_v52 }
 0x298   : > { %3311 = vrot.lane.b32.xlu0 %v3310_v61, %s3830_s30  ;;  %1229 = vmatpush.bf16.msra.mxu3 %v3059_v47 }
 0x299   : > { %3316 = vrot.lane.b32.xlu1 %v3315_v30, %s3832_s14 }
 0x29a   : > { %1206 = vmatpush.bf16.msrb.mxu0 %v3047_v59  ;;  %3229 = vmatpush.bf16.msrb.mxu1 %v3047_v59 }
 0x29b   : > { %v1071_v44 = vpop.permute.xlu1 %1070 }
 0x29c   : > { %v1084_v40 = vmul.f32 %v3450_v56, %v1071_v44  ;;  %v3048_v56 = vld [vmem:[%s5229_s3 + $0x28] sm:$0xf0] }
 0x29d   : > { %v3051_v60 = vor.u32 %v3203_v55, %v3048_v56 }
 0x29e   : > { %v3320_v41 = vpack.i.bf16 %v1085_v53, %v1084_v40  ;;  %1207 = vmatpush.bf16.msrb.mxu0 %v3039_v5  ;;  %3230 = vmatpush.bf16.msrb.mxu1 %v3039_v5 }
 0x29f   : > { %1230 = vmatpush.bf16.msra.mxu3 %v3051_v60 }
 0x2a0   : > { %3321 = vrot.lane.b32.xlu2 %v3320_v41, %s3830_s30 }
 0x2a2   : > { %1208 = vmatpush.bf16.msrb.mxu0 %v3031_v8  ;;  %3231 = vmatpush.bf16.msrb.mxu1 %v3031_v8 }
 0x2a3   : > { %1231 = vmatpush.bf16.msra.mxu3 %v3043_v51 }
 0x2a7   : > { %1232 = vmatpush.bf16.msra.mxu3 %v3035_v10 }
 0x2b4   : > { %v4281_v21 = vpop.permute.xlu2 %3306 }
 0x2b5   : > { %v3309_v27 = vunpack.i.h.bf16 %v4281_v21  ;;  %v3308_v61 = vunpack.i.l.bf16 %v4281_v21 }
 0x2c4   : > { %v4261_v11 = vpop.permute.xlu0 %3296 }
 0x2c5   : > { %v3299_v15 = vunpack.i.h.bf16 %v4261_v11  ;;  %v3298_v12 = vunpack.i.l.bf16 %v4261_v11 }
 0x2fa   : > { %v4263_v13 = vpop.permute.xlu1 %3301  ;;  %v4283_v24 = vpop.permute.xlu2 %3321 }
 0x2fb   : > { %v3304_v16 = vunpack.i.h.bf16 %v4263_v13  ;;  %v3303_v19 = vunpack.i.l.bf16 %v4263_v13  ;;  %v3324_v53 = vunpack.i.h.bf16 %v4283_v24  ;;  %v3323_v40 = vunpack.i.l.bf16 %v4283_v24 }
 0x2fd   : > { %v1134_v57 = vsel %vm767_vm0, %v3298_v12, %v3303_v19  ;;  %v1135_v18 = vsel %vm767_vm0, %v3299_v15, %v3304_v16 }
 0x2fe   : > { %v1148_v20 = vpack.c.bf16 %v1135_v18, %v1134_v57  ;;  %v815_v18 = vpop.f32.mrf.mxu1 }
 0x300   : > { %3060 = vmatmul.msk.bf16.vlgmr.msrb.gmra.mxu0 %vm1191_vm1, %v1148_v20  ;;  %3063 = vmatmul.msk.bf16.vlgmr.msra.gmra.mxu3 %vm1191_vm1, %v1148_v20 }
 0x30a   : > { %v4285_v52 = vpop.permute.xlu0 %3311 }
 0x30b   : > { %v4289_v30 = vpop.permute.xlu1 %3316  ;;  %v3314_v31 = vunpack.i.h.bf16 %v4285_v52  ;;  %v3313_v44 = vunpack.i.l.bf16 %v4285_v52 }
 0x30c   : > { %v3319_v41 = vunpack.i.h.bf16 %v4289_v30  ;;  %v3318_v26 = vunpack.i.l.bf16 %v4289_v30  ;;  %v4596_v30 = vld [vmem:[%s5233_s7] ss:$0 sm:$0xff] }
 0x30d   : > { %v1136_v46 = vsel %vm767_vm0, %v3308_v61, %v3313_v44  ;;  %v1137_v42 = vsel %vm767_vm0, %v3309_v27, %v3314_v31 }
 0x30e   : > { %v1139_v43 = vsel %vm767_vm0, %v3319_v41, %v3324_v53  ;;  %v1138_v28 = vsel %vm767_vm0, %v3318_v26, %v3323_v40  ;;  %v1149_v45 = vpack.c.bf16 %v1137_v42, %v1136_v46 }
 0x30f   : > { %v1150_v49 = vpack.c.bf16 %v1139_v43, %v1138_v28 }
 0x310   : > { %3061 = vmatmul.msk.bf16.gmra.mxu0 %vm1191_vm1, %v1149_v45  ;;  %3064 = vmatmul.msk.bf16.gmra.mxu3 %vm1191_vm1, %v1149_v45 }
 0x311   : > { %3062 = vmatmul.msk.bf16.vlgmr.msrb.gmra.mxu1 %vm1191_vm1, %v1150_v49 }
 0x320   : > { %3065 = vmatmul.msk.bf16.gmra.mxu3 %vm1191_vm1, %v1150_v49  ;;  %v817_v49 = vpop.f32.mrf.mxu1 }
 0x383   : > { %v1234_v47 = vpop.f32.mrf.mxu3 }
 0x384   : > { %v1423_v55 = vadd.f32 %v1234_v47, %v4042_v25 }
 0x386   : > { %v4323_v56 = vadd.f32 %v4068_v38, %v1423_v55 }
 0x388   : > { %3457 = vtanh.f32 %v4323_v56 }
 0x38b   : > { %v1236_v59 = vpop.f32.mrf.mxu3 }
 0x38c   : > { %v1424_v60 = vadd.f32 %v1236_v59, %v4049_v29 }
 0x38e   : > { %v3458_v63 = vpop.eup %3457  ;;  %v4328_v1 = vadd.f32 %v4068_v38, %v1424_v60 }
 0x38f   : > { %1507 = vrot.lane.b32.xlu0 %v3458_v63, %s3830_s30 }
 0x390   : > { %3459 = vtanh.f32 %v4328_v1 }
 0x393   : > { %v1239_v4 = vpop.f32.mrf.mxu3 }
 0x394   : > { %v1425_v25 = vadd.f32 %v1239_v4, %v4056_v33  ;;  %v1210_v33 = vpop.f32.mrf.mxu0 }
 0x395   : > { %v1249_v45 = vadd.f32 %v1210_v33, %v810_v2 }
 0x396   : > { %v3460_v5 = vpop.eup %3459  ;;  %v4334_v51 = vadd.f32 %v4068_v38, %v1425_v25 }
 0x397   : > { %1509 = vrot.lane.b32.xlu1 %v3460_v5, %s3830_s30  ;;  %v4359_v47 = vadd.f32 %v4036_v22, %v1249_v45 }
 0x398   : > { %3461 = vtanh.f32 %v4334_v51 }
 0x39b   : > { %v1241_v29 = vpop.f32.mrf.mxu3 }
 0x39c   : > { %v1426_v0 = vadd.f32 %v1241_v29, %v4059_v35  ;;  %v1212_v42 = vpop.f32.mrf.mxu0 }
 0x39e   : > { %v4340_v7 = vadd.f32 %v4068_v38, %v1426_v0  ;;  %v3462_v8 = vpop.eup %3461 }
 0x39f   : > { %1511 = vrot.lane.b32.xlu2 %v3462_v8, %s3830_s30  ;;  %v1436_v8 = vsub.f32 0.0, %v4328_v1 }
 0x3a0   : > { %3463 = vtanh.f32 %v4340_v7 }
 0x3a1   : > { %v1443_v33 = vmul.f32 1.442695, %v1436_v8 }
 0x3a3   : > { %v1244_v9 = vpop.f32.mrf.mxu3 }
 0x3a4   : > { %v1427_v10 = vadd.f32 %v1244_v9, %v4061_v36  ;;  %v1250_v36 = vadd.f32 %v1212_v42, %v812_v6  ;;  %v1215_v60 = vpop.f32.mrf.mxu0  ;;  %v1438_v42 = vsub.f32 0.0, %v4340_v7 }
 0x3a5   : > { %v1251_v63 = vadd.f32 %v1215_v60, %v815_v18 }
 0x3a6   : > { %v4346_v57 = vadd.f32 %v4068_v38, %v1427_v10  ;;  %v3464_v20 = vpop.eup %3463  ;;  %v1437_v10 = vsub.f32 0.0, %v4334_v51 }
 0x3a7   : > { %1513 = vrot.lane.b32.xlu0 %v3464_v20, %s3830_s30  ;;  %v4372_v2 = vadd.f32 %v4036_v22, %v1251_v63 }
 0x3a8   : > { %3465 = vtanh.f32 %v4346_v57  ;;  %v1445_v18 = vmul.f32 1.442695, %v1437_v10 }
 0x3ab   : > { %v1246_v35 = vpop.f32.mrf.mxu3 }
 0x3ac   : > { %v1428_v46 = vadd.f32 %v1246_v35, %v4063_v37  ;;  %v4362_v37 = vadd.f32 %v4036_v22, %v1250_v36  ;;  %v1217_v20 = vpop.f32.mrf.mxu0  ;;  %v1447_v36 = vmul.f32 1.442695, %v1438_v42 }
 0x3ae   : > { %v3466_v43 = vpop.eup %3465  ;;  %v4352_v28 = vadd.f32 %v4068_v38, %v1428_v46  ;;  %v820_v38 = vpop.f32.mrf.mxu1  ;;  %v1252_v46 = vadd.f32 %v1217_v20, %v817_v49  ;;  %v1439_v49 = vsub.f32 0.0, %v4346_v57 }
 0x3af   : > { %1515 = vrot.lane.b32.xlu1 %v3466_v43, %s3830_s30  ;;  %1477 = vrot.lane.b32.xlu0 %v4145_v48, %s3832_s14 }
 0x3b0   : > { %3467 = vtanh.f32 %v4352_v28  ;;  %v4394_v43 = vadd.f32 %v4036_v22, %v1252_v46  ;;  %v1449_v60 = vmul.f32 1.442695, %v1439_v49 }
 0x3b1   : > { %3469 = vtanh.f32 %v4359_v47 }
 0x3b2   : > { %3471 = vtanh.f32 %v4362_v37 }
 0x3b3   : > { %3473 = vtanh.f32 %v4372_v2 }
 0x3b6   : > { %v3468_v55 = vpop.eup %3467  ;;  %v822_v4 = vpop.f32.mrf.mxu1 }
 0x3b7   : > { %1479 = vrot.lane.b32.xlu1 %v4172_v17, %s3832_s14  ;;  %1517 = vrot.lane.b32.xlu2 %v3468_v55, %s3830_s30  ;;  %v3470_v59 = vpop.eup %3469 }
 0x3b8   : > { %v3472_v48 = vpop.eup %3471 }
 0x3b9   : > { %v3474_v25 = vpop.eup %3473 }
 0x3be   : > { %v1220_v17 = vpop.f32.mrf.mxu1 }
 0x3bf   : > { %1333 = vrot.lane.b32.xlu1 %v3470_v59, %s3830_s30  ;;  %1335 = vrot.lane.b32.xlu2 %v3472_v48, %s3830_s30  ;;  %v1253_v5 = vadd.f32 %v1220_v17, %v820_v38 }
 0x3c1   : > { %v4379_v29 = vadd.f32 %v4036_v22, %v1253_v5 }
 0x3c3   : > { %3475 = vtanh.f32 %v4379_v29 }
 0x3c6   : > { %v1222_v38 = vpop.f32.mrf.mxu1 }
 0x3c7   : > { %1483 = vrot.lane.b32.xlu1 %v4185_v50, %s3832_s14  ;;  %v1435_v50 = vsub.f32 0.0, %v4323_v56  ;;  %v1254_v17 = vadd.f32 %v1222_v38, %v822_v4 }
 0x3c9   : > { %v3476_v0 = vpop.eup %3475  ;;  %v1441_v6 = vmul.f32 1.442695, %v1435_v50  ;;  %v4406_v57 = vadd.f32 %v4036_v22, %v1254_v17  ;;  %v1261_v22 = vsub.f32 0.0, %v4359_v47 }
 0x3cb   : > { %3477 = vpow2.f32 %v1441_v6  ;;  %v1267_v10 = vmul.f32 1.442695, %v1261_v22 }
 0x3cc   : > { %3479 = vpow2.f32 %v1443_v33 }
 0x3cf   : > { %1337 = vrot.lane.b32.xlu1 %v3474_v25, %s3830_s30 }
 0x3d1   : > { %v3478_v9 = vpop.eup %3477 }
 0x3d2   : > { %v3480_v35 = vpop.eup %3479 }
 0x3d3   : > { %v1454_v56 = vadd.f32 1.0, %v3480_v35 }
 0x3d7   : > { %1487 = vrot.lane.b32.xlu1 %v4180_v39, %s3832_s14  ;;  %v1453_v39 = vadd.f32 1.0, %v3478_v9 }
 0x3d9   : > { %3481 = vrcp.f32 %v1453_v39 }
 0x3da   : > { %3483 = vpow2.f32 %v1445_v18 }
 0x3db   : > { %3485 = vrcp.f32 %v1454_v56 }
 0x3dc   : > { %3487 = vtanh.f32 %v4394_v43 }
 0x3dd   : > { %3489 = vpow2.f32 %v1447_v36 }
 0x3df   : > { %1341 = vrot.lane.b32.xlu1 %v3476_v0, %s3830_s30  ;;  %v1440_v0 = vsub.f32 0.0, %v4352_v28 }
 0x3e1   : > { %v1451_v4 = vmul.f32 1.442695, %v1440_v0 }
 0x3e7   : > { %1305 = vrot.lane.b32.xlu1 %v4128_v23, %s3832_s14  ;;  %v4391_v23 = vpop.eup %3481 }
 0x3e8   : > { %v3484_v51 = vpop.eup %3483 }
 0x3e9   : > { %v1455_v55 = vadd.f32 1.0, %v3484_v51  ;;  %v4400_v7 = vpop.eup %3485 }
 0x3ea   : > { %v3488_v63 = vpop.eup %3487 }
 0x3eb   : > { %3491 = vrcp.f32 %v1455_v55  ;;  %v3490_v25 = vpop.eup %3489 }
 0x3ec   : > { %3493 = vpow2.f32 %v1449_v60  ;;  %v1456_v6 = vadd.f32 1.0, %v3490_v25 }
 0x3ed   : > { %3495 = vtanh.f32 %v4406_v57 }
 0x3ee   : > { %3497 = vrcp.f32 %v1456_v6 }
 0x3ef   : > { %3499 = vpow2.f32 %v1451_v4 }
 0x3f1   : > { %v4409_v50 = vpop.eup %3491 }
 0x3f2   : > { %v3494_v33 = vpop.eup %3493 }
 0x3f3   : > { %v1457_v9 = vadd.f32 1.0, %v3494_v33  ;;  %v3496_v28 = vpop.eup %3495  ;;  %v1266_v33 = vsub.f32 0.0, %v4406_v57 }
 0x3f4   : > { %v4417_v39 = vpop.eup %3497 }
 0x3f5   : > { %3501 = vrcp.f32 %v1457_v9  ;;  %v3500_v35 = vpop.eup %3499  ;;  %v1277_v9 = vmul.f32 1.442695, %v1266_v33 }
 0x3f6   : > { %3503 = vpow2.f32 %v1267_v10  ;;  %v1458_v47 = vadd.f32 1.0, %v3500_v35 }
 0x3f8   : > { %3505 = vrcp.f32 %v1458_v47 }
 0x3f9   : > { %v1512_v5 = vpop.permute.xlu2 %1511 }
 0x3fa   : > { %v1527_v8 = vmul.f32 %v4409_v50, %v1512_v5  ;;  %v1264_v5 = vsub.f32 0.0, %v4394_v43 }
 0x3fb   : > { %v4423_v46 = vpop.eup %3501 }
 0x3fc   : > { %v1273_v0 = vmul.f32 1.442695, %v1264_v5 }
 0x401   : > { %v1508_v1 = vpop.permute.xlu0 %1507 }
 0x402   : > { %v1525_v45 = vmul.f32 %v4391_v23, %v1508_v1  ;;  %v3504_v1 = vpop.eup %3503 }
 0x403   : > { %v1279_v51 = vadd.f32 1.0, %v3504_v1  ;;  %v4429_v55 = vpop.eup %3505 }
 0x404   : > { %1537 = vrot.lane.b32.xlu2 %v1525_v45, %s3832_s14 }
 0x409   : > { %v1510_v59 = vpop.permute.xlu1 %1509 }
 0x40a   : > { %v1526_v48 = vmul.f32 %v4400_v7, %v1510_v59 }
 0x40c   : > { %1539 = vrot.lane.b32.xlu0 %v1526_v48, %s3832_s14  ;;  %1339 = vrot.lane.b32.xlu2 %v3488_v63, %s3830_s30 }
 0x411   : > { %v1518_v36 = vpop.permute.xlu2 %1517 }
 0x414   : > { %1481 = vrot.lane.b32.xlu0 %v4177_v34, %s3832_s14  ;;  %1541 = vrot.lane.b32.xlu2 %v1527_v8, %s3832_s14  ;;  %v1262_v34 = vsub.f32 0.0, %v4362_v37  ;;  %v1530_v37 = vmul.f32 %v4429_v55, %v1518_v36 }
 0x416   : > { %v1269_v45 = vmul.f32 1.442695, %v1262_v34  ;;  %v1263_v34 = vsub.f32 0.0, %v4372_v2 }
 0x418   : > { %3507 = vpow2.f32 %v1269_v45 }
 0x419   : > { %v1514_v18 = vpop.permute.xlu0 %1513  ;;  %3509 = vrcp.f32 %v1279_v51 }
 0x41a   : > { %v1528_v20 = vmul.f32 %v4417_v39, %v1514_v18 }
 0x41c   : > { %1343 = vrot.lane.b32.xlu2 %v3496_v28, %s3830_s30  ;;  %1543 = vrot.lane.b32.xlu0 %v1528_v20, %s3832_s14 }
 0x41e   : > { %v3508_v38 = vpop.eup %3507 }
 0x41f   : > { %v4433_v59 = vpop.eup %3509  ;;  %v1280_v60 = vadd.f32 1.0, %v3508_v38 }
 0x421   : > { %v1516_v56 = vpop.permute.xlu1 %1515  ;;  %3511 = vrcp.f32 %v1280_v60  ;;  %v1478_v8 = vpop.permute.xlu0 %1477 }
 0x422   : > { %v1529_v42 = vmul.f32 %v4423_v46, %v1516_v56  ;;  %3513 = vpow2.f32 %v1273_v0  ;;  %v1271_v56 = vmul.f32 1.442695, %v1263_v34 }
 0x424   : > { %1545 = vrot.lane.b32.xlu2 %v1529_v42, %s3832_s14  ;;  %1485 = vrot.lane.b32.xlu0 %v4193_v62, %s3832_s14  ;;  %v1336_v62 = vpop.permute.xlu2 %1335 }
 0x427   : > { %v4439_v17 = vpop.eup %3511 }
 0x428   : > { %v1352_v25 = vmul.f32 %v4439_v17, %v1336_v62  ;;  %v3514_v6 = vpop.eup %3513 }
 0x429   : > { %v1480_v49 = vpop.permute.xlu1 %1479  ;;  %v1282_v4 = vadd.f32 1.0, %v3514_v6 }
 0x42a   : > { %v1496_v45 = vmul.f32 %v4400_v7, %v1480_v49 }
 0x42b   : > { %3515 = vrcp.f32 %v1282_v4 }
 0x42c   : > { %1547 = vrot.lane.b32.xlu0 %v1530_v37, %s3832_s14 }
 0x431   : > { %v1334_v48 = vpop.permute.xlu1 %1333  ;;  %v4448_v10 = vpop.eup %3515 }
 0x432   : > { %v1351_v63 = vmul.f32 %v4433_v59, %v1334_v48 }
 0x434   : > { %1363 = vrot.lane.b32.xlu2 %v1351_v63, %s3832_s14  ;;  %1303 = vrot.lane.b32.xlu0 %v4121_v14, %s3832_s14  ;;  %v1495_v14 = vmul.f32 %v4391_v23, %v1478_v8 }
 0x439   : > { %v1484_v36 = vpop.permute.xlu1 %1483 }
 0x43a   : > { %v1498_v0 = vmul.f32 %v4417_v39, %v1484_v36 }
 0x43c   : > { %1365 = vrot.lane.b32.xlu0 %v1352_v25, %s3832_s14 }
 0x441   : > { %v1338_v62 = vpop.permute.xlu1 %1337 }
 0x444   : > { %1307 = vrot.lane.b32.xlu0 %v4136_v32, %s3832_s14 }
 0x449   : > { %v1488_v4 = vpop.permute.xlu1 %1487 }
 0x45e   : > { %v1538_v22 = vpop.permute.xlu2 %1537 }
 0x45f   : > { %v1555_v28 = vadd.f32 %v1538_v22, %v1495_v14 }
 0x461   : > { %3517 = vtanh.f32 %v1555_v28 }
 0x462   : > { %3519 = vpow2.f32 %v1277_v9 }
 0x466   : > { %v1340_v32 = vpop.permute.xlu2 %1339 }
 0x467   : > { %v3518_v18 = vpop.eup %3517  ;;  %v1354_v43 = vmul.f32 %v4448_v10, %v1340_v32 }
 0x468   : > { %1573 = vrot.lane.b32.xlu1 %v3518_v18, %s3830_s30  ;;  %v3520_v20 = vpop.eup %3519 }
 0x469   : > { %1369 = vrot.lane.b32.xlu0 %v1354_v43, %s3832_s14  ;;  %v1284_v57 = vadd.f32 1.0, %v3520_v20  ;;  %v1342_v43 = vpop.permute.xlu1 %1341 }
 0x46b   : > { %3521 = vrcp.f32 %v1284_v57  ;;  %v1500_v57 = vmul.f32 %v4429_v55, %v1488_v4 }
 0x46c   : > { %3523 = vpow2.f32 %v1271_v56 }
 0x46e   : > { %v1542_v35 = vpop.permute.xlu2 %1541 }
 0x470   : > { %1309 = vrot.lane.b32.xlu1 %v4152_v58, %s3832_s14 }
 0x471   : > { %1311 = vrot.lane.b32.xlu0 %v4161_v3, %s3832_s14  ;;  %v4458_v47 = vpop.eup %3521  ;;  %v1265_v3 = vsub.f32 0.0, %v4379_v29 }
 0x472   : > { %v3524_v58 = vpop.eup %3523 }
 0x473   : > { %v1281_v38 = vadd.f32 1.0, %v3524_v58  ;;  %v1275_v63 = vmul.f32 1.442695, %v1265_v3 }
 0x476   : > { %v1344_v42 = vpop.permute.xlu2 %1343 }
 0x477   : > { %v1356_v1 = vmul.f32 %v4458_v47, %v1344_v42 }
 0x479   : > { %1373 = vrot.lane.b32.xlu0 %v1356_v1, %s3832_s14 }
 0x47e   : > { %v1540_v51 = vpop.permute.xlu0 %1539  ;;  %v1546_v32 = vpop.permute.xlu2 %1545 }
 0x47f   : > { %v1556_v37 = vadd.f32 %v1540_v51, %v1496_v45 }
 0x481   : > { %3525 = vtanh.f32 %v1556_v37  ;;  %v1306_v37 = vpop.permute.xlu1 %1305 }
 0x482   : > { %3527 = vrcp.f32 %v1281_v38  ;;  %v1322_v58 = vmul.f32 %v4439_v17, %v1306_v37 }
 0x486   : > { %v1482_v2 = vpop.permute.xlu0 %1481 }
 0x487   : > { %v3526_v60 = vpop.eup %3525  ;;  %v1497_v48 = vmul.f32 %v4409_v50, %v1482_v2 }
 0x488   : > { %1575 = vrot.lane.b32.xlu2 %v3526_v60, %s3830_s30  ;;  %v4466_v49 = vpop.eup %3527 }
 0x489   : > { %v1557_v25 = vadd.f32 %v1542_v35, %v1497_v48  ;;  %v1353_v5 = vmul.f32 %v4466_v49, %v1338_v62 }
 0x48b   : > { %3529 = vtanh.f32 %v1557_v25 }
 0x48c   : > { %3531 = vpow2.f32 %v1275_v63 }
 0x48e   : > { %v1544_v6 = vpop.permute.xlu0 %1543  ;;  %v1364_v51 = vpop.permute.xlu2 %1363 }
 0x48f   : > { %v1558_v8 = vadd.f32 %v1544_v6, %v1498_v0 }
 0x490   : > { %1367 = vrot.lane.b32.xlu2 %v1353_v5, %s3832_s14 }
 0x491   : > { %v3530_v29 = vpop.eup %3529  ;;  %3533 = vtanh.f32 %v1558_v8 }
 0x492   : > { %v3532_v33 = vpop.eup %3531  ;;  %1577 = vrot.lane.b32.xlu1 %v3530_v29, %s3830_s30 }
 0x493   : > { %v1283_v14 = vadd.f32 1.0, %v3532_v33 }
 0x495   : > { %3535 = vrcp.f32 %v1283_v14 }
 0x496   : > { %v1486_v22 = vpop.permute.xlu0 %1485 }
 0x497   : > { %v3534_v9 = vpop.eup %3533  ;;  %v1499_v28 = vmul.f32 %v4423_v46, %v1486_v22 }
 0x498   : > { %1579 = vrot.lane.b32.xlu2 %v3534_v9, %s3830_s30 }
 0x499   : > { %v1559_v18 = vadd.f32 %v1546_v32, %v1499_v28 }
 0x49a   : > { %1313 = vrot.lane.b32.xlu1 %v4187_v54, %s3832_s14 }
 0x49b   : > { %3537 = vtanh.f32 %v1559_v18  ;;  %v4476_v20 = vpop.eup %3535 }
 0x49c   : > { %v1355_v35 = vmul.f32 %v4476_v20, %v1342_v43 }
 0x49e   : > { %v1548_v34 = vpop.permute.xlu0 %1547 }
 0x49f   : > { %v1560_v56 = vadd.f32 %v1548_v34, %v1500_v57 }
 0x4a0   : > { %1371 = vrot.lane.b32.xlu2 %v1355_v35, %s3832_s14 }
 0x4a1   : > { %v3538_v42 = vpop.eup %3537  ;;  %3539 = vtanh.f32 %v1560_v56 }
 0x4a2   : > { %1581 = vrot.lane.b32.xlu1 %v3538_v42, %s3830_s30 }
 0x4a6   : > { %v1304_v1 = vpop.permute.xlu0 %1303 }
 0x4a7   : > { %v3540_v45 = vpop.eup %3539  ;;  %v1321_v54 = vmul.f32 %v4433_v59, %v1304_v1  ;;  %v3213_v1 = vld [vmem:[%s5231_s5 + $0x34] sm:$0xf] }
 0x4a8   : > { %1583 = vrot.lane.b32.xlu2 %v3540_v45, %s3830_s30  ;;  %v3095_v45 = vld [vmem:[%s5231_s5 + $0x38] sm:$0xf0] }
 0x4a9   : > { %v1381_v36 = vadd.f32 %v1364_v51, %v1321_v54  ;;  %v3098_v54 = vor.u32 %v3213_v1, %v3095_v45 }
 0x4ab   : > { %3541 = vtanh.f32 %v1381_v36  ;;  %1775 = vmatpush.bf16.msrb.mxu2 %v3098_v54 }
 0x4ae   : > { %v1366_v38 = vpop.permute.xlu0 %1365 }
 0x4af   : > { %v1382_v3 = vadd.f32 %v1366_v38, %v1322_v58 }
 0x4b1   : > { %v3542_v2 = vpop.eup %3541  ;;  %3543 = vtanh.f32 %v1382_v3 }
 0x4b2   : > { %1399 = vrot.lane.b32.xlu1 %v3542_v2, %s3830_s30 }
 0x4b6   : > { %v1308_v63 = vpop.permute.xlu0 %1307 }
 0x4b7   : > { %v3544_v60 = vpop.eup %3543  ;;  %v1323_v4 = vmul.f32 %v4466_v49, %v1308_v63 }
 0x4b8   : > { %1401 = vrot.lane.b32.xlu2 %v3544_v60, %s3830_s30 }
 0x4da   : > { %v1574_v48 = vpop.permute.xlu1 %1573 }
 0x4db   : > { %v1591_v5 = vmul.f32 %v4391_v23, %v1574_v48  ;;  %v1370_v29 = vpop.permute.xlu0 %1369 }
 0x4e2   : > { %v1310_v62 = vpop.permute.xlu1 %1309  ;;  %v1576_v25 = vpop.permute.xlu2 %1575 }
 0x4e3   : > { %v1324_v0 = vmul.f32 %v4448_v10, %v1310_v62  ;;  %v1592_v6 = vmul.f32 %v4400_v7, %v1576_v25  ;;  %v1312_v32 = vpop.permute.xlu0 %1311 }
 0x4e4   : > { %v1325_v7 = vmul.f32 %v4476_v20, %v1312_v32  ;;  %v3069_v32 = vld [vmem:[%s5231_s5] sm:$0xf] }
 0x4e5   : > { %v1384_v8 = vadd.f32 %v1370_v29, %v1324_v0  ;;  %v3325_v33 = vpack.i.bf16 %v1592_v6, %v1591_v5 }
 0x4e7   : > { %3545 = vtanh.f32 %v1384_v8  ;;  %3326 = vrot.lane.b32.xlu0 %v3325_v33, %s3830_s30  ;;  %v3093_v8 = vld [vmem:[%s5231_s5 + $0x30] sm:$0xf] }
 0x4ea   : > { %v1368_v14 = vpop.permute.xlu2 %1367 }
 0x4eb   : > { %v1383_v22 = vadd.f32 %v1368_v14, %v1323_v4  ;;  %v1374_v58 = vpop.permute.xlu0 %1373  ;;  %v3079_v4 = vld [vmem:[%s5231_s5 + $0x18] sm:$0xf0] }
 0x4ed   : > { %v3546_v9 = vpop.eup %3545  ;;  %3547 = vtanh.f32 %v1383_v22 }
 0x4ee   : > { %1405 = vrot.lane.b32.xlu2 %v3546_v9, %s3830_s30  ;;  %v3077_v9 = vld [vmem:[%s5231_s5 + $0x10] sm:$0xf] }
 0x4f2   : > { %v1580_v23 = vpop.permute.xlu2 %1579 }
 0x4f3   : > { %v3548_v28 = vpop.eup %3547  ;;  %v1594_v34 = vmul.f32 %v4417_v39, %v1580_v23  ;;  %v3211_v39 = vld [vmem:[%s5231_s5 + $0x24] sm:$0xf] }
 0x4f4   : > { %1403 = vrot.lane.b32.xlu1 %v3548_v28, %s3830_s30  ;;  %v3210_v28 = vld [vmem:[%s5231_s5 + $0x14] sm:$0xf0] }
 0x4f5   : > { %v3078_v23 = vor.u32 %v3210_v28, %v3077_v9 }
 0x4fa   : > { %v1372_v18 = vpop.permute.xlu2 %1371 }
 0x4fb   : > { %v1385_v43 = vadd.f32 %v1372_v18, %v1325_v7  ;;  %v3208_v7 = vld [vmem:[%s5231_s5 + $0x4] sm:$0xf0]  ;;  %v3207_v18 = vld [vmem:[%s5231_s5 + $0x4] sm:$0xf] }
 0x4fd   : > { %3549 = vtanh.f32 %v1385_v43  ;;  %v3070_v43 = vor.u32 %v3208_v7, %v3069_v32 }
 0x502   : > { %v1584_v3 = vpop.permute.xlu2 %1583 }
 0x503   : > { %v3550_v35 = vpop.eup %3549  ;;  %v1596_v48 = vmul.f32 %v4429_v55, %v1584_v3  ;;  %v3085_v55 = vld [vmem:[%s5231_s5 + $0x20] sm:$0xf] }
 0x504   : > { %v1578_v57 = vpop.permute.xlu1 %1577  ;;  %1407 = vrot.lane.b32.xlu1 %v3550_v35, %s3830_s30 }
 0x505   : > { %v1593_v56 = vmul.f32 %v4409_v50, %v1578_v57  ;;  %v3087_v50 = vld [vmem:[%s5231_s5 + $0x28] sm:$0xf0] }
 0x506   : > { %v3090_v36 = vor.u32 %v3211_v39, %v3087_v50  ;;  %v3071_v57 = vld [vmem:[%s5231_s5 + $0x8] sm:$0xf0] }
 0x507   : > { %v3330_v42 = vpack.i.bf16 %v1594_v34, %v1593_v56  ;;  %v3074_v35 = vor.u32 %v3207_v18, %v3071_v57  ;;  %v4635_v57 = vld [vmem:[%s5233_s7 + $0x1] ss:$0 sm:$0xff] }
 0x508   : > { %1776 = vmatpush.bf16.msrb.mxu2 %v3090_v36 }
 0x509   : > { %3331 = vrot.lane.b32.xlu0 %v3330_v42, %s3830_s30 }
 0x50c   : > { %v1314_v51 = vpop.permute.xlu1 %1313 }
 0x50d   : > { %v1326_v37 = vmul.f32 %v4458_v47, %v1314_v51 }
 0x50f   : > { %v1386_v38 = vadd.f32 %v1374_v58, %v1326_v37 }
 0x511   : > { %3551 = vtanh.f32 %v1386_v38 }
 0x512   : > { %v1402_v25 = vpop.permute.xlu2 %1401 }
 0x513   : > { %v1418_v0 = vmul.f32 %v4439_v17, %v1402_v25  ;;  %v3212_v17 = vld [vmem:[%s5231_s5 + $0x24] sm:$0xf0] }
 0x514   : > { %v1582_v2 = vpop.permute.xlu1 %1581  ;;  %v3086_v14 = vor.u32 %v3212_v17, %v3085_v55 }
 0x515   : > { %v1595_v63 = vmul.f32 %v4423_v46, %v1582_v2  ;;  %v3214_v46 = vld [vmem:[%s5231_s5 + $0x34] sm:$0xf0] }
 0x516   : > { %v3094_v33 = vor.u32 %v3214_v46, %v3093_v8 }
 0x517   : > { %v3552_v60 = vpop.eup %3551  ;;  %v3335_v62 = vpack.i.bf16 %v1596_v48, %v1595_v63 }
 0x518   : > { %1409 = vrot.lane.b32.xlu2 %v3552_v60, %s3830_s30  ;;  %1736 = vmatpush.bf16.msra.mxu1 %v3094_v33 }
 0x519   : > { %3336 = vrot.lane.b32.xlu0 %v3335_v62, %s3830_s30 }
 0x51c   : > { %1737 = vmatpush.bf16.msra.mxu1 %v3086_v14 }
 0x520   : > { %1738 = vmatpush.bf16.msra.mxu1 %v3078_v23 }
 0x524   : > { %v1400_v5 = vpop.permute.xlu1 %1399  ;;  %1739 = vmatpush.bf16.msra.mxu1 %v3070_v43 }
 0x525   : > { %v1417_v6 = vmul.f32 %v4433_v59, %v1400_v5  ;;  %v3209_v59 = vld [vmem:[%s5231_s5 + $0x14] sm:$0xf] }
 0x526   : > { %v3082_v22 = vor.u32 %v3209_v59, %v3079_v4 }
 0x527   : > { %v3340_v29 = vpack.i.bf16 %v1418_v0, %v1417_v6 }
 0x528   : > { %1777 = vmatpush.bf16.msrb.mxu2 %v3082_v22 }
 0x529   : > { %3341 = vrot.lane.b32.xlu0 %v3340_v29, %s3832_s14 }
 0x52c   : > { %1778 = vmatpush.bf16.msrb.mxu2 %v3074_v35 }
 0x548   : > { %v1406_v39 = vpop.permute.xlu2 %1405 }
 0x549   : > { %v1420_v51 = vmul.f32 %v4448_v10, %v1406_v39 }
 0x559   : > { %v3327_v34 = vpop.permute.xlu0 %3326 }
 0x55a   : > { %v3329_v56 = vunpack.i.h.bf16 %v3327_v34  ;;  %v3328_v42 = vunpack.i.l.bf16 %v3327_v34 }
 0x55c   : > { %v1622_v1 = vsel %vm767_vm0, %v3299_v15, %v3329_v56  ;;  %v1621_v45 = vsel %vm767_vm0, %v3298_v12, %v3328_v42 }
 0x55d   : > { %v1668_v54 = vpack.c.bf16 %v1622_v1, %v1621_v45 }
 0x55f   : > { %3099 = vmatmul.msk.bf16.vlgmr.msra.gmra.mxu1 %vm1191_vm1, %v1668_v54  ;;  %3105 = vmatmul.msk.bf16.vlgmr.msrb.gmra.mxu2 %vm1191_vm1, %v1668_v54 }
 0x566   : > { %v1404_v50 = vpop.permute.xlu1 %1403 }
 0x567   : > { %v1419_v36 = vmul.f32 %v4466_v49, %v1404_v50 }
 0x569   : > { %v3345_v37 = vpack.i.bf16 %v1420_v51, %v1419_v36 }
 0x56b   : > { %3346 = vrot.lane.b32.xlu1 %v3345_v37, %s3832_s14 }
 0x572   : > { %v1410_v58 = vpop.permute.xlu2 %1409 }
 0x573   : > { %v1422_v11 = vmul.f32 %v4458_v47, %v1410_v58 }
 0x576   : > { %v1408_v15 = vpop.permute.xlu1 %1407 }
 0x577   : > { %v1421_v12 = vmul.f32 %v4476_v20, %v1408_v15 }
 0x579   : > { %v3350_v38 = vpack.i.bf16 %v1422_v11, %v1421_v12 }
 0x57b   : > { %v3332_v3 = vpop.permute.xlu0 %3331  ;;  %3351 = vrot.lane.b32.xlu2 %v3350_v38, %s3832_s14 }
 0x57c   : > { %v3334_v2 = vunpack.i.h.bf16 %v3332_v3  ;;  %v3333_v60 = vunpack.i.l.bf16 %v3332_v3 }
 0x57e   : > { %v1623_v10 = vsel %vm767_vm0, %v3308_v61, %v3333_v60  ;;  %v1624_v49 = vsel %vm767_vm0, %v3309_v27, %v3334_v2 }
 0x57f   : > { %v1669_v48 = vpack.c.bf16 %v1624_v49, %v1623_v10 }
 0x581   : > { %3100 = vmatmul.msk.bf16.gmra.mxu1 %vm1191_vm1, %v1669_v48  ;;  %3106 = vmatmul.msk.bf16.gmra.mxu2 %vm1191_vm1, %v1669_v48 }
 0x58b   : > { %v3337_v47 = vpop.permute.xlu0 %3336 }
 0x58c   : > { %v3339_v20 = vunpack.i.h.bf16 %v3337_v47  ;;  %v3338_v63 = vunpack.i.l.bf16 %v3337_v47 }
 0x58e   : > { %v1625_v62 = vsel %vm767_vm0, %v3318_v26, %v3338_v63  ;;  %v1626_v61 = vsel %vm767_vm0, %v3319_v41, %v3339_v20 }
 0x58f   : > { %v1670_v25 = vpack.c.bf16 %v1626_v61, %v1625_v62 }
 0x591   : > { %3101 = vmatmul.msk.bf16.gmra.mxu1 %vm1191_vm1, %v1670_v25  ;;  %3107 = vmatmul.msk.bf16.gmra.mxu2 %vm1191_vm1, %v1670_v25 }
 0x59b   : > { %v3342_v21 = vpop.permute.xlu0 %3341 }
 0x59c   : > { %v3344_v27 = vunpack.i.h.bf16 %v3342_v21  ;;  %v3343_v5 = vunpack.i.l.bf16 %v3342_v21 }
 0x59e   : > { %v1651_v0 = vsel %vm767_vm0, %v3343_v5, %v3303_v19  ;;  %v1652_v26 = vsel %vm767_vm0, %v3344_v27, %v3304_v16 }
 0x59f   : > { %v1671_v6 = vpack.c.bf16 %v1652_v26, %v1651_v0 }
 0x5a1   : > { %3102 = vmatmul.msk.bf16.gmra.mxu1 %vm1191_vm1, %v1671_v6  ;;  %3108 = vmatmul.msk.bf16.gmra.mxu2 %vm1191_vm1, %v1671_v6 }
 0x5d5   : > { %v3352_v4 = vpop.permute.xlu2 %3351 }
 0x5d6   : > { %v3354_v14 = vunpack.i.h.bf16 %v3352_v4  ;;  %v3353_v22 = vunpack.i.l.bf16 %v3352_v4 }
 0x5d8   : > { %v1656_v52 = vsel %vm767_vm0, %v3354_v14, %v3324_v53 }
 0x5dc   : > { %v1741_v41 = vpop.f32.mrf.mxu1 }
 0x5dd   : > { %v1813_v29 = vadd.f32 %v4596_v30, %v1741_v41  ;;  %v3347_v8 = vpop.permute.xlu1 %3346 }
 0x5de   : > { %v3349_v46 = vunpack.i.h.bf16 %v3347_v8  ;;  %v3348_v19 = vunpack.i.l.bf16 %v3347_v8 }
 0x5df   : > { %3553 = vtanh.f32 %v1813_v29  ;;  %v1819_v58 = vsub.f32 0.0, %v1813_v29 }
 0x5e0   : > { %v1653_v13 = vsel %vm767_vm0, %v3348_v19, %v3313_v44  ;;  %v1654_v16 = vsel %vm767_vm0, %v3349_v46, %v3314_v31  ;;  %v1655_v31 = vsel %vm767_vm0, %v3353_v22, %v3323_v40 }
 0x5e1   : > { %v1672_v55 = vpack.c.bf16 %v1654_v16, %v1653_v13  ;;  %v1673_v9 = vpack.c.bf16 %v1656_v52, %v1655_v31  ;;  %v1825_v15 = vmul.f32 1.442695, %v1819_v58 }
 0x5e2   : > { %v4616_v28 = vpop.f32.mrf.mxu2 }
 0x5e3   : > { %3103 = vmatmul.msk.bf16.gmra.mxu1 %vm1191_vm1, %v1672_v55  ;;  %3109 = vmatmul.msk.bf16.gmra.mxu2 %vm1191_vm1, %v1672_v55 }
 0x5e4   : > { %v1743_v33 = vpop.f32.mrf.mxu1 }
 0x5e5   : > { %v3554_v17 = vpop.eup %3553  ;;  %v1814_v59 = vadd.f32 %v4596_v30, %v1743_v33 }
 0x5e6   : > { %1861 = vrot.lane.b32.xlu0 %v3554_v17, %s3830_s30 }
 0x5e7   : > { %3555 = vtanh.f32 %v1814_v59  ;;  %v1820_v11 = vsub.f32 0.0, %v1814_v59 }
 0x5e9   : > { %v1827_v12 = vmul.f32 1.442695, %v1820_v11 }
 0x5ea   : > { %v4620_v23 = vpop.f32.mrf.mxu2 }
 0x5ed   : > { %v3556_v44 = vpop.eup %3555 }
 0x5ee   : > { %1863 = vrot.lane.b32.xlu1 %v3556_v44, %s3830_s30 }
 0x5f3   : > { %3104 = vmatmul.msk.bf16.gmra.mxu1 %vm1191_vm1, %v1673_v9  ;;  %3110 = vmatmul.msk.bf16.gmra.mxu2 %vm1191_vm1, %v1673_v9 }
 0x5fe   : > { %v1746_v32 = vpop.f32.mrf.mxu1 }
 0x5ff   : > { %v1815_v7 = vadd.f32 %v4596_v30, %v1746_v32 }
 0x601   : > { %3557 = vtanh.f32 %v1815_v7  ;;  %v1821_v2 = vsub.f32 0.0, %v1815_v7 }
 0x603   : > { %v1829_v48 = vmul.f32 1.442695, %v1821_v2 }
 0x604   : > { %v4623_v53 = vpop.f32.mrf.mxu2 }
 0x606   : > { %v1748_v56 = vpop.f32.mrf.mxu1 }
 0x607   : > { %v3558_v24 = vpop.eup %3557  ;;  %v1816_v42 = vadd.f32 %v4596_v30, %v1748_v56 }
 0x608   : > { %1865 = vrot.lane.b32.xlu1 %v3558_v24, %s3830_s30 }
 0x609   : > { %v1822_v46 = vsub.f32 0.0, %v1816_v42 }
 0x60b   : > { %v1831_v33 = vmul.f32 1.442695, %v1822_v46 }
 0x60c   : > { %v4626_v40 = vpop.f32.mrf.mxu2 }
 0x60e   : > { %v1751_v39 = vpop.f32.mrf.mxu1 }
 0x60f   : > { %v4645_v50 = vadd.f32 %v4596_v30, %v1751_v39 }
 0x611   : > { %v1823_v44 = vsub.f32 0.0, %v4645_v50 }
 0x613   : > { %v1833_v32 = vmul.f32 1.442695, %v1823_v44 }
 0x614   : > { %v4628_v18 = vpop.f32.mrf.mxu2 }
 0x616   : > { %v1753_v49 = vpop.f32.mrf.mxu1 }
 0x617   : > { %v4656_v47 = vadd.f32 %v4596_v30, %v1753_v49 }
 0x61c   : > { %v4630_v43 = vpop.f32.mrf.mxu2 }
 0x624   : > { %v1795_v35 = vpop.f32.mrf.mxu2 }
 0x625   : > { %v1924_v34 = vadd.f32 %v4635_v57, %v1795_v35 }
 0x627   : > { %3559 = vtanh.f32 %v1924_v34  ;;  %v1930_v61 = vsub.f32 0.0, %v1924_v34 }
 0x628   : > { %3561 = vtanh.f32 %v1816_v42 }
 0x629   : > { %v1936_v0 = vmul.f32 1.442695, %v1930_v61 }
 0x62c   : > { %v1797_v1 = vpop.f32.mrf.mxu2 }
 0x62d   : > { %v3560_v45 = vpop.eup %3559  ;;  %v4640_v54 = vadd.f32 %v4635_v57, %v1797_v1 }
 0x62e   : > { %1972 = vrot.lane.b32.xlu2 %v3560_v45, %s3830_s30  ;;  %v3562_v51 = vpop.eup %3561 }
 0x62f   : > { %3563 = vtanh.f32 %v4640_v54 }
 0x630   : > { %3565 = vtanh.f32 %v4645_v50 }
 0x631   : > { %3567 = vpow2.f32 %v1825_v15 }
 0x632   : > { %3569 = vpow2.f32 %v1827_v12 }
 0x635   : > { %v3564_v36 = vpop.eup %3563 }
 0x636   : > { %1974 = vrot.lane.b32.xlu0 %v3564_v36, %s3830_s30  ;;  %1867 = vrot.lane.b32.xlu2 %v3562_v51, %s3830_s30  ;;  %v3566_v37 = vpop.eup %3565  ;;  %v1931_v36 = vsub.f32 0.0, %v4640_v54 }
 0x637   : > { %v3568_v38 = vpop.eup %3567 }
 0x638   : > { %v1837_v10 = vadd.f32 1.0, %v3568_v38  ;;  %v3570_v20 = vpop.eup %3569  ;;  %v1938_v12 = vmul.f32 1.442695, %v1931_v36 }
 0x639   : > { %v1838_v21 = vadd.f32 1.0, %v3570_v20 }
 0x63e   : > { %1869 = vrot.lane.b32.xlu2 %v3566_v37, %s3830_s30 }
 0x658   : > { %v1862_v27 = vpop.permute.xlu0 %1861 }
 0x660   : > { %v1864_v13 = vpop.permute.xlu1 %1863 }
 0x666   : > { %v1800_v3 = vpop.f32.mrf.mxu2 }
 0x667   : > { %v4652_v60 = vadd.f32 %v4635_v57, %v1800_v3 }
 0x669   : > { %3571 = vtanh.f32 %v4652_v60 }
 0x66a   : > { %3573 = vrcp.f32 %v1837_v10 }
 0x66b   : > { %3575 = vpow2.f32 %v1829_v48 }
 0x66c   : > { %3577 = vtanh.f32 %v4656_v47 }
 0x66e   : > { %v1802_v63 = vpop.f32.mrf.mxu2 }
 0x66f   : > { %v3572_v62 = vpop.eup %3571  ;;  %v4659_v25 = vadd.f32 %v4635_v57, %v1802_v63 }
 0x670   : > { %1976 = vrot.lane.b32.xlu0 %v3572_v62, %s3830_s30  ;;  %v4664_v5 = vpop.eup %3573 }
 0x671   : > { %3579 = vtanh.f32 %v4659_v25  ;;  %v4667_v26 = vmul.f32 %v4664_v5, %v1862_v27  ;;  %v3576_v6 = vpop.eup %3575  ;;  %v1932_v27 = vsub.f32 0.0, %v4652_v60 }
 0x672   : > { %3581 = vrcp.f32 %v1838_v21  ;;  %v3578_v41 = vpop.eup %3577  ;;  %v1839_v16 = vadd.f32 1.0, %v3576_v6 }
 0x673   : > { %3583 = vpow2.f32 %v1936_v0  ;;  %v1940_v6 = vmul.f32 1.442695, %v1932_v27 }
 0x674   : > { %3585 = vtanh.f32 %v4667_v26 }
 0x676   : > { %v1805_v29 = vpop.f32.mrf.mxu2 }
 0x677   : > { %v3580_v8 = vpop.eup %3579  ;;  %v4670_v19 = vadd.f32 %v4635_v57, %v1805_v29  ;;  %v1824_v29 = vsub.f32 0.0, %v4656_v47 }
 0x678   : > { %1978 = vrot.lane.b32.xlu1 %v3580_v8, %s3830_s30  ;;  %1871 = vrot.lane.b32.xlu0 %v3578_v41, %s3830_s30  ;;  %v4676_v55 = vpop.eup %3581  ;;  %v1933_v8 = vsub.f32 0.0, %v4659_v25 }
 0x679   : > { %3587 = vtanh.f32 %v4670_v19  ;;  %v4679_v17 = vmul.f32 %v4676_v55, %v1864_v13  ;;  %v3584_v59 = vpop.eup %3583  ;;  %v1835_v46 = vmul.f32 1.442695, %v1824_v29 }
 0x67a   : > { %v3586_v4 = vpop.eup %3585  ;;  %3589 = vrcp.f32 %v1839_v16  ;;  %v1948_v31 = vadd.f32 1.0, %v3584_v59  ;;  %v1866_v9 = vpop.permute.xlu1 %1865  ;;  %v1942_v13 = vmul.f32 1.442695, %v1933_v8 }
 0x67b   : > { %3591 = vpow2.f32 %v1831_v33 }
 0x67c   : > { %3593 = vtanh.f32 %v4679_v17 }
 0x67e   : > { %v1807_v14 = vpop.f32.mrf.mxu2 }
 0x67f   : > { %v3588_v22 = vpop.eup %3587  ;;  %v1929_v52 = vadd.f32 %v4635_v57, %v1807_v14 }
 0x680   : > { %1897 = vrot.lane.b32.xlu0 %v3586_v4, %s3831_s13  ;;  %1980 = vrot.lane.b32.xlu1 %v3588_v22, %s3830_s30  ;;  %v4686_v7 = vpop.eup %3589  ;;  %v1934_v4 = vsub.f32 0.0, %v4670_v19 }
 0x681   : > { %3595 = vtanh.f32 %v1929_v52  ;;  %v3592_v24 = vpop.eup %3591  ;;  %v4689_v35 = vmul.f32 %v4686_v7, %v1866_v9  ;;  %v1935_v0 = vsub.f32 0.0, %v1929_v52 }
 0x682   : > { %3597 = vrcp.f32 %v1948_v31  ;;  %v3594_v34 = vpop.eup %3593  ;;  %v1840_v42 = vadd.f32 1.0, %v3592_v24  ;;  %v1944_v60 = vmul.f32 1.442695, %v1934_v4  ;;  %v3221_v4 = vld [vmem:[%s5232_s6 + $0x34] sm:$0xf] }
 0x683   : > { %3599 = vpow2.f32 %v1833_v32  ;;  %v1946_v41 = vmul.f32 1.442695, %v1935_v0 }
 0x684   : > { %3601 = vtanh.f32 %v4689_v35 }
 0x685   : > { %3603 = vrcp.f32 %v1840_v42 }
 0x687   : > { %v3596_v56 = vpop.eup %3595 }
 0x688   : > { %1899 = vrot.lane.b32.xlu1 %v3594_v34, %s3831_s13  ;;  %1982 = vrot.lane.b32.xlu2 %v3596_v56, %s3830_s30  ;;  %v4694_v1 = vpop.eup %3597  ;;  %v1973_v45 = vpop.permute.xlu2 %1972 }
 0x689   : > { %v4697_v39 = vmul.f32 %v4694_v1, %v1973_v45  ;;  %v3600_v50 = vpop.eup %3599 }
 0x68a   : > { %v3602_v51 = vpop.eup %3601  ;;  %v1841_v37 = vadd.f32 1.0, %v3600_v50 }
 0x68b   : > { %3605 = vtanh.f32 %v4697_v39  ;;  %v4702_v58 = vpop.eup %3603 }
 0x68c   : > { %3607 = vrcp.f32 %v1841_v37 }
 0x690   : > { %1901 = vrot.lane.b32.xlu1 %v3602_v51, %s3831_s13  ;;  %v1868_v15 = vpop.permute.xlu2 %1867 }
 0x691   : > { %v3606_v11 = vpop.eup %3605  ;;  %v4705_v38 = vmul.f32 %v4702_v58, %v1868_v15 }
 0x692   : > { %2008 = vrot.lane.b32.xlu2 %v3606_v11, %s3831_s13  ;;  %v4709_v3 = vpop.eup %3607 }
 0x693   : > { %3609 = vtanh.f32 %v4705_v38 }
 0x694   : > { %3611 = vpow2.f32 %v1938_v12 }
 0x698   : > { %v1870_v54 = vpop.permute.xlu2 %1869 }
 0x699   : > { %v3610_v2 = vpop.eup %3609  ;;  %v4712_v10 = vmul.f32 %v4709_v3, %v1870_v54 }
 0x69a   : > { %1903 = vrot.lane.b32.xlu2 %v3610_v2, %s3831_s13  ;;  %v3612_v49 = vpop.eup %3611 }
 0x69b   : > { %3613 = vtanh.f32 %v4712_v10  ;;  %v1949_v48 = vadd.f32 1.0, %v3612_v49 }
 0x69d   : > { %3615 = vrcp.f32 %v1949_v48 }
 0x6a1   : > { %v3614_v20 = vpop.eup %3613 }
 0x6a2   : > { %1905 = vrot.lane.b32.xlu2 %v3614_v20, %s3831_s13 }
 0x6a3   : > { %v4717_v63 = vpop.eup %3615 }
 0x6a8   : > { %v1975_v62 = vpop.permute.xlu0 %1974 }
 0x6a9   : > { %v4720_v61 = vmul.f32 %v4717_v63, %v1975_v62 }
 0x6ab   : > { %3617 = vtanh.f32 %v4720_v61 }
 0x6ac   : > { %3619 = vpow2.f32 %v1940_v6 }
 0x6ad   : > { %3621 = vpow2.f32 %v1946_v41 }
 0x6ae   : > { %3623 = vpow2.f32 %v1835_v46 }
 0x6af   : > { %3625 = vpow2.f32 %v1942_v13 }
 0x6b1   : > { %v3618_v21 = vpop.eup %3617 }
 0x6b2   : > { %2010 = vrot.lane.b32.xlu0 %v3618_v21, %s3831_s13  ;;  %v3620_v16 = vpop.eup %3619 }
 0x6b3   : > { %v3622_v33 = vpop.eup %3621  ;;  %v1950_v59 = vadd.f32 1.0, %v3620_v16 }
 0x6b4   : > { %v1953_v14 = vadd.f32 1.0, %v3622_v33  ;;  %v3624_v22 = vpop.eup %3623 }
 0x6b5   : > { %3627 = vrcp.f32 %v1950_v59  ;;  %v3626_v44 = vpop.eup %3625  ;;  %v1842_v47 = vadd.f32 1.0, %v3624_v22  ;;  %v3129_v22 = vld [vmem:[%s5232_s6 + $0x20] sm:$0xf] }
 0x6b6   : > { %3629 = vrcp.f32 %v1953_v14  ;;  %v1951_v52 = vadd.f32 1.0, %v3626_v44  ;;  %v3220_v44 = vld [vmem:[%s5232_s6 + $0x24] sm:$0xf0] }
 0x6b7   : > { %3631 = vpow2.f32 %v1944_v60  ;;  %v3139_v60 = vld [vmem:[%s5232_s6 + $0x38] sm:$0xf0] }
 0x6b8   : > { %3633 = vrcp.f32 %v1842_v47  ;;  %v3142_v47 = vor.u32 %v3221_v4, %v3139_v60 }
 0x6b9   : > { %3635 = vrcp.f32 %v1951_v52  ;;  %v3219_v52 = vld [vmem:[%s5232_s6 + $0x24] sm:$0xf] }
 0x6ba   : > { %2174 = vmatpush.bf16.msra.mxu0 %v3142_v47 }
 0x6bb   : > { %v4728_v25 = vpop.eup %3627 }
 0x6bc   : > { %v3630_v31 = vpop.eup %3629 }
 0x6bd   : > { %v3632_v19 = vpop.eup %3631 }
 0x6be   : > { %v1952_v56 = vadd.f32 1.0, %v3632_v19  ;;  %v4737_v42 = vpop.eup %3633  ;;  %v3218_v19 = vld [vmem:[%s5232_s6 + $0x14] sm:$0xf0] }
 0x6bf   : > { %v4739_v45 = vpop.eup %3635 }
 0x6e2   : > { %v1977_v9 = vpop.permute.xlu0 %1976  ;;  %v1983_v32 = vpop.permute.xlu2 %1982 }
 0x6e3   : > { %v4731_v24 = vmul.f32 %v4728_v25, %v1977_v9  ;;  %v4733_v34 = vmul.f32 %v3630_v31, %v1983_v32  ;;  %v3121_v32 = vld [vmem:[%s5232_s6 + $0x10] sm:$0xf] }
 0x6e5   : > { %3637 = vtanh.f32 %v4731_v24 }
 0x6e6   : > { %3639 = vtanh.f32 %v4733_v34 }
 0x6e7   : > { %3641 = vrcp.f32 %v1952_v56  ;;  %v3217_v56 = vld [vmem:[%s5232_s6 + $0x14] sm:$0xf] }
 0x6ea   : > { %v1979_v50 = vpop.permute.xlu1 %1978  ;;  %v1872_v51 = vpop.permute.xlu0 %1871 }
 0x6eb   : > { %v3638_v36 = vpop.eup %3637  ;;  %v4742_v37 = vmul.f32 %v4739_v45, %v1979_v50  ;;  %v4745_v15 = vmul.f32 %v4737_v42, %v1872_v51  ;;  %v3123_v50 = vld [vmem:[%s5232_s6 + $0x18] sm:$0xf0]  ;;  %v3122_v51 = vor.u32 %v3218_v19, %v3121_v32 }
 0x6ec   : > { %v3640_v11 = vpop.eup %3639  ;;  %2012 = vrot.lane.b32.xlu0 %v3638_v36, %s3831_s13  ;;  %v2009_v12 = vpop.permute.xlu2 %2008 }
 0x6ed   : > { %3643 = vtanh.f32 %v4742_v37  ;;  %2018 = vrot.lane.b32.xlu2 %v3640_v11, %s3831_s13  ;;  %v4751_v54 = vpop.eup %3641  ;;  %v2026_v48 = vmul.f32 %v4694_v1, %v2009_v12  ;;  %v3126_v11 = vor.u32 %v3217_v56, %v3123_v50 }
 0x6ee   : > { %3645 = vtanh.f32 %v4745_v15 }
 0x6f2   : > { %v1981_v2 = vpop.permute.xlu1 %1980  ;;  %v1898_v27 = vpop.permute.xlu0 %1897 }
 0x6f3   : > { %v3644_v49 = vpop.eup %3643  ;;  %v4755_v20 = vmul.f32 %v4751_v54, %v1981_v2  ;;  %v1915_v6 = vmul.f32 %v4664_v5, %v1898_v27 }
 0x6f4   : > { %v3646_v62 = vpop.eup %3645  ;;  %2014 = vrot.lane.b32.xlu1 %v3644_v49, %s3831_s13  ;;  %v1904_v21 = vpop.permute.xlu2 %1903 }
 0x6f5   : > { %3647 = vtanh.f32 %v4755_v20  ;;  %1907 = vrot.lane.b32.xlu0 %v3646_v62, %s3831_s13  ;;  %2062 = vrot.lane.b32.xlu2 %v2026_v48, %s3830_s30  ;;  %v1918_v41 = vmul.f32 %v4702_v58, %v1904_v21  ;;  %v3113_v21 = vld [vmem:[%s5232_s6] sm:$0xf] }
 0x6fa   : > { %v1900_v1 = vpop.permute.xlu1 %1899 }
 0x6fb   : > { %v3648_v0 = vpop.eup %3647  ;;  %v1916_v8 = vmul.f32 %v4676_v55, %v1900_v1 }
 0x6fc   : > { %2016 = vrot.lane.b32.xlu1 %v3648_v0, %s3831_s13  ;;  %v1906_v29 = vpop.permute.xlu2 %1905  ;;  %v3115_v0 = vld [vmem:[%s5232_s6 + $0x8] sm:$0xf0] }
 0x6fd   : > { %2038 = vrot.lane.b32.xlu0 %v1915_v6, %s3832_s14  ;;  %2044 = vrot.lane.b32.xlu2 %v1918_v41, %s3832_s14  ;;  %v1919_v46 = vmul.f32 %v4709_v3, %v1906_v29  ;;  %v3137_v3 = vld [vmem:[%s5232_s6 + $0x30] sm:$0xf] }
 0x702   : > { %v1902_v13 = vpop.permute.xlu1 %1901 }
 0x703   : > { %v1917_v5 = vmul.f32 %v4686_v7, %v1902_v13  ;;  %v3222_v7 = vld [vmem:[%s5232_s6 + $0x34] sm:$0xf0] }
 0x704   : > { %2040 = vrot.lane.b32.xlu1 %v1916_v8, %s3832_s14  ;;  %v3138_v14 = vor.u32 %v3222_v7, %v3137_v3 }
 0x705   : > { %2046 = vrot.lane.b32.xlu2 %v1919_v46, %s3832_s14 }
 0x706   : > { %2150 = vmatpush.bf16.msrb.mxu3 %v3138_v14 }
 0x70c   : > { %2042 = vrot.lane.b32.xlu1 %v1917_v5, %s3832_s14 }
 0x724   : > { %v2011_v58 = vpop.permute.xlu0 %2010 }
 0x725   : > { %v2027_v16 = vmul.f32 %v4717_v63, %v2011_v58 }
 0x727   : > { %2064 = vrot.lane.b32.xlu0 %v2027_v16, %s3830_s30 }
 0x747   : > { %v2019_v33 = vpop.permute.xlu2 %2018 }
 0x748   : > { %v2031_v59 = vmul.f32 %v3630_v31, %v2019_v33  ;;  %v3130_v31 = vor.u32 %v3220_v44, %v3129_v22 }
 0x74a   : > { %2072 = vrot.lane.b32.xlu2 %v2031_v59, %s3830_s30  ;;  %2151 = vmatpush.bf16.msrb.mxu3 %v3130_v31 }
 0x74e   : > { %2152 = vmatpush.bf16.msrb.mxu3 %v3122_v51 }
 0x74f   : > { %v4833_v41 = vpop.permute.xlu2 %2062 }
 0x757   : > { %v4849_v58 = vpop.permute.xlu2 %2044 }
 0x75e   : > { %v2013_v55 = vpop.permute.xlu0 %2012 }
 0x75f   : > { %v2028_v63 = vmul.f32 %v4728_v25, %v2013_v55  ;;  %v3131_v25 = vld [vmem:[%s5232_s6 + $0x28] sm:$0xf0]  ;;  %v4863_v7 = vpop.permute.xlu2 %2046 }
 0x760   : > { %v3134_v9 = vor.u32 %v3219_v52, %v3131_v25 }
 0x761   : > { %2066 = vrot.lane.b32.xlu0 %v2028_v63, %s3830_s30 }
 0x762   : > { %2175 = vmatpush.bf16.msra.mxu0 %v3134_v9 }
 0x766   : > { %v2015_v36 = vpop.permute.xlu1 %2014  ;;  %2176 = vmatpush.bf16.msra.mxu0 %v3126_v11 }
 0x767   : > { %v1908_v12 = vpop.permute.xlu0 %1907  ;;  %v2029_v2 = vmul.f32 %v4739_v45, %v2015_v36  ;;  %v3216_v45 = vld [vmem:[%s5232_s6 + $0x4] sm:$0xf0] }
 0x768   : > { %v1920_v49 = vmul.f32 %v4737_v42, %v1908_v12  ;;  %v3215_v42 = vld [vmem:[%s5232_s6 + $0x4] sm:$0xf]  ;;  %v3114_v27 = vor.u32 %v3216_v45, %v3113_v21 }
 0x769   : > { %2068 = vrot.lane.b32.xlu1 %v2029_v2, %s3830_s30 }
 0x76a   : > { %2048 = vrot.lane.b32.xlu0 %v1920_v49, %s3832_s14  ;;  %2153 = vmatpush.bf16.msrb.mxu3 %v3114_v27 }
 0x76e   : > { %v2017_v48 = vpop.permute.xlu1 %2016 }
 0x76f   : > { %v2030_v62 = vmul.f32 %v4751_v54, %v2017_v48  ;;  %v3118_v54 = vor.u32 %v3215_v42, %v3115_v0  ;;  %v4831_v6 = vpop.permute.xlu0 %2038  ;;  %v1756_v48 = vpop.f32.mrf.mxu1 }
 0x770   : > { %v2080_v8 = vsel %vm767_vm0, %v4831_v6, %v4833_v41 }
 0x771   : > { %2070 = vrot.lane.b32.xlu1 %v2030_v62, %s3830_s30  ;;  %2177 = vmatpush.bf16.msra.mxu0 %v3118_v54 }
 0x776   : > { %v4835_v1 = vpop.permute.xlu1 %2040 }
 0x777   : > { %v1758_v54 = vpop.f32.mrf.mxu1 }
 0x77e   : > { %v4847_v5 = vpop.permute.xlu1 %2042 }
 0x799   : > { %v4837_v29 = vpop.permute.xlu0 %2064 }
 0x79a   : > { %v2081_v46 = vsel %vm767_vm0, %v4835_v1, %v4837_v29 }
 0x79b   : > { %v2094_v13 = vpack.c.bf16 %v2081_v46, %v2080_v8 }
 0x79d   : > { %3143 = vmatmul.msk.bf16.vlgmr.msrb.gmra.mxu3 %vm1191_vm1, %v2094_v13  ;;  %3146 = vmatmul.msk.bf16.vlgmr.msra.gmra.mxu0 %vm1191_vm1, %v2094_v13 }
 0x7a4   : > { %v4872_v60 = vpop.permute.xlu2 %2072 }
 0x7d3   : > { %v4851_v16 = vpop.permute.xlu0 %2066 }
 0x7d4   : > { %v2082_v59 = vsel %vm767_vm0, %v4847_v5, %v4851_v16 }
 0x7db   : > { %v4853_v33 = vpop.permute.xlu1 %2068 }
 0x7dc   : > { %v2083_v55 = vsel %vm767_vm0, %v4849_v58, %v4853_v33  ;;  %v4867_v63 = vpop.permute.xlu0 %2048 }
 0x7dd   : > { %v2095_v3 = vpack.c.bf16 %v2083_v55, %v2082_v59  ;;  %v2085_v22 = vsel %vm767_vm0, %v4867_v63, %v4872_v60  ;;  %v1761_v55 = vpop.f32.mrf.mxu1 }
 0x7df   : > { %3144 = vmatmul.msk.bf16.gmra.mxu3 %vm1191_vm1, %v2095_v3  ;;  %3147 = vmatmul.msk.bf16.gmra.mxu0 %vm1191_vm1, %v2095_v3 }
 0x7e3   : > { %v4865_v4 = vpop.permute.xlu1 %2070 }
 0x7e4   : > { %v2084_v14 = vsel %vm767_vm0, %v4863_v7, %v4865_v4 }
 0x7e5   : > { %v2096_v44 = vpack.c.bf16 %v2085_v22, %v2084_v14 }
 0x7ef   : > { %3145 = vmatmul.msk.bf16.gmra.mxu3 %vm1191_vm1, %v2096_v44  ;;  %3148 = vmatmul.msk.bf16.gmra.mxu0 %vm1191_vm1, %v2096_v44 }
 0x81a   : > { %v2179_v47 = vpop.f32.mrf.mxu0 }
 0x81b   : > { %v2368_v52 = vadd.f32 %v2179_v47, %v4616_v28 }
 0x81d   : > { %v2374_v25 = vadd.f32 %v4635_v57, %v2368_v52 }
 0x81f   : > { %3649 = vtanh.f32 %v2374_v25  ;;  %v2380_v59 = vsub.f32 0.0, %v2374_v25 }
 0x820   : > { %v2155_v2 = vpop.f32.mrf.mxu3 }
 0x821   : > { %v2194_v8 = vadd.f32 %v2155_v2, %v1756_v48 }
 0x822   : > { %v2181_v31 = vpop.f32.mrf.mxu0 }
 0x823   : > { %v2369_v9 = vadd.f32 %v2181_v31, %v4620_v23  ;;  %v4911_v46 = vadd.f32 %v4596_v30, %v2194_v8  ;;  %v1763_v31 = vpop.f32.mrf.mxu1 }
 0x825   : > { %v3650_v32 = vpop.eup %3649  ;;  %v2375_v19 = vadd.f32 %v4635_v57, %v2369_v9 }
 0x826   : > { %2452 = vrot.lane.b32.xlu0 %v3650_v32, %s3830_s30 }
 0x827   : > { %3651 = vtanh.f32 %v2375_v19  ;;  %v2381_v22 = vsub.f32 0.0, %v2375_v19 }
 0x828   : > { %v2157_v42 = vpop.f32.mrf.mxu3 }
 0x829   : > { %v2388_v47 = vmul.f32 1.442695, %v2381_v22 }
 0x82d   : > { %v3652_v56 = vpop.eup %3651 }
 0x82e   : > { %2454 = vrot.lane.b32.xlu1 %v3652_v56, %s3830_s30 }
 0x85c   : > { %v2184_v50 = vpop.f32.mrf.mxu0 }
 0x85d   : > { %v2370_v51 = vadd.f32 %v2184_v50, %v4623_v53 }
 0x85f   : > { %v4887_v28 = vadd.f32 %v4635_v57, %v2370_v51  ;;  %v1766_v51 = vpop.f32.mrf.mxu1 }
 0x861   : > { %3653 = vtanh.f32 %v4887_v28 }
 0x864   : > { %v2186_v36 = vpop.f32.mrf.mxu0 }
 0x865   : > { %v2371_v23 = vadd.f32 %v2186_v36, %v4626_v40 }
 0x867   : > { %v3654_v11 = vpop.eup %3653  ;;  %v4892_v12 = vadd.f32 %v4635_v57, %v2371_v23 }
 0x868   : > { %2456 = vrot.lane.b32.xlu2 %v3654_v11, %s3830_s30 }
 0x869   : > { %3655 = vtanh.f32 %v4892_v12 }
 0x86c   : > { %v2189_v49 = vpop.f32.mrf.mxu0 }
 0x86d   : > { %v2372_v53 = vadd.f32 %v2189_v49, %v4628_v18  ;;  %v2195_v18 = vadd.f32 %v2157_v42, %v1758_v54 }
 0x86f   : > { %v3656_v62 = vpop.eup %3655  ;;  %v4898_v21 = vadd.f32 %v4635_v57, %v2372_v53 }
 0x870   : > { %2458 = vrot.lane.b32.xlu0 %v3656_v62, %s3830_s30 }
 0x871   : > { %3657 = vtanh.f32 %v4898_v21 }
 0x874   : > { %v2191_v40 = vpop.f32.mrf.mxu0 }
 0x875   : > { %v2373_v45 = vadd.f32 %v2191_v40, %v4630_v43  ;;  %v4914_v43 = vadd.f32 %v4596_v30, %v2195_v18 }
 0x877   : > { %v3658_v27 = vpop.eup %3657  ;;  %v4904_v0 = vadd.f32 %v4635_v57, %v2373_v45  ;;  %v2160_v57 = vpop.f32.mrf.mxu3 }
 0x878   : > { %2422 = vrot.lane.b32.xlu0 %v4697_v39, %s3832_s14  ;;  %2460 = vrot.lane.b32.xlu1 %v3658_v27, %s3830_s30  ;;  %v2386_v39 = vmul.f32 1.442695, %v2380_v59  ;;  %v2196_v44 = vadd.f32 %v2160_v57, %v1761_v55  ;;  %v2382_v27 = vsub.f32 0.0, %v4887_v28 }
 0x879   : > { %3659 = vtanh.f32 %v4904_v0 }
 0x87a   : > { %3661 = vtanh.f32 %v4911_v46  ;;  %v2390_v54 = vmul.f32 1.442695, %v2382_v27 }
 0x87b   : > { %3663 = vtanh.f32 %v4914_v43 }
 0x87c   : > { %3665 = vpow2.f32 %v2386_v39 }
 0x87d   : > { %3667 = vpow2.f32 %v2388_v47 }
 0x87f   : > { %v3660_v13 = vpop.eup %3659  ;;  %v2162_v52 = vpop.f32.mrf.mxu3 }
 0x880   : > { %2424 = vrot.lane.b32.xlu1 %v4720_v61, %s3832_s14  ;;  %2462 = vrot.lane.b32.xlu2 %v3660_v13, %s3830_s30  ;;  %v3662_v3 = vpop.eup %3661  ;;  %v4924_v61 = vadd.f32 %v4596_v30, %v2196_v44  ;;  %v2197_v19 = vadd.f32 %v2162_v52, %v1763_v31  ;;  %v1768_v13 = vpop.f32.mrf.mxu1  ;;  %v2206_v31 = vsub.f32 0.0, %v4911_v46 }
 0x881   : > { %v3664_v14 = vpop.eup %3663 }
 0x882   : > { %v3666_v25 = vpop.eup %3665  ;;  %3669 = vtanh.f32 %v4924_v61  ;;  %v4933_v2 = vadd.f32 %v4596_v30, %v2197_v19  ;;  %v2212_v19 = vmul.f32 1.442695, %v2206_v31 }
 0x883   : > { %v2398_v9 = vadd.f32 1.0, %v3666_v25  ;;  %v3668_v32 = vpop.eup %3667 }
 0x884   : > { %v2399_v36 = vadd.f32 1.0, %v3668_v32 }
 0x885   : > { %3671 = vrcp.f32 %v2398_v9 }
 0x886   : > { %3673 = vrcp.f32 %v2399_v36 }
 0x887   : > { %v2165_v56 = vpop.f32.mrf.mxu3  ;;  %3675 = vtanh.f32 %v4933_v2 }
 0x888   : > { %2278 = vrot.lane.b32.xlu1 %v3662_v3, %s3830_s30  ;;  %2280 = vrot.lane.b32.xlu2 %v3664_v14, %s3830_s30  ;;  %v3670_v50 = vpop.eup %3669  ;;  %v2198_v23 = vadd.f32 %v2165_v56, %v1766_v51  ;;  %v2384_v14 = vsub.f32 0.0, %v4898_v21 }
 0x88a   : > { %v4937_v53 = vadd.f32 %v4596_v30, %v2198_v23  ;;  %v2394_v22 = vmul.f32 1.442695, %v2384_v14 }
 0x88b   : > { %v4930_v11 = vpop.eup %3671 }
 0x88c   : > { %3677 = vtanh.f32 %v4937_v53  ;;  %v4944_v48 = vpop.eup %3673 }
 0x88d   : > { %v3676_v45 = vpop.eup %3675  ;;  %3679 = vpow2.f32 %v2390_v54 }
 0x88f   : > { %v2167_v18 = vpop.f32.mrf.mxu3 }
 0x890   : > { %2428 = vrot.lane.b32.xlu1 %v4742_v37, %s3832_s14  ;;  %v2199_v59 = vadd.f32 %v2167_v18, %v1768_v13 }
 0x892   : > { %v3678_v42 = vpop.eup %3677  ;;  %v4958_v28 = vadd.f32 %v4596_v30, %v2199_v59  ;;  %v2385_v30 = vsub.f32 0.0, %v4904_v0  ;;  %v2207_v0 = vsub.f32 0.0, %v4914_v43 }
 0x894   : > { %v2396_v52 = vmul.f32 1.442695, %v2385_v30  ;;  %v2214_v23 = vmul.f32 1.442695, %v2207_v0 }
 0x898   : > { %2282 = vrot.lane.b32.xlu1 %v3670_v50, %s3830_s30  ;;  %v2453_v49 = vpop.permute.xlu0 %2452 }
 0x899   : > { %v2470_v37 = vmul.f32 %v4930_v11, %v2453_v49 }
 0x89b   : > { %2482 = vrot.lane.b32.xlu2 %v2470_v37, %s3832_s14 }
 0x8a0   : > { %2432 = vrot.lane.b32.xlu1 %v4733_v34, %s3832_s14  ;;  %v2455_v62 = vpop.permute.xlu1 %2454  ;;  %v3680_v34 = vpop.eup %3679 }
 0x8a1   : > { %v2471_v40 = vmul.f32 %v4944_v48, %v2455_v62  ;;  %v2400_v8 = vadd.f32 1.0, %v3680_v34 }
 0x8a3   : > { %2484 = vrot.lane.b32.xlu0 %v2471_v40, %s3832_s14  ;;  %2284 = vrot.lane.b32.xlu2 %v3676_v45, %s3830_s30  ;;  %3681 = vrcp.f32 %v2400_v8  ;;  %v2209_v8 = vsub.f32 0.0, %v4933_v2 }
 0x8a4   : > { %3683 = vtanh.f32 %v4958_v28 }
 0x8a8   : > { %2286 = vrot.lane.b32.xlu1 %v3678_v42, %s3830_s30 }
 0x8a9   : > { %v4955_v57 = vpop.eup %3681 }
 0x8aa   : > { %v3684_v3 = vpop.eup %3683 }
 0x8ab   : > { %2426 = vrot.lane.b32.xlu0 %v4731_v24, %s3832_s14 }
 0x8b0   : > { %2250 = vrot.lane.b32.xlu1 %v4679_v17, %s3832_s14  ;;  %v2383_v17 = vsub.f32 0.0, %v4892_v12 }
 0x8b2   : > { %v2392_v24 = vmul.f32 1.442695, %v2383_v17 }
 0x8b4   : > { %3685 = vpow2.f32 %v2392_v24 }
 0x8b5   : > { %3687 = vpow2.f32 %v2394_v22 }
 0x8ba   : > { %v3686_v44 = vpop.eup %3685 }
 0x8bb   : > { %v2401_v47 = vadd.f32 1.0, %v3686_v44  ;;  %v3688_v25 = vpop.eup %3687  ;;  %v2208_v44 = vsub.f32 0.0, %v4924_v61 }
 0x8bc   : > { %v2402_v12 = vadd.f32 1.0, %v3688_v25 }
 0x8bd   : > { %3689 = vrcp.f32 %v2401_v47  ;;  %v2216_v30 = vmul.f32 1.442695, %v2208_v44 }
 0x8be   : > { %3691 = vpow2.f32 %v2396_v52 }
 0x8bf   : > { %3693 = vrcp.f32 %v2402_v12 }
 0x8c0   : > { %3695 = vpow2.f32 %v2212_v19 }
 0x8c2   : > { %v2457_v39 = vpop.permute.xlu2 %2456 }
 0x8c3   : > { %v2472_v55 = vmul.f32 %v4955_v57, %v2457_v39  ;;  %v4968_v9 = vpop.eup %3689 }
 0x8c4   : > { %v3692_v21 = vpop.eup %3691 }
 0x8c5   : > { %2486 = vrot.lane.b32.xlu2 %v2472_v55, %s3832_s14  ;;  %v2403_v51 = vadd.f32 1.0, %v3692_v21  ;;  %v4973_v36 = vpop.eup %3693  ;;  %v2218_v55 = vmul.f32 1.442695, %v2209_v8 }
 0x8c6   : > { %v3696_v37 = vpop.eup %3695 }
 0x8c7   : > { %3697 = vrcp.f32 %v2403_v51  ;;  %v2224_v40 = vadd.f32 1.0, %v3696_v37 }
 0x8c8   : > { %3699 = vpow2.f32 %v2214_v23 }
 0x8c9   : > { %3701 = vrcp.f32 %v2224_v40 }
 0x8cd   : > { %2288 = vrot.lane.b32.xlu2 %v3684_v3, %s3830_s30  ;;  %v4979_v45 = vpop.eup %3697 }
 0x8ce   : > { %v3700_v54 = vpop.eup %3699 }
 0x8cf   : > { %v2225_v18 = vadd.f32 1.0, %v3700_v54  ;;  %v4985_v59 = vpop.eup %3701 }
 0x8da   : > { %v2463_v50 = vpop.permute.xlu2 %2462 }
 0x8db   : > { %v2475_v42 = vmul.f32 %v4979_v45, %v2463_v50 }
 0x8e2   : > { %v2459_v32 = vpop.permute.xlu0 %2458  ;;  %v2281_v62 = vpop.permute.xlu2 %2280 }
 0x8e3   : > { %v2473_v56 = vmul.f32 %v4968_v9, %v2459_v32 }
 0x8e5   : > { %2488 = vrot.lane.b32.xlu0 %v2473_v56, %s3832_s14 }
 0x8ea   : > { %v2461_v46 = vpop.permute.xlu1 %2460  ;;  %v2423_v27 = vpop.permute.xlu0 %2422 }
 0x8eb   : > { %v2474_v49 = vmul.f32 %v4973_v36, %v2461_v46  ;;  %v2440_v34 = vmul.f32 %v4930_v11, %v2423_v27 }
 0x8ed   : > { %2430 = vrot.lane.b32.xlu0 %v4755_v20, %s3832_s14  ;;  %2490 = vrot.lane.b32.xlu2 %v2474_v49, %s3832_s14 }
 0x8f2   : > { %v2425_v43 = vpop.permute.xlu1 %2424 }
 0x8f5   : > { %2492 = vrot.lane.b32.xlu0 %v2475_v42, %s3832_s14  ;;  %v2483_v20 = vpop.permute.xlu2 %2482  ;;  %v2210_v42 = vsub.f32 0.0, %v4937_v53 }
 0x8f6   : > { %v2500_v13 = vadd.f32 %v2483_v20, %v2440_v34 }
 0x8f7   : > { %v2220_v27 = vmul.f32 1.442695, %v2210_v42 }
 0x8f8   : > { %3703 = vtanh.f32 %v2500_v13 }
 0x8f9   : > { %3705 = vrcp.f32 %v2225_v18 }
 0x8fa   : > { %v2279_v39 = vpop.permute.xlu1 %2278  ;;  %3707 = vpow2.f32 %v2218_v55 }
 0x8fb   : > { %v2296_v17 = vmul.f32 %v4985_v59, %v2279_v39 }
 0x8fd   : > { %2248 = vrot.lane.b32.xlu0 %v4667_v26, %s3832_s14  ;;  %2308 = vrot.lane.b32.xlu2 %v2296_v17, %s3832_s14  ;;  %v2211_v26 = vsub.f32 0.0, %v4958_v28  ;;  %v2285_v52 = vpop.permute.xlu2 %2284 }
 0x8fe   : > { %v3704_v24 = vpop.eup %3703 }
 0x8ff   : > { %2518 = vrot.lane.b32.xlu1 %v3704_v24, %s3830_s30  ;;  %v4992_v2 = vpop.eup %3705  ;;  %v2222_v47 = vmul.f32 1.442695, %v2211_v26 }
 0x900   : > { %v2297_v3 = vmul.f32 %v4992_v2, %v2281_v62  ;;  %v3708_v14 = vpop.eup %3707 }
 0x901   : > { %v2227_v22 = vadd.f32 1.0, %v3708_v14 }
 0x902   : > { %v2429_v19 = vpop.permute.xlu1 %2428 }
 0x903   : > { %3709 = vrcp.f32 %v2227_v22  ;;  %v2443_v54 = vmul.f32 %v4968_v9, %v2429_v19 }
 0x904   : > { %3711 = vpow2.f32 %v2216_v30 }
 0x905   : > { %2310 = vrot.lane.b32.xlu0 %v2297_v3, %s3832_s14  ;;  %3713 = vpow2.f32 %v2222_v47 }
 0x907   : > { %2254 = vrot.lane.b32.xlu1 %v4705_v38, %s3832_s14  ;;  %v2441_v38 = vmul.f32 %v4944_v48, %v2425_v43 }
 0x909   : > { %v5002_v25 = vpop.eup %3709 }
 0x90a   : > { %v2299_v31 = vmul.f32 %v5002_v25, %v2285_v52  ;;  %v3712_v32 = vpop.eup %3711  ;;  %v2283_v23 = vpop.permute.xlu1 %2282 }
 0x90b   : > { %v3714_v28 = vpop.eup %3713 }
 0x90c   : > { %v2229_v56 = vadd.f32 1.0, %v3714_v28 }
 0x90d   : > { %2252 = vrot.lane.b32.xlu0 %v4689_v35, %s3832_s14  ;;  %v2226_v35 = vadd.f32 1.0, %v3712_v32 }
 0x912   : > { %v2433_v34 = vpop.permute.xlu1 %2432 }
 0x913   : > { %v2445_v14 = vmul.f32 %v4979_v45, %v2433_v34 }
 0x915   : > { %2314 = vrot.lane.b32.xlu0 %v2299_v31, %s3832_s14  ;;  %v2485_v61 = vpop.permute.xlu0 %2484 }
 0x916   : > { %v2501_v12 = vadd.f32 %v2485_v61, %v2441_v38 }
 0x918   : > { %3715 = vtanh.f32 %v2501_v12 }
 0x919   : > { %3717 = vrcp.f32 %v2226_v35 }
 0x91a   : > { %3719 = vrcp.f32 %v2229_v56  ;;  %v2287_v24 = vpop.permute.xlu1 %2286 }
 0x91d   : > { %2256 = vrot.lane.b32.xlu0 %v4712_v10, %s3832_s14  ;;  %v2427_v21 = vpop.permute.xlu0 %2426 }
 0x91e   : > { %v3716_v0 = vpop.eup %3715  ;;  %v2442_v51 = vmul.f32 %v4955_v57, %v2427_v21 }
 0x91f   : > { %v2487_v50 = vpop.permute.xlu2 %2486  ;;  %2520 = vrot.lane.b32.xlu2 %v3716_v0, %s3830_s30  ;;  %v5011_v49 = vpop.eup %3717 }
 0x920   : > { %v2502_v46 = vadd.f32 %v2487_v50, %v2442_v51  ;;  %v5013_v37 = vpop.eup %3719  ;;  %v2298_v62 = vmul.f32 %v5011_v49, %v2283_v23 }
 0x922   : > { %3721 = vtanh.f32 %v2502_v46  ;;  %v2251_v47 = vpop.permute.xlu1 %2250 }
 0x923   : > { %3723 = vpow2.f32 %v2220_v27  ;;  %v2267_v19 = vmul.f32 %v4992_v2, %v2251_v47 }
 0x927   : > { %v2289_v40 = vpop.permute.xlu2 %2288  ;;  %2312 = vrot.lane.b32.xlu2 %v2298_v62, %s3832_s14 }
 0x928   : > { %v2301_v10 = vmul.f32 %v5013_v37, %v2289_v40  ;;  %v3722_v43 = vpop.eup %3721 }
 0x929   : > { %2522 = vrot.lane.b32.xlu1 %v3722_v43, %s3830_s30  ;;  %v3724_v18 = vpop.eup %3723 }
 0x92a   : > { %2318 = vrot.lane.b32.xlu0 %v2301_v10, %s3832_s14  ;;  %v2228_v13 = vadd.f32 1.0, %v3724_v18 }
 0x931   : > { %2258 = vrot.lane.b32.xlu1 %v4745_v15, %s3832_s14 }
 0x947   : > { %v2491_v3 = vpop.permute.xlu2 %2490 }
 0x957   : > { %v2489_v8 = vpop.permute.xlu0 %2488  ;;  %v2309_v61 = vpop.permute.xlu2 %2308 }
 0x958   : > { %v2503_v20 = vadd.f32 %v2489_v8, %v2443_v54 }
 0x95a   : > { %3725 = vtanh.f32 %v2503_v20 }
 0x95b   : > { %3727 = vrcp.f32 %v2228_v13  ;;  %v3226_v13 = vld [vmem:[%s5234_s8 + $0x18] sm:$0xff] }
 0x95c   : > { %2666 = vmatpush.bf16.msra.mxu3 %v3226_v13 }
 0x95f   : > { %v2431_v39 = vpop.permute.xlu0 %2430 }
 0x960   : > { %v3726_v55 = vpop.eup %3725  ;;  %v2444_v17 = vmul.f32 %v4973_v36, %v2431_v39 }
 0x961   : > { %2524 = vrot.lane.b32.xlu2 %v3726_v55, %s3830_s30  ;;  %v5026_v53 = vpop.eup %3727 }
 0x962   : > { %v2504_v15 = vadd.f32 %v2491_v3, %v2444_v17  ;;  %v2300_v22 = vmul.f32 %v5026_v53, %v2287_v24  ;;  %v3225_v17 = vld [vmem:[%s5234_s8 + $0x10] sm:$0xff] }
 0x963   : > { %2667 = vmatpush.bf16.msra.mxu3 %v3225_v17 }
 0x964   : > { %3729 = vtanh.f32 %v2504_v15 }
 0x967   : > { %v2493_v44 = vpop.permute.xlu0 %2492 }
 0x968   : > { %v2505_v26 = vadd.f32 %v2493_v44, %v2445_v14  ;;  %v3223_v14 = vld [vmem:[%s5234_s8] sm:$0xff] }
 0x969   : > { %2316 = vrot.lane.b32.xlu2 %v2300_v22, %s3832_s14 }
 0x96a   : > { %v3730_v30 = vpop.eup %3729  ;;  %3731 = vtanh.f32 %v2505_v26 }
 0x96b   : > { %2526 = vrot.lane.b32.xlu1 %v3730_v30, %s3830_s30 }
 0x96f   : > { %v2249_v52 = vpop.permute.xlu0 %2248 }
 0x970   : > { %v3732_v31 = vpop.eup %3731  ;;  %v2266_v38 = vmul.f32 %v4985_v59, %v2249_v52 }
 0x971   : > { %2528 = vrot.lane.b32.xlu2 %v3732_v31, %s3830_s30  ;;  %v2519_v32 = vpop.permute.xlu1 %2518 }
 0x972   : > { %v2326_v12 = vadd.f32 %v2309_v61, %v2266_v38  ;;  %v2536_v28 = vmul.f32 %v4930_v11, %v2519_v32 }
 0x974   : > { %3733 = vtanh.f32 %v2326_v12  ;;  %2548 = vrot.lane.b32.xlu0 %v2536_v28, %s3830_s30 }
 0x977   : > { %v2311_v35 = vpop.permute.xlu0 %2310 }
 0x978   : > { %v2327_v56 = vadd.f32 %v2311_v35, %v2267_v19 }
 0x979   : > { %v2521_v50 = vpop.permute.xlu2 %2520  ;;  %v2255_v10 = vpop.permute.xlu1 %2254 }
 0x97a   : > { %v3734_v21 = vpop.eup %3733  ;;  %3735 = vtanh.f32 %v2327_v56  ;;  %v2537_v0 = vmul.f32 %v4944_v48, %v2521_v50  ;;  %v2269_v42 = vmul.f32 %v5002_v25, %v2255_v10 }
 0x97b   : > { %2344 = vrot.lane.b32.xlu2 %v3734_v21, %s3830_s30 }
 0x97c   : > { %2550 = vrot.lane.b32.xlu1 %v2537_v0, %s3830_s30 }
 0x97f   : > { %v2253_v51 = vpop.permute.xlu0 %2252 }
 0x980   : > { %v3736_v46 = vpop.eup %3735  ;;  %v2268_v23 = vmul.f32 %v5011_v49, %v2253_v51 }
 0x981   : > { %2346 = vrot.lane.b32.xlu0 %v3736_v46, %s3830_s30  ;;  %v2313_v11 = vpop.permute.xlu2 %2312 }
 0x982   : > { %v2328_v62 = vadd.f32 %v2313_v11, %v2268_v23 }
 0x984   : > { %3737 = vtanh.f32 %v2328_v62 }
 0x987   : > { %v2315_v43 = vpop.permute.xlu0 %2314 }
 0x988   : > { %v2329_v27 = vadd.f32 %v2315_v43, %v2269_v42 }
 0x98a   : > { %v3738_v40 = vpop.eup %3737  ;;  %3739 = vtanh.f32 %v2329_v27 }
 0x98b   : > { %2348 = vrot.lane.b32.xlu0 %v3738_v40, %s3830_s30 }
 0x98f   : > { %v2257_v18 = vpop.permute.xlu0 %2256 }
 0x990   : > { %v3740_v34 = vpop.eup %3739  ;;  %v2270_v39 = vmul.f32 %v5026_v53, %v2257_v18 }
 0x99b   : > { %v2523_v48 = vpop.permute.xlu1 %2522 }
 0x99c   : > { %v2538_v54 = vmul.f32 %v4955_v57, %v2523_v48  ;;  %v2319_v47 = vpop.permute.xlu0 %2318 }
 0x99e   : > { %2552 = vrot.lane.b32.xlu1 %v2538_v54, %s3830_s30 }
 0x9a3   : > { %v2259_v22 = vpop.permute.xlu1 %2258 }
 0x9a4   : > { %v2271_v30 = vmul.f32 %v5013_v37, %v2259_v22 }
 0x9a6   : > { %2350 = vrot.lane.b32.xlu1 %v3740_v34, %s3830_s30 }
 0x9bb   : > { %v2525_v8 = vpop.permute.xlu2 %2524 }
 0x9bc   : > { %v2539_v20 = vmul.f32 %v4968_v9, %v2525_v8  ;;  %v3224_v9 = vld [vmem:[%s5234_s8 + $0x8] sm:$0xff] }
 0x9bd   : > { %2668 = vmatpush.bf16.msra.mxu3 %v3224_v9 }
 0x9be   : > { %2554 = vrot.lane.b32.xlu2 %v2539_v20, %s3830_s30 }
 0x9c1   : > { %2669 = vmatpush.bf16.msra.mxu3 %v3223_v14 }
 0x9c3   : > { %v2317_v57 = vpop.permute.xlu2 %2316 }
 0x9c4   : > { %v2330_v55 = vadd.f32 %v2317_v57, %v2270_v39 }
 0x9c6   : > { %3741 = vtanh.f32 %v2330_v55 }
 0x9cb   : > { %v2529_v24 = vpop.permute.xlu2 %2528 }
 0x9cc   : > { %v3742_v3 = vpop.eup %3741  ;;  %v2541_v15 = vmul.f32 %v4979_v45, %v2529_v24  ;;  %v2331_v45 = vadd.f32 %v2319_v47, %v2271_v30 }
 0x9cd   : > { %2352 = vrot.lane.b32.xlu1 %v3742_v3, %s3830_s30 }
 0x9ce   : > { %2558 = vrot.lane.b32.xlu0 %v2541_v15, %s3830_s30  ;;  %3743 = vtanh.f32 %v2331_v45 }
 0x9d4   : > { %v3744_v38 = vpop.eup %3743 }
 0x9d5   : > { %v2345_v44 = vpop.permute.xlu2 %2344 }
 0x9d6   : > { %v2362_v26 = vmul.f32 %v4985_v59, %v2345_v44 }
 0x9d8   : > { %2578 = vrot.lane.b32.xlu0 %v2362_v26, %s3832_s14 }
 0x9dd   : > { %v2527_v52 = vpop.permute.xlu1 %2526 }
 0x9de   : > { %v2540_v31 = vmul.f32 %v4973_v36, %v2527_v52 }
 0x9e0   : > { %2556 = vrot.lane.b32.xlu2 %v2540_v31, %s3830_s30 }
 0x9e6   : > { %v2549_v61 = vpop.permute.xlu0 %2548 }
 0x9e7   : > { %v5073_v59 = vsel %vm767_vm0, %v4831_v6, %v2549_v61 }
 0x9e8   : > { %2354 = vrot.lane.b32.xlu2 %v3744_v38, %s3830_s30 }
 0x9ee   : > { %v2551_v12 = vpop.permute.xlu1 %2550 }
 0x9ef   : > { %v5077_v32 = vsel %vm767_vm0, %v4835_v1, %v2551_v12 }
 0x9f0   : > { %v2610_v28 = vpack.c.bf16 %v5077_v32, %v5073_v59 }
 0x9f2   : > { %3165 = vmatmul.msk.bf16.vlgmr.msra.gmra.mxu3 %vm1191_vm1, %v2610_v28 }
 0x9f3   : > { %v2347_v36 = vpop.permute.xlu0 %2346 }
 0x9f4   : > { %v2363_v19 = vmul.f32 %v4992_v2, %v2347_v36 }
 0x9f6   : > { %2580 = vrot.lane.b32.xlu1 %v2363_v19, %s3832_s14 }
 0x9fd   : > { %v2349_v35 = vpop.permute.xlu0 %2348 }
 0x9fe   : > { %v2364_v56 = vmul.f32 %v5011_v49, %v2349_v35 }
 0xa00   : > { %2582 = vrot.lane.b32.xlu2 %v2364_v56, %s3832_s14 }
 0xa10   : > { %v2553_v6 = vpop.permute.xlu1 %2552 }
 0xa11   : > { %v5088_v1 = vsel %vm767_vm0, %v4847_v5, %v2553_v6 }
 0xa18   : > { %v2555_v21 = vpop.permute.xlu2 %2554  ;;  %v2351_v0 = vpop.permute.xlu1 %2350 }
 0xa19   : > { %v5092_v50 = vsel %vm767_vm0, %v4849_v58, %v2555_v21  ;;  %v2365_v51 = vmul.f32 %v5002_v25, %v2351_v0 }
 0xa1a   : > { %v2611_v2 = vpack.c.bf16 %v5092_v50, %v5088_v1 }
 0xa1b   : > { %2584 = vrot.lane.b32.xlu0 %v2365_v51, %s3832_s14 }
 0xa1c   : > { %3166 = vmatmul.msk.bf16.gmra.mxu3 %vm1191_vm1, %v2611_v2 }
 0xa3a   : > { %v2557_v49 = vpop.permute.xlu2 %2556 }
 0xa3b   : > { %v5102_v11 = vsel %vm767_vm0, %v4863_v7, %v2557_v49 }
 0xa3f   : > { %v2353_v46 = vpop.permute.xlu1 %2352 }
 0xa40   : > { %v2366_v23 = vmul.f32 %v5026_v53, %v2353_v46  ;;  %v2559_v5 = vpop.permute.xlu0 %2558 }
 0xa41   : > { %v5106_v58 = vsel %vm767_vm0, %v4867_v63, %v2559_v5 }
 0xa42   : > { %v2612_v25 = vpack.c.bf16 %v5106_v58, %v5102_v11  ;;  %2586 = vrot.lane.b32.xlu1 %v2366_v23, %s3832_s14  ;;  %v2355_v62 = vpop.permute.xlu2 %2354 }
 0xa43   : > { %v2367_v40 = vmul.f32 %v5013_v37, %v2355_v62  ;;  %v5128_v37 = vld [vmem:[%s5235_s9] ss:$0 sm:$0xff] }
 0xa44   : > { %3167 = vmatmul.msk.bf16.gmra.mxu3 %vm1191_vm1, %v2612_v25 }
 0xa45   : > { %2588 = vrot.lane.b32.xlu2 %v2367_v40, %s3832_s14 }
 0xa4a   : > { %v2579_v53 = vpop.permute.xlu0 %2578 }
 0xa4b   : > { %v5116_v7 = vsel %vm767_vm0, %v2579_v53, %v4833_v41  ;;  %v5134_v41 = vld [vmem:[%s5236_s10] ss:$0 sm:$0xff] }
 0xa5a   : > { %v2583_v18 = vpop.permute.xlu2 %2582 }
 0xa5b   : > { %v5141_v39 = vsel %vm767_vm0, %v2583_v18, %v4851_v16 }
 0xa68   : > { %v2581_v10 = vpop.permute.xlu1 %2580 }
 0xa69   : > { %v5120_v63 = vsel %vm767_vm0, %v2581_v10, %v4837_v29 }
 0xa6a   : > { %v2613_v43 = vpack.c.bf16 %v5120_v63, %v5116_v7 }
 0xa6c   : > { %3168 = vmatmul.msk.bf16.gmra.mxu3 %vm1191_vm1, %v2613_v43 }
 0xa75   : > { %v2671_v42 = vpop.f32.mrf.mxu3 }
 0xa76   : > { %v2672_v27 = vadd.f32 %v5128_v37, %v2671_v42 }
 0xa78   : > { %3745 = vtanh.f32 %v2672_v27 }
 0xa7d   : > { %v2673_v29 = vpop.f32.mrf.mxu3 }
 0xa7e   : > { %v3746_v48 = vpop.eup %3745  ;;  %v2674_v54 = vadd.f32 %v5128_v37, %v2673_v29 }
 0xa7f   : > { %v2717_v34 = vmul.f32 %v3746_v48, %v5134_v41 }
 0xa80   : > { %3747 = vtanh.f32 %v2674_v54 }
 0xa81   : > { %2729 = vadd.xlane.f32.xlu0 %v2717_v34 }
 0xa86   : > { %v3748_v8 = vpop.eup %3747 }
 0xa87   : > { %v2718_v20 = vmul.f32 %v3748_v8, %v5134_v41 }
 0xa89   : > { %2731 = vadd.xlane.f32.xlu1 %v2718_v20 }
 0xa8d   : > { %v2585_v13 = vpop.permute.xlu0 %2584 }
 0xa8e   : > { %v5145_v57 = vsel %vm767_vm0, %v2585_v13, %v4853_v33 }
 0xa8f   : > { %v2614_v55 = vpack.c.bf16 %v5145_v57, %v5141_v39 }
 0xa91   : > { %3169 = vmatmul.msk.bf16.gmra.mxu3 %vm1191_vm1, %v2614_v55 }
 0xa9f   : > { %v2676_v17 = vpop.f32.mrf.mxu3  ;;  %v2589_v22 = vpop.permute.xlu2 %2588 }
 0xaa0   : > { %v2677_v9 = vadd.f32 %v5128_v37, %v2676_v17  ;;  %v5156_v26 = vsel %vm767_vm0, %v2589_v22, %v4872_v60 }
 0xaa2   : > { %3749 = vtanh.f32 %v2677_v9 }
 0xaa7   : > { %v2678_v24 = vpop.f32.mrf.mxu3 }
 0xaa8   : > { %v3750_v3 = vpop.eup %3749  ;;  %v2679_v15 = vadd.f32 %v5128_v37, %v2678_v24 }
 0xaa9   : > { %v2719_v16 = vmul.f32 %v3750_v3, %v5134_v41 }
 0xaaa   : > { %3751 = vtanh.f32 %v2679_v15 }
 0xaab   : > { %2733 = vadd.xlane.f32.xlu2 %v2719_v16 }
 0xab0   : > { %v3752_v14 = vpop.eup %3751 }
 0xab1   : > { %v2720_v33 = vmul.f32 %v3752_v14, %v5134_v41 }
 0xab3   : > { %2735 = vadd.xlane.f32.xlu2 %v2720_v33 }
 0xab4   : > { %v2587_v44 = vpop.permute.xlu1 %2586 }
 0xab5   : > { %v5160_v30 = vsel %vm767_vm0, %v2587_v44, %v4865_v4 }
 0xab6   : > { %v2615_v47 = vpack.c.bf16 %v5156_v26, %v5160_v30 }
 0xab8   : > { %3170 = vmatmul.msk.bf16.gmra.mxu3 %vm1191_vm1, %v2615_v47 }
 0xac7   : > { %v2681_v45 = vpop.f32.mrf.mxu3 }
 0xac8   : > { %v2682_v52 = vadd.f32 %v5128_v37, %v2681_v45 }
 0xaca   : > { %3753 = vtanh.f32 %v2682_v52 }
 0xacf   : > { %v2683_v31 = vpop.f32.mrf.mxu3 }
 0xad0   : > { %v3754_v38 = vpop.eup %3753  ;;  %v2684_v61 = vadd.f32 %v5128_v37, %v2683_v31 }
 0xad1   : > { %v2721_v60 = vmul.f32 %v3754_v38, %v5134_v41 }
 0xad2   : > { %3755 = vtanh.f32 %v2684_v61 }
 0xad3   : > { %2737 = vadd.xlane.f32.xlu0 %v2721_v60 }
 0xad8   : > { %v3756_v12 = vpop.eup %3755 }
 0xad9   : > { %v2722_v4 = vmul.f32 %v3756_v12, %v5134_v41 }
 0xadb   : > { %2739 = vadd.xlane.f32.xlu1 %v2722_v4 }
 0xaef   : > { %v2686_v28 = vpop.f32.mrf.mxu3 }
 0xaf0   : > { %v2687_v36 = vadd.f32 %v5128_v37, %v2686_v28 }
 0xaf2   : > { %3757 = vtanh.f32 %v2687_v36 }
 0xaf4   : > { %v2730_v34 = vpop.xlane.xlu0 %2729 }
 0xaf7   : > { %v2688_v19 = vpop.f32.mrf.mxu3 }
 0xaf8   : > { %v3758_v35 = vpop.eup %3757  ;;  %v2689_v56 = vadd.f32 %v5128_v37, %v2688_v19 }
 0xaf9   : > { %v2723_v6 = vmul.f32 %v3758_v35, %v5134_v41 }
 0xafa   : > { %3759 = vtanh.f32 %v2689_v56 }
 0xafb   : > { %2741 = vadd.xlane.f32.xlu2 %v2723_v6 }
 0xafc   : > { %v2732_v24 = vpop.xlane.xlu1 %2731 }
 0xb00   : > { %v3760_v21 = vpop.eup %3759 }
 0xb01   : > { %v2724_v0 = vmul.f32 %v3760_v21, %v5134_v41 }
 0xb03   : > { %2743 = vadd.xlane.f32.xlu0 %v2724_v0 }
 0xb14   : > { %v2691_v2 = vpop.f32.mrf.mxu3 }
 0xb15   : > { %v2692_v51 = vadd.f32 %v5128_v37, %v2691_v2 }
 0xb17   : > { %3761 = vtanh.f32 %v2692_v51 }
 0xb1c   : > { %v2693_v49 = vpop.f32.mrf.mxu3 }
 0xb1d   : > { %v3762_v46 = vpop.eup %3761  ;;  %v2694_v23 = vadd.f32 %v5128_v37, %v2693_v49 }
 0xb1e   : > { %v2725_v5 = vmul.f32 %v3762_v46, %v5134_v41  ;;  %v2734_v54 = vpop.xlane.xlu2 %2733 }
 0xb1f   : > { %3763 = vtanh.f32 %v2694_v23 }
 0xb20   : > { %2745 = vadd.xlane.f32.xlu1 %v2725_v5 }
 0xb25   : > { %v3764_v25 = vpop.eup %3763 }
 0xb26   : > { %v2726_v62 = vmul.f32 %v3764_v25, %v5134_v41  ;;  %v2736_v8 = vpop.xlane.xlu2 %2735 }
 0xb28   : > { %2747 = vadd.xlane.f32.xlu2 %v2726_v62 }
 0xb3b   : > { %v2696_v40 = vpop.f32.mrf.mxu3 }
 0xb3c   : > { %v2697_v53 = vadd.f32 %v5128_v37, %v2696_v40 }
 0xb3e   : > { %3765 = vtanh.f32 %v2697_v53 }
 0xb43   : > { %v2698_v10 = vpop.f32.mrf.mxu3 }
 0xb44   : > { %v3766_v43 = vpop.eup %3765  ;;  %v2699_v42 = vadd.f32 %v5128_v37, %v2698_v10 }
 0xb45   : > { %v2727_v27 = vmul.f32 %v3766_v43, %v5134_v41 }
 0xb46   : > { %3767 = vtanh.f32 %v2699_v42  ;;  %v5181_v20 = vpop.xlane.xlu0 %2737 }
 0xb47   : > { %2749 = vadd.xlane.f32.xlu0 %v2727_v27 }
 0xb4c   : > { %v3768_v29 = vpop.eup %3767 }
 0xb4d   : > { %v2728_v48 = vmul.f32 %v3768_v29, %v5134_v41 }
 0xb4e   : > { %v2740_v19 = vpop.xlane.xlu1 %2739 }
 0xb4f   : > { %2751 = vadd.xlane.f32.xlu1 %v2728_v48 }
 0xb6e   : > { %v2742_v18 = vpop.xlane.xlu2 %2741 }
 0xb6f   : > { %v2753_v13 = vmax.f32 %v2730_v34, %v2742_v18 }
 0xb71   : > { %v2759_v55 = vsub.f32 %v2730_v34, %v2753_v13  ;;  %v2777_v17 = vsub.f32 %v2742_v18, %v2753_v13 }
 0xb73   : > { %v2765_v9 = vmul.f32 1.442695, %v2759_v55  ;;  %v2783_v37 = vmul.f32 1.442695, %v2777_v17 }
 0xb75   : > { %3769 = vpow2.f32 %v2765_v9 }
 0xb76   : > { %3771 = vpow2.f32 %v2783_v37  ;;  %v2744_v3 = vpop.xlane.xlu0 %2743 }
 0xb77   : > { %v2754_v15 = vmax.f32 %v2732_v24, %v2744_v3 }
 0xb79   : > { %v2760_v16 = vsub.f32 %v2732_v24, %v2754_v15  ;;  %v2778_v41 = vsub.f32 %v2744_v3, %v2754_v15 }
 0xb7b   : > { %v3770_v14 = vpop.eup %3769  ;;  %v2767_v33 = vmul.f32 1.442695, %v2760_v16  ;;  %v2785_v22 = vmul.f32 1.442695, %v2778_v41 }
 0xb7c   : > { %v3772_v44 = vpop.eup %3771 }
 0xb7d   : > { %v2795_v47 = vadd.f32 %v3772_v44, %v3770_v14  ;;  %3773 = vpow2.f32 %v2767_v33 }
 0xb7e   : > { %3775 = vpow2.f32 %v2785_v22 }
 0xb7f   : > { %3777 = vrcp.f32 %v2795_v47 }
 0xb83   : > { %v3774_v45 = vpop.eup %3773 }
 0xb84   : > { %v3776_v52 = vpop.eup %3775 }
 0xb85   : > { %v3778_v31 = vpop.eup %3777  ;;  %v2796_v38 = vadd.f32 %v3776_v52, %v3774_v45 }
 0xb86   : > { %v2807_v61 = vmul.f32 %v3778_v31, %v3770_v14  ;;  %v2819_v60 = vmul.f32 %v3778_v31, %v3772_v44 }
 0xb87   : > { %3779 = vrcp.f32 %v2796_v38 }
 0xb88   : > { %v2813_v12 = vmul.f32 %v2807_v61, %v5073_v59  ;;  %v2825_v4 = vmul.f32 %v2819_v60, %v5116_v7 }
 0xb8a   : > { %v2831_v28 = vadd.f32 %v2825_v4, %v2813_v12 }
 0xb8c   : > { %2837 = vst.msk [vmem:[%s5190_s12] sm:$0xff] %vm1191_vm1, %v2831_v28 }
 0xb8d   : > { %v3780_v36 = vpop.eup %3779 }
 0xb8e   : > { %v2808_v35 = vmul.f32 %v3780_v36, %v3774_v45  ;;  %v2820_v56 = vmul.f32 %v3780_v36, %v3776_v52 }
 0xb90   : > { %v2814_v6 = vmul.f32 %v2808_v35, %v5077_v32  ;;  %v2826_v59 = vmul.f32 %v2820_v56, %v5120_v63 }
 0xb92   : > { %v2832_v21 = vadd.f32 %v2826_v59, %v2814_v6 }
 0xb93   : > { %v2746_v7 = vpop.xlane.xlu1 %2745 }
 0xb94   : > { %2838 = vst.msk [vmem:[%s5190_s12 + $0x8] sm:$0xff] %vm1191_vm1, %v2832_v21  ;;  %v2755_v0 = vmax.f32 %v2734_v54, %v2746_v7 }
 0xb96   : > { %v2761_v2 = vsub.f32 %v2734_v54, %v2755_v0  ;;  %v2779_v51 = vsub.f32 %v2746_v7, %v2755_v0 }
 0xb98   : > { %v2769_v49 = vmul.f32 1.442695, %v2761_v2  ;;  %v2787_v46 = vmul.f32 1.442695, %v2779_v51 }
 0xb9a   : > { %3781 = vpow2.f32 %v2769_v49 }
 0xb9b   : > { %3783 = vpow2.f32 %v2787_v46  ;;  %v2748_v23 = vpop.xlane.xlu2 %2747 }
 0xb9c   : > { %v2756_v5 = vmax.f32 %v2736_v8, %v2748_v23 }
 0xb9e   : > { %v2762_v25 = vsub.f32 %v2736_v8, %v2756_v5  ;;  %v2780_v62 = vsub.f32 %v2748_v23, %v2756_v5 }
 0xba0   : > { %v3782_v40 = vpop.eup %3781  ;;  %v2771_v53 = vmul.f32 1.442695, %v2762_v25  ;;  %v2789_v32 = vmul.f32 1.442695, %v2780_v62 }
 0xba1   : > { %v3784_v63 = vpop.eup %3783 }
 0xba2   : > { %v2797_v10 = vadd.f32 %v3784_v63, %v3782_v40  ;;  %3785 = vpow2.f32 %v2771_v53 }
 0xba3   : > { %3787 = vpow2.f32 %v2789_v32 }
 0xba4   : > { %3789 = vrcp.f32 %v2797_v10 }
 0xba8   : > { %v3786_v43 = vpop.eup %3785 }
 0xba9   : > { %v3788_v42 = vpop.eup %3787 }
 0xbaa   : > { %v3790_v27 = vpop.eup %3789  ;;  %v2798_v29 = vadd.f32 %v3788_v42, %v3786_v43 }
 0xbab   : > { %v2809_v48 = vmul.f32 %v3790_v27, %v3782_v40  ;;  %v2821_v54 = vmul.f32 %v3790_v27, %v3784_v63 }
 0xbac   : > { %3791 = vrcp.f32 %v2798_v29 }
 0xbad   : > { %v2815_v34 = vmul.f32 %v2809_v48, %v5088_v1  ;;  %v2827_v8 = vmul.f32 %v2821_v54, %v5141_v39 }
 0xbaf   : > { %v2833_v18 = vadd.f32 %v2827_v8, %v2815_v34 }
 0xbb1   : > { %2839 = vst.msk [vmem:[%s5190_s12 + $0x10] sm:$0xff] %vm1191_vm1, %v2833_v18 }
 0xbb2   : > { %v3792_v13 = vpop.eup %3791 }
 0xbb3   : > { %v2810_v55 = vmul.f32 %v3792_v13, %v3786_v43  ;;  %v2822_v17 = vmul.f32 %v3792_v13, %v3788_v42 }
 0xbb5   : > { %v2816_v9 = vmul.f32 %v2810_v55, %v5092_v50  ;;  %v2828_v37 = vmul.f32 %v2822_v17, %v5145_v57 }
 0xbb7   : > { %v2834_v24 = vadd.f32 %v2828_v37, %v2816_v9 }
 0xbb9   : > { %2840 = vst.msk [vmem:[%s5190_s12 + $0x18] sm:$0xff] %vm1191_vm1, %v2834_v24 }
 0xbba   : > { %v2750_v3 = vpop.xlane.xlu0 %2749 }
 0xbbb   : > { %v2757_v15 = vmax.f32 %v5181_v20, %v2750_v3 }
 0xbbd   : > { %v2763_v1 = vsub.f32 %v5181_v20, %v2757_v15  ;;  %v2781_v16 = vsub.f32 %v2750_v3, %v2757_v15 }
 0xbbf   : > { %v2773_v39 = vmul.f32 1.442695, %v2763_v1  ;;  %v2791_v41 = vmul.f32 1.442695, %v2781_v16 }
 0xbc1   : > { %3793 = vpow2.f32 %v2773_v39 }
 0xbc2   : > { %3795 = vpow2.f32 %v2791_v41  ;;  %v2752_v14 = vpop.xlane.xlu1 %2751 }
 0xbc3   : > { %v2758_v33 = vmax.f32 %v2740_v19, %v2752_v14 }
 0xbc5   : > { %v2764_v22 = vsub.f32 %v2740_v19, %v2758_v33  ;;  %v2782_v44 = vsub.f32 %v2752_v14, %v2758_v33 }
 0xbc7   : > { %v3794_v50 = vpop.eup %3793  ;;  %v2775_v47 = vmul.f32 1.442695, %v2764_v22  ;;  %v2793_v57 = vmul.f32 1.442695, %v2782_v44 }
 0xbc8   : > { %v3796_v45 = vpop.eup %3795 }
 0xbc9   : > { %v2799_v52 = vadd.f32 %v3796_v45, %v3794_v50  ;;  %3797 = vpow2.f32 %v2775_v47 }
 0xbca   : > { %3799 = vpow2.f32 %v2793_v57 }
 0xbcb   : > { %3801 = vrcp.f32 %v2799_v52 }
 0xbcf   : > { %v3798_v31 = vpop.eup %3797 }
 0xbd0   : > { %v3800_v20 = vpop.eup %3799 }
 0xbd1   : > { %v3802_v38 = vpop.eup %3801  ;;  %v2800_v61 = vadd.f32 %v3800_v20, %v3798_v31 }
 0xbd2   : > { %v2811_v60 = vmul.f32 %v3802_v38, %v3794_v50  ;;  %v2823_v12 = vmul.f32 %v3802_v38, %v3796_v45 }
 0xbd3   : > { %3803 = vrcp.f32 %v2800_v61 }
 0xbd4   : > { %v2817_v4 = vmul.f32 %v2811_v60, %v5102_v11  ;;  %v2829_v28 = vmul.f32 %v2823_v12, %v5160_v30 }
 0xbd6   : > { %v2835_v36 = vadd.f32 %v2829_v28, %v2817_v4 }
 0xbd8   : > { %2841 = vst.msk [vmem:[%s5190_s12 + $0x20] sm:$0xff] %vm1191_vm1, %v2835_v36 }
 0xbd9   : > { %v3804_v19 = vpop.eup %3803 }
 0xbda   : > { %v2812_v35 = vmul.f32 %v3804_v19, %v3798_v31  ;;  %v2824_v56 = vmul.f32 %v3804_v19, %v3800_v20 }
 0xbdc   : > { %v2818_v6 = vmul.f32 %v2812_v35, %v5106_v58  ;;  %v2830_v59 = vmul.f32 %v2824_v56, %v5156_v26 }
 0xbde   : > { %v2836_v21 = vadd.f32 %v2830_v59, %v2818_v6 }
 0xbe0   : > { %2842 = vst.msk [vmem:[%s5190_s12 + $0x28] sm:$0xff] %vm1191_vm1, %v2836_v21 }
 0xbe1 PF: > { %p18_p9 = scmp.ge.s32.totalorder %s3910_s21, 4   ;;  %s5238_s17 = smov %s3823_s18 }
 0xbe2   : > { %s5239_s18 = smov %s3919_s24  ;;  %s5240_s19 = smov %s3910_s21 }
 0xbe3   :  { %20 = sbr.rel (!%p18_p9) target bundleno = 2 (0x2), region = 140 }

// kernel: _lambda_.5
= control target key start
LH: loop header
LB: loop body
LE: loop exit
PB: predicated region body
PF: predicated region fallthrough
CT: control target
= control target key end

     0   :  { %vm110_vm0 = vcmask 523264   ;;  %s2267_s30 = smov 48   ;;  %s2268_s14 = smov 64   ;;  %vm155_vm1 = vcmask 130048   ;;  %vm227_vm3 = vcmask 1043456   ;;  %vm199_vm4 = vcmask 64512   ;;  %s2910_s2 = inlined_call_operand.vmem [shape: bf16[2,64,192], index: 2, kind: input, shape index: {}]   ;;  %s2911_s0 = inlined_call_operand.vmem [shape: f32[2,8,64], index: 0, kind: input, shape index: {}]   ;;  %s2912_s1 = inlined_call_operand.vmem [shape: f32[8,64], index: 1, kind: input, shape index: {}]   ;;  %s2913_s3 = inlined_call_operand.vmem [shape: f32[2,1,192], index: 3, kind: input, shape index: {}]   ;;  %s2914_s5 = inlined_call_operand.vmem [shape: f32[2,1,64], index: 5, kind: input, shape index: {}]   ;;  %s2915_s4 = inlined_call_operand.vmem [shape: bf16[2,64,64], index: 4, kind: input, shape index: {}]   ;;  %s2916_s7 = inlined_call_operand.vmem [shape: f32[2,1,64], index: 7, kind: input, shape index: {}]   ;;  %s2917_s6 = inlined_call_operand.vmem [shape: bf16[2,64,64], index: 6, kind: input, shape index: {}]   ;;  %s2918_s10 = inlined_call_operand.vmem [shape: f32[2,4,64], index: 10, kind: input, shape index: {}]   ;;  %s2919_s9 = inlined_call_operand.vmem [shape: f32[2,1,64], index: 9, kind: input, shape index: {}]   ;;  %s2920_s8 = inlined_call_operand.vmem [shape: bf16[2,64,64], index: 8, kind: input, shape index: {}]   ;;  %s2921_s12 = inlined_call_operand.vmem [shape: f32[1,5], index: 12, kind: input, shape index: {}]   ;;  %s2922_s11 = inlined_call_operand.vmem [shape: bf16[64,5], index: 11, kind: input, shape index: {}]   ;;  %s2923_s13 = inlined_call_operand.vmem [shape: f32[2,8,5], index: 13, kind: output, shape index: {}]  }
   0x1   :  { %v1865_v0 = vld [vmem:[%s2910_s2 + $0x30] sm:$0xf]  ;;  %v2102_v1 = vld [vmem:[%s2910_s2 + $0x34] sm:$0xf0]  ;;  %v1857_v2 = vld [vmem:[%s2910_s2 + $0x20] sm:$0xf] }
   0x2   :  { %v1866_v3 = vor.u32 %v2102_v1, %v1865_v0  ;;  %v2100_v4 = vld [vmem:[%s2910_s2 + $0x24] sm:$0xf0]  ;;  %v1849_v6 = vld [vmem:[%s2910_s2 + $0x10] sm:$0xf]  ;;  %v2098_v7 = vld [vmem:[%s2910_s2 + $0x14] sm:$0xf0] }
   0x3   :  { %v1858_v5 = vor.u32 %v2100_v4, %v1857_v2  ;;  %v1850_v8 = vor.u32 %v2098_v7, %v1849_v6  ;;  %v45_v9 = vld [vmem:[%s2911_s0] sm:$0xff]  ;;  %v46_v10 = vld [vmem:[%s2911_s0 + $0x8] sm:$0xff]  ;;  %s2269_s15 = smov 112   ;;  %s2270_s16 = smov 32   ;;  %v2101_v38 = vld [vmem:[%s2910_s2 + $0x34] sm:$0xf] }
   0x4   :  { %118 = vmatpush.bf16.msra.mxu0 %v1866_v3  ;;  %v47_v11 = vld [vmem:[%s2912_s1] sm:$0xff]  ;;  %v2096_v13 = vld [vmem:[%s2910_s2 + $0x4] sm:$0xf0]  ;;  %s2271_s17 = smov 96   ;;  %s2272_s18 = smov 16   ;;  %vm637_vm5 = vcmask 261120  }
   0x5   :  { %v1841_v12 = vld [vmem:[%s2910_s2] sm:$0xf]  ;;  %v2379_v14 = vadd.f32 %v47_v11, %v45_v9  ;;  %v2381_v15 = vadd.f32 %v47_v11, %v46_v10  ;;  %s2273_s19 = smov 80   ;;  %v1867_v39 = vld [vmem:[%s2910_s2 + $0x38] sm:$0xf0]  ;;  %v50_v10 = vlaneseq  ;;  %vm640_vm6 = vcmask 392192  }
   0x6   :  { %v1842_v16 = vor.u32 %v2096_v13, %v1841_v12  ;;  %v2389_v18 = vld [vmem:[%s2913_s3] sm:$0x3]  ;;  %v1870_v40 = vor.u32 %v2101_v38, %v1867_v39  ;;  %v2099_v41 = vld [vmem:[%s2910_s2 + $0x24] sm:$0xf]  ;;  %v1859_v42 = vld [vmem:[%s2910_s2 + $0x28] sm:$0xf0] }
   0x7   :  { %v63_v17 = vpack.c.bf16 %v2381_v15, %v2379_v14  ;;  %v66_v19 = vperm.slane %v2389_v18, 0  ;;  %v2097_v43 = vld [vmem:[%s2910_s2 + $0x14] sm:$0xf]  ;;  %v1862_v44 = vor.u32 %v2099_v41, %v1859_v42  ;;  %v1851_v45 = vld [vmem:[%s2910_s2 + $0x18] sm:$0xf0]  ;;  %v67_v9 = vperm.slane %v2389_v18, 1 }
   0x8   :  { %119 = vmatpush.bf16.msra.mxu0 %v1858_v5  ;;  %132 = vmatpush.bf16.msra.mxu1 %v1870_v40  ;;  %v1854_v46 = vor.u32 %v2097_v43, %v1851_v45  ;;  %v2095_v47 = vld [vmem:[%s2910_s2 + $0x4] sm:$0xf]  ;;  %v1843_v48 = vld [vmem:[%s2910_s2 + $0x8] sm:$0xf0] }
   0x9   :  { %v1846_v49 = vor.u32 %v2095_v47, %v1843_v48 }
   0xc   :  { %120 = vmatpush.bf16.msra.mxu0 %v1850_v8  ;;  %133 = vmatpush.bf16.msra.mxu1 %v1862_v44 }
  0x10   :  { %121 = vmatpush.bf16.msra.mxu0 %v1842_v16  ;;  %134 = vmatpush.bf16.msra.mxu1 %v1854_v46  ;;  %v51_v16 = vand.u32 127, %v50_v10 }
  0x12   :  { %vm52_vm2 = vcmp.ge.s32.totalorder %v51_v16, 3 }
  0x13   :  { %1871 = vmatmul.msk.bf16.vlgmr.msra.gmra.mxu0 %vm110_vm0, %v63_v17 }
  0x14   :  { %135 = vmatpush.bf16.msra.mxu1 %v1846_v49 }
  0x17   :  { %1872 = vmatmul.msk.bf16.vlgmr.msra.gmra.mxu1 %vm110_vm0, %v63_v17 }
  0x90   :  { %v123_v20 = vpop.f32.mrf.mxu0 }
  0x91   :  { %v124_v21 = vadd.f32 %v123_v20, %v66_v19 }
  0x93   :  { %v142_v22 = vmul.f32 0.25, %v124_v21  ;;  %v146_v23 = vpack.c.bf16 %v124_v21, %v124_v21 }
  0x94   :  { %v137_v8 = vpop.f32.mrf.mxu1 }
  0x95   :  { %v2392_v24 = vpack.c.bf16 %v142_v22, %v142_v22  ;;  %v151_v25 = vunpack.c.l.b16 %v146_v23  ;;  %v138_v13 = vadd.f32 %v137_v8, %v67_v9  ;;  %v2274_v22 = vmov 0.0  }
  0x96   :  { %v2457_v23 = vsel %vm52_vm2, -1e+30, %v2274_v22 }
  0x97   :  { %v152_v26 = vpack.c.b16 %v151_v25, %v151_v25  ;;  %v264_v27 = vunpack.c.l.b16 %v2392_v24 }
  0x98   :  { %v125_v28 = vpop.f32.mrf.mxu0 }
  0x99   :  { %v126_v29 = vadd.f32 %v125_v28, %v66_v19  ;;  %268 = vrot.lane.b32.xlu1 %v152_v26, %s2267_s30  ;;  %153 = vrot.lane.b32.xlu0 %v152_v26, %s2268_s14  ;;  %v265_v30 = vpack.c.b16 %v264_v27, %v264_v27  ;;  %v148_v19 = vpack.c.bf16 %v138_v13, %v138_v13 }
  0x9b   :  { %v143_v31 = vmul.f32 0.25, %v126_v29  ;;  %v147_v32 = vpack.c.bf16 %v126_v29, %v126_v29  ;;  %266 = vrot.lane.b32.xlu2 %v265_v30, %s2269_s15  ;;  %v229_v20 = vsel %vm227_vm3, %v148_v19, 0  ;;  %v340_v39 = vunpack.c.l.b16 %v148_v19 }
  0x9c   :  { %v139_v11 = vpop.f32.mrf.mxu1 }
  0x9d   :  { %v145_v33 = vpack.c.bf16 %v143_v31, %v143_v31  ;;  %v176_v34 = vunpack.c.l.b16 %v147_v32  ;;  %v140_v12 = vadd.f32 %v139_v11, %v67_v9  ;;  %v2468_v44 = vpack.c.b16 %v340_v39, %v340_v39 }
  0x9f   :  { %v177_v35 = vpack.c.b16 %v176_v34, %v176_v34  ;;  %v290_v36 = vunpack.c.l.b16 %v145_v33  ;;  %v2452_v17 = vpack.c.bf16 %v140_v12, %v140_v12 }
  0xa1   :  { %294 = vrot.lane.b32.xlu1 %v177_v35, %s2267_s30  ;;  %178 = vrot.lane.b32.xlu0 %v177_v35, %s2268_s14  ;;  %v291_v37 = vpack.c.b16 %v290_v36, %v290_v36  ;;  %v248_v21 = vsel %vm227_vm3, %v2452_v17, 0 }
  0xa3   :  { %292 = vrot.lane.b32.xlu2 %v291_v37, %s2269_s15 }
  0xa9   :  { %412 = vrot.lane.b32.xlu1 %v177_v35, %s2270_s16  ;;  %389 = vrot.lane.b32.xlu0 %v152_v26, %s2270_s16 }
  0xab   :  { %387 = vrot.lane.b32.xlu2 %v265_v30, %s2271_s17 }
  0xb1   :  { %501 = vrot.lane.b32.xlu1 %v152_v26, %s2272_s18  ;;  %410 = vrot.lane.b32.xlu0 %v291_v37, %s2271_s17 }
  0xb3   :  { %524 = vrot.lane.b32.xlu2 %v177_v35, %s2272_s18 }
  0xb9   :  { %522 = vrot.lane.b32.xlu1 %v291_v37, %s2273_s19  ;;  %499 = vrot.lane.b32.xlu0 %v265_v30, %s2273_s19 }
  0xf5   :  { %v267_v50 = vpop.permute.xlu2 %266 }
  0xfd   :  { %v293_v51 = vpop.permute.xlu2 %292 }
 0x105   :  { %v388_v56 = vpop.permute.xlu2 %387 }
 0x10b   :  { %v269_v52 = vpop.permute.xlu1 %268  ;;  %v154_v53 = vpop.permute.xlu0 %153 }
 0x10c   :  { %v160_v54 = vsel %vm155_vm1, %v154_v53, 0  ;;  %v274_v55 = vsel %vm155_vm1, %v269_v52, 0 }
 0x10d   :  { %169 = vmatpush.bf16.xpose.msra.mxu2 %v160_v54  ;;  %283 = vmatpush.bf16.xpose.msrb.mxu0 %v274_v55  ;;  %v525_v61 = vpop.permute.xlu2 %524 }
 0x10e   :  { %v530_v2 = vsel %vm155_vm1, %v525_v61, 0 }
 0x113   :  { %v295_v57 = vpop.permute.xlu1 %294  ;;  %v179_v58 = vpop.permute.xlu0 %178 }
 0x114   :  { %1873 = vmatmul.msk.bf16.vlgmr.msra.gmra.mxu2 %vm155_vm1, %v2392_v24  ;;  %1877 = vmatmul.msk.bf16.vlgmr.msrb.gmra.mxu0 %vm155_vm1, %v267_v50  ;;  %v184_v59 = vsel %vm155_vm1, %v179_v58, 0  ;;  %v300_v60 = vsel %vm155_vm1, %v295_v57, 0 }
 0x115   :  { %193 = vmatpush.bf16.xpose.msra.mxu3 %v184_v59  ;;  %309 = vmatpush.bf16.xpose.msrb.mxu1 %v300_v60 }
 0x116   :  { %238 = vmatpush.bf16.msrb.mxu2 %v229_v20 }
 0x11b   :  { %v413_v62 = vpop.permute.xlu1 %412  ;;  %v390_v63 = vpop.permute.xlu0 %389 }
 0x11c   :  { %v418_v0 = vsel %vm155_vm1, %v413_v62, 0  ;;  %v395_v1 = vsel %vm155_vm1, %v390_v63, 0  ;;  %1874 = vmatmul.msk.bf16.vlgmr.msra.gmra.mxu3 %vm155_vm1, %v145_v33  ;;  %1878 = vmatmul.msk.bf16.vlgmr.msrb.gmra.mxu1 %vm155_vm1, %v293_v51 }
 0x11d   :  { %404 = vmatpush.bf16.xpose.msra.mxu0 %v395_v1  ;;  %427 = vmatpush.bf16.xpose.msra.mxu1 %v418_v0 }
 0x11e   :  { %257 = vmatpush.bf16.msrb.mxu3 %v248_v21 }
 0x123   :  { %v502_v3 = vpop.permute.xlu1 %501  ;;  %v411_v5 = vpop.permute.xlu0 %410 }
 0x124   :  { %v507_v4 = vsel %vm155_vm1, %v502_v3, 0  ;;  %1881 = vmatmul.msk.bf16.vlgmr.msra.gmra.mxu0 %vm155_vm1, %v388_v56 }
 0x125   :  { %539 = vmatpush.bf16.xpose.msrb.mxu1 %v530_v2  ;;  %516 = vmatpush.bf16.xpose.msrb.mxu0 %v507_v4 }
 0x12b   :  { %v500_v6 = vpop.permute.xlu0 %499  ;;  %v523_v7 = vpop.permute.xlu1 %522 }
 0x12c   :  { %1882 = vmatmul.msk.bf16.vlgmr.msra.gmra.mxu1 %vm155_vm1, %v411_v5 }
 0x134   :  { %1885 = vmatmul.msk.bf16.vlgmr.msrb.gmra.mxu0 %vm155_vm1, %v500_v6 }
 0x13c   :  { %1886 = vmatmul.msk.bf16.vlgmr.msrb.gmra.mxu1 %vm155_vm1, %v523_v7 }
 0x191   :  { %v285_v18 = vpop.f32.mrf.mxu0 }
 0x192   :  { %v286_v24 = vadd.f32 %v285_v18, %v2457_v23 }
 0x194   :  { %v315_v25 = vsel %vm199_vm4, %v286_v24, -inf }
 0x195   :  { %316 = vmax.xlane.f32.xlu1 %v315_v25  ;;  %v364_v25 = vunpack.c.l.b16 %v2452_v17 }
 0x197   :  { %v171_v26 = vpop.f32.mrf.mxu2 }
 0x198   :  { %v172_v27 = vadd.f32 %v171_v26, %v2457_v23 }
 0x199   :  { %v287_v28 = vpop.f32.mrf.mxu0  ;;  %v311_v29 = vpop.f32.mrf.mxu1 }
 0x19a   :  { %v200_v30 = vsel %vm199_vm4, %v172_v27, -inf  ;;  %v312_v31 = vadd.f32 %v311_v29, %v2457_v23  ;;  %v365_v28 = vpack.c.b16 %v364_v25, %v364_v25 }
 0x19b   :  { %201 = vmax.xlane.f32.xlu2 %v200_v30 }
 0x19c   :  { %v318_v38 = vsel %vm199_vm4, %v312_v31, -inf }
 0x19f   :  { %v173_v32 = vpop.f32.mrf.mxu2  ;;  %v195_v33 = vpop.f32.mrf.mxu3 }
 0x1a0   :  { %v196_v34 = vadd.f32 %v195_v33, %v2457_v23 }
 0x1a1   :  { %v313_v35 = vpop.f32.mrf.mxu1  ;;  %v406_v36 = vpop.f32.mrf.mxu0 }
 0x1a2   :  { %v203_v37 = vsel %vm199_vm4, %v196_v34, -inf  ;;  %v407_v40 = vadd.f32 %v406_v36, %v2457_v23 }
 0x1a3   :  { %204 = vmax.xlane.f32.xlu0 %v203_v37  ;;  %319 = vmax.xlane.f32.xlu2 %v318_v38 }
 0x1a4   :  { %v433_v46 = vsel %vm199_vm4, %v407_v40, -inf }
 0x1a7   :  { %v197_v41 = vpop.f32.mrf.mxu3 }
 0x1a9   :  { %v408_v42 = vpop.f32.mrf.mxu0  ;;  %v429_v43 = vpop.f32.mrf.mxu1 }
 0x1aa   :  { %v430_v45 = vadd.f32 %v429_v43, %v2457_v23 }
 0x1ab   :  { %434 = vmax.xlane.f32.xlu2 %v433_v46 }
 0x1ac   :  { %v436_v47 = vsel %vm199_vm4, %v430_v45, -inf }
 0x1ad   :  { %437 = vmax.xlane.f32.xlu0 %v436_v47 }
 0x1ae   :  { %342 = vrot.lane.b32.xlu1 %v2468_v44, %s2269_s15 }
 0x1b1   :  { %v431_v48 = vpop.f32.mrf.mxu1  ;;  %v518_v49 = vpop.f32.mrf.mxu0 }
 0x1b2   :  { %v519_v55 = vadd.f32 %v518_v49, %v2457_v23 }
 0x1b4   :  { %v545_v56 = vsel %vm199_vm4, %v519_v55, -inf }
 0x1b9   :  { %v520_v50 = vpop.f32.mrf.mxu0  ;;  %v541_v51 = vpop.f32.mrf.mxu1 }
 0x1ba   :  { %v2476_v52 = vadd.f32 %v541_v51, %v2457_v23 }
 0x1bc   :  { %v548_v53 = vsel %vm199_vm4, %v2476_v52, -inf }
 0x1bd   :  { %549 = vmax.xlane.f32.xlu2 %v548_v53 }
 0x1c1   :  { %457 = vrot.lane.b32.xlu0 %v2468_v44, %s2271_s17  ;;  %v543_v54 = vpop.f32.mrf.mxu1 }
 0x1d8   :  { %546 = vmax.xlane.f32.xlu1 %v545_v56 }
 0x208   :  { %v317_v57 = vpop.xlane.xlu1 %316 }
 0x209   :  { %v321_v58 = vsub.f32 %v286_v24, %v317_v57 }
 0x20b   :  { %v323_v59 = vmul.f32 1.442695, %v321_v58 }
 0x20d   :  { %2185 = vpow2.f32 %v323_v59 }
 0x20e   :  { %v202_v60 = vpop.xlane.xlu2 %201 }
 0x20f   :  { %v206_v61 = vsub.f32 %v172_v27, %v202_v60 }
 0x211   :  { %v208_v62 = vmul.f32 1.442695, %v206_v61 }
 0x213   :  { %v2484_v63 = vpop.eup %2185  ;;  %2187 = vpow2.f32 %v208_v62 }
 0x214   :  { %v327_v0 = vsel %vm199_vm4, %v2484_v63, 0.0 }
 0x215   :  { %328 = vadd.xlane.f32.xlu2 %v327_v0 }
 0x216   :  { %v205_v1 = vpop.xlane.xlu0 %204  ;;  %v320_v2 = vpop.xlane.xlu2 %319 }
 0x217   :  { %v207_v3 = vsub.f32 %v196_v34, %v205_v1  ;;  %v322_v4 = vsub.f32 %v312_v31, %v320_v2 }
 0x219   :  { %v2188_v5 = vpop.eup %2187  ;;  %v210_v6 = vmul.f32 1.442695, %v207_v3  ;;  %v325_v7 = vmul.f32 1.442695, %v322_v4 }
 0x21a   :  { %v212_v8 = vsel %vm199_vm4, %v2188_v5, 0.0 }
 0x21b   :  { %2189 = vpow2.f32 %v210_v6  ;;  %213 = vadd.xlane.f32.xlu0 %v212_v8 }
 0x21c   :  { %2191 = vpow2.f32 %v325_v7 }
 0x21e   :  { %v435_v9 = vpop.xlane.xlu2 %434 }
 0x21f   :  { %v439_v10 = vsub.f32 %v407_v40, %v435_v9 }
 0x220   :  { %v438_v11 = vpop.xlane.xlu0 %437  ;;  %v343_v12 = vpop.permute.xlu1 %342 }
 0x221   :  { %v2190_v13 = vpop.eup %2189  ;;  %v441_v16 = vmul.f32 1.442695, %v439_v10  ;;  %v348_v19 = vsel %vm227_vm3, %v343_v12, 0  ;;  %v440_v21 = vsub.f32 %v430_v45, %v438_v11 }
 0x222   :  { %v2490_v20 = vpop.eup %2191  ;;  %v215_v22 = vsel %vm199_vm4, %v2190_v13, 0.0  ;;  %357 = vmatpush.bf16.msra.mxu2 %v348_v19 }
 0x223   :  { %2193 = vpow2.f32 %v441_v16  ;;  %216 = vadd.xlane.f32.xlu1 %v215_v22  ;;  %v330_v18 = vsel %vm199_vm4, %v2490_v20, 0.0  ;;  %v443_v24 = vmul.f32 1.442695, %v440_v21 }
 0x224   :  { %331 = vadd.xlane.f32.xlu0 %v330_v18 }
 0x225   :  { %2195 = vpow2.f32 %v443_v24 }
 0x229   :  { %v2496_v26 = vpop.eup %2193 }
 0x22a   :  { %v445_v27 = vsel %vm199_vm4, %v2496_v26, 0.0 }
 0x22b   :  { %v2501_v29 = vpop.eup %2195 }
 0x22c   :  { %446 = vadd.xlane.f32.xlu0 %v445_v27  ;;  %v448_v30 = vsel %vm199_vm4, %v2501_v29, 0.0 }
 0x22d   :  { %366 = vrot.lane.b32.xlu2 %v365_v28, %s2269_s15 }
 0x230   :  { %v550_v33 = vpop.xlane.xlu2 %549 }
 0x231   :  { %v552_v34 = vsub.f32 %v2476_v52, %v550_v33 }
 0x233   :  { %v555_v37 = vmul.f32 1.442695, %v552_v34  ;;  %v458_v40 = vpop.permute.xlu0 %457 }
 0x234   :  { %449 = vadd.xlane.f32.xlu0 %v448_v30  ;;  %v463_v49 = vsel %vm227_vm3, %v458_v40, 0  ;;  %v2106_v40 = vld [vmem:[%s2915_s4 + $0x18] sm:$0xff] }
 0x235   :  { %687 = vmatpush.bf16.msra.mxu0 %v2106_v40 }
 0x23c   :  { %478 = vrot.lane.b32.xlu1 %v365_v28, %s2271_s17 }
 0x248   :  { %569 = vrot.lane.b32.xlu0 %v2468_v44, %s2273_s19 }
 0x24b   :  { %v547_v17 = vpop.xlane.xlu1 %546 }
 0x24c   :  { %v551_v31 = vsub.f32 %v519_v55, %v547_v17 }
 0x24e   :  { %v553_v32 = vmul.f32 1.442695, %v551_v31 }
 0x250   :  { %2197 = vpow2.f32 %v553_v32  ;;  %590 = vrot.lane.b32.xlu0 %v365_v28, %s2273_s19 }
 0x251   :  { %2199 = vpow2.f32 %v555_v37 }
 0x256   :  { %v2198_v35 = vpop.eup %2197 }
 0x257   :  { %v557_v36 = vsel %vm199_vm4, %v2198_v35, 0.0  ;;  %v2511_v38 = vpop.eup %2199 }
 0x258   :  { %558 = vadd.xlane.f32.xlu2 %v557_v36  ;;  %v560_v39 = vsel %vm199_vm4, %v2511_v38, 0.0 }
 0x266   :  { %561 = vadd.xlane.f32.xlu1 %v560_v39 }
 0x288   :  { %v329_v41 = vpop.xlane.xlu2 %328 }
 0x28e   :  { %v214_v42 = vpop.xlane.xlu0 %213 }
 0x28f   :  { %2201 = vrcp.f32 %v214_v42  ;;  %v2104_v42 = vld [vmem:[%s2915_s4 + $0x8] sm:$0xff] }
 0x290   :  { %v367_v43 = vpop.permute.xlu2 %366 }
 0x291   :  { %v372_v44 = vsel %vm227_vm3, %v367_v43, 0  ;;  %v2103_v43 = vld [vmem:[%s2915_s4] sm:$0xff] }
 0x292   :  { %381 = vmatpush.bf16.msra.mxu3 %v372_v44 }
 0x295   :  { %v2202_v45 = vpop.eup %2201 }
 0x296   :  { %v220_v46 = vmul.f32 %v2202_v45, %v2188_v5  ;;  %v217_v47 = vpop.xlane.xlu1 %216 }
 0x297   :  { %2203 = vrcp.f32 %v217_v47  ;;  %v332_v50 = vpop.xlane.xlu0 %331 }
 0x298   :  { %v222_v48 = vpack.c.bf16 %v220_v46, %v220_v46  ;;  %2205 = vrcp.f32 %v329_v41  ;;  %v2105_v41 = vld [vmem:[%s2915_s4 + $0x10] sm:$0xff] }
 0x299   :  { %2207 = vrcp.f32 %v332_v50  ;;  %688 = vmatpush.bf16.msra.mxu0 %v2105_v41 }
 0x29a   :  { %1875 = vmatmul.msk.bf16.vlgmr.msrb.gmra.mxu2 %vm199_vm4, %v222_v48 }
 0x29b   :  { %472 = vmatpush.bf16.msrb.mxu2 %v463_v49 }
 0x29d   :  { %v2204_v51 = vpop.eup %2203  ;;  %689 = vmatpush.bf16.msra.mxu0 %v2104_v42  ;;  %v2585_v42 = vld [vmem:[%s2918_s10] sm:$0xf] }
 0x29e   :  { %v221_v52 = vmul.f32 %v2204_v51, %v2190_v13  ;;  %v2206_v54 = vpop.eup %2205 }
 0x29f   :  { %v335_v55 = vmul.f32 %v2206_v54, %v2484_v63  ;;  %v447_v56 = vpop.xlane.xlu0 %446  ;;  %v2208_v58 = vpop.eup %2207 }
 0x2a0   :  { %v223_v53 = vpack.c.bf16 %v221_v52, %v221_v52  ;;  %2209 = vrcp.f32 %v447_v56  ;;  %v336_v59 = vmul.f32 %v2208_v58, %v2490_v20 }
 0x2a1   :  { %v337_v57 = vpack.c.bf16 %v335_v55, %v335_v55  ;;  %690 = vmatpush.bf16.msra.mxu0 %v2103_v43 }
 0x2a2   :  { %1876 = vmatmul.msk.bf16.vlgmr.msrb.gmra.mxu3 %vm199_vm4, %v223_v53  ;;  %v338_v62 = vpack.c.bf16 %v336_v59, %v336_v59 }
 0x2a6   :  { %v2210_v1 = vpop.eup %2209 }
 0x2a7   :  { %v450_v0 = vpop.xlane.xlu0 %449  ;;  %v453_v63 = vmul.f32 %v2210_v1, %v2496_v26 }
 0x2a8   :  { %2211 = vrcp.f32 %v450_v0 }
 0x2a9   :  { %v455_v2 = vpack.c.bf16 %v453_v63, %v453_v63 }
 0x2aa   :  { %1879 = vmatmul.msk.bf16.vlgmr.msra.gmra.mxu2 %vm199_vm4, %v337_v57 }
 0x2ae   :  { %v479_v60 = vpop.permute.xlu1 %478  ;;  %v2212_v3 = vpop.eup %2211 }
 0x2af   :  { %v484_v61 = vsel %vm227_vm3, %v479_v60, 0  ;;  %v454_v6 = vmul.f32 %v2212_v3, %v2501_v29  ;;  %v2178_v60 = vld [vmem:[%s2914_s5] ss:$0 sm:$0xff] }
 0x2b0   :  { %493 = vmatpush.bf16.msrb.mxu3 %v484_v61 }
 0x2b1   :  { %v456_v7 = vpack.c.bf16 %v454_v6, %v454_v6 }
 0x2b2   :  { %1880 = vmatmul.msk.bf16.vlgmr.msra.gmra.mxu3 %vm199_vm4, %v338_v62 }
 0x2ba   :  { %v570_v4 = vpop.permute.xlu0 %569  ;;  %1883 = vmatmul.msk.bf16.vlgmr.msrb.gmra.mxu2 %vm199_vm4, %v455_v2 }
 0x2bb   :  { %v575_v5 = vsel %vm227_vm3, %v570_v4, 0 }
 0x2bc   :  { %584 = vmatpush.bf16.msra.mxu2 %v575_v5  ;;  %v2275_v5 = vmov 64.0  }
 0x2c2   :  { %v591_v8 = vpop.permute.xlu0 %590  ;;  %1884 = vmatmul.msk.bf16.vlgmr.msrb.gmra.mxu3 %vm199_vm4, %v456_v7 }
 0x2c3   :  { %v596_v9 = vsel %vm227_vm3, %v591_v8, 0 }
 0x2c4   :  { %605 = vmatpush.bf16.msra.mxu3 %v596_v9 }
 0x2cb   :  { %v559_v10 = vpop.xlane.xlu2 %558 }
 0x2cc   :  { %2213 = vrcp.f32 %v559_v10 }
 0x2d2   :  { %v2214_v11 = vpop.eup %2213 }
 0x2d3   :  { %v565_v12 = vmul.f32 %v2214_v11, %v2198_v35 }
 0x2d5   :  { %v567_v13 = vpack.c.bf16 %v565_v12, %v565_v12 }
 0x2d7   :  { %1887 = vmatmul.msk.bf16.vlgmr.msra.gmra.mxu2 %vm199_vm4, %v567_v13 }
 0x2d9   :  { %v562_v16 = vpop.xlane.xlu1 %561 }
 0x2da   :  { %2215 = vrcp.f32 %v562_v16 }
 0x2db   :  { %2217 = vrcp.f32 %v2275_v5  ;;  %v2180_v5 = vld [vmem:[%s2919_s9] ss:$0 sm:$0xff] }
 0x2e0   :  { %v2216_v19 = vpop.eup %2215 }
 0x2e1   :  { %v566_v20 = vmul.f32 %v2216_v19, %v2511_v38  ;;  %v2218_v6 = vpop.eup %2217 }
 0x2e2   :  { %v706_v7 = vmul.f32 64.0, %v2218_v6  ;;  %vm710_vm7 = vweird.f32 %v2218_v6 }
 0x2e3   :  { %v568_v21 = vpack.c.bf16 %v566_v20, %v566_v20 }
 0x2e4   :  { %v707_v8 = vsub.f32 1.0, %v706_v7 }
 0x2e5   :  { %1888 = vmatmul.msk.bf16.vlgmr.msra.gmra.mxu3 %vm199_vm4, %v568_v21 }
 0x2e6   :  { %v708_v9 = vmul.f32 %v2218_v6, %v707_v8 }
 0x2e8   :  { %v709_v10 = vadd.f32 %v2218_v6, %v708_v9 }
 0x2ea   :  { %v2562_v11 = vsel %vm710_vm7, %v2218_v6, %v709_v10 }
 0x31d   :  { %v240_v22 = vpop.f32.mrf.mxu2 }
 0x325   :  { %v242_v18 = vpop.f32.mrf.mxu2  ;;  %v259_v24 = vpop.f32.mrf.mxu3 }
 0x32d   :  { %v261_v25 = vpop.f32.mrf.mxu3  ;;  %v359_v26 = vpop.f32.mrf.mxu2 }
 0x32e   :  { %v2109_v25 = vld [vmem:[%s2917_s6 + $0x10] sm:$0xff] }
 0x335   :  { %v361_v27 = vpop.f32.mrf.mxu2  ;;  %v383_v28 = vpop.f32.mrf.mxu3 }
 0x336   :  { %v2148_v29 = vpack.i.bf16 %v383_v28, %v359_v26  ;;  %v2108_v26 = vld [vmem:[%s2917_s6 + $0x8] sm:$0xff] }
 0x338   :  { %2149 = vrot.lane.b32.xlu0 %v2148_v29, %s2272_s18 }
 0x33d   :  { %v385_v30 = vpop.f32.mrf.mxu3  ;;  %v474_v17 = vpop.f32.mrf.mxu2 }
 0x33e   :  { %v2107_v30 = vld [vmem:[%s2917_s6] sm:$0xff] }
 0x345   :  { %v476_v31 = vpop.f32.mrf.mxu2  ;;  %v495_v32 = vpop.f32.mrf.mxu3 }
 0x346   :  { %v2153_v33 = vpack.i.bf16 %v495_v32, %v474_v17 }
 0x348   :  { %2154 = vrot.lane.b32.xlu0 %v2153_v33, %s2270_s16 }
 0x34d   :  { %v497_v34 = vpop.f32.mrf.mxu3 }
 0x35a   :  { %v586_v35 = vpop.f32.mrf.mxu2 }
 0x362   :  { %v588_v36 = vpop.f32.mrf.mxu2 }
 0x368   :  { %v607_v37 = vpop.f32.mrf.mxu3 }
 0x369   :  { %v2158_v38 = vpack.i.bf16 %v607_v37, %v586_v35 }
 0x36b   :  { %2159 = vrot.lane.b32.xlu2 %v2158_v38, %s2267_s30 }
 0x370   :  { %v609_v39 = vpop.f32.mrf.mxu3 }
 0x3aa   :  { %v2150_v44 = vpop.permute.xlu0 %2149 }
 0x3ab   :  { %v2152_v46 = vunpack.i.h.bf16 %v2150_v44  ;;  %v2151_v47 = vunpack.i.l.bf16 %v2150_v44 }
 0x3ad   :  { %v636_v51 = vsel %vm155_vm1, %v259_v24, %v2152_v46  ;;  %v635_v52 = vsel %vm155_vm1, %v240_v22, %v2151_v47  ;;  %v2110_v24 = vld [vmem:[%s2917_s6 + $0x18] sm:$0xff]  ;;  %v750_v46 = vperm.slane %v2585_v42, 0 }
 0x3ae   :  { %800 = vmatpush.bf16.msra.mxu1 %v2110_v24 }
 0x3b2   :  { %801 = vmatpush.bf16.msra.mxu1 %v2109_v25 }
 0x3b6   :  { %802 = vmatpush.bf16.msra.mxu1 %v2108_v26 }
 0x3ba   :  { %v2155_v45 = vpop.permute.xlu0 %2154  ;;  %803 = vmatpush.bf16.msra.mxu1 %v2107_v30 }
 0x3bb   :  { %v2157_v48 = vunpack.i.h.bf16 %v2155_v45  ;;  %v2156_v49 = vunpack.i.l.bf16 %v2155_v45 }
 0x3bd   :  { %v639_v55 = vsel %vm637_vm5, %v636_v51, %v2157_v48  ;;  %v638_v56 = vsel %vm637_vm5, %v635_v52, %v2156_v49 }
 0x3c5   :  { %v2160_v50 = vpop.permute.xlu2 %2159 }
 0x3c6   :  { %v2162_v53 = vunpack.i.h.bf16 %v2160_v50  ;;  %v2161_v54 = vunpack.i.l.bf16 %v2160_v50  ;;  %v753_v50 = vperm.slane %v2585_v42, 1 }
 0x3c8   :  { %v642_v57 = vsel %vm640_vm6, %v639_v55, %v2162_v53  ;;  %v641_v58 = vsel %vm640_vm6, %v638_v56, %v2161_v54 }
 0x3c9   :  { %v651_v59 = vpack.c.bf16 %v642_v57, %v641_v58  ;;  %v2114_v57 = vld [vmem:[%s2920_s8 + $0x18] sm:$0xff]  ;;  %v2113_v58 = vld [vmem:[%s2920_s8 + $0x10] sm:$0xff] }
 0x3ca   :  { %856 = vmatpush.bf16.msrb.mxu2 %v2114_v57 }
 0x3cb   :  { %1905 = vmatmul.msk.bf16.vlgmr.msra.gmra.mxu0 %vm110_vm0, %v651_v59  ;;  %v2112_v59 = vld [vmem:[%s2920_s8 + $0x8] sm:$0xff] }
 0x3ce   :  { %857 = vmatpush.bf16.msrb.mxu2 %v2113_v58 }
 0x3d2   :  { %858 = vmatpush.bf16.msrb.mxu2 %v2112_v59 }
 0x448   :  { %v692_v61 = vpop.f32.mrf.mxu0 }
 0x449   :  { %v693_v62 = vadd.f32 %v2178_v60, %v692_v61 }
 0x44b   :  { %v697_v0 = vadd.f32 %v693_v62, %v2379_v14  ;;  %v2179_v62 = vld [vmem:[%s2916_s7] ss:$0 sm:$0xff] }
 0x44d   :  { %v699_v1 = vsel %vm110_vm0, %v697_v0, 0.0 }
 0x44e   :  { %700 = vadd.xlane.f32.xlu1 %v699_v1 }
 0x450   :  { %v694_v63 = vpop.f32.mrf.mxu0 }
 0x451   :  { %v695_v2 = vadd.f32 %v2178_v60, %v694_v63  ;;  %v2111_v60 = vld [vmem:[%s2920_s8] sm:$0xff] }
 0x452   :  { %859 = vmatpush.bf16.msrb.mxu2 %v2111_v60 }
 0x453   :  { %v698_v3 = vadd.f32 %v695_v2, %v2381_v15 }
 0x455   :  { %v702_v4 = vsel %vm110_vm0, %v698_v3, 0.0 }
 0x456   :  { %703 = vadd.xlane.f32.xlu0 %v702_v4 }
 0x4c1   :  { %v701_v14 = vpop.xlane.xlu1 %700 }
 0x4c2   :  { %v712_v12 = vmul.f32 %v2562_v11, %v701_v14 }
 0x4c4   :  { %v714_v13 = vsub.f32 %v697_v0, %v712_v12 }
 0x4c6   :  { %v716_v16 = vmul.f32 %v714_v13, %v714_v13 }
 0x4c8   :  { %v718_v15 = vsel %vm110_vm0, %v716_v16, 0.0 }
 0x4c9   :  { %v704_v19 = vpop.xlane.xlu0 %703  ;;  %719 = vadd.xlane.f32.xlu1 %v718_v15 }
 0x4ca   :  { %v713_v20 = vmul.f32 %v2562_v11, %v704_v19 }
 0x4cc   :  { %v715_v21 = vsub.f32 %v698_v3, %v713_v20 }
 0x4ce   :  { %v717_v22 = vmul.f32 %v715_v21, %v715_v21 }
 0x4d0   :  { %v721_v18 = vsel %vm110_vm0, %v717_v22, 0.0 }
 0x4d1   :  { %722 = vadd.xlane.f32.xlu1 %v721_v18 }
 0x53c   :  { %v720_v27 = vpop.xlane.xlu1 %719 }
 0x53d   :  { %v724_v28 = vmul.f32 %v720_v27, %v2562_v11  ;;  %v1976_v27 = vld [vmem:[%s2910_s2 + $0x70] sm:$0xf] }
 0x53f   :  { %v726_v29 = vadd.f32 1e-05, %v724_v28  ;;  %v2122_v28 = vld [vmem:[%s2910_s2 + $0x74] sm:$0xf0] }
 0x540   :  { %v1977_v30 = vor.u32 %v2122_v28, %v1976_v27 }
 0x541   :  { %2219 = vrsqrt.f32 %v726_v29  ;;  %vm734_vm9 = vweird.f32 %v726_v29 }
 0x542   :  { %984 = vmatpush.bf16.msrb.mxu3 %v1977_v30 }
 0x544   :  { %v723_v17 = vpop.xlane.xlu1 %722 }
 0x545   :  { %v725_v31 = vmul.f32 %v723_v17, %v2562_v11  ;;  %v1978_v17 = vld [vmem:[%s2910_s2 + $0x78] sm:$0xf0] }
 0x547   :  { %v2220_v32 = vpop.eup %2219  ;;  %v727_v33 = vadd.f32 1e-05, %v725_v31 }
 0x548   :  { %v729_v34 = vmul.f32 %v2220_v32, %v726_v29  ;;  %vm735_vm8 = vweird.f32 %v2220_v32  ;;  %v2121_v29 = vld [vmem:[%s2910_s2 + $0x74] sm:$0xf] }
 0x549   :  { %2221 = vrsqrt.f32 %v727_v33  ;;  %vm736_vm10 = vmor %vm734_vm9, %vm735_vm8  ;;  %vm744_vm12 = vweird.f32 %v727_v33  ;;  %v1981_v31 = vor.u32 %v2121_v29, %v1978_v17 }
 0x54a   :  { %v730_v35 = vmul.f32 %v2220_v32, %v729_v34  ;;  %v2119_v34 = vld [vmem:[%s2910_s2 + $0x64] sm:$0xf] }
 0x54b   :  { %998 = vmatpush.bf16.msrb.mxu0 %v1981_v31 }
 0x54c   :  { %v731_v36 = vmul.f32 0.5, %v730_v35 }
 0x54e   :  { %v732_v37 = vsub.f32 1.5, %v731_v36  ;;  %v1970_v36 = vld [vmem:[%s2910_s2 + $0x68] sm:$0xf0] }
 0x54f   :  { %v2222_v38 = vpop.eup %2221 }
 0x550   :  { %v733_v39 = vmul.f32 %v2220_v32, %v732_v37  ;;  %v739_v40 = vmul.f32 %v2222_v38, %v727_v33  ;;  %vm745_vm11 = vweird.f32 %v2222_v38  ;;  %v2120_v33 = vld [vmem:[%s2910_s2 + $0x64] sm:$0xf0]  ;;  %v1973_v37 = vor.u32 %v2119_v34, %v1970_v36 }
 0x551   :  { %vm746_vm13 = vmor %vm744_vm12, %vm745_vm11 }
 0x552   :  { %v740_v41 = vmul.f32 %v2222_v38, %v739_v40  ;;  %v737_v43 = vsel %vm736_vm10, %v2220_v32, %v733_v39  ;;  %v1968_v32 = vld [vmem:[%s2910_s2 + $0x60] sm:$0xf]  ;;  %999 = vmatpush.bf16.msrb.mxu0 %v1973_v37  ;;  %v2118_v39 = vld [vmem:[%s2910_s2 + $0x54] sm:$0xf0]  ;;  %v2117_v40 = vld [vmem:[%s2910_s2 + $0x54] sm:$0xf] }
 0x553   :  { %v748_v47 = vmul.f32 %v737_v43, %v714_v13  ;;  %v1969_v35 = vor.u32 %v2120_v33, %v1968_v32  ;;  %v1962_v43 = vld [vmem:[%s2910_s2 + $0x58] sm:$0xf0] }
 0x554   :  { %v741_v44 = vmul.f32 0.5, %v740_v41 }
 0x555   :  { %v751_v51 = vmul.f32 %v750_v46, %v748_v47  ;;  %985 = vmatpush.bf16.msrb.mxu3 %v1969_v35  ;;  %v1952_v47 = vld [vmem:[%s2910_s2 + $0x40] sm:$0xf] }
 0x556   :  { %v742_v45 = vsub.f32 1.5, %v741_v44 }
 0x557   :  { %v754_v54 = vadd.f32 %v753_v50, %v751_v51 }
 0x558   :  { %v743_v48 = vmul.f32 %v2222_v38, %v742_v45  ;;  %v1965_v45 = vor.u32 %v2117_v40, %v1962_v43 }
 0x55a   :  { %v747_v49 = vsel %vm746_vm13, %v2222_v38, %v743_v48  ;;  %v1960_v38 = vld [vmem:[%s2910_s2 + $0x50] sm:$0xf]  ;;  %1000 = vmatpush.bf16.msrb.mxu0 %v1965_v45  ;;  %v2116_v48 = vld [vmem:[%s2910_s2 + $0x44] sm:$0xf0] }
 0x55b   :  { %v749_v52 = vmul.f32 %v747_v49, %v715_v21  ;;  %v1961_v41 = vor.u32 %v2118_v39, %v1960_v38  ;;  %v2115_v49 = vld [vmem:[%s2910_s2 + $0x44] sm:$0xf]  ;;  %v1953_v51 = vor.u32 %v2116_v48, %v1952_v47 }
 0x55d   :  { %v752_v53 = vmul.f32 %v750_v46, %v749_v52  ;;  %986 = vmatpush.bf16.msrb.mxu3 %v1961_v41  ;;  %v1954_v52 = vld [vmem:[%s2910_s2 + $0x48] sm:$0xf0] }
 0x55f   :  { %v755_v55 = vadd.f32 %v753_v50, %v752_v53  ;;  %v1957_v53 = vor.u32 %v2115_v49, %v1954_v52 }
 0x561   :  { %v764_v56 = vpack.c.bf16 %v755_v55, %v754_v54  ;;  %987 = vmatpush.bf16.msrb.mxu3 %v1953_v51  ;;  %1001 = vmatpush.bf16.msrb.mxu0 %v1957_v53 }
 0x563   :  { %1922 = vmatmul.msk.bf16.vlgmr.msra.gmra.mxu1 %vm110_vm0, %v764_v56 }
 0x5e0   :  { %v805_v61 = vpop.f32.mrf.mxu1 }
 0x5e1   :  { %v806_v0 = vadd.f32 %v2179_v62, %v805_v61 }
 0x5e3   :  { %v810_v2 = vmax.f32 %v806_v0, 0.0 }
 0x5e8   :  { %v807_v1 = vpop.f32.mrf.mxu1 }
 0x5e9   :  { %v808_v63 = vadd.f32 %v2179_v62, %v807_v1 }
 0x5eb   :  { %v811_v3 = vmax.f32 %v808_v63, 0.0 }
 0x5ed   :  { %v820_v4 = vpack.c.bf16 %v811_v3, %v810_v2 }
 0x5ef   :  { %1939 = vmatmul.msk.bf16.vlgmr.msrb.gmra.mxu2 %vm110_vm0, %v820_v4 }
 0x672   :  { %v861_v6 = vpop.f32.mrf.mxu2 }
 0x673   :  { %v862_v7 = vadd.f32 %v2180_v5, %v861_v6 }
 0x675   :  { %v866_v8 = vadd.f32 %v862_v7, %v754_v54 }
 0x677   :  { %v868_v9 = vsel %vm110_vm0, %v866_v8, 0.0 }
 0x678   :  { %869 = vadd.xlane.f32.xlu2 %v868_v9  ;;  %v915_v9 = vperm.slane %v2585_v42, 3 }
 0x67a   :  { %v863_v10 = vpop.f32.mrf.mxu2 }
 0x67b   :  { %v864_v14 = vadd.f32 %v2180_v5, %v863_v10  ;;  %v912_v5 = vperm.slane %v2585_v42, 2 }
 0x67d   :  { %v867_v12 = vadd.f32 %v864_v14, %v755_v55 }
 0x67f   :  { %v871_v13 = vsel %vm110_vm0, %v867_v12, 0.0 }
 0x680   :  { %872 = vadd.xlane.f32.xlu1 %v871_v13 }
 0x6eb   :  { %v870_v16 = vpop.xlane.xlu2 %869 }
 0x6ec   :  { %v874_v15 = vmul.f32 %v870_v16, %v2562_v11 }
 0x6ee   :  { %v2612_v19 = vsub.f32 %v866_v8, %v874_v15 }
 0x6f0   :  { %v878_v20 = vmul.f32 %v2612_v19, %v2612_v19 }
 0x6f2   :  { %v880_v21 = vsel %vm110_vm0, %v878_v20, 0.0 }
 0x6f3   :  { %v873_v22 = vpop.xlane.xlu1 %872  ;;  %881 = vadd.xlane.f32.xlu1 %v880_v21 }
 0x6f4   :  { %v875_v18 = vmul.f32 %v873_v22, %v2562_v11 }
 0x6f6   :  { %v2618_v24 = vsub.f32 %v867_v12, %v875_v18 }
 0x6f8   :  { %v879_v25 = vmul.f32 %v2618_v24, %v2618_v24 }
 0x6fa   :  { %v883_v26 = vsel %vm110_vm0, %v879_v25, 0.0 }
 0x6fb   :  { %884 = vadd.xlane.f32.xlu1 %v883_v26 }
 0x766   :  { %v882_v44 = vpop.xlane.xlu1 %881 }
 0x767   :  { %v886_v46 = vmul.f32 %v882_v44, %v2562_v11 }
 0x769   :  { %v888_v50 = vadd.f32 1e-05, %v886_v46 }
 0x76b   :  { %2223 = vrsqrt.f32 %v888_v50  ;;  %vm896_vm15 = vweird.f32 %v888_v50 }
 0x76e   :  { %v885_v54 = vpop.xlane.xlu1 %884 }
 0x76f   :  { %v887_v55 = vmul.f32 %v885_v54, %v2562_v11 }
 0x771   :  { %v2224_v56 = vpop.eup %2223  ;;  %v889_v57 = vadd.f32 1e-05, %v887_v55 }
 0x772   :  { %v891_v58 = vmul.f32 %v2224_v56, %v888_v50  ;;  %vm897_vm14 = vweird.f32 %v2224_v56 }
 0x773   :  { %2225 = vrsqrt.f32 %v889_v57  ;;  %vm898_vm2 = vmor %vm896_vm15, %vm897_vm14  ;;  %vm906_vm8 = vweird.f32 %v889_v57 }
 0x774   :  { %v892_v59 = vmul.f32 %v2224_v56, %v891_v58 }
 0x776   :  { %v893_v60 = vmul.f32 0.5, %v892_v59 }
 0x778   :  { %v894_v61 = vsub.f32 1.5, %v893_v60 }
 0x779   :  { %v2226_v62 = vpop.eup %2225 }
 0x77a   :  { %v895_v0 = vmul.f32 %v2224_v56, %v894_v61  ;;  %v901_v1 = vmul.f32 %v2226_v62, %v889_v57  ;;  %vm907_vm7 = vweird.f32 %v2226_v62 }
 0x77b   :  { %vm908_vm9 = vmor %vm906_vm8, %vm907_vm7  ;;  %vm1832_vm7 = vcmask 39936  }
 0x77c   :  { %v902_v63 = vmul.f32 %v2226_v62, %v901_v1  ;;  %v899_v2 = vsel %vm898_vm2, %v2224_v56, %v895_v0 }
 0x77d   :  { %v910_v6 = vmul.f32 %v899_v2, %v2612_v19  ;;  %v1949_v19 = vld [vmem:[%s2913_s3 + $0x2] sm:$0x3] }
 0x77e   :  { %v903_v3 = vmul.f32 0.5, %v902_v63  ;;  %v934_v42 = vperm.slane %v1949_v19, 1  ;;  %v933_v18 = vperm.slane %v1949_v19, 0 }
 0x77f   :  { %v913_v10 = vmul.f32 %v912_v5, %v910_v6 }
 0x780   :  { %v904_v4 = vsub.f32 1.5, %v903_v3 }
 0x781   :  { %v2677_v13 = vadd.f32 %v915_v9, %v913_v10 }
 0x782   :  { %v905_v7 = vmul.f32 %v2226_v62, %v904_v4 }
 0x784   :  { %v909_v8 = vsel %vm908_vm9, %v2226_v62, %v905_v7 }
 0x785   :  { %v911_v14 = vmul.f32 %v909_v8, %v2618_v24 }
 0x787   :  { %v914_v12 = vmul.f32 %v912_v5, %v911_v14 }
 0x789   :  { %v2679_v16 = vadd.f32 %v915_v9, %v914_v12 }
 0x78b   :  { %v929_v15 = vpack.c.bf16 %v2679_v16, %v2677_v13 }
 0x78d   :  { %1982 = vmatmul.msk.bf16.vlgmr.msrb.gmra.mxu3 %vm110_vm0, %v929_v15  ;;  %1983 = vmatmul.msk.bf16.vlgmr.msrb.gmra.mxu0 %vm110_vm0, %v929_v15 }
 0x80a   :  { %v1003_v20 = vpop.f32.mrf.mxu0 }
 0x80b   :  { %v1004_v21 = vadd.f32 %v1003_v20, %v934_v42 }
 0x80d   :  { %v2688_v22 = vpack.c.bf16 %v1004_v21, %v1004_v21 }
 0x80f   :  { %v1092_v24 = vsel %vm227_vm3, %v2688_v22, 0 }
 0x810   :  { %v989_v25 = vpop.f32.mrf.mxu3  ;;  %1101 = vmatpush.bf16.msra.mxu3 %v1092_v24 }
 0x811   :  { %v990_v26 = vadd.f32 %v989_v25, %v933_v18 }
 0x812   :  { %v1005_v27 = vpop.f32.mrf.mxu0 }
 0x813   :  { %v1012_v28 = vpack.c.bf16 %v990_v26, %v990_v26  ;;  %v1006_v29 = vadd.f32 %v1005_v27, %v934_v42  ;;  %v1008_v30 = vmul.f32 0.25, %v990_v26 }
 0x815   :  { %v1017_v17 = vunpack.c.l.b16 %v1012_v28  ;;  %v2692_v31 = vpack.c.bf16 %v1006_v29, %v1006_v29  ;;  %v1010_v34 = vpack.c.bf16 %v1008_v30, %v1008_v30 }
 0x817   :  { %v1018_v32 = vpack.c.b16 %v1017_v17, %v1017_v17  ;;  %v1111_v33 = vsel %vm227_vm3, %v2692_v31, 0  ;;  %v1127_v39 = vunpack.c.l.b16 %v1010_v34 }
 0x818   :  { %v991_v35 = vpop.f32.mrf.mxu3  ;;  %1120 = vmatpush.bf16.msra.mxu0 %v1111_v33 }
 0x819   :  { %v992_v36 = vadd.f32 %v991_v35, %v933_v18  ;;  %1131 = vrot.lane.b32.xlu2 %v1018_v32, %s2267_s30  ;;  %1019 = vrot.lane.b32.xlu0 %v1018_v32, %s2268_s14  ;;  %v1128_v44 = vpack.c.b16 %v1127_v39, %v1127_v39 }
 0x81b   :  { %v1009_v37 = vmul.f32 0.25, %v992_v36  ;;  %v1013_v38 = vpack.c.bf16 %v992_v36, %v992_v36 }
 0x81d   :  { %v1041_v40 = vunpack.c.l.b16 %v1013_v38  ;;  %v1011_v41 = vpack.c.bf16 %v1009_v37, %v1009_v37 }
 0x81f   :  { %v1042_v43 = vpack.c.b16 %v1041_v40, %v1041_v40  ;;  %v1153_v45 = vunpack.c.l.b16 %v1011_v41 }
 0x821   :  { %1043 = vrot.lane.b32.xlu1 %v1042_v43, %s2268_s14  ;;  %1157 = vrot.lane.b32.xlu0 %v1042_v43, %s2267_s30  ;;  %v1154_v46 = vpack.c.b16 %v1153_v45, %v1153_v45 }
 0x822   :  { %1250 = vrot.lane.b32.xlu2 %v1128_v44, %s2271_s17 }
 0x829   :  { %1155 = vrot.lane.b32.xlu1 %v1154_v46, %s2269_s15  ;;  %1129 = vrot.lane.b32.xlu0 %v1128_v44, %s2269_s15 }
 0x82a   :  { %1387 = vrot.lane.b32.xlu2 %v1042_v43, %s2272_s18 }
 0x831   :  { %1275 = vrot.lane.b32.xlu1 %v1042_v43, %s2270_s16  ;;  %1252 = vrot.lane.b32.xlu0 %v1018_v32, %s2270_s16  ;;  %v1203_v43 = vunpack.c.l.b16 %v2688_v22 }
 0x839   :  { %1364 = vrot.lane.b32.xlu1 %v1018_v32, %s2272_s18  ;;  %1273 = vrot.lane.b32.xlu0 %v1154_v46, %s2271_s17 }
 0x841   :  { %1385 = vrot.lane.b32.xlu1 %v1154_v46, %s2273_s19  ;;  %1362 = vrot.lane.b32.xlu0 %v1128_v44, %s2273_s19  ;;  %v1204_v44 = vpack.c.b16 %v1203_v43, %v1203_v43 }
 0x873   :  { %v1132_v47 = vpop.permute.xlu2 %1131 }
 0x874   :  { %v1137_v50 = vsel %vm155_vm1, %v1132_v47, 0 }
 0x87c   :  { %v1251_v57 = vpop.permute.xlu2 %1250 }
 0x884   :  { %v1388_v62 = vpop.permute.xlu2 %1387 }
 0x885   :  { %v1393_v1 = vsel %vm155_vm1, %v1388_v62, 0 }
 0x88b   :  { %v1020_v48 = vpop.permute.xlu0 %1019 }
 0x88c   :  { %v1025_v49 = vsel %vm155_vm1, %v1020_v48, 0 }
 0x88d   :  { %1034 = vmatpush.bf16.xpose.msrb.mxu1 %v1025_v49 }
 0x893   :  { %v1044_v51 = vpop.permute.xlu1 %1043  ;;  %v1158_v52 = vpop.permute.xlu0 %1157 }
 0x894   :  { %v1049_v53 = vsel %vm155_vm1, %v1044_v51, 0  ;;  %v1163_v54 = vsel %vm155_vm1, %v1158_v52, 0  ;;  %1984 = vmatmul.msk.bf16.vlgmr.msrb.gmra.mxu1 %vm155_vm1, %v1010_v34 }
 0x895   :  { %1146 = vmatpush.bf16.xpose.msra.mxu1 %v1137_v50  ;;  %1058 = vmatpush.bf16.xpose.msra.mxu2 %v1049_v53  ;;  %v1227_v53 = vunpack.c.l.b16 %v2692_v31 }
 0x89b   :  { %v1156_v55 = vpop.permute.xlu1 %1155  ;;  %v1130_v56 = vpop.permute.xlu0 %1129 }
 0x89c   :  { %1985 = vmatmul.msk.bf16.vlgmr.msra.gmra.mxu2 %vm155_vm1, %v1011_v41 }
 0x89d   :  { %1172 = vmatpush.bf16.xpose.msrb.mxu2 %v1163_v54 }
 0x8a3   :  { %v1276_v58 = vpop.permute.xlu1 %1275  ;;  %v1253_v59 = vpop.permute.xlu0 %1252 }
 0x8a4   :  { %v1281_v60 = vsel %vm155_vm1, %v1276_v58, 0  ;;  %v1258_v61 = vsel %vm155_vm1, %v1253_v59, 0  ;;  %1988 = vmatmul.msk.bf16.vlgmr.msra.gmra.mxu1 %vm155_vm1, %v1130_v56 }
 0x8a5   :  { %1267 = vmatpush.bf16.xpose.msrb.mxu1 %v1258_v61  ;;  %1290 = vmatpush.bf16.xpose.msra.mxu2 %v1281_v60 }
 0x8ab   :  { %v1365_v0 = vpop.permute.xlu1 %1364  ;;  %v1274_v2 = vpop.permute.xlu0 %1273 }
 0x8ac   :  { %v1370_v63 = vsel %vm155_vm1, %v1365_v0, 0  ;;  %1989 = vmatmul.msk.bf16.vlgmr.msrb.gmra.mxu2 %vm155_vm1, %v1156_v55  ;;  %v1228_v55 = vpack.c.b16 %v1227_v53, %v1227_v53 }
 0x8ad   :  { %1402 = vmatpush.bf16.xpose.msrb.mxu2 %v1393_v1  ;;  %1379 = vmatpush.bf16.xpose.msra.mxu1 %v1370_v63 }
 0x8b3   :  { %v1363_v3 = vpop.permute.xlu0 %1362  ;;  %v1386_v4 = vpop.permute.xlu1 %1385 }
 0x8b4   :  { %1992 = vmatmul.msk.bf16.vlgmr.msrb.gmra.mxu1 %vm155_vm1, %v1251_v57 }
 0x8bc   :  { %1993 = vmatmul.msk.bf16.vlgmr.msra.gmra.mxu2 %vm155_vm1, %v1274_v2 }
 0x8c4   :  { %1996 = vmatmul.msk.bf16.vlgmr.msra.gmra.mxu1 %vm155_vm1, %v1363_v3 }
 0x8cc   :  { %1997 = vmatmul.msk.bf16.vlgmr.msrb.gmra.mxu2 %vm155_vm1, %v1386_v4 }
 0x911   :  { %v1036_v5 = vpop.f32.mrf.mxu1 }
 0x912   :  { %v1037_v6 = vadd.f32 %v1036_v5, %v2457_v23 }
 0x914   :  { %v1064_v7 = vsel %vm199_vm4, %v1037_v6, -inf }
 0x915   :  { %1065 = vmax.xlane.f32.xlu2 %v1064_v7 }
 0x919   :  { %v1038_v8 = vpop.f32.mrf.mxu1 }
 0x91f   :  { %v1060_v9 = vpop.f32.mrf.mxu2 }
 0x920   :  { %v1061_v10 = vadd.f32 %v1060_v9, %v2457_v23 }
 0x921   :  { %v1148_v14 = vpop.f32.mrf.mxu1 }
 0x922   :  { %v2730_v12 = vadd.f32 %v1148_v14, %v2457_v23  ;;  %v1067_v15 = vsel %vm199_vm4, %v1061_v10, -inf }
 0x923   :  { %1068 = vmax.xlane.f32.xlu0 %v1067_v15 }
 0x924   :  { %v1178_v19 = vsel %vm199_vm4, %v2730_v12, -inf }
 0x925   :  { %1179 = vmax.xlane.f32.xlu1 %v1178_v19 }
 0x927   :  { %v1062_v42 = vpop.f32.mrf.mxu2 }
 0x929   :  { %v1150_v20 = vpop.f32.mrf.mxu1 }
 0x92f   :  { %v1174_v21 = vpop.f32.mrf.mxu2 }
 0x930   :  { %v1175_v18 = vadd.f32 %v1174_v21, %v2457_v23 }
 0x931   :  { %v1269_v24 = vpop.f32.mrf.mxu1 }
 0x932   :  { %v1270_v25 = vadd.f32 %v1269_v24, %v2457_v23  ;;  %v1181_v26 = vsel %vm199_vm4, %v1175_v18, -inf }
 0x933   :  { %1182 = vmax.xlane.f32.xlu2 %v1181_v26 }
 0x934   :  { %v1296_v27 = vsel %vm199_vm4, %v1270_v25, -inf }
 0x935   :  { %1297 = vmax.xlane.f32.xlu0 %v1296_v27 }
 0x937   :  { %v1176_v28 = vpop.f32.mrf.mxu2 }
 0x939   :  { %v1271_v29 = vpop.f32.mrf.mxu1 }
 0x93f   :  { %v1292_v30 = vpop.f32.mrf.mxu2 }
 0x940   :  { %v1293_v17 = vadd.f32 %v1292_v30, %v2457_v23 }
 0x941   :  { %v1381_v32 = vpop.f32.mrf.mxu1 }
 0x942   :  { %v2741_v33 = vadd.f32 %v1381_v32, %v2457_v23  ;;  %v1299_v34 = vsel %vm199_vm4, %v1293_v17, -inf }
 0x943   :  { %1300 = vmax.xlane.f32.xlu1 %v1299_v34 }
 0x944   :  { %v1408_v35 = vsel %vm199_vm4, %v2741_v33, -inf }
 0x945   :  { %1409 = vmax.xlane.f32.xlu2 %v1408_v35 }
 0x947   :  { %v1294_v36 = vpop.f32.mrf.mxu2 }
 0x949   :  { %v1383_v37 = vpop.f32.mrf.mxu1 }
 0x94f   :  { %v1404_v38 = vpop.f32.mrf.mxu2 }
 0x950   :  { %v2747_v39 = vadd.f32 %v1404_v38, %v2457_v23 }
 0x952   :  { %v1411_v40 = vsel %vm199_vm4, %v2747_v39, -inf }
 0x953   :  { %1412 = vmax.xlane.f32.xlu1 %v1411_v40 }
 0x957   :  { %v1406_v41 = vpop.f32.mrf.mxu2 }
 0x96c   :  { %1320 = vrot.lane.b32.xlu1 %v1204_v44, %s2271_s17 }
 0x988   :  { %v1066_v45 = vpop.xlane.xlu2 %1065 }
 0x989   :  { %v1070_v46 = vsub.f32 %v1037_v6, %v1066_v45 }
 0x98b   :  { %v1072_v47 = vmul.f32 1.442695, %v1070_v46 }
 0x98d   :  { %2227 = vpow2.f32 %v1072_v47 }
 0x993   :  { %v2228_v48 = vpop.eup %2227 }
 0x994   :  { %v1076_v49 = vsel %vm199_vm4, %v2228_v48, 0.0 }
 0x995   :  { %1077 = vadd.xlane.f32.xlu0 %v1076_v49 }
 0x996   :  { %v1069_v23 = vpop.xlane.xlu0 %1068 }
 0x997   :  { %v1071_v50 = vsub.f32 %v1061_v10, %v1069_v23 }
 0x998   :  { %v1180_v61 = vpop.xlane.xlu1 %1179 }
 0x999   :  { %v1074_v51 = vmul.f32 1.442695, %v1071_v50  ;;  %v1184_v5 = vsub.f32 %v2730_v12, %v1180_v61 }
 0x99b   :  { %2229 = vpow2.f32 %v1074_v51  ;;  %v1186_v7 = vmul.f32 1.442695, %v1184_v5 }
 0x9a1   :  { %v2754_v52 = vpop.eup %2229 }
 0x9a2   :  { %v1079_v22 = vsel %vm199_vm4, %v2754_v52, 0.0 }
 0x9a3   :  { %1080 = vadd.xlane.f32.xlu2 %v1079_v22 }
 0x9a6   :  { %v1183_v54 = vpop.xlane.xlu2 %1182 }
 0x9a7   :  { %v1185_v56 = vsub.f32 %v1175_v18, %v1183_v54 }
 0x9a8   :  { %v1298_v57 = vpop.xlane.xlu0 %1297 }
 0x9a9   :  { %v1188_v58 = vmul.f32 1.442695, %v1185_v56  ;;  %v1302_v59 = vsub.f32 %v1270_v25, %v1298_v57  ;;  %1229 = vrot.lane.b32.xlu0 %v1228_v55, %s2269_s15 }
 0x9ab   :  { %2231 = vpow2.f32 %v1188_v58  ;;  %v1304_v60 = vmul.f32 1.442695, %v1302_v59 }
 0x9ad   :  { %2233 = vpow2.f32 %v1304_v60 }
 0x9b1   :  { %v2232_v62 = vpop.eup %2231 }
 0x9b2   :  { %v1193_v0 = vsel %vm199_vm4, %v2232_v62, 0.0 }
 0x9b3   :  { %1194 = vadd.xlane.f32.xlu1 %v1193_v0  ;;  %v2761_v63 = vpop.eup %2233 }
 0x9b4   :  { %v1308_v3 = vsel %vm199_vm4, %v2761_v63, 0.0 }
 0x9b6   :  { %v1301_v1 = vpop.xlane.xlu1 %1300 }
 0x9b7   :  { %v1303_v31 = vsub.f32 %v1293_v17, %v1301_v1 }
 0x9b8   :  { %v1410_v9 = vpop.xlane.xlu2 %1409 }
 0x9b9   :  { %v1306_v2 = vmul.f32 1.442695, %v1303_v31  ;;  %v1414_v10 = vsub.f32 %v2741_v33, %v1410_v9 }
 0x9bb   :  { %2235 = vpow2.f32 %v1306_v2  ;;  %1205 = vrot.lane.b32.xlu2 %v1204_v44, %s2269_s15  ;;  %1309 = vadd.xlane.f32.xlu1 %v1308_v3  ;;  %v1416_v15 = vmul.f32 1.442695, %v1414_v10 }
 0x9bc   :  { %2237 = vpow2.f32 %v1186_v7 }
 0x9bd   :  { %2239 = vpow2.f32 %v1416_v15 }
 0x9c1   :  { %v2766_v4 = vpop.eup %2235 }
 0x9c2   :  { %v1311_v6 = vsel %vm199_vm4, %v2766_v4, 0.0  ;;  %v2238_v8 = vpop.eup %2237 }
 0x9c3   :  { %1312 = vadd.xlane.f32.xlu1 %v1311_v6  ;;  %v1190_v14 = vsel %vm199_vm4, %v2238_v8, 0.0  ;;  %v2774_v19 = vpop.eup %2239 }
 0x9c4   :  { %v1420_v12 = vsel %vm199_vm4, %v2774_v19, 0.0 }
 0x9c6   :  { %v1413_v42 = vpop.xlane.xlu1 %1412 }
 0x9c7   :  { %v1415_v20 = vsub.f32 %v2747_v39, %v1413_v42 }
 0x9c9   :  { %v1418_v21 = vmul.f32 1.442695, %v1415_v20 }
 0x9cb   :  { %2241 = vpow2.f32 %v1418_v21 }
 0x9d1   :  { %v2781_v24 = vpop.eup %2241 }
 0x9d2   :  { %v1423_v27 = vsel %vm199_vm4, %v2781_v24, 0.0 }
 0x9d3   :  { %1191 = vadd.xlane.f32.xlu0 %v1190_v14 }
 0x9dc   :  { %1432 = vrot.lane.b32.xlu1 %v1204_v44, %s2273_s19 }
 0x9de   :  { %v1321_v33 = vpop.permute.xlu1 %1320 }
 0x9df   :  { %v1326_v37 = vsel %vm227_vm3, %v1321_v33, 0 }
 0x9e4   :  { %1453 = vrot.lane.b32.xlu1 %v1228_v55, %s2273_s19  ;;  %1421 = vadd.xlane.f32.xlu2 %v1420_v12 }
 0x9e7   :  { %1341 = vrot.lane.b32.xlu0 %v1228_v55, %s2271_s17 }
 0xa08   :  { %v1078_v18 = vpop.xlane.xlu0 %1077 }
 0xa09   :  { %2243 = vrcp.f32 %v1078_v18 }
 0xa0f   :  { %v2244_v25 = vpop.eup %2243 }
 0xa10   :  { %v1084_v26 = vmul.f32 %v2244_v25, %v2228_v48 }
 0xa11   :  { %1424 = vadd.xlane.f32.xlu0 %v1423_v27  ;;  %v2126_v27 = vld [vmem:[%s2915_s4 + $0x38] sm:$0xff] }
 0xa12   :  { %v1086_v28 = vpack.c.bf16 %v1084_v26, %v1084_v26  ;;  %1550 = vmatpush.bf16.msrb.mxu1 %v2126_v27 }
 0xa14   :  { %1986 = vmatmul.msk.bf16.vlgmr.msra.gmra.mxu3 %vm199_vm4, %v1086_v28  ;;  %v2125_v28 = vld [vmem:[%s2915_s4 + $0x30] sm:$0xff] }
 0xa16   :  { %v1081_v29 = vpop.xlane.xlu2 %1080  ;;  %1551 = vmatpush.bf16.msrb.mxu1 %v2125_v28 }
 0xa17   :  { %2245 = vrcp.f32 %v1081_v29  ;;  %v2124_v29 = vld [vmem:[%s2915_s4 + $0x28] sm:$0xff] }
 0xa1a   :  { %1552 = vmatpush.bf16.msrb.mxu1 %v2124_v29 }
 0xa1b   :  { %v1230_v30 = vpop.permute.xlu0 %1229 }
 0xa1c   :  { %v1235_v17 = vsel %vm227_vm3, %v1230_v30, 0  ;;  %v2123_v30 = vld [vmem:[%s2915_s4 + $0x20] sm:$0xff] }
 0xa1d   :  { %v2246_v32 = vpop.eup %2245  ;;  %1244 = vmatpush.bf16.msrb.mxu0 %v1235_v17 }
 0xa1e   :  { %v1085_v34 = vmul.f32 %v2246_v32, %v2754_v52  ;;  %v1206_v35 = vpop.permute.xlu2 %1205  ;;  %1553 = vmatpush.bf16.msrb.mxu1 %v2123_v30 }
 0xa1f   :  { %v1211_v36 = vsel %vm227_vm3, %v1206_v35, 0 }
 0xa20   :  { %v1087_v38 = vpack.c.bf16 %v1085_v34, %v1085_v34  ;;  %1220 = vmatpush.bf16.msrb.mxu3 %v1211_v36 }
 0xa22   :  { %1987 = vmatmul.msk.bf16.vlgmr.msra.gmra.mxu0 %vm199_vm4, %v1087_v38 }
 0xa24   :  { %1335 = vmatpush.bf16.msra.mxu3 %v1326_v37 }
 0xa26   :  { %v1195_v39 = vpop.xlane.xlu1 %1194 }
 0xa27   :  { %2247 = vrcp.f32 %v1195_v39 }
 0xa2d   :  { %v2248_v40 = vpop.eup %2247 }
 0xa2e   :  { %v1199_v41 = vmul.f32 %v2248_v40, %v2232_v62  ;;  %v1310_v44 = vpop.xlane.xlu1 %1309 }
 0xa30   :  { %v1201_v43 = vpack.c.bf16 %v1199_v41, %v1199_v41 }
 0xa32   :  { %1991 = vmatmul.msk.bf16.vlgmr.msrb.gmra.mxu0 %vm199_vm4, %v1201_v43 }
 0xa36   :  { %v1313_v45 = vpop.xlane.xlu1 %1312 }
 0xa46   :  { %v1192_v46 = vpop.xlane.xlu0 %1191 }
 0xa47   :  { %2249 = vrcp.f32 %v1192_v46 }
 0xa48   :  { %2251 = vrcp.f32 %v1313_v45 }
 0xa49   :  { %2253 = vrcp.f32 %v1310_v44 }
 0xa4d   :  { %v2250_v47 = vpop.eup %2249 }
 0xa4e   :  { %v1198_v48 = vmul.f32 %v2250_v47, %v2238_v8  ;;  %v1433_v49 = vpop.permute.xlu1 %1432  ;;  %v2252_v51 = vpop.eup %2251 }
 0xa4f   :  { %v1438_v50 = vsel %vm227_vm3, %v1433_v49, 0  ;;  %v1317_v52 = vmul.f32 %v2252_v51, %v2766_v4  ;;  %v2254_v53 = vpop.eup %2253 }
 0xa50   :  { %v1200_v23 = vpack.c.bf16 %v1198_v48, %v1198_v48  ;;  %v1316_v57 = vmul.f32 %v2254_v53, %v2761_v63  ;;  %v2181_v48 = vld [vmem:[%s2914_s5 + $0x1] ss:$0 sm:$0xff] }
 0xa51   :  { %v1319_v58 = vpack.c.bf16 %v1317_v52, %v1317_v52 }
 0xa52   :  { %1990 = vmatmul.msk.bf16.vlgmr.msrb.gmra.mxu3 %vm199_vm4, %v1200_v23  ;;  %v1318_v59 = vpack.c.bf16 %v1316_v57, %v1316_v57 }
 0xa53   :  { %1447 = vmatpush.bf16.msrb.mxu3 %v1438_v50 }
 0xa56   :  { %v1454_v22 = vpop.permute.xlu1 %1453 }
 0xa57   :  { %v1459_v56 = vsel %vm227_vm3, %v1454_v22, 0  ;;  %v1422_v60 = vpop.xlane.xlu2 %1421 }
 0xa58   :  { %2255 = vrcp.f32 %v1422_v60 }
 0xa59   :  { %v1342_v54 = vpop.permute.xlu0 %1341 }
 0xa5a   :  { %v1347_v55 = vsel %vm227_vm3, %v1342_v54, 0 }
 0xa5b   :  { %1356 = vmatpush.bf16.msra.mxu0 %v1347_v55 }
 0xa5e   :  { %1995 = vmatmul.msk.bf16.vlgmr.msra.gmra.mxu0 %vm199_vm4, %v1319_v58  ;;  %v2256_v61 = vpop.eup %2255 }
 0xa5f   :  { %1468 = vmatpush.bf16.msrb.mxu0 %v1459_v56  ;;  %v1428_v62 = vmul.f32 %v2256_v61, %v2774_v19 }
 0xa61   :  { %v1430_v0 = vpack.c.bf16 %v1428_v62, %v1428_v62 }
 0xa62   :  { %1994 = vmatmul.msk.bf16.vlgmr.msra.gmra.mxu3 %vm199_vm4, %v1318_v59 }
 0xa72   :  { %1998 = vmatmul.msk.bf16.vlgmr.msrb.gmra.mxu3 %vm199_vm4, %v1430_v0 }
 0xa84   :  { %v1425_v1 = vpop.xlane.xlu0 %1424 }
 0xa85   :  { %2257 = vrcp.f32 %v1425_v1  ;;  %v2129_v1 = vld [vmem:[%s2917_s6 + $0x30] sm:$0xff] }
 0xa8b   :  { %v2258_v31 = vpop.eup %2257 }
 0xa8c   :  { %v1429_v63 = vmul.f32 %v2258_v31, %v2781_v24  ;;  %v2128_v31 = vld [vmem:[%s2917_s6 + $0x28] sm:$0xff] }
 0xa8e   :  { %v1431_v2 = vpack.c.bf16 %v1429_v63, %v1429_v63 }
 0xa90   :  { %1999 = vmatmul.msk.bf16.vlgmr.msrb.gmra.mxu0 %vm199_vm4, %v1431_v2 }
 0xa97   :  { %v1103_v3 = vpop.f32.mrf.mxu3 }
 0xa9f   :  { %v1105_v4 = vpop.f32.mrf.mxu3  ;;  %v1122_v5 = vpop.f32.mrf.mxu0 }
 0xaa0   :  { %v2127_v4 = vld [vmem:[%s2917_s6 + $0x20] sm:$0xff] }
 0xaa7   :  { %v1124_v6 = vpop.f32.mrf.mxu0 }
 0xaaf   :  { %v1246_v7 = vpop.f32.mrf.mxu0 }
 0xab7   :  { %v1248_v8 = vpop.f32.mrf.mxu0 }
 0xad5   :  { %v1222_v9 = vpop.f32.mrf.mxu3 }
 0xad6   :  { %v2163_v10 = vpack.i.bf16 %v1246_v7, %v1222_v9 }
 0xad8   :  { %2164 = vrot.lane.b32.xlu1 %v2163_v10, %s2272_s18 }
 0xadb   :  { %v1358_v14 = vpop.f32.mrf.mxu0 }
 0xadd   :  { %v1224_v15 = vpop.f32.mrf.mxu3 }
 0xae3   :  { %v1360_v19 = vpop.f32.mrf.mxu0 }
 0xae5   :  { %v1337_v12 = vpop.f32.mrf.mxu3 }
 0xae6   :  { %v2168_v42 = vpack.i.bf16 %v1358_v14, %v1337_v12 }
 0xae8   :  { %2169 = vrot.lane.b32.xlu2 %v2168_v42, %s2270_s16 }
 0xaed   :  { %v1339_v20 = vpop.f32.mrf.mxu3 }
 0xaf5   :  { %v1449_v21 = vpop.f32.mrf.mxu3 }
 0xafd   :  { %v1451_v18 = vpop.f32.mrf.mxu3 }
 0xb0d   :  { %v1470_v24 = vpop.f32.mrf.mxu0 }
 0xb0e   :  { %v2173_v25 = vpack.i.bf16 %v1470_v24, %v1449_v21  ;;  %v2854_v21 = vld [vmem:[%s2918_s10 + $0x4] sm:$0xf] }
 0xb0f   :  { %v1609_v30 = vperm.slane %v2854_v21, 1 }
 0xb10   :  { %2174 = vrot.lane.b32.xlu1 %v2173_v25, %s2267_s30 }
 0xb15   :  { %v1472_v26 = vpop.f32.mrf.mxu0 }
 0xb16   :  { %v1606_v26 = vperm.slane %v2854_v21, 0 }
 0xb42   :  { %v2170_v34 = vpop.permute.xlu2 %2169 }
 0xb43   :  { %v2172_v37 = vunpack.i.h.bf16 %v2170_v34  ;;  %v2171_v38 = vunpack.i.l.bf16 %v2170_v34 }
 0xb4a   :  { %v2165_v17 = vpop.permute.xlu1 %2164 }
 0xb4b   :  { %v2167_v32 = vunpack.i.h.bf16 %v2165_v17  ;;  %v2166_v33 = vunpack.i.l.bf16 %v2165_v17 }
 0xb4d   :  { %v1499_v35 = vsel %vm155_vm1, %v1122_v5, %v2167_v32  ;;  %v1498_v36 = vsel %vm155_vm1, %v1103_v3, %v2166_v33 }
 0xb4e   :  { %v1500_v43 = vsel %vm637_vm5, %v1498_v36, %v2171_v38  ;;  %v1501_v44 = vsel %vm637_vm5, %v1499_v35, %v2172_v37  ;;  %v2134_v37 = vld [vmem:[%s2920_s8 + $0x38] sm:$0xff]  ;;  %v2133_v38 = vld [vmem:[%s2920_s8 + $0x30] sm:$0xff] }
 0xb4f   :  { %1716 = vmatpush.bf16.msra.mxu3 %v2134_v37 }
 0xb53   :  { %1717 = vmatpush.bf16.msra.mxu3 %v2133_v38  ;;  %v2184_v38 = vld [vmem:[%s2921_s12] ss:$0 sm:$0xff] }
 0xb82   :  { %v2175_v39 = vpop.permute.xlu1 %2174 }
 0xb83   :  { %v2177_v40 = vunpack.i.h.bf16 %v2175_v39  ;;  %v2176_v41 = vunpack.i.l.bf16 %v2175_v39  ;;  %v2132_v39 = vld [vmem:[%s2920_s8 + $0x28] sm:$0xff] }
 0xb84   :  { %1718 = vmatpush.bf16.msra.mxu3 %v2132_v39 }
 0xb85   :  { %v1502_v45 = vsel %vm640_vm6, %v1500_v43, %v2176_v41  ;;  %v1503_v46 = vsel %vm640_vm6, %v1501_v44, %v2177_v40  ;;  %v2131_v40 = vld [vmem:[%s2920_s8 + $0x20] sm:$0xff] }
 0xb86   :  { %v1513_v47 = vpack.c.bf16 %v1503_v46, %v1502_v45  ;;  %v2182_v43 = vld [vmem:[%s2916_s7 + $0x1] ss:$0 sm:$0xff] }
 0xb88   :  { %2025 = vmatmul.msk.bf16.vlgmr.msrb.gmra.mxu1 %vm110_vm0, %v1513_v47  ;;  %1719 = vmatpush.bf16.msra.mxu3 %v2131_v40 }
 0xc05   :  { %v1555_v49 = vpop.f32.mrf.mxu1 }
 0xc06   :  { %v1556_v23 = vadd.f32 %v2181_v48, %v1555_v49 }
 0xc08   :  { %v1560_v50 = vadd.f32 %v1556_v23, %v2677_v13  ;;  %v2183_v23 = vld [vmem:[%s2919_s9 + $0x1] ss:$0 sm:$0xff] }
 0xc0a   :  { %v1562_v51 = vsel %vm110_vm0, %v1560_v50, 0.0 }
 0xc0b   :  { %1563 = vadd.xlane.f32.xlu0 %v1562_v51 }
 0xc0d   :  { %v1557_v52 = vpop.f32.mrf.mxu1 }
 0xc0e   :  { %v1558_v22 = vadd.f32 %v2181_v48, %v1557_v52 }
 0xc10   :  { %v1561_v53 = vadd.f32 %v1558_v22, %v2679_v16  ;;  %v2130_v16 = vld [vmem:[%s2917_s6 + $0x38] sm:$0xff] }
 0xc11   :  { %1658 = vmatpush.bf16.msra.mxu2 %v2130_v16 }
 0xc12   :  { %v1565_v54 = vsel %vm110_vm0, %v1561_v53, 0.0 }
 0xc13   :  { %1566 = vadd.xlane.f32.xlu1 %v1565_v54 }
 0xc15   :  { %1659 = vmatpush.bf16.msra.mxu2 %v2129_v1 }
 0xc19   :  { %1660 = vmatpush.bf16.msra.mxu2 %v2128_v31  ;;  %v2138_v31 = vld [vmem:[%s2922_s11 + $0x18] sm:$0xff] }
 0xc1a   :  { %1822 = vmatpush.bf16.msra.mxu0 %v2138_v31 }
 0xc1d   :  { %1661 = vmatpush.bf16.msra.mxu2 %v2127_v4 }
 0xc7e   :  { %v1564_v55 = vpop.xlane.xlu0 %1563 }
 0xc7f   :  { %v1568_v56 = vmul.f32 %v1564_v55, %v2562_v11 }
 0xc81   :  { %v1570_v57 = vsub.f32 %v1560_v50, %v1568_v56 }
 0xc83   :  { %v1572_v58 = vmul.f32 %v1570_v57, %v1570_v57 }
 0xc85   :  { %v1574_v59 = vsel %vm110_vm0, %v1572_v58, 0.0 }
 0xc86   :  { %v1567_v60 = vpop.xlane.xlu1 %1566  ;;  %1575 = vadd.xlane.f32.xlu0 %v1574_v59 }
 0xc87   :  { %v1569_v13 = vmul.f32 %v1567_v60, %v2562_v11 }
 0xc89   :  { %v1571_v61 = vsub.f32 %v1561_v53, %v1569_v13 }
 0xc8b   :  { %v1573_v62 = vmul.f32 %v1571_v61, %v1571_v61 }
 0xc8d   :  { %v1577_v0 = vsel %vm110_vm0, %v1573_v62, 0.0 }
 0xc8e   :  { %1578 = vadd.xlane.f32.xlu0 %v1577_v0 }
 0xcf9   :  { %v1576_v63 = vpop.xlane.xlu0 %1575 }
 0xcfa   :  { %v1580_v2 = vmul.f32 %v1576_v63, %v2562_v11  ;;  %v2137_v63 = vld [vmem:[%s2922_s11 + $0x10] sm:$0xff] }
 0xcfb   :  { %1823 = vmatpush.bf16.msra.mxu0 %v2137_v63 }
 0xcfc   :  { %v1582_v3 = vadd.f32 1e-05, %v1580_v2  ;;  %v2136_v2 = vld [vmem:[%s2922_s11 + $0x8] sm:$0xff] }
 0xcfe   :  { %2259 = vrsqrt.f32 %v1582_v3  ;;  %vm1590_vm3 = vweird.f32 %v1582_v3 }
 0xcff   :  { %1824 = vmatpush.bf16.msra.mxu0 %v2136_v2 }
 0xd01   :  { %v1579_v5 = vpop.xlane.xlu0 %1578 }
 0xd02   :  { %v1581_v6 = vmul.f32 %v1579_v5, %v2562_v11 }
 0xd04   :  { %v2260_v7 = vpop.eup %2259  ;;  %v1583_v8 = vadd.f32 1e-05, %v1581_v6  ;;  %v2135_v6 = vld [vmem:[%s2922_s11] sm:$0xff] }
 0xd05   :  { %v1585_v9 = vmul.f32 %v2260_v7, %v1582_v3  ;;  %vm1591_vm1 = vweird.f32 %v2260_v7  ;;  %1825 = vmatpush.bf16.msra.mxu0 %v2135_v6 }
 0xd06   :  { %2261 = vrsqrt.f32 %v1583_v8  ;;  %vm1592_vm4 = vmor %vm1590_vm3, %vm1591_vm1  ;;  %vm1600_vm6 = vweird.f32 %v1583_v8 }
 0xd07   :  { %v1586_v10 = vmul.f32 %v2260_v7, %v1585_v9 }
 0xd09   :  { %v1587_v14 = vmul.f32 0.5, %v1586_v10 }
 0xd0b   :  { %v1588_v15 = vsub.f32 1.5, %v1587_v14 }
 0xd0c   :  { %v2262_v19 = vpop.eup %2261 }
 0xd0d   :  { %v1589_v12 = vmul.f32 %v2260_v7, %v1588_v15  ;;  %v1595_v42 = vmul.f32 %v2262_v19, %v1583_v8  ;;  %vm1601_vm5 = vweird.f32 %v2262_v19 }
 0xd0e   :  { %vm1602_vm10 = vmor %vm1600_vm6, %vm1601_vm5 }
 0xd0f   :  { %v1596_v20 = vmul.f32 %v2262_v19, %v1595_v42  ;;  %v1593_v18 = vsel %vm1592_vm4, %v2260_v7, %v1589_v12 }
 0xd10   :  { %v1604_v27 = vmul.f32 %v1593_v18, %v1570_v57 }
 0xd11   :  { %v1597_v24 = vmul.f32 0.5, %v1596_v20 }
 0xd12   :  { %v1607_v17 = vmul.f32 %v1606_v26, %v1604_v27 }
 0xd13   :  { %v1598_v25 = vsub.f32 1.5, %v1597_v24 }
 0xd14   :  { %v1610_v34 = vadd.f32 %v1609_v30, %v1607_v17  ;;  %v1775_v17 = vperm.slane %v2854_v21, 3 }
 0xd15   :  { %v1599_v28 = vmul.f32 %v2262_v19, %v1598_v25 }
 0xd17   :  { %v1603_v29 = vsel %vm1602_vm10, %v2262_v19, %v1599_v28 }
 0xd18   :  { %v1605_v32 = vmul.f32 %v1603_v29, %v1571_v61 }
 0xd1a   :  { %v1608_v33 = vmul.f32 %v1606_v26, %v1605_v32 }
 0xd1c   :  { %v1611_v35 = vadd.f32 %v1609_v30, %v1608_v33 }
 0xd1e   :  { %v1621_v36 = vpack.c.bf16 %v1611_v35, %v1610_v34 }
 0xd20   :  { %2051 = vmatmul.msk.bf16.vlgmr.msra.gmra.mxu2 %vm110_vm0, %v1621_v36 }
 0xda3   :  { %v1663_v41 = vpop.f32.mrf.mxu2 }
 0xda4   :  { %v1664_v44 = vadd.f32 %v2182_v43, %v1663_v41 }
 0xda6   :  { %v1668_v47 = vmax.f32 %v1664_v44, 0.0 }
 0xdab   :  { %v1665_v45 = vpop.f32.mrf.mxu2 }
 0xdac   :  { %v1666_v46 = vadd.f32 %v2182_v43, %v1665_v45 }
 0xdae   :  { %v1669_v48 = vmax.f32 %v1666_v46, 0.0 }
 0xdb0   :  { %v1679_v49 = vpack.c.bf16 %v1669_v48, %v1668_v47 }
 0xdb2   :  { %2077 = vmatmul.msk.bf16.vlgmr.msra.gmra.mxu3 %vm110_vm0, %v1679_v49 }
 0xe35   :  { %v1721_v50 = vpop.f32.mrf.mxu3 }
 0xe36   :  { %v1722_v51 = vadd.f32 %v2183_v23, %v1721_v50 }
 0xe38   :  { %v1726_v52 = vadd.f32 %v1722_v51, %v1610_v34 }
 0xe3a   :  { %v1728_v22 = vsel %vm110_vm0, %v1726_v52, 0.0 }
 0xe3b   :  { %1729 = vadd.xlane.f32.xlu2 %v1728_v22 }
 0xe3d   :  { %v1723_v53 = vpop.f32.mrf.mxu3 }
 0xe3e   :  { %v1724_v54 = vadd.f32 %v2183_v23, %v1723_v53 }
 0xe40   :  { %v1727_v55 = vadd.f32 %v1724_v54, %v1611_v35 }
 0xe42   :  { %v1731_v56 = vsel %vm110_vm0, %v1727_v55, 0.0 }
 0xe43   :  { %1732 = vadd.xlane.f32.xlu0 %v1731_v56 }
 0xeae   :  { %v1730_v57 = vpop.xlane.xlu2 %1729 }
 0xeaf   :  { %v1734_v58 = vmul.f32 %v1730_v57, %v2562_v11 }
 0xeb1   :  { %v1736_v59 = vsub.f32 %v1726_v52, %v1734_v58 }
 0xeb3   :  { %v1738_v60 = vmul.f32 %v1736_v59, %v1736_v59 }
 0xeb5   :  { %v1740_v13 = vsel %vm110_vm0, %v1738_v60, 0.0 }
 0xeb6   :  { %v1733_v61 = vpop.xlane.xlu0 %1732  ;;  %1741 = vadd.xlane.f32.xlu0 %v1740_v13 }
 0xeb7   :  { %v1735_v62 = vmul.f32 %v1733_v61, %v2562_v11 }
 0xeb9   :  { %v1737_v0 = vsub.f32 %v1727_v55, %v1735_v62 }
 0xebb   :  { %v1739_v16 = vmul.f32 %v1737_v0, %v1737_v0 }
 0xebd   :  { %v1743_v1 = vsel %vm110_vm0, %v1739_v16, 0.0 }
 0xebe   :  { %1744 = vadd.xlane.f32.xlu0 %v1743_v1 }
 0xf29   :  { %v1742_v3 = vpop.xlane.xlu0 %1741 }
 0xf2a   :  { %v1746_v4 = vmul.f32 %v1742_v3, %v2562_v11 }
 0xf2c   :  { %v1748_v5 = vadd.f32 1e-05, %v1746_v4 }
 0xf2e   :  { %2263 = vrsqrt.f32 %v1748_v5  ;;  %vm1756_vm12 = vweird.f32 %v1748_v5 }
 0xf31   :  { %v1745_v7 = vpop.xlane.xlu0 %1744 }
 0xf32   :  { %v1747_v8 = vmul.f32 %v1745_v7, %v2562_v11  ;;  %v1772_v11 = vperm.slane %v2854_v21, 2 }
 0xf34   :  { %v2264_v9 = vpop.eup %2263  ;;  %v1749_v10 = vadd.f32 1e-05, %v1747_v8 }
 0xf35   :  { %v1751_v14 = vmul.f32 %v2264_v9, %v1748_v5  ;;  %vm1757_vm11 = vweird.f32 %v2264_v9 }
 0xf36   :  { %2265 = vrsqrt.f32 %v1749_v10  ;;  %vm1758_vm13 = vmor %vm1756_vm12, %vm1757_vm11  ;;  %vm1766_vm15 = vweird.f32 %v1749_v10 }
 0xf37   :  { %v1752_v15 = vmul.f32 %v2264_v9, %v1751_v14 }
 0xf39   :  { %v1753_v19 = vmul.f32 0.5, %v1752_v15 }
 0xf3b   :  { %v1754_v12 = vsub.f32 1.5, %v1753_v19 }
 0xf3c   :  { %v2266_v42 = vpop.eup %2265 }
 0xf3d   :  { %v1755_v20 = vmul.f32 %v2264_v9, %v1754_v12  ;;  %v1761_v18 = vmul.f32 %v2266_v42, %v1749_v10  ;;  %vm1767_vm14 = vweird.f32 %v2266_v42 }
 0xf3e   :  { %vm1768_vm2 = vmor %vm1766_vm15, %vm1767_vm14 }
 0xf3f   :  { %v1762_v24 = vmul.f32 %v2266_v42, %v1761_v18  ;;  %v1759_v25 = vsel %vm1758_vm13, %v2264_v9, %v1755_v20 }
 0xf40   :  { %v1770_v28 = vmul.f32 %v1759_v25, %v1736_v59 }
 0xf41   :  { %v1763_v26 = vmul.f32 0.5, %v1762_v24 }
 0xf42   :  { %v1773_v32 = vmul.f32 %v1772_v11, %v1770_v28 }
 0xf43   :  { %v1764_v27 = vsub.f32 1.5, %v1763_v26 }
 0xf44   :  { %v1776_v35 = vadd.f32 %v1775_v17, %v1773_v32 }
 0xf45   :  { %v1765_v29 = vmul.f32 %v2266_v42, %v1764_v27 }
 0xf47   :  { %v1769_v30 = vsel %vm1768_vm2, %v2266_v42, %v1765_v29 }
 0xf48   :  { %v1771_v33 = vmul.f32 %v1769_v30, %v1737_v0 }
 0xf4a   :  { %v1774_v34 = vmul.f32 %v1772_v11, %v1771_v33 }
 0xf4c   :  { %v1777_v36 = vadd.f32 %v1775_v17, %v1774_v34 }
 0xf4e   :  { %v1786_v37 = vpack.c.bf16 %v1777_v36, %v1776_v35 }
 0xf50   :  { %2094 = vmatmul.msk.bf16.vlgmr.msra.gmra.mxu0 %vm110_vm0, %v1786_v37 }
 0xfcd   :  { %v1827_v39 = vpop.f32.mrf.mxu0 }
 0xfce   :  { %v1828_v40 = vadd.f32 %v2184_v38, %v1827_v39 }
 0xfd0   :  { %1833 = vst.msk [vmem:[%s2923_s13] sm:$0xff] %vm1832_vm7, %v1828_v40 }
 0xfd5   :  { %v1829_v21 = vpop.f32.mrf.mxu0 }
 0xfd6   :  { %v1830_v41 = vadd.f32 %v2184_v38, %v1829_v21 }
 0xfd8   :  { %1834 = vst.msk [vmem:[%s2923_s13 + $0x8] sm:$0xff] %vm1832_vm7, %v1830_v41 }

</bundles_post_ra>
